<compile_context>
chip_gen: v7x
topology: tpu7x:2x2x1
jax: 0.10.0
libtpu: 0.0.40
codegen_flags: <defaults>
</compile_context>

<pallas_src>
import functools
import math

import jax
import jax.numpy as jnp
from jax.experimental import pallas as pl
from jax.experimental.pallas import tpu as pltpu


# -----------------------------------------------------------------------------
# Fused kernel: entire ModalFusionModule forward (all blocks, both modalities,
# whole batch) in one invocation.  Everything lives in VMEM.
# -----------------------------------------------------------------------------
def modal_fusion_kernel(
    fa_ref, fv_ref,            # (B, S, E) f32 token activations (audio, visual)
    lnv_ref,                   # (NSUB, 8, E) f32 rows: lnq_g, lnq_b, lnkv_g,
                               #   lnkv_b, ln2_g, ln2_b, bo, b2
    b1_ref,                    # (NSUB, 1, M) f32 FFN hidden bias
    wq_ref, wk_ref, wv_ref,    # (NSUB, H, E, Dh) bf16 per-head projections
    wo_ref,                    # (NSUB, H, Dh, E) bf16 per-head output proj
    w1_ref,                    # (NSUB, E, M) bf16
    w2_ref,                    # (NSUB, M, E) bf16
    fv_out_ref, fa_out_ref,    # (B, S, E) f32 outputs
    *, num_blocks, num_heads, dim_head,
):
    B, S, E = fa_ref.shape
    BS = B * S
    scale = 1.0 / math.sqrt(dim_head)

    # Flatten batch*tokens for the dense matmuls (bigger MXU M dim).
    fa = fa_ref[...].reshape(BS, E)
    fv = fv_ref[...].reshape(BS, E)

    def norm_hat(t):                 # (t - mean) / sqrt(var + eps), no affine
        mu = jnp.mean(t, axis=-1, keepdims=True)
        var = jnp.mean((t - mu) * (t - mu), axis=-1, keepdims=True)
        return (t - mu) * jax.lax.rsqrt(var + 1e-5)

    def cma(sub, x, x_hat, y_hat):
        """One cross-modal attention block.

        x      : (BS, E) residual stream of the query modality (raw).
        x_hat  : normalized (zero-mean / unit-var) x, affine applied here.
        y_hat  : normalized key/value modality activations.
        """
        vecs = lnv_ref[sub]                      # (8, E) f32
        lnq_g, lnq_b = vecs[0:1], vecs[1:2]
        lnkv_g, lnkv_b = vecs[2:3], vecs[3:4]
        ln2_g, ln2_b = vecs[4:5], vecs[5:6]
        bo, b2 = vecs[6:7], vecs[7:8]
        b1 = b1_ref[sub]                         # (1, M) f32

        # Attention scale folded into the (Q-only) normalized input: exactly
        # equivalent to scaling q per head, but a single (BS, E) multiply.
        xn = ((x_hat * lnq_g + lnq_b) * scale).astype(jnp.bfloat16)   # (BS, E)
        yn = (y_hat * lnkv_g + lnkv_b).astype(jnp.bfloat16)           # (BS, E)

        # Per-head attention with stacked per-head weights: static leading-dim
        # indexing (no lane slicing) and per-head wo accumulation (no concat).
        attn_out = jnp.zeros((BS, E), jnp.float32)
        for h in range(num_heads):
            qh = jnp.dot(xn, wq_ref[sub, h],
                         preferred_element_type=jnp.float32)    # (BS, Dh)
            kh = jnp.dot(yn, wk_ref[sub, h],
                         preferred_element_type=jnp.float32)
            vh = jnp.dot(yn, wv_ref[sub, h],
                         preferred_element_type=jnp.float32)

            q3 = qh.reshape(B, S, dim_head).astype(jnp.bfloat16)
            k3 = kh.reshape(B, S, dim_head).astype(jnp.bfloat16)
            v3 = vh.reshape(B, S, dim_head).astype(jnp.bfloat16)

            # Batched QK^T without materializing a transpose.
            s = jnp.einsum('bqd,bkd->bqk', q3, k3,
                           preferred_element_type=jnp.float32)   # (B, S, S)
            s = s - jnp.max(s, axis=-1, keepdims=True)
            p = jnp.exp(s)
            p = p * pl.reciprocal(jnp.sum(p, axis=-1, keepdims=True),
                                  approx=True)
            oh = jnp.einsum('bqk,bkd->bqd', p.astype(jnp.bfloat16), v3,
                            preferred_element_type=jnp.float32)  # (B, S, Dh)

            attn_out = attn_out + jnp.dot(
                oh.reshape(BS, dim_head).astype(jnp.bfloat16),
                wo_ref[sub, h], preferred_element_type=jnp.float32)

        x1 = x + attn_out + bo                                   # residual 1

        # Feed-forward (pre-norm).
        x1n = (norm_hat(x1) * ln2_g + ln2_b).astype(jnp.bfloat16)
        h1 = jnp.dot(x1n, w1_ref[sub],
                     preferred_element_type=jnp.float32) + b1
        h1 = jax.nn.gelu(h1, approximate=True)  # TODO(synk): PyTorch default is erf GELU
        ffn = jnp.dot(h1.astype(jnp.bfloat16), w2_ref[sub],
                      preferred_element_type=jnp.float32) + b2
        return x1 + ffn                                          # residual 2

    # Layer loop: both blocks of a layer read the *old* fa/fv (matches the
    # PyTorch  temp_ = audio(Fa, Fv); Fv = visual(Fv, Fa); Fa = temp_  ordering).
    # LayerNorm statistics of the shared inputs are computed once per layer.
    for i in range(num_blocks):
        fa_hat = norm_hat(fa)
        fv_hat = norm_hat(fv)
        new_fa = cma(2 * i, fa, fa_hat, fv_hat)      # audio: Q = Fa, K/V = Fv
        new_fv = cma(2 * i + 1, fv, fv_hat, fa_hat)  # visual: Q = Fv, K/V = Fa
        fa, fv = new_fa, new_fv

    fv_out_ref[...] = fv.reshape(B, S, E)
    fa_out_ref[...] = fa.reshape(B, S, E)


# -----------------------------------------------------------------------------
# Module wrapper: packs parameters into stacked slabs and issues ONE pallas_call.
# -----------------------------------------------------------------------------
def _make_subblock_weights(key, emb, heads, dh, mlp):
    kq, kk, kv, ko, k1, k2 = jax.random.split(key, 6)
    s = 0.02
    return dict(
        wq=s * jax.random.normal(kq, (heads, emb, dh), jnp.float32),
        wk=s * jax.random.normal(kk, (heads, emb, dh), jnp.float32),
        wv=s * jax.random.normal(kv, (heads, emb, dh), jnp.float32),
        wo=s * jax.random.normal(ko, (heads, dh, emb), jnp.float32),
        w1=s * jax.random.normal(k1, (emb, mlp), jnp.float32),
        w2=s * jax.random.normal(k2, (mlp, emb), jnp.float32),
    )


class ModalFusionModule:
    """JAX/Pallas port of ModalFusionModule (fusion_type='DWAF'/'CMA')."""

    def __init__(self, key, num_blocks=3, input_channels=96, emb_size=96,
                 num_heads=4, input_size=4, patch_size=4, mlp_channels=96,
                 dim_head=96, att_drop=0.0, ffn_drop=0.0, fusion_type="DWAF"):
        assert input_channels == emb_size, "token dim = channel dim here"
        del patch_size, att_drop, ffn_drop, fusion_type  # see TODOs above
        self.num_blocks = num_blocks
        self.num_heads = num_heads
        self.dim_head = dim_head

        nsub = 2 * num_blocks        # interleaved [audio_0, visual_0, audio_1, ...]
        keys = jax.random.split(key, nsub)
        blocks = [_make_subblock_weights(keys[i], emb_size, num_heads,
                                         dim_head, mlp_channels)
                  for i in range(nsub)]

        # Matmul weights live in bf16 (MXU-native, half the DMA/VMEM bytes).
        self.wq = jnp.stack([b["wq"] for b in blocks]).astype(jnp.bfloat16)
        self.wk = jnp.stack([b["wk"] for b in blocks]).astype(jnp.bfloat16)
        self.wv = jnp.stack([b["wv"] for b in blocks]).astype(jnp.bfloat16)
        self.wo = jnp.stack([b["wo"] for b in blocks]).astype(jnp.bfloat16)
        self.w1 = jnp.stack([b["w1"] for b in blocks]).astype(jnp.bfloat16)
        self.w2 = jnp.stack([b["w2"] for b in blocks]).astype(jnp.bfloat16)

        # All per-block E-sized vectors packed into one (NSUB, 8, E) f32 slab:
        # rows = [lnq_g, lnq_b, lnkv_g, lnkv_b, ln2_g, ln2_b, bo, b2].
        ones, zeros = jnp.ones((emb_size,)), jnp.zeros((emb_size,))
        ln_rows = jnp.stack([ones, zeros, ones, zeros, ones, zeros,
                             zeros, zeros]).astype(jnp.float32)
        self.ln_vecs = jnp.tile(ln_rows[None], (nsub, 1, 1))
        self.b1 = jnp.zeros((nsub, 1, mlp_channels), jnp.float32)

    @staticmethod
    def _to_tokens(x):           # NCHW -> (B, S, C)   (done once per forward)
        B, C, H, W = x.shape
        return jnp.transpose(x.reshape(B, C, H * W), (0, 2, 1))

    @staticmethod
    def _from_tokens(t, H, W):   # (B, S, C) -> NCHW
        B, S, C = t.shape
        return jnp.transpose(t, (0, 2, 1)).reshape(B, C, H, W)

    def __call__(self, Fv, Fa):
        B, C, H, W = Fv.shape
        S = H * W
        fv = self._to_tokens(Fv.astype(jnp.float32))
        fa = self._to_tokens(Fa.astype(jnp.float32))

        kernel = functools.partial(
            modal_fusion_kernel, num_blocks=self.num_blocks,
            num_heads=self.num_heads, dim_head=self.dim_head)

        vmem_spec = pl.BlockSpec(memory_space=pltpu.MemorySpace.VMEM)
        out_fv, out_fa = pl.pallas_call(
            kernel,
            out_shape=(jax.ShapeDtypeStruct((B, S, C), jnp.float32),
                       jax.ShapeDtypeStruct((B, S, C), jnp.float32)),
            in_specs=[vmem_spec] * 10,
            out_specs=(vmem_spec, vmem_spec),
            compiler_params=pltpu.CompilerParams(
                vmem_limit_bytes=64 * 1024 * 1024),
        )(fa, fv, self.ln_vecs, self.b1, self.wq, self.wk, self.wv,
          self.wo, self.w1, self.w2)

        return self._from_tokens(out_fv, H, W), self._from_tokens(out_fa, H, W)


# -----------------------------------------------------------------------------
# Demo / smoke test.
# -----------------------------------------------------------------------------
if __name__ == "__main__":
    key = jax.random.PRNGKey(0)
    k_params, k_fv, k_fa = jax.random.split(key, 3)

    # Small shapes consistent with the module: batch=2, channels=emb=32,
    # spatial=4x4 (-> 16 tokens), 4 heads x dim_head 8, mlp=32, 2 blocks.
    B, C, H, W = 2, 32, 4, 4
    module = ModalFusionModule(
        k_params, num_blocks=2, input_channels=C, emb_size=C,
        num_heads=4, input_size=H, patch_size=H, mlp_channels=32,
        dim_head=8, fusion_type="DWAF")

    Fv = jax.random.normal(k_fv, (B, C, H, W), jnp.float32)
    Fa = jax.random.normal(k_fa, (B, C, H, W), jnp.float32)

    out_Fv, out_Fa = module(Fv, Fa)
    jax.block_until_ready((out_Fv, out_Fa))

    assert out_Fv.shape == (B, C, H, W) and out_Fa.shape == (B, C, H, W)
    assert jnp.all(jnp.isfinite(out_Fv)) and jnp.all(jnp.isfinite(out_Fa))
    print("KERNEL_OK")
</pallas_src>

<mosaic_0001>
module attributes {stable_mosaic.version = 11 : i64} {
  func.func @modal_fusion_kernel(%arg0: memref<2x16x32xf32, #tpu.memory_space<vmem>>, %arg1: memref<2x16x32xf32, #tpu.memory_space<vmem>>, %arg2: memref<4x8x32xf32, #tpu.memory_space<vmem>>, %arg3: memref<4x1x32xf32, #tpu.memory_space<vmem>>, %arg4: memref<4x4x32x8xbf16, #tpu.memory_space<vmem>>, %arg5: memref<4x4x32x8xbf16, #tpu.memory_space<vmem>>, %arg6: memref<4x4x32x8xbf16, #tpu.memory_space<vmem>>, %arg7: memref<4x4x8x32xbf16, #tpu.memory_space<vmem>>, %arg8: memref<4x32x32xbf16, #tpu.memory_space<vmem>>, %arg9: memref<4x32x32xbf16, #tpu.memory_space<vmem>>, %arg10: memref<2x16x32xf32, #tpu.memory_space<vmem>>, %arg11: memref<2x16x32xf32, #tpu.memory_space<vmem>>) attributes {dimension_semantics = [], scalar_prefetch = 0 : i64, scratch_operands = 0 : i64, tpu.core_type = #tpu.core_type<tc>} {
    %c0 = arith.constant 0 : index
    %c0_0 = arith.constant 0 : index
    %c0_1 = arith.constant 0 : index
    %0 = vector.load %arg0[%c0, %c0_0, %c0_1] : memref<2x16x32xf32, #tpu.memory_space<vmem>>, vector<2x16x32xf32>
    %1 = vector.shape_cast %0 : vector<2x16x32xf32> to vector<32x32xf32>
    %c0_2 = arith.constant 0 : index
    %c0_3 = arith.constant 0 : index
    %c0_4 = arith.constant 0 : index
    %2 = vector.load %arg1[%c0_2, %c0_3, %c0_4] : memref<2x16x32xf32, #tpu.memory_space<vmem>>, vector<2x16x32xf32>
    %3 = vector.shape_cast %2 : vector<2x16x32xf32> to vector<32x32xf32>
    %cst = arith.constant dense<0.000000e+00> : vector<32xf32>
    %4 = vector.multi_reduction <add>, %1, %cst [1] : vector<32x32xf32> to vector<32xf32>
    %5 = vector.shape_cast %4 : vector<32xf32> to vector<32x1xf32>
    %cst_5 = arith.constant 3.200000e+01 : f32
    %6 = vector.broadcast %cst_5 : f32 to vector<32x1xf32>
    %7 = arith.divf %5, %6 : vector<32x1xf32>
    %8 = vector.broadcast %7 : vector<32x1xf32> to vector<32x32xf32>
    %9 = arith.subf %1, %8 : vector<32x32xf32>
    %10 = vector.broadcast %7 : vector<32x1xf32> to vector<32x32xf32>
    %11 = arith.subf %1, %10 : vector<32x32xf32>
    %12 = arith.mulf %9, %11 : vector<32x32xf32>
    %cst_6 = arith.constant dense<0.000000e+00> : vector<32xf32>
    %13 = vector.multi_reduction <add>, %12, %cst_6 [1] : vector<32x32xf32> to vector<32xf32>
    %14 = vector.shape_cast %13 : vector<32xf32> to vector<32x1xf32>
    %cst_7 = arith.constant 3.200000e+01 : f32
    %15 = vector.broadcast %cst_7 : f32 to vector<32x1xf32>
    %16 = arith.divf %14, %15 : vector<32x1xf32>
    %17 = vector.broadcast %7 : vector<32x1xf32> to vector<32x32xf32>
    %18 = arith.subf %1, %17 : vector<32x32xf32>
    %cst_8 = arith.constant 9.99999974E-6 : f32
    %19 = vector.broadcast %cst_8 : f32 to vector<32x1xf32>
    %20 = arith.addf %16, %19 : vector<32x1xf32>
    %21 = math.rsqrt %20 : vector<32x1xf32>
    %22 = vector.broadcast %21 : vector<32x1xf32> to vector<32x32xf32>
    %23 = arith.mulf %18, %22 : vector<32x32xf32>
    %cst_9 = arith.constant dense<0.000000e+00> : vector<32xf32>
    %24 = vector.multi_reduction <add>, %3, %cst_9 [1] : vector<32x32xf32> to vector<32xf32>
    %25 = vector.shape_cast %24 : vector<32xf32> to vector<32x1xf32>
    %cst_10 = arith.constant 3.200000e+01 : f32
    %26 = vector.broadcast %cst_10 : f32 to vector<32x1xf32>
    %27 = arith.divf %25, %26 : vector<32x1xf32>
    %28 = vector.broadcast %27 : vector<32x1xf32> to vector<32x32xf32>
    %29 = arith.subf %3, %28 : vector<32x32xf32>
    %30 = vector.broadcast %27 : vector<32x1xf32> to vector<32x32xf32>
    %31 = arith.subf %3, %30 : vector<32x32xf32>
    %32 = arith.mulf %29, %31 : vector<32x32xf32>
    %cst_11 = arith.constant dense<0.000000e+00> : vector<32xf32>
    %33 = vector.multi_reduction <add>, %32, %cst_11 [1] : vector<32x32xf32> to vector<32xf32>
    %34 = vector.shape_cast %33 : vector<32xf32> to vector<32x1xf32>
    %cst_12 = arith.constant 3.200000e+01 : f32
    %35 = vector.broadcast %cst_12 : f32 to vector<32x1xf32>
    %36 = arith.divf %34, %35 : vector<32x1xf32>
    %37 = vector.broadcast %27 : vector<32x1xf32> to vector<32x32xf32>
    %38 = arith.subf %3, %37 : vector<32x32xf32>
    %cst_13 = arith.constant 9.99999974E-6 : f32
    %39 = vector.broadcast %cst_13 : f32 to vector<32x1xf32>
    %40 = arith.addf %36, %39 : vector<32x1xf32>
    %41 = math.rsqrt %40 : vector<32x1xf32>
    %42 = vector.broadcast %41 : vector<32x1xf32> to vector<32x32xf32>
    %43 = arith.mulf %38, %42 : vector<32x32xf32>
    %c0_14 = arith.constant 0 : index
    %c0_15 = arith.constant 0 : index
    %c0_16 = arith.constant 0 : index
    %44 = vector.load %arg2[%c0_14, %c0_15, %c0_16] : memref<4x8x32xf32, #tpu.memory_space<vmem>>, vector<1x8x32xf32>
    %45 = vector.shape_cast %44 : vector<1x8x32xf32> to vector<8x32xf32>
    %46 = vector.extract_strided_slice %45 {offsets = [0, 0], sizes = [1, 32], strides = [1, 1]} : vector<8x32xf32> to vector<1x32xf32>
    %47 = vector.extract_strided_slice %45 {offsets = [1, 0], sizes = [1, 32], strides = [1, 1]} : vector<8x32xf32> to vector<1x32xf32>
    %48 = vector.extract_strided_slice %45 {offsets = [2, 0], sizes = [1, 32], strides = [1, 1]} : vector<8x32xf32> to vector<1x32xf32>
    %49 = vector.extract_strided_slice %45 {offsets = [3, 0], sizes = [1, 32], strides = [1, 1]} : vector<8x32xf32> to vector<1x32xf32>
    %50 = vector.extract_strided_slice %45 {offsets = [4, 0], sizes = [1, 32], strides = [1, 1]} : vector<8x32xf32> to vector<1x32xf32>
    %51 = vector.extract_strided_slice %45 {offsets = [5, 0], sizes = [1, 32], strides = [1, 1]} : vector<8x32xf32> to vector<1x32xf32>
    %52 = vector.extract_strided_slice %45 {offsets = [6, 0], sizes = [1, 32], strides = [1, 1]} : vector<8x32xf32> to vector<1x32xf32>
    %53 = vector.extract_strided_slice %45 {offsets = [7, 0], sizes = [1, 32], strides = [1, 1]} : vector<8x32xf32> to vector<1x32xf32>
    %c0_17 = arith.constant 0 : index
    %c0_18 = arith.constant 0 : index
    %c0_19 = arith.constant 0 : index
    %54 = vector.load %arg3[%c0_17, %c0_18, %c0_19] : memref<4x1x32xf32, #tpu.memory_space<vmem>>, vector<1x1x32xf32>
    %55 = vector.shape_cast %54 : vector<1x1x32xf32> to vector<1x32xf32>
    %56 = vector.broadcast %46 : vector<1x32xf32> to vector<32x32xf32>
    %57 = arith.mulf %23, %56 : vector<32x32xf32>
    %58 = vector.broadcast %47 : vector<1x32xf32> to vector<32x32xf32>
    %59 = arith.addf %57, %58 : vector<32x32xf32>
    %cst_20 = arith.constant 0.353553385 : f32
    %60 = vector.broadcast %cst_20 : f32 to vector<32x32xf32>
    %61 = arith.mulf %59, %60 : vector<32x32xf32>
    %62 = arith.truncf %61 : vector<32x32xf32> to vector<32x32xbf16>
    %63 = vector.broadcast %48 : vector<1x32xf32> to vector<32x32xf32>
    %64 = arith.mulf %43, %63 : vector<32x32xf32>
    %65 = vector.broadcast %49 : vector<1x32xf32> to vector<32x32xf32>
    %66 = arith.addf %64, %65 : vector<32x32xf32>
    %67 = arith.truncf %66 : vector<32x32xf32> to vector<32x32xbf16>
    %cst_21 = arith.constant 0.000000e+00 : f32
    %68 = vector.broadcast %cst_21 : f32 to vector<32x32xf32>
    %c0_22 = arith.constant 0 : index
    %c0_23 = arith.constant 0 : index
    %c0_24 = arith.constant 0 : index
    %c0_25 = arith.constant 0 : index
    %69 = vector.load %arg4[%c0_22, %c0_23, %c0_24, %c0_25] : memref<4x4x32x8xbf16, #tpu.memory_space<vmem>>, vector<1x1x32x8xbf16>
    %70 = vector.shape_cast %69 : vector<1x1x32x8xbf16> to vector<32x8xbf16>
    %cst_26 = arith.constant dense<0.000000e+00> : vector<32x8xf32>
    %71 = tpu.matmul %62, %70, %cst_26 {dimension_numbers = #tpu.dot_dimension_numbers<[1], [0], [0], [1], [0, 0, 1, 1], [], []>} : vector<32x32xbf16>, vector<32x8xbf16>, vector<32x8xf32> -> vector<32x8xf32>
    %c0_27 = arith.constant 0 : index
    %c0_28 = arith.constant 0 : index
    %c0_29 = arith.constant 0 : index
    %c0_30 = arith.constant 0 : index
    %72 = vector.load %arg5[%c0_27, %c0_28, %c0_29, %c0_30] : memref<4x4x32x8xbf16, #tpu.memory_space<vmem>>, vector<1x1x32x8xbf16>
    %73 = vector.shape_cast %72 : vector<1x1x32x8xbf16> to vector<32x8xbf16>
    %cst_31 = arith.constant dense<0.000000e+00> : vector<32x8xf32>
    %74 = tpu.matmul %67, %73, %cst_31 {dimension_numbers = #tpu.dot_dimension_numbers<[1], [0], [0], [1], [0, 0, 1, 1], [], []>} : vector<32x32xbf16>, vector<32x8xbf16>, vector<32x8xf32> -> vector<32x8xf32>
    %c0_32 = arith.constant 0 : index
    %c0_33 = arith.constant 0 : index
    %c0_34 = arith.constant 0 : index
    %c0_35 = arith.constant 0 : index
    %75 = vector.load %arg6[%c0_32, %c0_33, %c0_34, %c0_35] : memref<4x4x32x8xbf16, #tpu.memory_space<vmem>>, vector<1x1x32x8xbf16>
    %76 = vector.shape_cast %75 : vector<1x1x32x8xbf16> to vector<32x8xbf16>
    %cst_36 = arith.constant dense<0.000000e+00> : vector<32x8xf32>
    %77 = tpu.matmul %67, %76, %cst_36 {dimension_numbers = #tpu.dot_dimension_numbers<[1], [0], [0], [1], [0, 0, 1, 1], [], []>} : vector<32x32xbf16>, vector<32x8xbf16>, vector<32x8xf32> -> vector<32x8xf32>
    %78 = vector.shape_cast %71 : vector<32x8xf32> to vector<2x16x8xf32>
    %79 = arith.truncf %78 : vector<2x16x8xf32> to vector<2x16x8xbf16>
    %80 = vector.shape_cast %74 : vector<32x8xf32> to vector<2x16x8xf32>
    %81 = arith.truncf %80 : vector<2x16x8xf32> to vector<2x16x8xbf16>
    %82 = vector.shape_cast %77 : vector<32x8xf32> to vector<2x16x8xf32>
    %83 = arith.truncf %82 : vector<2x16x8xf32> to vector<2x16x8xbf16>
    "tpu.trace_start"() <{level = 10 : i32, message = "bqd,bkd->bqk"}> : () -> ()
    %cst_37 = arith.constant dense<0.000000e+00> : vector<2x16x16xf32>
    %84 = tpu.matmul %79, %81, %cst_37 {dimension_numbers = #tpu.dot_dimension_numbers<[2], [2], [1], [1], [0, 0, 0, 1, 1, 1], [0], [0]>} : vector<2x16x8xbf16>, vector<2x16x8xbf16>, vector<2x16x16xf32> -> vector<2x16x16xf32>
    "tpu.trace_stop"() : () -> ()
    %cst_38 = arith.constant dense<0xFF800000> : vector<2x16xf32>
    %85 = vector.multi_reduction <maximumf>, %84, %cst_38 [2] : vector<2x16x16xf32> to vector<2x16xf32>
    %86 = vector.shape_cast %85 : vector<2x16xf32> to vector<2x16x1xf32>
    %87 = vector.broadcast %86 : vector<2x16x1xf32> to vector<2x16x16xf32>
    %88 = arith.subf %84, %87 : vector<2x16x16xf32>
    %89 = math.exp %88 : vector<2x16x16xf32>
    %cst_39 = arith.constant dense<0.000000e+00> : vector<2x16xf32>
    %90 = vector.multi_reduction <add>, %89, %cst_39 [2] : vector<2x16x16xf32> to vector<2x16xf32>
    %91 = vector.shape_cast %90 : vector<2x16xf32> to vector<2x16x1xf32>
    %92 = tpu.reciprocal %91 {approx = true} : vector<2x16x1xf32> -> vector<2x16x1xf32>
    %93 = vector.broadcast %92 : vector<2x16x1xf32> to vector<2x16x16xf32>
    %94 = arith.mulf %89, %93 : vector<2x16x16xf32>
    %95 = arith.truncf %94 : vector<2x16x16xf32> to vector<2x16x16xbf16>
    "tpu.trace_start"() <{level = 10 : i32, message = "bqk,bkd->bqd"}> : () -> ()
    %cst_40 = arith.constant dense<0.000000e+00> : vector<2x16x8xf32>
    %96 = tpu.matmul %95, %83, %cst_40 {dimension_numbers = #tpu.dot_dimension_numbers<[2], [1], [1], [2], [0, 0, 0, 1, 1, 2], [0], [0]>} : vector<2x16x16xbf16>, vector<2x16x8xbf16>, vector<2x16x8xf32> -> vector<2x16x8xf32>
    "tpu.trace_stop"() : () -> ()
    %97 = vector.shape_cast %96 : vector<2x16x8xf32> to vector<32x8xf32>
    %98 = arith.truncf %97 : vector<32x8xf32> to vector<32x8xbf16>
    %c0_41 = arith.constant 0 : index
    %c0_42 = arith.constant 0 : index
    %c0_43 = arith.constant 0 : index
    %c0_44 = arith.constant 0 : index
    %99 = vector.load %arg7[%c0_41, %c0_42, %c0_43, %c0_44] : memref<4x4x8x32xbf16, #tpu.memory_space<vmem>>, vector<1x1x8x32xbf16>
    %100 = vector.shape_cast %99 : vector<1x1x8x32xbf16> to vector<8x32xbf16>
    %cst_45 = arith.constant dense<0.000000e+00> : vector<32x32xf32>
    %101 = tpu.matmul %98, %100, %cst_45 {dimension_numbers = #tpu.dot_dimension_numbers<[1], [0], [0], [1], [0, 0, 1, 1], [], []>} : vector<32x8xbf16>, vector<8x32xbf16>, vector<32x32xf32> -> vector<32x32xf32>
    %102 = arith.addf %68, %101 : vector<32x32xf32>
    %c0_46 = arith.constant 0 : index
    %c1 = arith.constant 1 : index
    %c0_47 = arith.constant 0 : index
    %c0_48 = arith.constant 0 : index
    %103 = vector.load %arg4[%c0_46, %c1, %c0_47, %c0_48] : memref<4x4x32x8xbf16, #tpu.memory_space<vmem>>, vector<1x1x32x8xbf16>
    %104 = vector.shape_cast %103 : vector<1x1x32x8xbf16> to vector<32x8xbf16>
    %cst_49 = arith.constant dense<0.000000e+00> : vector<32x8xf32>
    %105 = tpu.matmul %62, %104, %cst_49 {dimension_numbers = #tpu.dot_dimension_numbers<[1], [0], [0], [1], [0, 0, 1, 1], [], []>} : vector<32x32xbf16>, vector<32x8xbf16>, vector<32x8xf32> -> vector<32x8xf32>
    %c0_50 = arith.constant 0 : index
    %c1_51 = arith.constant 1 : index
    %c0_52 = arith.constant 0 : index
    %c0_53 = arith.constant 0 : index
    %106 = vector.load %arg5[%c0_50, %c1_51, %c0_52, %c0_53] : memref<4x4x32x8xbf16, #tpu.memory_space<vmem>>, vector<1x1x32x8xbf16>
    %107 = vector.shape_cast %106 : vector<1x1x32x8xbf16> to vector<32x8xbf16>
    %cst_54 = arith.constant dense<0.000000e+00> : vector<32x8xf32>
    %108 = tpu.matmul %67, %107, %cst_54 {dimension_numbers = #tpu.dot_dimension_numbers<[1], [0], [0], [1], [0, 0, 1, 1], [], []>} : vector<32x32xbf16>, vector<32x8xbf16>, vector<32x8xf32> -> vector<32x8xf32>
    %c0_55 = arith.constant 0 : index
    %c1_56 = arith.constant 1 : index
    %c0_57 = arith.constant 0 : index
    %c0_58 = arith.constant 0 : index
    %109 = vector.load %arg6[%c0_55, %c1_56, %c0_57, %c0_58] : memref<4x4x32x8xbf16, #tpu.memory_space<vmem>>, vector<1x1x32x8xbf16>
    %110 = vector.shape_cast %109 : vector<1x1x32x8xbf16> to vector<32x8xbf16>
    %cst_59 = arith.constant dense<0.000000e+00> : vector<32x8xf32>
    %111 = tpu.matmul %67, %110, %cst_59 {dimension_numbers = #tpu.dot_dimension_numbers<[1], [0], [0], [1], [0, 0, 1, 1], [], []>} : vector<32x32xbf16>, vector<32x8xbf16>, vector<32x8xf32> -> vector<32x8xf32>
    %112 = vector.shape_cast %105 : vector<32x8xf32> to vector<2x16x8xf32>
    %113 = arith.truncf %112 : vector<2x16x8xf32> to vector<2x16x8xbf16>
    %114 = vector.shape_cast %108 : vector<32x8xf32> to vector<2x16x8xf32>
    %115 = arith.truncf %114 : vector<2x16x8xf32> to vector<2x16x8xbf16>
    %116 = vector.shape_cast %111 : vector<32x8xf32> to vector<2x16x8xf32>
    %117 = arith.truncf %116 : vector<2x16x8xf32> to vector<2x16x8xbf16>
    "tpu.trace_start"() <{level = 10 : i32, message = "bqd,bkd->bqk"}> : () -> ()
    %cst_60 = arith.constant dense<0.000000e+00> : vector<2x16x16xf32>
    %118 = tpu.matmul %113, %115, %cst_60 {dimension_numbers = #tpu.dot_dimension_numbers<[2], [2], [1], [1], [0, 0, 0, 1, 1, 1], [0], [0]>} : vector<2x16x8xbf16>, vector<2x16x8xbf16>, vector<2x16x16xf32> -> vector<2x16x16xf32>
    "tpu.trace_stop"() : () -> ()
    %cst_61 = arith.constant dense<0xFF800000> : vector<2x16xf32>
    %119 = vector.multi_reduction <maximumf>, %118, %cst_61 [2] : vector<2x16x16xf32> to vector<2x16xf32>
    %120 = vector.shape_cast %119 : vector<2x16xf32> to vector<2x16x1xf32>
    %121 = vector.broadcast %120 : vector<2x16x1xf32> to vector<2x16x16xf32>
    %122 = arith.subf %118, %121 : vector<2x16x16xf32>
    %123 = math.exp %122 : vector<2x16x16xf32>
    %cst_62 = arith.constant dense<0.000000e+00> : vector<2x16xf32>
    %124 = vector.multi_reduction <add>, %123, %cst_62 [2] : vector<2x16x16xf32> to vector<2x16xf32>
    %125 = vector.shape_cast %124 : vector<2x16xf32> to vector<2x16x1xf32>
    %126 = tpu.reciprocal %125 {approx = true} : vector<2x16x1xf32> -> vector<2x16x1xf32>
    %127 = vector.broadcast %126 : vector<2x16x1xf32> to vector<2x16x16xf32>
    %128 = arith.mulf %123, %127 : vector<2x16x16xf32>
    %129 = arith.truncf %128 : vector<2x16x16xf32> to vector<2x16x16xbf16>
    "tpu.trace_start"() <{level = 10 : i32, message = "bqk,bkd->bqd"}> : () -> ()
    %cst_63 = arith.constant dense<0.000000e+00> : vector<2x16x8xf32>
    %130 = tpu.matmul %129, %117, %cst_63 {dimension_numbers = #tpu.dot_dimension_numbers<[2], [1], [1], [2], [0, 0, 0, 1, 1, 2], [0], [0]>} : vector<2x16x16xbf16>, vector<2x16x8xbf16>, vector<2x16x8xf32> -> vector<2x16x8xf32>
    "tpu.trace_stop"() : () -> ()
    %131 = vector.shape_cast %130 : vector<2x16x8xf32> to vector<32x8xf32>
    %132 = arith.truncf %131 : vector<32x8xf32> to vector<32x8xbf16>
    %c0_64 = arith.constant 0 : index
    %c1_65 = arith.constant 1 : index
    %c0_66 = arith.constant 0 : index
    %c0_67 = arith.constant 0 : index
    %133 = vector.load %arg7[%c0_64, %c1_65, %c0_66, %c0_67] : memref<4x4x8x32xbf16, #tpu.memory_space<vmem>>, vector<1x1x8x32xbf16>
    %134 = vector.shape_cast %133 : vector<1x1x8x32xbf16> to vector<8x32xbf16>
    %cst_68 = arith.constant dense<0.000000e+00> : vector<32x32xf32>
    %135 = tpu.matmul %132, %134, %cst_68 {dimension_numbers = #tpu.dot_dimension_numbers<[1], [0], [0], [1], [0, 0, 1, 1], [], []>} : vector<32x8xbf16>, vector<8x32xbf16>, vector<32x32xf32> -> vector<32x32xf32>
    %136 = arith.addf %102, %135 : vector<32x32xf32>
    %c0_69 = arith.constant 0 : index
    %c2 = arith.constant 2 : index
    %c0_70 = arith.constant 0 : index
    %c0_71 = arith.constant 0 : index
    %137 = vector.load %arg4[%c0_69, %c2, %c0_70, %c0_71] : memref<4x4x32x8xbf16, #tpu.memory_space<vmem>>, vector<1x1x32x8xbf16>
    %138 = vector.shape_cast %137 : vector<1x1x32x8xbf16> to vector<32x8xbf16>
    %cst_72 = arith.constant dense<0.000000e+00> : vector<32x8xf32>
    %139 = tpu.matmul %62, %138, %cst_72 {dimension_numbers = #tpu.dot_dimension_numbers<[1], [0], [0], [1], [0, 0, 1, 1], [], []>} : vector<32x32xbf16>, vector<32x8xbf16>, vector<32x8xf32> -> vector<32x8xf32>
    %c0_73 = arith.constant 0 : index
    %c2_74 = arith.constant 2 : index
    %c0_75 = arith.constant 0 : index
    %c0_76 = arith.constant 0 : index
    %140 = vector.load %arg5[%c0_73, %c2_74, %c0_75, %c0_76] : memref<4x4x32x8xbf16, #tpu.memory_space<vmem>>, vector<1x1x32x8xbf16>
    %141 = vector.shape_cast %140 : vector<1x1x32x8xbf16> to vector<32x8xbf16>
    %cst_77 = arith.constant dense<0.000000e+00> : vector<32x8xf32>
    %142 = tpu.matmul %67, %141, %cst_77 {dimension_numbers = #tpu.dot_dimension_numbers<[1], [0], [0], [1], [0, 0, 1, 1], [], []>} : vector<32x32xbf16>, vector<32x8xbf16>, vector<32x8xf32> -> vector<32x8xf32>
    %c0_78 = arith.constant 0 : index
    %c2_79 = arith.constant 2 : index
    %c0_80 = arith.constant 0 : index
    %c0_81 = arith.constant 0 : index
    %143 = vector.load %arg6[%c0_78, %c2_79, %c0_80, %c0_81] : memref<4x4x32x8xbf16, #tpu.memory_space<vmem>>, vector<1x1x32x8xbf16>
    %144 = vector.shape_cast %143 : vector<1x1x32x8xbf16> to vector<32x8xbf16>
    %cst_82 = arith.constant dense<0.000000e+00> : vector<32x8xf32>
    %145 = tpu.matmul %67, %144, %cst_82 {dimension_numbers = #tpu.dot_dimension_numbers<[1], [0], [0], [1], [0, 0, 1, 1], [], []>} : vector<32x32xbf16>, vector<32x8xbf16>, vector<32x8xf32> -> vector<32x8xf32>
    %146 = vector.shape_cast %139 : vector<32x8xf32> to vector<2x16x8xf32>
    %147 = arith.truncf %146 : vector<2x16x8xf32> to vector<2x16x8xbf16>
    %148 = vector.shape_cast %142 : vector<32x8xf32> to vector<2x16x8xf32>
    %149 = arith.truncf %148 : vector<2x16x8xf32> to vector<2x16x8xbf16>
    %150 = vector.shape_cast %145 : vector<32x8xf32> to vector<2x16x8xf32>
    %151 = arith.truncf %150 : vector<2x16x8xf32> to vector<2x16x8xbf16>
    "tpu.trace_start"() <{level = 10 : i32, message = "bqd,bkd->bqk"}> : () -> ()
    %cst_83 = arith.constant dense<0.000000e+00> : vector<2x16x16xf32>
    %152 = tpu.matmul %147, %149, %cst_83 {dimension_numbers = #tpu.dot_dimension_numbers<[2], [2], [1], [1], [0, 0, 0, 1, 1, 1], [0], [0]>} : vector<2x16x8xbf16>, vector<2x16x8xbf16>, vector<2x16x16xf32> -> vector<2x16x16xf32>
    "tpu.trace_stop"() : () -> ()
    %cst_84 = arith.constant dense<0xFF800000> : vector<2x16xf32>
    %153 = vector.multi_reduction <maximumf>, %152, %cst_84 [2] : vector<2x16x16xf32> to vector<2x16xf32>
    %154 = vector.shape_cast %153 : vector<2x16xf32> to vector<2x16x1xf32>
    %155 = vector.broadcast %154 : vector<2x16x1xf32> to vector<2x16x16xf32>
    %156 = arith.subf %152, %155 : vector<2x16x16xf32>
    %157 = math.exp %156 : vector<2x16x16xf32>
    %cst_85 = arith.constant dense<0.000000e+00> : vector<2x16xf32>
    %158 = vector.multi_reduction <add>, %157, %cst_85 [2] : vector<2x16x16xf32> to vector<2x16xf32>
    %159 = vector.shape_cast %158 : vector<2x16xf32> to vector<2x16x1xf32>
    %160 = tpu.reciprocal %159 {approx = true} : vector<2x16x1xf32> -> vector<2x16x1xf32>
    %161 = vector.broadcast %160 : vector<2x16x1xf32> to vector<2x16x16xf32>
    %162 = arith.mulf %157, %161 : vector<2x16x16xf32>
    %163 = arith.truncf %162 : vector<2x16x16xf32> to vector<2x16x16xbf16>
    "tpu.trace_start"() <{level = 10 : i32, message = "bqk,bkd->bqd"}> : () -> ()
    %cst_86 = arith.constant dense<0.000000e+00> : vector<2x16x8xf32>
    %164 = tpu.matmul %163, %151, %cst_86 {dimension_numbers = #tpu.dot_dimension_numbers<[2], [1], [1], [2], [0, 0, 0, 1, 1, 2], [0], [0]>} : vector<2x16x16xbf16>, vector<2x16x8xbf16>, vector<2x16x8xf32> -> vector<2x16x8xf32>
    "tpu.trace_stop"() : () -> ()
    %165 = vector.shape_cast %164 : vector<2x16x8xf32> to vector<32x8xf32>
    %166 = arith.truncf %165 : vector<32x8xf32> to vector<32x8xbf16>
    %c0_87 = arith.constant 0 : index
    %c2_88 = arith.constant 2 : index
    %c0_89 = arith.constant 0 : index
    %c0_90 = arith.constant 0 : index
    %167 = vector.load %arg7[%c0_87, %c2_88, %c0_89, %c0_90] : memref<4x4x8x32xbf16, #tpu.memory_space<vmem>>, vector<1x1x8x32xbf16>
    %168 = vector.shape_cast %167 : vector<1x1x8x32xbf16> to vector<8x32xbf16>
    %cst_91 = arith.constant dense<0.000000e+00> : vector<32x32xf32>
    %169 = tpu.matmul %166, %168, %cst_91 {dimension_numbers = #tpu.dot_dimension_numbers<[1], [0], [0], [1], [0, 0, 1, 1], [], []>} : vector<32x8xbf16>, vector<8x32xbf16>, vector<32x32xf32> -> vector<32x32xf32>
    %170 = arith.addf %136, %169 : vector<32x32xf32>
    %c0_92 = arith.constant 0 : index
    %c3 = arith.constant 3 : index
    %c0_93 = arith.constant 0 : index
    %c0_94 = arith.constant 0 : index
    %171 = vector.load %arg4[%c0_92, %c3, %c0_93, %c0_94] : memref<4x4x32x8xbf16, #tpu.memory_space<vmem>>, vector<1x1x32x8xbf16>
    %172 = vector.shape_cast %171 : vector<1x1x32x8xbf16> to vector<32x8xbf16>
    %cst_95 = arith.constant dense<0.000000e+00> : vector<32x8xf32>
    %173 = tpu.matmul %62, %172, %cst_95 {dimension_numbers = #tpu.dot_dimension_numbers<[1], [0], [0], [1], [0, 0, 1, 1], [], []>} : vector<32x32xbf16>, vector<32x8xbf16>, vector<32x8xf32> -> vector<32x8xf32>
    %c0_96 = arith.constant 0 : index
    %c3_97 = arith.constant 3 : index
    %c0_98 = arith.constant 0 : index
    %c0_99 = arith.constant 0 : index
    %174 = vector.load %arg5[%c0_96, %c3_97, %c0_98, %c0_99] : memref<4x4x32x8xbf16, #tpu.memory_space<vmem>>, vector<1x1x32x8xbf16>
    %175 = vector.shape_cast %174 : vector<1x1x32x8xbf16> to vector<32x8xbf16>
    %cst_100 = arith.constant dense<0.000000e+00> : vector<32x8xf32>
    %176 = tpu.matmul %67, %175, %cst_100 {dimension_numbers = #tpu.dot_dimension_numbers<[1], [0], [0], [1], [0, 0, 1, 1], [], []>} : vector<32x32xbf16>, vector<32x8xbf16>, vector<32x8xf32> -> vector<32x8xf32>
    %c0_101 = arith.constant 0 : index
    %c3_102 = arith.constant 3 : index
    %c0_103 = arith.constant 0 : index
    %c0_104 = arith.constant 0 : index
    %177 = vector.load %arg6[%c0_101, %c3_102, %c0_103, %c0_104] : memref<4x4x32x8xbf16, #tpu.memory_space<vmem>>, vector<1x1x32x8xbf16>
    %178 = vector.shape_cast %177 : vector<1x1x32x8xbf16> to vector<32x8xbf16>
    %cst_105 = arith.constant dense<0.000000e+00> : vector<32x8xf32>
    %179 = tpu.matmul %67, %178, %cst_105 {dimension_numbers = #tpu.dot_dimension_numbers<[1], [0], [0], [1], [0, 0, 1, 1], [], []>} : vector<32x32xbf16>, vector<32x8xbf16>, vector<32x8xf32> -> vector<32x8xf32>
    %180 = vector.shape_cast %173 : vector<32x8xf32> to vector<2x16x8xf32>
    %181 = arith.truncf %180 : vector<2x16x8xf32> to vector<2x16x8xbf16>
    %182 = vector.shape_cast %176 : vector<32x8xf32> to vector<2x16x8xf32>
    %183 = arith.truncf %182 : vector<2x16x8xf32> to vector<2x16x8xbf16>
    %184 = vector.shape_cast %179 : vector<32x8xf32> to vector<2x16x8xf32>
    %185 = arith.truncf %184 : vector<2x16x8xf32> to vector<2x16x8xbf16>
    "tpu.trace_start"() <{level = 10 : i32, message = "bqd,bkd->bqk"}> : () -> ()
    %cst_106 = arith.constant dense<0.000000e+00> : vector<2x16x16xf32>
    %186 = tpu.matmul %181, %183, %cst_106 {dimension_numbers = #tpu.dot_dimension_numbers<[2], [2], [1], [1], [0, 0, 0, 1, 1, 1], [0], [0]>} : vector<2x16x8xbf16>, vector<2x16x8xbf16>, vector<2x16x16xf32> -> vector<2x16x16xf32>
    "tpu.trace_stop"() : () -> ()
    %cst_107 = arith.constant dense<0xFF800000> : vector<2x16xf32>
    %187 = vector.multi_reduction <maximumf>, %186, %cst_107 [2] : vector<2x16x16xf32> to vector<2x16xf32>
    %188 = vector.shape_cast %187 : vector<2x16xf32> to vector<2x16x1xf32>
    %189 = vector.broadcast %188 : vector<2x16x1xf32> to vector<2x16x16xf32>
    %190 = arith.subf %186, %189 : vector<2x16x16xf32>
    %191 = math.exp %190 : vector<2x16x16xf32>
    %cst_108 = arith.constant dense<0.000000e+00> : vector<2x16xf32>
    %192 = vector.multi_reduction <add>, %191, %cst_108 [2] : vector<2x16x16xf32> to vector<2x16xf32>
    %193 = vector.shape_cast %192 : vector<2x16xf32> to vector<2x16x1xf32>
    %194 = tpu.reciprocal %193 {approx = true} : vector<2x16x1xf32> -> vector<2x16x1xf32>
    %195 = vector.broadcast %194 : vector<2x16x1xf32> to vector<2x16x16xf32>
    %196 = arith.mulf %191, %195 : vector<2x16x16xf32>
    %197 = arith.truncf %196 : vector<2x16x16xf32> to vector<2x16x16xbf16>
    "tpu.trace_start"() <{level = 10 : i32, message = "bqk,bkd->bqd"}> : () -> ()
    %cst_109 = arith.constant dense<0.000000e+00> : vector<2x16x8xf32>
    %198 = tpu.matmul %197, %185, %cst_109 {dimension_numbers = #tpu.dot_dimension_numbers<[2], [1], [1], [2], [0, 0, 0, 1, 1, 2], [0], [0]>} : vector<2x16x16xbf16>, vector<2x16x8xbf16>, vector<2x16x8xf32> -> vector<2x16x8xf32>
    "tpu.trace_stop"() : () -> ()
    %199 = vector.shape_cast %198 : vector<2x16x8xf32> to vector<32x8xf32>
    %200 = arith.truncf %199 : vector<32x8xf32> to vector<32x8xbf16>
    %c0_110 = arith.constant 0 : index
    %c3_111 = arith.constant 3 : index
    %c0_112 = arith.constant 0 : index
    %c0_113 = arith.constant 0 : index
    %201 = vector.load %arg7[%c0_110, %c3_111, %c0_112, %c0_113] : memref<4x4x8x32xbf16, #tpu.memory_space<vmem>>, vector<1x1x8x32xbf16>
    %202 = vector.shape_cast %201 : vector<1x1x8x32xbf16> to vector<8x32xbf16>
    %cst_114 = arith.constant dense<0.000000e+00> : vector<32x32xf32>
    %203 = tpu.matmul %200, %202, %cst_114 {dimension_numbers = #tpu.dot_dimension_numbers<[1], [0], [0], [1], [0, 0, 1, 1], [], []>} : vector<32x8xbf16>, vector<8x32xbf16>, vector<32x32xf32> -> vector<32x32xf32>
    %204 = arith.addf %170, %203 : vector<32x32xf32>
    %205 = arith.addf %1, %204 : vector<32x32xf32>
    %206 = vector.broadcast %52 : vector<1x32xf32> to vector<32x32xf32>
    %207 = arith.addf %205, %206 : vector<32x32xf32>
    %cst_115 = arith.constant dense<0.000000e+00> : vector<32xf32>
    %208 = vector.multi_reduction <add>, %207, %cst_115 [1] : vector<32x32xf32> to vector<32xf32>
    %209 = vector.shape_cast %208 : vector<32xf32> to vector<32x1xf32>
    %cst_116 = arith.constant 3.200000e+01 : f32
    %210 = vector.broadcast %cst_116 : f32 to vector<32x1xf32>
    %211 = arith.divf %209, %210 : vector<32x1xf32>
    %212 = vector.broadcast %211 : vector<32x1xf32> to vector<32x32xf32>
    %213 = arith.subf %207, %212 : vector<32x32xf32>
    %214 = vector.broadcast %211 : vector<32x1xf32> to vector<32x32xf32>
    %215 = arith.subf %207, %214 : vector<32x32xf32>
    %216 = arith.mulf %213, %215 : vector<32x32xf32>
    %cst_117 = arith.constant dense<0.000000e+00> : vector<32xf32>
    %217 = vector.multi_reduction <add>, %216, %cst_117 [1] : vector<32x32xf32> to vector<32xf32>
    %218 = vector.shape_cast %217 : vector<32xf32> to vector<32x1xf32>
    %cst_118 = arith.constant 3.200000e+01 : f32
    %219 = vector.broadcast %cst_118 : f32 to vector<32x1xf32>
    %220 = arith.divf %218, %219 : vector<32x1xf32>
    %221 = vector.broadcast %211 : vector<32x1xf32> to vector<32x32xf32>
    %222 = arith.subf %207, %221 : vector<32x32xf32>
    %cst_119 = arith.constant 9.99999974E-6 : f32
    %223 = vector.broadcast %cst_119 : f32 to vector<32x1xf32>
    %224 = arith.addf %220, %223 : vector<32x1xf32>
    %225 = math.rsqrt %224 : vector<32x1xf32>
    %226 = vector.broadcast %225 : vector<32x1xf32> to vector<32x32xf32>
    %227 = arith.mulf %222, %226 : vector<32x32xf32>
    %228 = vector.broadcast %50 : vector<1x32xf32> to vector<32x32xf32>
    %229 = arith.mulf %227, %228 : vector<32x32xf32>
    %230 = vector.broadcast %51 : vector<1x32xf32> to vector<32x32xf32>
    %231 = arith.addf %229, %230 : vector<32x32xf32>
    %232 = arith.truncf %231 : vector<32x32xf32> to vector<32x32xbf16>
    %c0_120 = arith.constant 0 : index
    %c0_121 = arith.constant 0 : index
    %c0_122 = arith.constant 0 : index
    %233 = vector.load %arg8[%c0_120, %c0_121, %c0_122] : memref<4x32x32xbf16, #tpu.memory_space<vmem>>, vector<1x32x32xbf16>
    %234 = vector.shape_cast %233 : vector<1x32x32xbf16> to vector<32x32xbf16>
    %cst_123 = arith.constant dense<0.000000e+00> : vector<32x32xf32>
    %235 = tpu.matmul %232, %234, %cst_123 {dimension_numbers = #tpu.dot_dimension_numbers<[1], [0], [0], [1], [0, 0, 1, 1], [], []>} : vector<32x32xbf16>, vector<32x32xbf16>, vector<32x32xf32> -> vector<32x32xf32>
    %236 = vector.broadcast %55 : vector<1x32xf32> to vector<32x32xf32>
    %237 = arith.addf %235, %236 : vector<32x32xf32>
    %238 = arith.mulf %237, %237 : vector<32x32xf32>
    %239 = arith.mulf %237, %238 : vector<32x32xf32>
    %cst_124 = arith.constant 4.471500e-02 : f32
    %240 = vector.broadcast %cst_124 : f32 to vector<32x32xf32>
    %241 = arith.mulf %240, %239 : vector<32x32xf32>
    %242 = arith.addf %237, %241 : vector<32x32xf32>
    %cst_125 = arith.constant 0.797884583 : f32
    %243 = vector.broadcast %cst_125 : f32 to vector<32x32xf32>
    %244 = arith.mulf %243, %242 : vector<32x32xf32>
    %245 = math.tanh %244 : vector<32x32xf32>
    %cst_126 = arith.constant 1.000000e+00 : f32
    %246 = vector.broadcast %cst_126 : f32 to vector<32x32xf32>
    %247 = arith.addf %246, %245 : vector<32x32xf32>
    %cst_127 = arith.constant 5.000000e-01 : f32
    %248 = vector.broadcast %cst_127 : f32 to vector<32x32xf32>
    %249 = arith.mulf %248, %247 : vector<32x32xf32>
    %250 = arith.mulf %237, %249 : vector<32x32xf32>
    %251 = arith.truncf %250 : vector<32x32xf32> to vector<32x32xbf16>
    %c0_128 = arith.constant 0 : index
    %c0_129 = arith.constant 0 : index
    %c0_130 = arith.constant 0 : index
    %252 = vector.load %arg9[%c0_128, %c0_129, %c0_130] : memref<4x32x32xbf16, #tpu.memory_space<vmem>>, vector<1x32x32xbf16>
    %253 = vector.shape_cast %252 : vector<1x32x32xbf16> to vector<32x32xbf16>
    %cst_131 = arith.constant dense<0.000000e+00> : vector<32x32xf32>
    %254 = tpu.matmul %251, %253, %cst_131 {dimension_numbers = #tpu.dot_dimension_numbers<[1], [0], [0], [1], [0, 0, 1, 1], [], []>} : vector<32x32xbf16>, vector<32x32xbf16>, vector<32x32xf32> -> vector<32x32xf32>
    %255 = vector.broadcast %53 : vector<1x32xf32> to vector<32x32xf32>
    %256 = arith.addf %254, %255 : vector<32x32xf32>
    %257 = arith.addf %207, %256 : vector<32x32xf32>
    %c1_132 = arith.constant 1 : index
    %c0_133 = arith.constant 0 : index
    %c0_134 = arith.constant 0 : index
    %258 = vector.load %arg2[%c1_132, %c0_133, %c0_134] : memref<4x8x32xf32, #tpu.memory_space<vmem>>, vector<1x8x32xf32>
    %259 = vector.shape_cast %258 : vector<1x8x32xf32> to vector<8x32xf32>
    %260 = vector.extract_strided_slice %259 {offsets = [0, 0], sizes = [1, 32], strides = [1, 1]} : vector<8x32xf32> to vector<1x32xf32>
    %261 = vector.extract_strided_slice %259 {offsets = [1, 0], sizes = [1, 32], strides = [1, 1]} : vector<8x32xf32> to vector<1x32xf32>
    %262 = vector.extract_strided_slice %259 {offsets = [2, 0], sizes = [1, 32], strides = [1, 1]} : vector<8x32xf32> to vector<1x32xf32>
    %263 = vector.extract_strided_slice %259 {offsets = [3, 0], sizes = [1, 32], strides = [1, 1]} : vector<8x32xf32> to vector<1x32xf32>
    %264 = vector.extract_strided_slice %259 {offsets = [4, 0], sizes = [1, 32], strides = [1, 1]} : vector<8x32xf32> to vector<1x32xf32>
    %265 = vector.extract_strided_slice %259 {offsets = [5, 0], sizes = [1, 32], strides = [1, 1]} : vector<8x32xf32> to vector<1x32xf32>
    %266 = vector.extract_strided_slice %259 {offsets = [6, 0], sizes = [1, 32], strides = [1, 1]} : vector<8x32xf32> to vector<1x32xf32>
    %267 = vector.extract_strided_slice %259 {offsets = [7, 0], sizes = [1, 32], strides = [1, 1]} : vector<8x32xf32> to vector<1x32xf32>
    %c1_135 = arith.constant 1 : index
    %c0_136 = arith.constant 0 : index
    %c0_137 = arith.constant 0 : index
    %268 = vector.load %arg3[%c1_135, %c0_136, %c0_137] : memref<4x1x32xf32, #tpu.memory_space<vmem>>, vector<1x1x32xf32>
    %269 = vector.shape_cast %268 : vector<1x1x32xf32> to vector<1x32xf32>
    %270 = vector.broadcast %260 : vector<1x32xf32> to vector<32x32xf32>
    %271 = arith.mulf %43, %270 : vector<32x32xf32>
    %272 = vector.broadcast %261 : vector<1x32xf32> to vector<32x32xf32>
    %273 = arith.addf %271, %272 : vector<32x32xf32>
    %cst_138 = arith.constant 0.353553385 : f32
    %274 = vector.broadcast %cst_138 : f32 to vector<32x32xf32>
    %275 = arith.mulf %273, %274 : vector<32x32xf32>
    %276 = arith.truncf %275 : vector<32x32xf32> to vector<32x32xbf16>
    %277 = vector.broadcast %262 : vector<1x32xf32> to vector<32x32xf32>
    %278 = arith.mulf %23, %277 : vector<32x32xf32>
    %279 = vector.broadcast %263 : vector<1x32xf32> to vector<32x32xf32>
    %280 = arith.addf %278, %279 : vector<32x32xf32>
    %281 = arith.truncf %280 : vector<32x32xf32> to vector<32x32xbf16>
    %cst_139 = arith.constant 0.000000e+00 : f32
    %282 = vector.broadcast %cst_139 : f32 to vector<32x32xf32>
    %c1_140 = arith.constant 1 : index
    %c0_141 = arith.constant 0 : index
    %c0_142 = arith.constant 0 : index
    %c0_143 = arith.constant 0 : index
    %283 = vector.load %arg4[%c1_140, %c0_141, %c0_142, %c0_143] : memref<4x4x32x8xbf16, #tpu.memory_space<vmem>>, vector<1x1x32x8xbf16>
    %284 = vector.shape_cast %283 : vector<1x1x32x8xbf16> to vector<32x8xbf16>
    %cst_144 = arith.constant dense<0.000000e+00> : vector<32x8xf32>
    %285 = tpu.matmul %276, %284, %cst_144 {dimension_numbers = #tpu.dot_dimension_numbers<[1], [0], [0], [1], [0, 0, 1, 1], [], []>} : vector<32x32xbf16>, vector<32x8xbf16>, vector<32x8xf32> -> vector<32x8xf32>
    %c1_145 = arith.constant 1 : index
    %c0_146 = arith.constant 0 : index
    %c0_147 = arith.constant 0 : index
    %c0_148 = arith.constant 0 : index
    %286 = vector.load %arg5[%c1_145, %c0_146, %c0_147, %c0_148] : memref<4x4x32x8xbf16, #tpu.memory_space<vmem>>, vector<1x1x32x8xbf16>
    %287 = vector.shape_cast %286 : vector<1x1x32x8xbf16> to vector<32x8xbf16>
    %cst_149 = arith.constant dense<0.000000e+00> : vector<32x8xf32>
    %288 = tpu.matmul %281, %287, %cst_149 {dimension_numbers = #tpu.dot_dimension_numbers<[1], [0], [0], [1], [0, 0, 1, 1], [], []>} : vector<32x32xbf16>, vector<32x8xbf16>, vector<32x8xf32> -> vector<32x8xf32>
    %c1_150 = arith.constant 1 : index
    %c0_151 = arith.constant 0 : index
    %c0_152 = arith.constant 0 : index
    %c0_153 = arith.constant 0 : index
    %289 = vector.load %arg6[%c1_150, %c0_151, %c0_152, %c0_153] : memref<4x4x32x8xbf16, #tpu.memory_space<vmem>>, vector<1x1x32x8xbf16>
    %290 = vector.shape_cast %289 : vector<1x1x32x8xbf16> to vector<32x8xbf16>
    %cst_154 = arith.constant dense<0.000000e+00> : vector<32x8xf32>
    %291 = tpu.matmul %281, %290, %cst_154 {dimension_numbers = #tpu.dot_dimension_numbers<[1], [0], [0], [1], [0, 0, 1, 1], [], []>} : vector<32x32xbf16>, vector<32x8xbf16>, vector<32x8xf32> -> vector<32x8xf32>
    %292 = vector.shape_cast %285 : vector<32x8xf32> to vector<2x16x8xf32>
    %293 = arith.truncf %292 : vector<2x16x8xf32> to vector<2x16x8xbf16>
    %294 = vector.shape_cast %288 : vector<32x8xf32> to vector<2x16x8xf32>
    %295 = arith.truncf %294 : vector<2x16x8xf32> to vector<2x16x8xbf16>
    %296 = vector.shape_cast %291 : vector<32x8xf32> to vector<2x16x8xf32>
    %297 = arith.truncf %296 : vector<2x16x8xf32> to vector<2x16x8xbf16>
    "tpu.trace_start"() <{level = 10 : i32, message = "bqd,bkd->bqk"}> : () -> ()
    %cst_155 = arith.constant dense<0.000000e+00> : vector<2x16x16xf32>
    %298 = tpu.matmul %293, %295, %cst_155 {dimension_numbers = #tpu.dot_dimension_numbers<[2], [2], [1], [1], [0, 0, 0, 1, 1, 1], [0], [0]>} : vector<2x16x8xbf16>, vector<2x16x8xbf16>, vector<2x16x16xf32> -> vector<2x16x16xf32>
    "tpu.trace_stop"() : () -> ()
    %cst_156 = arith.constant dense<0xFF800000> : vector<2x16xf32>
    %299 = vector.multi_reduction <maximumf>, %298, %cst_156 [2] : vector<2x16x16xf32> to vector<2x16xf32>
    %300 = vector.shape_cast %299 : vector<2x16xf32> to vector<2x16x1xf32>
    %301 = vector.broadcast %300 : vector<2x16x1xf32> to vector<2x16x16xf32>
    %302 = arith.subf %298, %301 : vector<2x16x16xf32>
    %303 = math.exp %302 : vector<2x16x16xf32>
    %cst_157 = arith.constant dense<0.000000e+00> : vector<2x16xf32>
    %304 = vector.multi_reduction <add>, %303, %cst_157 [2] : vector<2x16x16xf32> to vector<2x16xf32>
    %305 = vector.shape_cast %304 : vector<2x16xf32> to vector<2x16x1xf32>
    %306 = tpu.reciprocal %305 {approx = true} : vector<2x16x1xf32> -> vector<2x16x1xf32>
    %307 = vector.broadcast %306 : vector<2x16x1xf32> to vector<2x16x16xf32>
    %308 = arith.mulf %303, %307 : vector<2x16x16xf32>
    %309 = arith.truncf %308 : vector<2x16x16xf32> to vector<2x16x16xbf16>
    "tpu.trace_start"() <{level = 10 : i32, message = "bqk,bkd->bqd"}> : () -> ()
    %cst_158 = arith.constant dense<0.000000e+00> : vector<2x16x8xf32>
    %310 = tpu.matmul %309, %297, %cst_158 {dimension_numbers = #tpu.dot_dimension_numbers<[2], [1], [1], [2], [0, 0, 0, 1, 1, 2], [0], [0]>} : vector<2x16x16xbf16>, vector<2x16x8xbf16>, vector<2x16x8xf32> -> vector<2x16x8xf32>
    "tpu.trace_stop"() : () -> ()
    %311 = vector.shape_cast %310 : vector<2x16x8xf32> to vector<32x8xf32>
    %312 = arith.truncf %311 : vector<32x8xf32> to vector<32x8xbf16>
    %c1_159 = arith.constant 1 : index
    %c0_160 = arith.constant 0 : index
    %c0_161 = arith.constant 0 : index
    %c0_162 = arith.constant 0 : index
    %313 = vector.load %arg7[%c1_159, %c0_160, %c0_161, %c0_162] : memref<4x4x8x32xbf16, #tpu.memory_space<vmem>>, vector<1x1x8x32xbf16>
    %314 = vector.shape_cast %313 : vector<1x1x8x32xbf16> to vector<8x32xbf16>
    %cst_163 = arith.constant dense<0.000000e+00> : vector<32x32xf32>
    %315 = tpu.matmul %312, %314, %cst_163 {dimension_numbers = #tpu.dot_dimension_numbers<[1], [0], [0], [1], [0, 0, 1, 1], [], []>} : vector<32x8xbf16>, vector<8x32xbf16>, vector<32x32xf32> -> vector<32x32xf32>
    %316 = arith.addf %282, %315 : vector<32x32xf32>
    %c1_164 = arith.constant 1 : index
    %c1_165 = arith.constant 1 : index
    %c0_166 = arith.constant 0 : index
    %c0_167 = arith.constant 0 : index
    %317 = vector.load %arg4[%c1_164, %c1_165, %c0_166, %c0_167] : memref<4x4x32x8xbf16, #tpu.memory_space<vmem>>, vector<1x1x32x8xbf16>
    %318 = vector.shape_cast %317 : vector<1x1x32x8xbf16> to vector<32x8xbf16>
    %cst_168 = arith.constant dense<0.000000e+00> : vector<32x8xf32>
    %319 = tpu.matmul %276, %318, %cst_168 {dimension_numbers = #tpu.dot_dimension_numbers<[1], [0], [0], [1], [0, 0, 1, 1], [], []>} : vector<32x32xbf16>, vector<32x8xbf16>, vector<32x8xf32> -> vector<32x8xf32>
    %c1_169 = arith.constant 1 : index
    %c1_170 = arith.constant 1 : index
    %c0_171 = arith.constant 0 : index
    %c0_172 = arith.constant 0 : index
    %320 = vector.load %arg5[%c1_169, %c1_170, %c0_171, %c0_172] : memref<4x4x32x8xbf16, #tpu.memory_space<vmem>>, vector<1x1x32x8xbf16>
    %321 = vector.shape_cast %320 : vector<1x1x32x8xbf16> to vector<32x8xbf16>
    %cst_173 = arith.constant dense<0.000000e+00> : vector<32x8xf32>
    %322 = tpu.matmul %281, %321, %cst_173 {dimension_numbers = #tpu.dot_dimension_numbers<[1], [0], [0], [1], [0, 0, 1, 1], [], []>} : vector<32x32xbf16>, vector<32x8xbf16>, vector<32x8xf32> -> vector<32x8xf32>
    %c1_174 = arith.constant 1 : index
    %c1_175 = arith.constant 1 : index
    %c0_176 = arith.constant 0 : index
    %c0_177 = arith.constant 0 : index
    %323 = vector.load %arg6[%c1_174, %c1_175, %c0_176, %c0_177] : memref<4x4x32x8xbf16, #tpu.memory_space<vmem>>, vector<1x1x32x8xbf16>
    %324 = vector.shape_cast %323 : vector<1x1x32x8xbf16> to vector<32x8xbf16>
    %cst_178 = arith.constant dense<0.000000e+00> : vector<32x8xf32>
    %325 = tpu.matmul %281, %324, %cst_178 {dimension_numbers = #tpu.dot_dimension_numbers<[1], [0], [0], [1], [0, 0, 1, 1], [], []>} : vector<32x32xbf16>, vector<32x8xbf16>, vector<32x8xf32> -> vector<32x8xf32>
    %326 = vector.shape_cast %319 : vector<32x8xf32> to vector<2x16x8xf32>
    %327 = arith.truncf %326 : vector<2x16x8xf32> to vector<2x16x8xbf16>
    %328 = vector.shape_cast %322 : vector<32x8xf32> to vector<2x16x8xf32>
    %329 = arith.truncf %328 : vector<2x16x8xf32> to vector<2x16x8xbf16>
    %330 = vector.shape_cast %325 : vector<32x8xf32> to vector<2x16x8xf32>
    %331 = arith.truncf %330 : vector<2x16x8xf32> to vector<2x16x8xbf16>
    "tpu.trace_start"() <{level = 10 : i32, message = "bqd,bkd->bqk"}> : () -> ()
    %cst_179 = arith.constant dense<0.000000e+00> : vector<2x16x16xf32>
    %332 = tpu.matmul %327, %329, %cst_179 {dimension_numbers = #tpu.dot_dimension_numbers<[2], [2], [1], [1], [0, 0, 0, 1, 1, 1], [0], [0]>} : vector<2x16x8xbf16>, vector<2x16x8xbf16>, vector<2x16x16xf32> -> vector<2x16x16xf32>
    "tpu.trace_stop"() : () -> ()
    %cst_180 = arith.constant dense<0xFF800000> : vector<2x16xf32>
    %333 = vector.multi_reduction <maximumf>, %332, %cst_180 [2] : vector<2x16x16xf32> to vector<2x16xf32>
    %334 = vector.shape_cast %333 : vector<2x16xf32> to vector<2x16x1xf32>
    %335 = vector.broadcast %334 : vector<2x16x1xf32> to vector<2x16x16xf32>
    %336 = arith.subf %332, %335 : vector<2x16x16xf32>
    %337 = math.exp %336 : vector<2x16x16xf32>
    %cst_181 = arith.constant dense<0.000000e+00> : vector<2x16xf32>
    %338 = vector.multi_reduction <add>, %337, %cst_181 [2] : vector<2x16x16xf32> to vector<2x16xf32>
    %339 = vector.shape_cast %338 : vector<2x16xf32> to vector<2x16x1xf32>
    %340 = tpu.reciprocal %339 {approx = true} : vector<2x16x1xf32> -> vector<2x16x1xf32>
    %341 = vector.broadcast %340 : vector<2x16x1xf32> to vector<2x16x16xf32>
    %342 = arith.mulf %337, %341 : vector<2x16x16xf32>
    %343 = arith.truncf %342 : vector<2x16x16xf32> to vector<2x16x16xbf16>
    "tpu.trace_start"() <{level = 10 : i32, message = "bqk,bkd->bqd"}> : () -> ()
    %cst_182 = arith.constant dense<0.000000e+00> : vector<2x16x8xf32>
    %344 = tpu.matmul %343, %331, %cst_182 {dimension_numbers = #tpu.dot_dimension_numbers<[2], [1], [1], [2], [0, 0, 0, 1, 1, 2], [0], [0]>} : vector<2x16x16xbf16>, vector<2x16x8xbf16>, vector<2x16x8xf32> -> vector<2x16x8xf32>
    "tpu.trace_stop"() : () -> ()
    %345 = vector.shape_cast %344 : vector<2x16x8xf32> to vector<32x8xf32>
    %346 = arith.truncf %345 : vector<32x8xf32> to vector<32x8xbf16>
    %c1_183 = arith.constant 1 : index
    %c1_184 = arith.constant 1 : index
    %c0_185 = arith.constant 0 : index
    %c0_186 = arith.constant 0 : index
    %347 = vector.load %arg7[%c1_183, %c1_184, %c0_185, %c0_186] : memref<4x4x8x32xbf16, #tpu.memory_space<vmem>>, vector<1x1x8x32xbf16>
    %348 = vector.shape_cast %347 : vector<1x1x8x32xbf16> to vector<8x32xbf16>
    %cst_187 = arith.constant dense<0.000000e+00> : vector<32x32xf32>
    %349 = tpu.matmul %346, %348, %cst_187 {dimension_numbers = #tpu.dot_dimension_numbers<[1], [0], [0], [1], [0, 0, 1, 1], [], []>} : vector<32x8xbf16>, vector<8x32xbf16>, vector<32x32xf32> -> vector<32x32xf32>
    %350 = arith.addf %316, %349 : vector<32x32xf32>
    %c1_188 = arith.constant 1 : index
    %c2_189 = arith.constant 2 : index
    %c0_190 = arith.constant 0 : index
    %c0_191 = arith.constant 0 : index
    %351 = vector.load %arg4[%c1_188, %c2_189, %c0_190, %c0_191] : memref<4x4x32x8xbf16, #tpu.memory_space<vmem>>, vector<1x1x32x8xbf16>
    %352 = vector.shape_cast %351 : vector<1x1x32x8xbf16> to vector<32x8xbf16>
    %cst_192 = arith.constant dense<0.000000e+00> : vector<32x8xf32>
    %353 = tpu.matmul %276, %352, %cst_192 {dimension_numbers = #tpu.dot_dimension_numbers<[1], [0], [0], [1], [0, 0, 1, 1], [], []>} : vector<32x32xbf16>, vector<32x8xbf16>, vector<32x8xf32> -> vector<32x8xf32>
    %c1_193 = arith.constant 1 : index
    %c2_194 = arith.constant 2 : index
    %c0_195 = arith.constant 0 : index
    %c0_196 = arith.constant 0 : index
    %354 = vector.load %arg5[%c1_193, %c2_194, %c0_195, %c0_196] : memref<4x4x32x8xbf16, #tpu.memory_space<vmem>>, vector<1x1x32x8xbf16>
    %355 = vector.shape_cast %354 : vector<1x1x32x8xbf16> to vector<32x8xbf16>
    %cst_197 = arith.constant dense<0.000000e+00> : vector<32x8xf32>
    %356 = tpu.matmul %281, %355, %cst_197 {dimension_numbers = #tpu.dot_dimension_numbers<[1], [0], [0], [1], [0, 0, 1, 1], [], []>} : vector<32x32xbf16>, vector<32x8xbf16>, vector<32x8xf32> -> vector<32x8xf32>
    %c1_198 = arith.constant 1 : index
    %c2_199 = arith.constant 2 : index
    %c0_200 = arith.constant 0 : index
    %c0_201 = arith.constant 0 : index
    %357 = vector.load %arg6[%c1_198, %c2_199, %c0_200, %c0_201] : memref<4x4x32x8xbf16, #tpu.memory_space<vmem>>, vector<1x1x32x8xbf16>
    %358 = vector.shape_cast %357 : vector<1x1x32x8xbf16> to vector<32x8xbf16>
    %cst_202 = arith.constant dense<0.000000e+00> : vector<32x8xf32>
    %359 = tpu.matmul %281, %358, %cst_202 {dimension_numbers = #tpu.dot_dimension_numbers<[1], [0], [0], [1], [0, 0, 1, 1], [], []>} : vector<32x32xbf16>, vector<32x8xbf16>, vector<32x8xf32> -> vector<32x8xf32>
    %360 = vector.shape_cast %353 : vector<32x8xf32> to vector<2x16x8xf32>
    %361 = arith.truncf %360 : vector<2x16x8xf32> to vector<2x16x8xbf16>
    %362 = vector.shape_cast %356 : vector<32x8xf32> to vector<2x16x8xf32>
    %363 = arith.truncf %362 : vector<2x16x8xf32> to vector<2x16x8xbf16>
    %364 = vector.shape_cast %359 : vector<32x8xf32> to vector<2x16x8xf32>
    %365 = arith.truncf %364 : vector<2x16x8xf32> to vector<2x16x8xbf16>
    "tpu.trace_start"() <{level = 10 : i32, message = "bqd,bkd->bqk"}> : () -> ()
    %cst_203 = arith.constant dense<0.000000e+00> : vector<2x16x16xf32>
    %366 = tpu.matmul %361, %363, %cst_203 {dimension_numbers = #tpu.dot_dimension_numbers<[2], [2], [1], [1], [0, 0, 0, 1, 1, 1], [0], [0]>} : vector<2x16x8xbf16>, vector<2x16x8xbf16>, vector<2x16x16xf32> -> vector<2x16x16xf32>
    "tpu.trace_stop"() : () -> ()
    %cst_204 = arith.constant dense<0xFF800000> : vector<2x16xf32>
    %367 = vector.multi_reduction <maximumf>, %366, %cst_204 [2] : vector<2x16x16xf32> to vector<2x16xf32>
    %368 = vector.shape_cast %367 : vector<2x16xf32> to vector<2x16x1xf32>
    %369 = vector.broadcast %368 : vector<2x16x1xf32> to vector<2x16x16xf32>
    %370 = arith.subf %366, %369 : vector<2x16x16xf32>
    %371 = math.exp %370 : vector<2x16x16xf32>
    %cst_205 = arith.constant dense<0.000000e+00> : vector<2x16xf32>
    %372 = vector.multi_reduction <add>, %371, %cst_205 [2] : vector<2x16x16xf32> to vector<2x16xf32>
    %373 = vector.shape_cast %372 : vector<2x16xf32> to vector<2x16x1xf32>
    %374 = tpu.reciprocal %373 {approx = true} : vector<2x16x1xf32> -> vector<2x16x1xf32>
    %375 = vector.broadcast %374 : vector<2x16x1xf32> to vector<2x16x16xf32>
    %376 = arith.mulf %371, %375 : vector<2x16x16xf32>
    %377 = arith.truncf %376 : vector<2x16x16xf32> to vector<2x16x16xbf16>
    "tpu.trace_start"() <{level = 10 : i32, message = "bqk,bkd->bqd"}> : () -> ()
    %cst_206 = arith.constant dense<0.000000e+00> : vector<2x16x8xf32>
    %378 = tpu.matmul %377, %365, %cst_206 {dimension_numbers = #tpu.dot_dimension_numbers<[2], [1], [1], [2], [0, 0, 0, 1, 1, 2], [0], [0]>} : vector<2x16x16xbf16>, vector<2x16x8xbf16>, vector<2x16x8xf32> -> vector<2x16x8xf32>
    "tpu.trace_stop"() : () -> ()
    %379 = vector.shape_cast %378 : vector<2x16x8xf32> to vector<32x8xf32>
    %380 = arith.truncf %379 : vector<32x8xf32> to vector<32x8xbf16>
    %c1_207 = arith.constant 1 : index
    %c2_208 = arith.constant 2 : index
    %c0_209 = arith.constant 0 : index
    %c0_210 = arith.constant 0 : index
    %381 = vector.load %arg7[%c1_207, %c2_208, %c0_209, %c0_210] : memref<4x4x8x32xbf16, #tpu.memory_space<vmem>>, vector<1x1x8x32xbf16>
    %382 = vector.shape_cast %381 : vector<1x1x8x32xbf16> to vector<8x32xbf16>
    %cst_211 = arith.constant dense<0.000000e+00> : vector<32x32xf32>
    %383 = tpu.matmul %380, %382, %cst_211 {dimension_numbers = #tpu.dot_dimension_numbers<[1], [0], [0], [1], [0, 0, 1, 1], [], []>} : vector<32x8xbf16>, vector<8x32xbf16>, vector<32x32xf32> -> vector<32x32xf32>
    %384 = arith.addf %350, %383 : vector<32x32xf32>
    %c1_212 = arith.constant 1 : index
    %c3_213 = arith.constant 3 : index
    %c0_214 = arith.constant 0 : index
    %c0_215 = arith.constant 0 : index
    %385 = vector.load %arg4[%c1_212, %c3_213, %c0_214, %c0_215] : memref<4x4x32x8xbf16, #tpu.memory_space<vmem>>, vector<1x1x32x8xbf16>
    %386 = vector.shape_cast %385 : vector<1x1x32x8xbf16> to vector<32x8xbf16>
    %cst_216 = arith.constant dense<0.000000e+00> : vector<32x8xf32>
    %387 = tpu.matmul %276, %386, %cst_216 {dimension_numbers = #tpu.dot_dimension_numbers<[1], [0], [0], [1], [0, 0, 1, 1], [], []>} : vector<32x32xbf16>, vector<32x8xbf16>, vector<32x8xf32> -> vector<32x8xf32>
    %c1_217 = arith.constant 1 : index
    %c3_218 = arith.constant 3 : index
    %c0_219 = arith.constant 0 : index
    %c0_220 = arith.constant 0 : index
    %388 = vector.load %arg5[%c1_217, %c3_218, %c0_219, %c0_220] : memref<4x4x32x8xbf16, #tpu.memory_space<vmem>>, vector<1x1x32x8xbf16>
    %389 = vector.shape_cast %388 : vector<1x1x32x8xbf16> to vector<32x8xbf16>
    %cst_221 = arith.constant dense<0.000000e+00> : vector<32x8xf32>
    %390 = tpu.matmul %281, %389, %cst_221 {dimension_numbers = #tpu.dot_dimension_numbers<[1], [0], [0], [1], [0, 0, 1, 1], [], []>} : vector<32x32xbf16>, vector<32x8xbf16>, vector<32x8xf32> -> vector<32x8xf32>
    %c1_222 = arith.constant 1 : index
    %c3_223 = arith.constant 3 : index
    %c0_224 = arith.constant 0 : index
    %c0_225 = arith.constant 0 : index
    %391 = vector.load %arg6[%c1_222, %c3_223, %c0_224, %c0_225] : memref<4x4x32x8xbf16, #tpu.memory_space<vmem>>, vector<1x1x32x8xbf16>
    %392 = vector.shape_cast %391 : vector<1x1x32x8xbf16> to vector<32x8xbf16>
    %cst_226 = arith.constant dense<0.000000e+00> : vector<32x8xf32>
    %393 = tpu.matmul %281, %392, %cst_226 {dimension_numbers = #tpu.dot_dimension_numbers<[1], [0], [0], [1], [0, 0, 1, 1], [], []>} : vector<32x32xbf16>, vector<32x8xbf16>, vector<32x8xf32> -> vector<32x8xf32>
    %394 = vector.shape_cast %387 : vector<32x8xf32> to vector<2x16x8xf32>
    %395 = arith.truncf %394 : vector<2x16x8xf32> to vector<2x16x8xbf16>
    %396 = vector.shape_cast %390 : vector<32x8xf32> to vector<2x16x8xf32>
    %397 = arith.truncf %396 : vector<2x16x8xf32> to vector<2x16x8xbf16>
    %398 = vector.shape_cast %393 : vector<32x8xf32> to vector<2x16x8xf32>
    %399 = arith.truncf %398 : vector<2x16x8xf32> to vector<2x16x8xbf16>
    "tpu.trace_start"() <{level = 10 : i32, message = "bqd,bkd->bqk"}> : () -> ()
    %cst_227 = arith.constant dense<0.000000e+00> : vector<2x16x16xf32>
    %400 = tpu.matmul %395, %397, %cst_227 {dimension_numbers = #tpu.dot_dimension_numbers<[2], [2], [1], [1], [0, 0, 0, 1, 1, 1], [0], [0]>} : vector<2x16x8xbf16>, vector<2x16x8xbf16>, vector<2x16x16xf32> -> vector<2x16x16xf32>
    "tpu.trace_stop"() : () -> ()
    %cst_228 = arith.constant dense<0xFF800000> : vector<2x16xf32>
    %401 = vector.multi_reduction <maximumf>, %400, %cst_228 [2] : vector<2x16x16xf32> to vector<2x16xf32>
    %402 = vector.shape_cast %401 : vector<2x16xf32> to vector<2x16x1xf32>
    %403 = vector.broadcast %402 : vector<2x16x1xf32> to vector<2x16x16xf32>
    %404 = arith.subf %400, %403 : vector<2x16x16xf32>
    %405 = math.exp %404 : vector<2x16x16xf32>
    %cst_229 = arith.constant dense<0.000000e+00> : vector<2x16xf32>
    %406 = vector.multi_reduction <add>, %405, %cst_229 [2] : vector<2x16x16xf32> to vector<2x16xf32>
    %407 = vector.shape_cast %406 : vector<2x16xf32> to vector<2x16x1xf32>
    %408 = tpu.reciprocal %407 {approx = true} : vector<2x16x1xf32> -> vector<2x16x1xf32>
    %409 = vector.broadcast %408 : vector<2x16x1xf32> to vector<2x16x16xf32>
    %410 = arith.mulf %405, %409 : vector<2x16x16xf32>
    %411 = arith.truncf %410 : vector<2x16x16xf32> to vector<2x16x16xbf16>
    "tpu.trace_start"() <{level = 10 : i32, message = "bqk,bkd->bqd"}> : () -> ()
    %cst_230 = arith.constant dense<0.000000e+00> : vector<2x16x8xf32>
    %412 = tpu.matmul %411, %399, %cst_230 {dimension_numbers = #tpu.dot_dimension_numbers<[2], [1], [1], [2], [0, 0, 0, 1, 1, 2], [0], [0]>} : vector<2x16x16xbf16>, vector<2x16x8xbf16>, vector<2x16x8xf32> -> vector<2x16x8xf32>
    "tpu.trace_stop"() : () -> ()
    %413 = vector.shape_cast %412 : vector<2x16x8xf32> to vector<32x8xf32>
    %414 = arith.truncf %413 : vector<32x8xf32> to vector<32x8xbf16>
    %c1_231 = arith.constant 1 : index
    %c3_232 = arith.constant 3 : index
    %c0_233 = arith.constant 0 : index
    %c0_234 = arith.constant 0 : index
    %415 = vector.load %arg7[%c1_231, %c3_232, %c0_233, %c0_234] : memref<4x4x8x32xbf16, #tpu.memory_space<vmem>>, vector<1x1x8x32xbf16>
    %416 = vector.shape_cast %415 : vector<1x1x8x32xbf16> to vector<8x32xbf16>
    %cst_235 = arith.constant dense<0.000000e+00> : vector<32x32xf32>
    %417 = tpu.matmul %414, %416, %cst_235 {dimension_numbers = #tpu.dot_dimension_numbers<[1], [0], [0], [1], [0, 0, 1, 1], [], []>} : vector<32x8xbf16>, vector<8x32xbf16>, vector<32x32xf32> -> vector<32x32xf32>
    %418 = arith.addf %384, %417 : vector<32x32xf32>
    %419 = arith.addf %3, %418 : vector<32x32xf32>
    %420 = vector.broadcast %266 : vector<1x32xf32> to vector<32x32xf32>
    %421 = arith.addf %419, %420 : vector<32x32xf32>
    %cst_236 = arith.constant dense<0.000000e+00> : vector<32xf32>
    %422 = vector.multi_reduction <add>, %421, %cst_236 [1] : vector<32x32xf32> to vector<32xf32>
    %423 = vector.shape_cast %422 : vector<32xf32> to vector<32x1xf32>
    %cst_237 = arith.constant 3.200000e+01 : f32
    %424 = vector.broadcast %cst_237 : f32 to vector<32x1xf32>
    %425 = arith.divf %423, %424 : vector<32x1xf32>
    %426 = vector.broadcast %425 : vector<32x1xf32> to vector<32x32xf32>
    %427 = arith.subf %421, %426 : vector<32x32xf32>
    %428 = vector.broadcast %425 : vector<32x1xf32> to vector<32x32xf32>
    %429 = arith.subf %421, %428 : vector<32x32xf32>
    %430 = arith.mulf %427, %429 : vector<32x32xf32>
    %cst_238 = arith.constant dense<0.000000e+00> : vector<32xf32>
    %431 = vector.multi_reduction <add>, %430, %cst_238 [1] : vector<32x32xf32> to vector<32xf32>
    %432 = vector.shape_cast %431 : vector<32xf32> to vector<32x1xf32>
    %cst_239 = arith.constant 3.200000e+01 : f32
    %433 = vector.broadcast %cst_239 : f32 to vector<32x1xf32>
    %434 = arith.divf %432, %433 : vector<32x1xf32>
    %435 = vector.broadcast %425 : vector<32x1xf32> to vector<32x32xf32>
    %436 = arith.subf %421, %435 : vector<32x32xf32>
    %cst_240 = arith.constant 9.99999974E-6 : f32
    %437 = vector.broadcast %cst_240 : f32 to vector<32x1xf32>
    %438 = arith.addf %434, %437 : vector<32x1xf32>
    %439 = math.rsqrt %438 : vector<32x1xf32>
    %440 = vector.broadcast %439 : vector<32x1xf32> to vector<32x32xf32>
    %441 = arith.mulf %436, %440 : vector<32x32xf32>
    %442 = vector.broadcast %264 : vector<1x32xf32> to vector<32x32xf32>
    %443 = arith.mulf %441, %442 : vector<32x32xf32>
    %444 = vector.broadcast %265 : vector<1x32xf32> to vector<32x32xf32>
    %445 = arith.addf %443, %444 : vector<32x32xf32>
    %446 = arith.truncf %445 : vector<32x32xf32> to vector<32x32xbf16>
    %c1_241 = arith.constant 1 : index
    %c0_242 = arith.constant 0 : index
    %c0_243 = arith.constant 0 : index
    %447 = vector.load %arg8[%c1_241, %c0_242, %c0_243] : memref<4x32x32xbf16, #tpu.memory_space<vmem>>, vector<1x32x32xbf16>
    %448 = vector.shape_cast %447 : vector<1x32x32xbf16> to vector<32x32xbf16>
    %cst_244 = arith.constant dense<0.000000e+00> : vector<32x32xf32>
    %449 = tpu.matmul %446, %448, %cst_244 {dimension_numbers = #tpu.dot_dimension_numbers<[1], [0], [0], [1], [0, 0, 1, 1], [], []>} : vector<32x32xbf16>, vector<32x32xbf16>, vector<32x32xf32> -> vector<32x32xf32>
    %450 = vector.broadcast %269 : vector<1x32xf32> to vector<32x32xf32>
    %451 = arith.addf %449, %450 : vector<32x32xf32>
    %452 = arith.mulf %451, %451 : vector<32x32xf32>
    %453 = arith.mulf %451, %452 : vector<32x32xf32>
    %cst_245 = arith.constant 4.471500e-02 : f32
    %454 = vector.broadcast %cst_245 : f32 to vector<32x32xf32>
    %455 = arith.mulf %454, %453 : vector<32x32xf32>
    %456 = arith.addf %451, %455 : vector<32x32xf32>
    %cst_246 = arith.constant 0.797884583 : f32
    %457 = vector.broadcast %cst_246 : f32 to vector<32x32xf32>
    %458 = arith.mulf %457, %456 : vector<32x32xf32>
    %459 = math.tanh %458 : vector<32x32xf32>
    %cst_247 = arith.constant 1.000000e+00 : f32
    %460 = vector.broadcast %cst_247 : f32 to vector<32x32xf32>
    %461 = arith.addf %460, %459 : vector<32x32xf32>
    %cst_248 = arith.constant 5.000000e-01 : f32
    %462 = vector.broadcast %cst_248 : f32 to vector<32x32xf32>
    %463 = arith.mulf %462, %461 : vector<32x32xf32>
    %464 = arith.mulf %451, %463 : vector<32x32xf32>
    %465 = arith.truncf %464 : vector<32x32xf32> to vector<32x32xbf16>
    %c1_249 = arith.constant 1 : index
    %c0_250 = arith.constant 0 : index
    %c0_251 = arith.constant 0 : index
    %466 = vector.load %arg9[%c1_249, %c0_250, %c0_251] : memref<4x32x32xbf16, #tpu.memory_space<vmem>>, vector<1x32x32xbf16>
    %467 = vector.shape_cast %466 : vector<1x32x32xbf16> to vector<32x32xbf16>
    %cst_252 = arith.constant dense<0.000000e+00> : vector<32x32xf32>
    %468 = tpu.matmul %465, %467, %cst_252 {dimension_numbers = #tpu.dot_dimension_numbers<[1], [0], [0], [1], [0, 0, 1, 1], [], []>} : vector<32x32xbf16>, vector<32x32xbf16>, vector<32x32xf32> -> vector<32x32xf32>
    %469 = vector.broadcast %267 : vector<1x32xf32> to vector<32x32xf32>
    %470 = arith.addf %468, %469 : vector<32x32xf32>
    %471 = arith.addf %421, %470 : vector<32x32xf32>
    %cst_253 = arith.constant dense<0.000000e+00> : vector<32xf32>
    %472 = vector.multi_reduction <add>, %257, %cst_253 [1] : vector<32x32xf32> to vector<32xf32>
    %473 = vector.shape_cast %472 : vector<32xf32> to vector<32x1xf32>
    %cst_254 = arith.constant 3.200000e+01 : f32
    %474 = vector.broadcast %cst_254 : f32 to vector<32x1xf32>
    %475 = arith.divf %473, %474 : vector<32x1xf32>
    %476 = vector.broadcast %475 : vector<32x1xf32> to vector<32x32xf32>
    %477 = arith.subf %257, %476 : vector<32x32xf32>
    %478 = vector.broadcast %475 : vector<32x1xf32> to vector<32x32xf32>
    %479 = arith.subf %257, %478 : vector<32x32xf32>
    %480 = arith.mulf %477, %479 : vector<32x32xf32>
    %cst_255 = arith.constant dense<0.000000e+00> : vector<32xf32>
    %481 = vector.multi_reduction <add>, %480, %cst_255 [1] : vector<32x32xf32> to vector<32xf32>
    %482 = vector.shape_cast %481 : vector<32xf32> to vector<32x1xf32>
    %cst_256 = arith.constant 3.200000e+01 : f32
    %483 = vector.broadcast %cst_256 : f32 to vector<32x1xf32>
    %484 = arith.divf %482, %483 : vector<32x1xf32>
    %485 = vector.broadcast %475 : vector<32x1xf32> to vector<32x32xf32>
    %486 = arith.subf %257, %485 : vector<32x32xf32>
    %cst_257 = arith.constant 9.99999974E-6 : f32
    %487 = vector.broadcast %cst_257 : f32 to vector<32x1xf32>
    %488 = arith.addf %484, %487 : vector<32x1xf32>
    %489 = math.rsqrt %488 : vector<32x1xf32>
    %490 = vector.broadcast %489 : vector<32x1xf32> to vector<32x32xf32>
    %491 = arith.mulf %486, %490 : vector<32x32xf32>
    %cst_258 = arith.constant dense<0.000000e+00> : vector<32xf32>
    %492 = vector.multi_reduction <add>, %471, %cst_258 [1] : vector<32x32xf32> to vector<32xf32>
    %493 = vector.shape_cast %492 : vector<32xf32> to vector<32x1xf32>
    %cst_259 = arith.constant 3.200000e+01 : f32
    %494 = vector.broadcast %cst_259 : f32 to vector<32x1xf32>
    %495 = arith.divf %493, %494 : vector<32x1xf32>
    %496 = vector.broadcast %495 : vector<32x1xf32> to vector<32x32xf32>
    %497 = arith.subf %471, %496 : vector<32x32xf32>
    %498 = vector.broadcast %495 : vector<32x1xf32> to vector<32x32xf32>
    %499 = arith.subf %471, %498 : vector<32x32xf32>
    %500 = arith.mulf %497, %499 : vector<32x32xf32>
    %cst_260 = arith.constant dense<0.000000e+00> : vector<32xf32>
    %501 = vector.multi_reduction <add>, %500, %cst_260 [1] : vector<32x32xf32> to vector<32xf32>
    %502 = vector.shape_cast %501 : vector<32xf32> to vector<32x1xf32>
    %cst_261 = arith.constant 3.200000e+01 : f32
    %503 = vector.broadcast %cst_261 : f32 to vector<32x1xf32>
    %504 = arith.divf %502, %503 : vector<32x1xf32>
    %505 = vector.broadcast %495 : vector<32x1xf32> to vector<32x32xf32>
    %506 = arith.subf %471, %505 : vector<32x32xf32>
    %cst_262 = arith.constant 9.99999974E-6 : f32
    %507 = vector.broadcast %cst_262 : f32 to vector<32x1xf32>
    %508 = arith.addf %504, %507 : vector<32x1xf32>
    %509 = math.rsqrt %508 : vector<32x1xf32>
    %510 = vector.broadcast %509 : vector<32x1xf32> to vector<32x32xf32>
    %511 = arith.mulf %506, %510 : vector<32x32xf32>
    %c2_263 = arith.constant 2 : index
    %c0_264 = arith.constant 0 : index
    %c0_265 = arith.constant 0 : index
    %512 = vector.load %arg2[%c2_263, %c0_264, %c0_265] : memref<4x8x32xf32, #tpu.memory_space<vmem>>, vector<1x8x32xf32>
    %513 = vector.shape_cast %512 : vector<1x8x32xf32> to vector<8x32xf32>
    %514 = vector.extract_strided_slice %513 {offsets = [0, 0], sizes = [1, 32], strides = [1, 1]} : vector<8x32xf32> to vector<1x32xf32>
    %515 = vector.extract_strided_slice %513 {offsets = [1, 0], sizes = [1, 32], strides = [1, 1]} : vector<8x32xf32> to vector<1x32xf32>
    %516 = vector.extract_strided_slice %513 {offsets = [2, 0], sizes = [1, 32], strides = [1, 1]} : vector<8x32xf32> to vector<1x32xf32>
    %517 = vector.extract_strided_slice %513 {offsets = [3, 0], sizes = [1, 32], strides = [1, 1]} : vector<8x32xf32> to vector<1x32xf32>
    %518 = vector.extract_strided_slice %513 {offsets = [4, 0], sizes = [1, 32], strides = [1, 1]} : vector<8x32xf32> to vector<1x32xf32>
    %519 = vector.extract_strided_slice %513 {offsets = [5, 0], sizes = [1, 32], strides = [1, 1]} : vector<8x32xf32> to vector<1x32xf32>
    %520 = vector.extract_strided_slice %513 {offsets = [6, 0], sizes = [1, 32], strides = [1, 1]} : vector<8x32xf32> to vector<1x32xf32>
    %521 = vector.extract_strided_slice %513 {offsets = [7, 0], sizes = [1, 32], strides = [1, 1]} : vector<8x32xf32> to vector<1x32xf32>
    %c2_266 = arith.constant 2 : index
    %c0_267 = arith.constant 0 : index
    %c0_268 = arith.constant 0 : index
    %522 = vector.load %arg3[%c2_266, %c0_267, %c0_268] : memref<4x1x32xf32, #tpu.memory_space<vmem>>, vector<1x1x32xf32>
    %523 = vector.shape_cast %522 : vector<1x1x32xf32> to vector<1x32xf32>
    %524 = vector.broadcast %514 : vector<1x32xf32> to vector<32x32xf32>
    %525 = arith.mulf %491, %524 : vector<32x32xf32>
    %526 = vector.broadcast %515 : vector<1x32xf32> to vector<32x32xf32>
    %527 = arith.addf %525, %526 : vector<32x32xf32>
    %cst_269 = arith.constant 0.353553385 : f32
    %528 = vector.broadcast %cst_269 : f32 to vector<32x32xf32>
    %529 = arith.mulf %527, %528 : vector<32x32xf32>
    %530 = arith.truncf %529 : vector<32x32xf32> to vector<32x32xbf16>
    %531 = vector.broadcast %516 : vector<1x32xf32> to vector<32x32xf32>
    %532 = arith.mulf %511, %531 : vector<32x32xf32>
    %533 = vector.broadcast %517 : vector<1x32xf32> to vector<32x32xf32>
    %534 = arith.addf %532, %533 : vector<32x32xf32>
    %535 = arith.truncf %534 : vector<32x32xf32> to vector<32x32xbf16>
    %cst_270 = arith.constant 0.000000e+00 : f32
    %536 = vector.broadcast %cst_270 : f32 to vector<32x32xf32>
    %c2_271 = arith.constant 2 : index
    %c0_272 = arith.constant 0 : index
    %c0_273 = arith.constant 0 : index
    %c0_274 = arith.constant 0 : index
    %537 = vector.load %arg4[%c2_271, %c0_272, %c0_273, %c0_274] : memref<4x4x32x8xbf16, #tpu.memory_space<vmem>>, vector<1x1x32x8xbf16>
    %538 = vector.shape_cast %537 : vector<1x1x32x8xbf16> to vector<32x8xbf16>
    %cst_275 = arith.constant dense<0.000000e+00> : vector<32x8xf32>
    %539 = tpu.matmul %530, %538, %cst_275 {dimension_numbers = #tpu.dot_dimension_numbers<[1], [0], [0], [1], [0, 0, 1, 1], [], []>} : vector<32x32xbf16>, vector<32x8xbf16>, vector<32x8xf32> -> vector<32x8xf32>
    %c2_276 = arith.constant 2 : index
    %c0_277 = arith.constant 0 : index
    %c0_278 = arith.constant 0 : index
    %c0_279 = arith.constant 0 : index
    %540 = vector.load %arg5[%c2_276, %c0_277, %c0_278, %c0_279] : memref<4x4x32x8xbf16, #tpu.memory_space<vmem>>, vector<1x1x32x8xbf16>
    %541 = vector.shape_cast %540 : vector<1x1x32x8xbf16> to vector<32x8xbf16>
    %cst_280 = arith.constant dense<0.000000e+00> : vector<32x8xf32>
    %542 = tpu.matmul %535, %541, %cst_280 {dimension_numbers = #tpu.dot_dimension_numbers<[1], [0], [0], [1], [0, 0, 1, 1], [], []>} : vector<32x32xbf16>, vector<32x8xbf16>, vector<32x8xf32> -> vector<32x8xf32>
    %c2_281 = arith.constant 2 : index
    %c0_282 = arith.constant 0 : index
    %c0_283 = arith.constant 0 : index
    %c0_284 = arith.constant 0 : index
    %543 = vector.load %arg6[%c2_281, %c0_282, %c0_283, %c0_284] : memref<4x4x32x8xbf16, #tpu.memory_space<vmem>>, vector<1x1x32x8xbf16>
    %544 = vector.shape_cast %543 : vector<1x1x32x8xbf16> to vector<32x8xbf16>
    %cst_285 = arith.constant dense<0.000000e+00> : vector<32x8xf32>
    %545 = tpu.matmul %535, %544, %cst_285 {dimension_numbers = #tpu.dot_dimension_numbers<[1], [0], [0], [1], [0, 0, 1, 1], [], []>} : vector<32x32xbf16>, vector<32x8xbf16>, vector<32x8xf32> -> vector<32x8xf32>
    %546 = vector.shape_cast %539 : vector<32x8xf32> to vector<2x16x8xf32>
    %547 = arith.truncf %546 : vector<2x16x8xf32> to vector<2x16x8xbf16>
    %548 = vector.shape_cast %542 : vector<32x8xf32> to vector<2x16x8xf32>
    %549 = arith.truncf %548 : vector<2x16x8xf32> to vector<2x16x8xbf16>
    %550 = vector.shape_cast %545 : vector<32x8xf32> to vector<2x16x8xf32>
    %551 = arith.truncf %550 : vector<2x16x8xf32> to vector<2x16x8xbf16>
    "tpu.trace_start"() <{level = 10 : i32, message = "bqd,bkd->bqk"}> : () -> ()
    %cst_286 = arith.constant dense<0.000000e+00> : vector<2x16x16xf32>
    %552 = tpu.matmul %547, %549, %cst_286 {dimension_numbers = #tpu.dot_dimension_numbers<[2], [2], [1], [1], [0, 0, 0, 1, 1, 1], [0], [0]>} : vector<2x16x8xbf16>, vector<2x16x8xbf16>, vector<2x16x16xf32> -> vector<2x16x16xf32>
    "tpu.trace_stop"() : () -> ()
    %cst_287 = arith.constant dense<0xFF800000> : vector<2x16xf32>
    %553 = vector.multi_reduction <maximumf>, %552, %cst_287 [2] : vector<2x16x16xf32> to vector<2x16xf32>
    %554 = vector.shape_cast %553 : vector<2x16xf32> to vector<2x16x1xf32>
    %555 = vector.broadcast %554 : vector<2x16x1xf32> to vector<2x16x16xf32>
    %556 = arith.subf %552, %555 : vector<2x16x16xf32>
    %557 = math.exp %556 : vector<2x16x16xf32>
    %cst_288 = arith.constant dense<0.000000e+00> : vector<2x16xf32>
    %558 = vector.multi_reduction <add>, %557, %cst_288 [2] : vector<2x16x16xf32> to vector<2x16xf32>
    %559 = vector.shape_cast %558 : vector<2x16xf32> to vector<2x16x1xf32>
    %560 = tpu.reciprocal %559 {approx = true} : vector<2x16x1xf32> -> vector<2x16x1xf32>
    %561 = vector.broadcast %560 : vector<2x16x1xf32> to vector<2x16x16xf32>
    %562 = arith.mulf %557, %561 : vector<2x16x16xf32>
    %563 = arith.truncf %562 : vector<2x16x16xf32> to vector<2x16x16xbf16>
    "tpu.trace_start"() <{level = 10 : i32, message = "bqk,bkd->bqd"}> : () -> ()
    %cst_289 = arith.constant dense<0.000000e+00> : vector<2x16x8xf32>
    %564 = tpu.matmul %563, %551, %cst_289 {dimension_numbers = #tpu.dot_dimension_numbers<[2], [1], [1], [2], [0, 0, 0, 1, 1, 2], [0], [0]>} : vector<2x16x16xbf16>, vector<2x16x8xbf16>, vector<2x16x8xf32> -> vector<2x16x8xf32>
    "tpu.trace_stop"() : () -> ()
    %565 = vector.shape_cast %564 : vector<2x16x8xf32> to vector<32x8xf32>
    %566 = arith.truncf %565 : vector<32x8xf32> to vector<32x8xbf16>
    %c2_290 = arith.constant 2 : index
    %c0_291 = arith.constant 0 : index
    %c0_292 = arith.constant 0 : index
    %c0_293 = arith.constant 0 : index
    %567 = vector.load %arg7[%c2_290, %c0_291, %c0_292, %c0_293] : memref<4x4x8x32xbf16, #tpu.memory_space<vmem>>, vector<1x1x8x32xbf16>
    %568 = vector.shape_cast %567 : vector<1x1x8x32xbf16> to vector<8x32xbf16>
    %cst_294 = arith.constant dense<0.000000e+00> : vector<32x32xf32>
    %569 = tpu.matmul %566, %568, %cst_294 {dimension_numbers = #tpu.dot_dimension_numbers<[1], [0], [0], [1], [0, 0, 1, 1], [], []>} : vector<32x8xbf16>, vector<8x32xbf16>, vector<32x32xf32> -> vector<32x32xf32>
    %570 = arith.addf %536, %569 : vector<32x32xf32>
    %c2_295 = arith.constant 2 : index
    %c1_296 = arith.constant 1 : index
    %c0_297 = arith.constant 0 : index
    %c0_298 = arith.constant 0 : index
    %571 = vector.load %arg4[%c2_295, %c1_296, %c0_297, %c0_298] : memref<4x4x32x8xbf16, #tpu.memory_space<vmem>>, vector<1x1x32x8xbf16>
    %572 = vector.shape_cast %571 : vector<1x1x32x8xbf16> to vector<32x8xbf16>
    %cst_299 = arith.constant dense<0.000000e+00> : vector<32x8xf32>
    %573 = tpu.matmul %530, %572, %cst_299 {dimension_numbers = #tpu.dot_dimension_numbers<[1], [0], [0], [1], [0, 0, 1, 1], [], []>} : vector<32x32xbf16>, vector<32x8xbf16>, vector<32x8xf32> -> vector<32x8xf32>
    %c2_300 = arith.constant 2 : index
    %c1_301 = arith.constant 1 : index
    %c0_302 = arith.constant 0 : index
    %c0_303 = arith.constant 0 : index
    %574 = vector.load %arg5[%c2_300, %c1_301, %c0_302, %c0_303] : memref<4x4x32x8xbf16, #tpu.memory_space<vmem>>, vector<1x1x32x8xbf16>
    %575 = vector.shape_cast %574 : vector<1x1x32x8xbf16> to vector<32x8xbf16>
    %cst_304 = arith.constant dense<0.000000e+00> : vector<32x8xf32>
    %576 = tpu.matmul %535, %575, %cst_304 {dimension_numbers = #tpu.dot_dimension_numbers<[1], [0], [0], [1], [0, 0, 1, 1], [], []>} : vector<32x32xbf16>, vector<32x8xbf16>, vector<32x8xf32> -> vector<32x8xf32>
    %c2_305 = arith.constant 2 : index
    %c1_306 = arith.constant 1 : index
    %c0_307 = arith.constant 0 : index
    %c0_308 = arith.constant 0 : index
    %577 = vector.load %arg6[%c2_305, %c1_306, %c0_307, %c0_308] : memref<4x4x32x8xbf16, #tpu.memory_space<vmem>>, vector<1x1x32x8xbf16>
    %578 = vector.shape_cast %577 : vector<1x1x32x8xbf16> to vector<32x8xbf16>
    %cst_309 = arith.constant dense<0.000000e+00> : vector<32x8xf32>
    %579 = tpu.matmul %535, %578, %cst_309 {dimension_numbers = #tpu.dot_dimension_numbers<[1], [0], [0], [1], [0, 0, 1, 1], [], []>} : vector<32x32xbf16>, vector<32x8xbf16>, vector<32x8xf32> -> vector<32x8xf32>
    %580 = vector.shape_cast %573 : vector<32x8xf32> to vector<2x16x8xf32>
    %581 = arith.truncf %580 : vector<2x16x8xf32> to vector<2x16x8xbf16>
    %582 = vector.shape_cast %576 : vector<32x8xf32> to vector<2x16x8xf32>
    %583 = arith.truncf %582 : vector<2x16x8xf32> to vector<2x16x8xbf16>
    %584 = vector.shape_cast %579 : vector<32x8xf32> to vector<2x16x8xf32>
    %585 = arith.truncf %584 : vector<2x16x8xf32> to vector<2x16x8xbf16>
    "tpu.trace_start"() <{level = 10 : i32, message = "bqd,bkd->bqk"}> : () -> ()
    %cst_310 = arith.constant dense<0.000000e+00> : vector<2x16x16xf32>
    %586 = tpu.matmul %581, %583, %cst_310 {dimension_numbers = #tpu.dot_dimension_numbers<[2], [2], [1], [1], [0, 0, 0, 1, 1, 1], [0], [0]>} : vector<2x16x8xbf16>, vector<2x16x8xbf16>, vector<2x16x16xf32> -> vector<2x16x16xf32>
    "tpu.trace_stop"() : () -> ()
    %cst_311 = arith.constant dense<0xFF800000> : vector<2x16xf32>
    %587 = vector.multi_reduction <maximumf>, %586, %cst_311 [2] : vector<2x16x16xf32> to vector<2x16xf32>
    %588 = vector.shape_cast %587 : vector<2x16xf32> to vector<2x16x1xf32>
    %589 = vector.broadcast %588 : vector<2x16x1xf32> to vector<2x16x16xf32>
    %590 = arith.subf %586, %589 : vector<2x16x16xf32>
    %591 = math.exp %590 : vector<2x16x16xf32>
    %cst_312 = arith.constant dense<0.000000e+00> : vector<2x16xf32>
    %592 = vector.multi_reduction <add>, %591, %cst_312 [2] : vector<2x16x16xf32> to vector<2x16xf32>
    %593 = vector.shape_cast %592 : vector<2x16xf32> to vector<2x16x1xf32>
    %594 = tpu.reciprocal %593 {approx = true} : vector<2x16x1xf32> -> vector<2x16x1xf32>
    %595 = vector.broadcast %594 : vector<2x16x1xf32> to vector<2x16x16xf32>
    %596 = arith.mulf %591, %595 : vector<2x16x16xf32>
    %597 = arith.truncf %596 : vector<2x16x16xf32> to vector<2x16x16xbf16>
    "tpu.trace_start"() <{level = 10 : i32, message = "bqk,bkd->bqd"}> : () -> ()
    %cst_313 = arith.constant dense<0.000000e+00> : vector<2x16x8xf32>
    %598 = tpu.matmul %597, %585, %cst_313 {dimension_numbers = #tpu.dot_dimension_numbers<[2], [1], [1], [2], [0, 0, 0, 1, 1, 2], [0], [0]>} : vector<2x16x16xbf16>, vector<2x16x8xbf16>, vector<2x16x8xf32> -> vector<2x16x8xf32>
    "tpu.trace_stop"() : () -> ()
    %599 = vector.shape_cast %598 : vector<2x16x8xf32> to vector<32x8xf32>
    %600 = arith.truncf %599 : vector<32x8xf32> to vector<32x8xbf16>
    %c2_314 = arith.constant 2 : index
    %c1_315 = arith.constant 1 : index
    %c0_316 = arith.constant 0 : index
    %c0_317 = arith.constant 0 : index
    %601 = vector.load %arg7[%c2_314, %c1_315, %c0_316, %c0_317] : memref<4x4x8x32xbf16, #tpu.memory_space<vmem>>, vector<1x1x8x32xbf16>
    %602 = vector.shape_cast %601 : vector<1x1x8x32xbf16> to vector<8x32xbf16>
    %cst_318 = arith.constant dense<0.000000e+00> : vector<32x32xf32>
    %603 = tpu.matmul %600, %602, %cst_318 {dimension_numbers = #tpu.dot_dimension_numbers<[1], [0], [0], [1], [0, 0, 1, 1], [], []>} : vector<32x8xbf16>, vector<8x32xbf16>, vector<32x32xf32> -> vector<32x32xf32>
    %604 = arith.addf %570, %603 : vector<32x32xf32>
    %c2_319 = arith.constant 2 : index
    %c2_320 = arith.constant 2 : index
    %c0_321 = arith.constant 0 : index
    %c0_322 = arith.constant 0 : index
    %605 = vector.load %arg4[%c2_319, %c2_320, %c0_321, %c0_322] : memref<4x4x32x8xbf16, #tpu.memory_space<vmem>>, vector<1x1x32x8xbf16>
    %606 = vector.shape_cast %605 : vector<1x1x32x8xbf16> to vector<32x8xbf16>
    %cst_323 = arith.constant dense<0.000000e+00> : vector<32x8xf32>
    %607 = tpu.matmul %530, %606, %cst_323 {dimension_numbers = #tpu.dot_dimension_numbers<[1], [0], [0], [1], [0, 0, 1, 1], [], []>} : vector<32x32xbf16>, vector<32x8xbf16>, vector<32x8xf32> -> vector<32x8xf32>
    %c2_324 = arith.constant 2 : index
    %c2_325 = arith.constant 2 : index
    %c0_326 = arith.constant 0 : index
    %c0_327 = arith.constant 0 : index
    %608 = vector.load %arg5[%c2_324, %c2_325, %c0_326, %c0_327] : memref<4x4x32x8xbf16, #tpu.memory_space<vmem>>, vector<1x1x32x8xbf16>
    %609 = vector.shape_cast %608 : vector<1x1x32x8xbf16> to vector<32x8xbf16>
    %cst_328 = arith.constant dense<0.000000e+00> : vector<32x8xf32>
    %610 = tpu.matmul %535, %609, %cst_328 {dimension_numbers = #tpu.dot_dimension_numbers<[1], [0], [0], [1], [0, 0, 1, 1], [], []>} : vector<32x32xbf16>, vector<32x8xbf16>, vector<32x8xf32> -> vector<32x8xf32>
    %c2_329 = arith.constant 2 : index
    %c2_330 = arith.constant 2 : index
    %c0_331 = arith.constant 0 : index
    %c0_332 = arith.constant 0 : index
    %611 = vector.load %arg6[%c2_329, %c2_330, %c0_331, %c0_332] : memref<4x4x32x8xbf16, #tpu.memory_space<vmem>>, vector<1x1x32x8xbf16>
    %612 = vector.shape_cast %611 : vector<1x1x32x8xbf16> to vector<32x8xbf16>
    %cst_333 = arith.constant dense<0.000000e+00> : vector<32x8xf32>
    %613 = tpu.matmul %535, %612, %cst_333 {dimension_numbers = #tpu.dot_dimension_numbers<[1], [0], [0], [1], [0, 0, 1, 1], [], []>} : vector<32x32xbf16>, vector<32x8xbf16>, vector<32x8xf32> -> vector<32x8xf32>
    %614 = vector.shape_cast %607 : vector<32x8xf32> to vector<2x16x8xf32>
    %615 = arith.truncf %614 : vector<2x16x8xf32> to vector<2x16x8xbf16>
    %616 = vector.shape_cast %610 : vector<32x8xf32> to vector<2x16x8xf32>
    %617 = arith.truncf %616 : vector<2x16x8xf32> to vector<2x16x8xbf16>
    %618 = vector.shape_cast %613 : vector<32x8xf32> to vector<2x16x8xf32>
    %619 = arith.truncf %618 : vector<2x16x8xf32> to vector<2x16x8xbf16>
    "tpu.trace_start"() <{level = 10 : i32, message = "bqd,bkd->bqk"}> : () -> ()
    %cst_334 = arith.constant dense<0.000000e+00> : vector<2x16x16xf32>
    %620 = tpu.matmul %615, %617, %cst_334 {dimension_numbers = #tpu.dot_dimension_numbers<[2], [2], [1], [1], [0, 0, 0, 1, 1, 1], [0], [0]>} : vector<2x16x8xbf16>, vector<2x16x8xbf16>, vector<2x16x16xf32> -> vector<2x16x16xf32>
    "tpu.trace_stop"() : () -> ()
    %cst_335 = arith.constant dense<0xFF800000> : vector<2x16xf32>
    %621 = vector.multi_reduction <maximumf>, %620, %cst_335 [2] : vector<2x16x16xf32> to vector<2x16xf32>
    %622 = vector.shape_cast %621 : vector<2x16xf32> to vector<2x16x1xf32>
    %623 = vector.broadcast %622 : vector<2x16x1xf32> to vector<2x16x16xf32>
    %624 = arith.subf %620, %623 : vector<2x16x16xf32>
    %625 = math.exp %624 : vector<2x16x16xf32>
    %cst_336 = arith.constant dense<0.000000e+00> : vector<2x16xf32>
    %626 = vector.multi_reduction <add>, %625, %cst_336 [2] : vector<2x16x16xf32> to vector<2x16xf32>
    %627 = vector.shape_cast %626 : vector<2x16xf32> to vector<2x16x1xf32>
    %628 = tpu.reciprocal %627 {approx = true} : vector<2x16x1xf32> -> vector<2x16x1xf32>
    %629 = vector.broadcast %628 : vector<2x16x1xf32> to vector<2x16x16xf32>
    %630 = arith.mulf %625, %629 : vector<2x16x16xf32>
    %631 = arith.truncf %630 : vector<2x16x16xf32> to vector<2x16x16xbf16>
    "tpu.trace_start"() <{level = 10 : i32, message = "bqk,bkd->bqd"}> : () -> ()
    %cst_337 = arith.constant dense<0.000000e+00> : vector<2x16x8xf32>
    %632 = tpu.matmul %631, %619, %cst_337 {dimension_numbers = #tpu.dot_dimension_numbers<[2], [1], [1], [2], [0, 0, 0, 1, 1, 2], [0], [0]>} : vector<2x16x16xbf16>, vector<2x16x8xbf16>, vector<2x16x8xf32> -> vector<2x16x8xf32>
    "tpu.trace_stop"() : () -> ()
    %633 = vector.shape_cast %632 : vector<2x16x8xf32> to vector<32x8xf32>
    %634 = arith.truncf %633 : vector<32x8xf32> to vector<32x8xbf16>
    %c2_338 = arith.constant 2 : index
    %c2_339 = arith.constant 2 : index
    %c0_340 = arith.constant 0 : index
    %c0_341 = arith.constant 0 : index
    %635 = vector.load %arg7[%c2_338, %c2_339, %c0_340, %c0_341] : memref<4x4x8x32xbf16, #tpu.memory_space<vmem>>, vector<1x1x8x32xbf16>
    %636 = vector.shape_cast %635 : vector<1x1x8x32xbf16> to vector<8x32xbf16>
    %cst_342 = arith.constant dense<0.000000e+00> : vector<32x32xf32>
    %637 = tpu.matmul %634, %636, %cst_342 {dimension_numbers = #tpu.dot_dimension_numbers<[1], [0], [0], [1], [0, 0, 1, 1], [], []>} : vector<32x8xbf16>, vector<8x32xbf16>, vector<32x32xf32> -> vector<32x32xf32>
    %638 = arith.addf %604, %637 : vector<32x32xf32>
    %c2_343 = arith.constant 2 : index
    %c3_344 = arith.constant 3 : index
    %c0_345 = arith.constant 0 : index
    %c0_346 = arith.constant 0 : index
    %639 = vector.load %arg4[%c2_343, %c3_344, %c0_345, %c0_346] : memref<4x4x32x8xbf16, #tpu.memory_space<vmem>>, vector<1x1x32x8xbf16>
    %640 = vector.shape_cast %639 : vector<1x1x32x8xbf16> to vector<32x8xbf16>
    %cst_347 = arith.constant dense<0.000000e+00> : vector<32x8xf32>
    %641 = tpu.matmul %530, %640, %cst_347 {dimension_numbers = #tpu.dot_dimension_numbers<[1], [0], [0], [1], [0, 0, 1, 1], [], []>} : vector<32x32xbf16>, vector<32x8xbf16>, vector<32x8xf32> -> vector<32x8xf32>
    %c2_348 = arith.constant 2 : index
    %c3_349 = arith.constant 3 : index
    %c0_350 = arith.constant 0 : index
    %c0_351 = arith.constant 0 : index
    %642 = vector.load %arg5[%c2_348, %c3_349, %c0_350, %c0_351] : memref<4x4x32x8xbf16, #tpu.memory_space<vmem>>, vector<1x1x32x8xbf16>
    %643 = vector.shape_cast %642 : vector<1x1x32x8xbf16> to vector<32x8xbf16>
    %cst_352 = arith.constant dense<0.000000e+00> : vector<32x8xf32>
    %644 = tpu.matmul %535, %643, %cst_352 {dimension_numbers = #tpu.dot_dimension_numbers<[1], [0], [0], [1], [0, 0, 1, 1], [], []>} : vector<32x32xbf16>, vector<32x8xbf16>, vector<32x8xf32> -> vector<32x8xf32>
    %c2_353 = arith.constant 2 : index
    %c3_354 = arith.constant 3 : index
    %c0_355 = arith.constant 0 : index
    %c0_356 = arith.constant 0 : index
    %645 = vector.load %arg6[%c2_353, %c3_354, %c0_355, %c0_356] : memref<4x4x32x8xbf16, #tpu.memory_space<vmem>>, vector<1x1x32x8xbf16>
    %646 = vector.shape_cast %645 : vector<1x1x32x8xbf16> to vector<32x8xbf16>
    %cst_357 = arith.constant dense<0.000000e+00> : vector<32x8xf32>
    %647 = tpu.matmul %535, %646, %cst_357 {dimension_numbers = #tpu.dot_dimension_numbers<[1], [0], [0], [1], [0, 0, 1, 1], [], []>} : vector<32x32xbf16>, vector<32x8xbf16>, vector<32x8xf32> -> vector<32x8xf32>
    %648 = vector.shape_cast %641 : vector<32x8xf32> to vector<2x16x8xf32>
    %649 = arith.truncf %648 : vector<2x16x8xf32> to vector<2x16x8xbf16>
    %650 = vector.shape_cast %644 : vector<32x8xf32> to vector<2x16x8xf32>
    %651 = arith.truncf %650 : vector<2x16x8xf32> to vector<2x16x8xbf16>
    %652 = vector.shape_cast %647 : vector<32x8xf32> to vector<2x16x8xf32>
    %653 = arith.truncf %652 : vector<2x16x8xf32> to vector<2x16x8xbf16>
    "tpu.trace_start"() <{level = 10 : i32, message = "bqd,bkd->bqk"}> : () -> ()
    %cst_358 = arith.constant dense<0.000000e+00> : vector<2x16x16xf32>
    %654 = tpu.matmul %649, %651, %cst_358 {dimension_numbers = #tpu.dot_dimension_numbers<[2], [2], [1], [1], [0, 0, 0, 1, 1, 1], [0], [0]>} : vector<2x16x8xbf16>, vector<2x16x8xbf16>, vector<2x16x16xf32> -> vector<2x16x16xf32>
    "tpu.trace_stop"() : () -> ()
    %cst_359 = arith.constant dense<0xFF800000> : vector<2x16xf32>
    %655 = vector.multi_reduction <maximumf>, %654, %cst_359 [2] : vector<2x16x16xf32> to vector<2x16xf32>
    %656 = vector.shape_cast %655 : vector<2x16xf32> to vector<2x16x1xf32>
    %657 = vector.broadcast %656 : vector<2x16x1xf32> to vector<2x16x16xf32>
    %658 = arith.subf %654, %657 : vector<2x16x16xf32>
    %659 = math.exp %658 : vector<2x16x16xf32>
    %cst_360 = arith.constant dense<0.000000e+00> : vector<2x16xf32>
    %660 = vector.multi_reduction <add>, %659, %cst_360 [2] : vector<2x16x16xf32> to vector<2x16xf32>
    %661 = vector.shape_cast %660 : vector<2x16xf32> to vector<2x16x1xf32>
    %662 = tpu.reciprocal %661 {approx = true} : vector<2x16x1xf32> -> vector<2x16x1xf32>
    %663 = vector.broadcast %662 : vector<2x16x1xf32> to vector<2x16x16xf32>
    %664 = arith.mulf %659, %663 : vector<2x16x16xf32>
    %665 = arith.truncf %664 : vector<2x16x16xf32> to vector<2x16x16xbf16>
    "tpu.trace_start"() <{level = 10 : i32, message = "bqk,bkd->bqd"}> : () -> ()
    %cst_361 = arith.constant dense<0.000000e+00> : vector<2x16x8xf32>
    %666 = tpu.matmul %665, %653, %cst_361 {dimension_numbers = #tpu.dot_dimension_numbers<[2], [1], [1], [2], [0, 0, 0, 1, 1, 2], [0], [0]>} : vector<2x16x16xbf16>, vector<2x16x8xbf16>, vector<2x16x8xf32> -> vector<2x16x8xf32>
    "tpu.trace_stop"() : () -> ()
    %667 = vector.shape_cast %666 : vector<2x16x8xf32> to vector<32x8xf32>
    %668 = arith.truncf %667 : vector<32x8xf32> to vector<32x8xbf16>
    %c2_362 = arith.constant 2 : index
    %c3_363 = arith.constant 3 : index
    %c0_364 = arith.constant 0 : index
    %c0_365 = arith.constant 0 : index
    %669 = vector.load %arg7[%c2_362, %c3_363, %c0_364, %c0_365] : memref<4x4x8x32xbf16, #tpu.memory_space<vmem>>, vector<1x1x8x32xbf16>
    %670 = vector.shape_cast %669 : vector<1x1x8x32xbf16> to vector<8x32xbf16>
    %cst_366 = arith.constant dense<0.000000e+00> : vector<32x32xf32>
    %671 = tpu.matmul %668, %670, %cst_366 {dimension_numbers = #tpu.dot_dimension_numbers<[1], [0], [0], [1], [0, 0, 1, 1], [], []>} : vector<32x8xbf16>, vector<8x32xbf16>, vector<32x32xf32> -> vector<32x32xf32>
    %672 = arith.addf %638, %671 : vector<32x32xf32>
    %673 = arith.addf %257, %672 : vector<32x32xf32>
    %674 = vector.broadcast %520 : vector<1x32xf32> to vector<32x32xf32>
    %675 = arith.addf %673, %674 : vector<32x32xf32>
    %cst_367 = arith.constant dense<0.000000e+00> : vector<32xf32>
    %676 = vector.multi_reduction <add>, %675, %cst_367 [1] : vector<32x32xf32> to vector<32xf32>
    %677 = vector.shape_cast %676 : vector<32xf32> to vector<32x1xf32>
    %cst_368 = arith.constant 3.200000e+01 : f32
    %678 = vector.broadcast %cst_368 : f32 to vector<32x1xf32>
    %679 = arith.divf %677, %678 : vector<32x1xf32>
    %680 = vector.broadcast %679 : vector<32x1xf32> to vector<32x32xf32>
    %681 = arith.subf %675, %680 : vector<32x32xf32>
    %682 = vector.broadcast %679 : vector<32x1xf32> to vector<32x32xf32>
    %683 = arith.subf %675, %682 : vector<32x32xf32>
    %684 = arith.mulf %681, %683 : vector<32x32xf32>
    %cst_369 = arith.constant dense<0.000000e+00> : vector<32xf32>
    %685 = vector.multi_reduction <add>, %684, %cst_369 [1] : vector<32x32xf32> to vector<32xf32>
    %686 = vector.shape_cast %685 : vector<32xf32> to vector<32x1xf32>
    %cst_370 = arith.constant 3.200000e+01 : f32
    %687 = vector.broadcast %cst_370 : f32 to vector<32x1xf32>
    %688 = arith.divf %686, %687 : vector<32x1xf32>
    %689 = vector.broadcast %679 : vector<32x1xf32> to vector<32x32xf32>
    %690 = arith.subf %675, %689 : vector<32x32xf32>
    %cst_371 = arith.constant 9.99999974E-6 : f32
    %691 = vector.broadcast %cst_371 : f32 to vector<32x1xf32>
    %692 = arith.addf %688, %691 : vector<32x1xf32>
    %693 = math.rsqrt %692 : vector<32x1xf32>
    %694 = vector.broadcast %693 : vector<32x1xf32> to vector<32x32xf32>
    %695 = arith.mulf %690, %694 : vector<32x32xf32>
    %696 = vector.broadcast %518 : vector<1x32xf32> to vector<32x32xf32>
    %697 = arith.mulf %695, %696 : vector<32x32xf32>
    %698 = vector.broadcast %519 : vector<1x32xf32> to vector<32x32xf32>
    %699 = arith.addf %697, %698 : vector<32x32xf32>
    %700 = arith.truncf %699 : vector<32x32xf32> to vector<32x32xbf16>
    %c2_372 = arith.constant 2 : index
    %c0_373 = arith.constant 0 : index
    %c0_374 = arith.constant 0 : index
    %701 = vector.load %arg8[%c2_372, %c0_373, %c0_374] : memref<4x32x32xbf16, #tpu.memory_space<vmem>>, vector<1x32x32xbf16>
    %702 = vector.shape_cast %701 : vector<1x32x32xbf16> to vector<32x32xbf16>
    %cst_375 = arith.constant dense<0.000000e+00> : vector<32x32xf32>
    %703 = tpu.matmul %700, %702, %cst_375 {dimension_numbers = #tpu.dot_dimension_numbers<[1], [0], [0], [1], [0, 0, 1, 1], [], []>} : vector<32x32xbf16>, vector<32x32xbf16>, vector<32x32xf32> -> vector<32x32xf32>
    %704 = vector.broadcast %523 : vector<1x32xf32> to vector<32x32xf32>
    %705 = arith.addf %703, %704 : vector<32x32xf32>
    %706 = arith.mulf %705, %705 : vector<32x32xf32>
    %707 = arith.mulf %705, %706 : vector<32x32xf32>
    %cst_376 = arith.constant 4.471500e-02 : f32
    %708 = vector.broadcast %cst_376 : f32 to vector<32x32xf32>
    %709 = arith.mulf %708, %707 : vector<32x32xf32>
    %710 = arith.addf %705, %709 : vector<32x32xf32>
    %cst_377 = arith.constant 0.797884583 : f32
    %711 = vector.broadcast %cst_377 : f32 to vector<32x32xf32>
    %712 = arith.mulf %711, %710 : vector<32x32xf32>
    %713 = math.tanh %712 : vector<32x32xf32>
    %cst_378 = arith.constant 1.000000e+00 : f32
    %714 = vector.broadcast %cst_378 : f32 to vector<32x32xf32>
    %715 = arith.addf %714, %713 : vector<32x32xf32>
    %cst_379 = arith.constant 5.000000e-01 : f32
    %716 = vector.broadcast %cst_379 : f32 to vector<32x32xf32>
    %717 = arith.mulf %716, %715 : vector<32x32xf32>
    %718 = arith.mulf %705, %717 : vector<32x32xf32>
    %719 = arith.truncf %718 : vector<32x32xf32> to vector<32x32xbf16>
    %c2_380 = arith.constant 2 : index
    %c0_381 = arith.constant 0 : index
    %c0_382 = arith.constant 0 : index
    %720 = vector.load %arg9[%c2_380, %c0_381, %c0_382] : memref<4x32x32xbf16, #tpu.memory_space<vmem>>, vector<1x32x32xbf16>
    %721 = vector.shape_cast %720 : vector<1x32x32xbf16> to vector<32x32xbf16>
    %cst_383 = arith.constant dense<0.000000e+00> : vector<32x32xf32>
    %722 = tpu.matmul %719, %721, %cst_383 {dimension_numbers = #tpu.dot_dimension_numbers<[1], [0], [0], [1], [0, 0, 1, 1], [], []>} : vector<32x32xbf16>, vector<32x32xbf16>, vector<32x32xf32> -> vector<32x32xf32>
    %723 = vector.broadcast %521 : vector<1x32xf32> to vector<32x32xf32>
    %724 = arith.addf %722, %723 : vector<32x32xf32>
    %725 = arith.addf %675, %724 : vector<32x32xf32>
    %c3_384 = arith.constant 3 : index
    %c0_385 = arith.constant 0 : index
    %c0_386 = arith.constant 0 : index
    %726 = vector.load %arg2[%c3_384, %c0_385, %c0_386] : memref<4x8x32xf32, #tpu.memory_space<vmem>>, vector<1x8x32xf32>
    %727 = vector.shape_cast %726 : vector<1x8x32xf32> to vector<8x32xf32>
    %728 = vector.extract_strided_slice %727 {offsets = [0, 0], sizes = [1, 32], strides = [1, 1]} : vector<8x32xf32> to vector<1x32xf32>
    %729 = vector.extract_strided_slice %727 {offsets = [1, 0], sizes = [1, 32], strides = [1, 1]} : vector<8x32xf32> to vector<1x32xf32>
    %730 = vector.extract_strided_slice %727 {offsets = [2, 0], sizes = [1, 32], strides = [1, 1]} : vector<8x32xf32> to vector<1x32xf32>
    %731 = vector.extract_strided_slice %727 {offsets = [3, 0], sizes = [1, 32], strides = [1, 1]} : vector<8x32xf32> to vector<1x32xf32>
    %732 = vector.extract_strided_slice %727 {offsets = [4, 0], sizes = [1, 32], strides = [1, 1]} : vector<8x32xf32> to vector<1x32xf32>
    %733 = vector.extract_strided_slice %727 {offsets = [5, 0], sizes = [1, 32], strides = [1, 1]} : vector<8x32xf32> to vector<1x32xf32>
    %734 = vector.extract_strided_slice %727 {offsets = [6, 0], sizes = [1, 32], strides = [1, 1]} : vector<8x32xf32> to vector<1x32xf32>
    %735 = vector.extract_strided_slice %727 {offsets = [7, 0], sizes = [1, 32], strides = [1, 1]} : vector<8x32xf32> to vector<1x32xf32>
    %c3_387 = arith.constant 3 : index
    %c0_388 = arith.constant 0 : index
    %c0_389 = arith.constant 0 : index
    %736 = vector.load %arg3[%c3_387, %c0_388, %c0_389] : memref<4x1x32xf32, #tpu.memory_space<vmem>>, vector<1x1x32xf32>
    %737 = vector.shape_cast %736 : vector<1x1x32xf32> to vector<1x32xf32>
    %738 = vector.broadcast %728 : vector<1x32xf32> to vector<32x32xf32>
    %739 = arith.mulf %511, %738 : vector<32x32xf32>
    %740 = vector.broadcast %729 : vector<1x32xf32> to vector<32x32xf32>
    %741 = arith.addf %739, %740 : vector<32x32xf32>
    %cst_390 = arith.constant 0.353553385 : f32
    %742 = vector.broadcast %cst_390 : f32 to vector<32x32xf32>
    %743 = arith.mulf %741, %742 : vector<32x32xf32>
    %744 = arith.truncf %743 : vector<32x32xf32> to vector<32x32xbf16>
    %745 = vector.broadcast %730 : vector<1x32xf32> to vector<32x32xf32>
    %746 = arith.mulf %491, %745 : vector<32x32xf32>
    %747 = vector.broadcast %731 : vector<1x32xf32> to vector<32x32xf32>
    %748 = arith.addf %746, %747 : vector<32x32xf32>
    %749 = arith.truncf %748 : vector<32x32xf32> to vector<32x32xbf16>
    %cst_391 = arith.constant 0.000000e+00 : f32
    %750 = vector.broadcast %cst_391 : f32 to vector<32x32xf32>
    %c3_392 = arith.constant 3 : index
    %c0_393 = arith.constant 0 : index
    %c0_394 = arith.constant 0 : index
    %c0_395 = arith.constant 0 : index
    %751 = vector.load %arg4[%c3_392, %c0_393, %c0_394, %c0_395] : memref<4x4x32x8xbf16, #tpu.memory_space<vmem>>, vector<1x1x32x8xbf16>
    %752 = vector.shape_cast %751 : vector<1x1x32x8xbf16> to vector<32x8xbf16>
    %cst_396 = arith.constant dense<0.000000e+00> : vector<32x8xf32>
    %753 = tpu.matmul %744, %752, %cst_396 {dimension_numbers = #tpu.dot_dimension_numbers<[1], [0], [0], [1], [0, 0, 1, 1], [], []>} : vector<32x32xbf16>, vector<32x8xbf16>, vector<32x8xf32> -> vector<32x8xf32>
    %c3_397 = arith.constant 3 : index
    %c0_398 = arith.constant 0 : index
    %c0_399 = arith.constant 0 : index
    %c0_400 = arith.constant 0 : index
    %754 = vector.load %arg5[%c3_397, %c0_398, %c0_399, %c0_400] : memref<4x4x32x8xbf16, #tpu.memory_space<vmem>>, vector<1x1x32x8xbf16>
    %755 = vector.shape_cast %754 : vector<1x1x32x8xbf16> to vector<32x8xbf16>
    %cst_401 = arith.constant dense<0.000000e+00> : vector<32x8xf32>
    %756 = tpu.matmul %749, %755, %cst_401 {dimension_numbers = #tpu.dot_dimension_numbers<[1], [0], [0], [1], [0, 0, 1, 1], [], []>} : vector<32x32xbf16>, vector<32x8xbf16>, vector<32x8xf32> -> vector<32x8xf32>
    %c3_402 = arith.constant 3 : index
    %c0_403 = arith.constant 0 : index
    %c0_404 = arith.constant 0 : index
    %c0_405 = arith.constant 0 : index
    %757 = vector.load %arg6[%c3_402, %c0_403, %c0_404, %c0_405] : memref<4x4x32x8xbf16, #tpu.memory_space<vmem>>, vector<1x1x32x8xbf16>
    %758 = vector.shape_cast %757 : vector<1x1x32x8xbf16> to vector<32x8xbf16>
    %cst_406 = arith.constant dense<0.000000e+00> : vector<32x8xf32>
    %759 = tpu.matmul %749, %758, %cst_406 {dimension_numbers = #tpu.dot_dimension_numbers<[1], [0], [0], [1], [0, 0, 1, 1], [], []>} : vector<32x32xbf16>, vector<32x8xbf16>, vector<32x8xf32> -> vector<32x8xf32>
    %760 = vector.shape_cast %753 : vector<32x8xf32> to vector<2x16x8xf32>
    %761 = arith.truncf %760 : vector<2x16x8xf32> to vector<2x16x8xbf16>
    %762 = vector.shape_cast %756 : vector<32x8xf32> to vector<2x16x8xf32>
    %763 = arith.truncf %762 : vector<2x16x8xf32> to vector<2x16x8xbf16>
    %764 = vector.shape_cast %759 : vector<32x8xf32> to vector<2x16x8xf32>
    %765 = arith.truncf %764 : vector<2x16x8xf32> to vector<2x16x8xbf16>
    "tpu.trace_start"() <{level = 10 : i32, message = "bqd,bkd->bqk"}> : () -> ()
    %cst_407 = arith.constant dense<0.000000e+00> : vector<2x16x16xf32>
    %766 = tpu.matmul %761, %763, %cst_407 {dimension_numbers = #tpu.dot_dimension_numbers<[2], [2], [1], [1], [0, 0, 0, 1, 1, 1], [0], [0]>} : vector<2x16x8xbf16>, vector<2x16x8xbf16>, vector<2x16x16xf32> -> vector<2x16x16xf32>
    "tpu.trace_stop"() : () -> ()
    %cst_408 = arith.constant dense<0xFF800000> : vector<2x16xf32>
    %767 = vector.multi_reduction <maximumf>, %766, %cst_408 [2] : vector<2x16x16xf32> to vector<2x16xf32>
    %768 = vector.shape_cast %767 : vector<2x16xf32> to vector<2x16x1xf32>
    %769 = vector.broadcast %768 : vector<2x16x1xf32> to vector<2x16x16xf32>
    %770 = arith.subf %766, %769 : vector<2x16x16xf32>
    %771 = math.exp %770 : vector<2x16x16xf32>
    %cst_409 = arith.constant dense<0.000000e+00> : vector<2x16xf32>
    %772 = vector.multi_reduction <add>, %771, %cst_409 [2] : vector<2x16x16xf32> to vector<2x16xf32>
    %773 = vector.shape_cast %772 : vector<2x16xf32> to vector<2x16x1xf32>
    %774 = tpu.reciprocal %773 {approx = true} : vector<2x16x1xf32> -> vector<2x16x1xf32>
    %775 = vector.broadcast %774 : vector<2x16x1xf32> to vector<2x16x16xf32>
    %776 = arith.mulf %771, %775 : vector<2x16x16xf32>
    %777 = arith.truncf %776 : vector<2x16x16xf32> to vector<2x16x16xbf16>
    "tpu.trace_start"() <{level = 10 : i32, message = "bqk,bkd->bqd"}> : () -> ()
    %cst_410 = arith.constant dense<0.000000e+00> : vector<2x16x8xf32>
    %778 = tpu.matmul %777, %765, %cst_410 {dimension_numbers = #tpu.dot_dimension_numbers<[2], [1], [1], [2], [0, 0, 0, 1, 1, 2], [0], [0]>} : vector<2x16x16xbf16>, vector<2x16x8xbf16>, vector<2x16x8xf32> -> vector<2x16x8xf32>
    "tpu.trace_stop"() : () -> ()
    %779 = vector.shape_cast %778 : vector<2x16x8xf32> to vector<32x8xf32>
    %780 = arith.truncf %779 : vector<32x8xf32> to vector<32x8xbf16>
    %c3_411 = arith.constant 3 : index
    %c0_412 = arith.constant 0 : index
    %c0_413 = arith.constant 0 : index
    %c0_414 = arith.constant 0 : index
    %781 = vector.load %arg7[%c3_411, %c0_412, %c0_413, %c0_414] : memref<4x4x8x32xbf16, #tpu.memory_space<vmem>>, vector<1x1x8x32xbf16>
    %782 = vector.shape_cast %781 : vector<1x1x8x32xbf16> to vector<8x32xbf16>
    %cst_415 = arith.constant dense<0.000000e+00> : vector<32x32xf32>
    %783 = tpu.matmul %780, %782, %cst_415 {dimension_numbers = #tpu.dot_dimension_numbers<[1], [0], [0], [1], [0, 0, 1, 1], [], []>} : vector<32x8xbf16>, vector<8x32xbf16>, vector<32x32xf32> -> vector<32x32xf32>
    %784 = arith.addf %750, %783 : vector<32x32xf32>
    %c3_416 = arith.constant 3 : index
    %c1_417 = arith.constant 1 : index
    %c0_418 = arith.constant 0 : index
    %c0_419 = arith.constant 0 : index
    %785 = vector.load %arg4[%c3_416, %c1_417, %c0_418, %c0_419] : memref<4x4x32x8xbf16, #tpu.memory_space<vmem>>, vector<1x1x32x8xbf16>
    %786 = vector.shape_cast %785 : vector<1x1x32x8xbf16> to vector<32x8xbf16>
    %cst_420 = arith.constant dense<0.000000e+00> : vector<32x8xf32>
    %787 = tpu.matmul %744, %786, %cst_420 {dimension_numbers = #tpu.dot_dimension_numbers<[1], [0], [0], [1], [0, 0, 1, 1], [], []>} : vector<32x32xbf16>, vector<32x8xbf16>, vector<32x8xf32> -> vector<32x8xf32>
    %c3_421 = arith.constant 3 : index
    %c1_422 = arith.constant 1 : index
    %c0_423 = arith.constant 0 : index
    %c0_424 = arith.constant 0 : index
    %788 = vector.load %arg5[%c3_421, %c1_422, %c0_423, %c0_424] : memref<4x4x32x8xbf16, #tpu.memory_space<vmem>>, vector<1x1x32x8xbf16>
    %789 = vector.shape_cast %788 : vector<1x1x32x8xbf16> to vector<32x8xbf16>
    %cst_425 = arith.constant dense<0.000000e+00> : vector<32x8xf32>
    %790 = tpu.matmul %749, %789, %cst_425 {dimension_numbers = #tpu.dot_dimension_numbers<[1], [0], [0], [1], [0, 0, 1, 1], [], []>} : vector<32x32xbf16>, vector<32x8xbf16>, vector<32x8xf32> -> vector<32x8xf32>
    %c3_426 = arith.constant 3 : index
    %c1_427 = arith.constant 1 : index
    %c0_428 = arith.constant 0 : index
    %c0_429 = arith.constant 0 : index
    %791 = vector.load %arg6[%c3_426, %c1_427, %c0_428, %c0_429] : memref<4x4x32x8xbf16, #tpu.memory_space<vmem>>, vector<1x1x32x8xbf16>
    %792 = vector.shape_cast %791 : vector<1x1x32x8xbf16> to vector<32x8xbf16>
    %cst_430 = arith.constant dense<0.000000e+00> : vector<32x8xf32>
    %793 = tpu.matmul %749, %792, %cst_430 {dimension_numbers = #tpu.dot_dimension_numbers<[1], [0], [0], [1], [0, 0, 1, 1], [], []>} : vector<32x32xbf16>, vector<32x8xbf16>, vector<32x8xf32> -> vector<32x8xf32>
    %794 = vector.shape_cast %787 : vector<32x8xf32> to vector<2x16x8xf32>
    %795 = arith.truncf %794 : vector<2x16x8xf32> to vector<2x16x8xbf16>
    %796 = vector.shape_cast %790 : vector<32x8xf32> to vector<2x16x8xf32>
    %797 = arith.truncf %796 : vector<2x16x8xf32> to vector<2x16x8xbf16>
    %798 = vector.shape_cast %793 : vector<32x8xf32> to vector<2x16x8xf32>
    %799 = arith.truncf %798 : vector<2x16x8xf32> to vector<2x16x8xbf16>
    "tpu.trace_start"() <{level = 10 : i32, message = "bqd,bkd->bqk"}> : () -> ()
    %cst_431 = arith.constant dense<0.000000e+00> : vector<2x16x16xf32>
    %800 = tpu.matmul %795, %797, %cst_431 {dimension_numbers = #tpu.dot_dimension_numbers<[2], [2], [1], [1], [0, 0, 0, 1, 1, 1], [0], [0]>} : vector<2x16x8xbf16>, vector<2x16x8xbf16>, vector<2x16x16xf32> -> vector<2x16x16xf32>
    "tpu.trace_stop"() : () -> ()
    %cst_432 = arith.constant dense<0xFF800000> : vector<2x16xf32>
    %801 = vector.multi_reduction <maximumf>, %800, %cst_432 [2] : vector<2x16x16xf32> to vector<2x16xf32>
    %802 = vector.shape_cast %801 : vector<2x16xf32> to vector<2x16x1xf32>
    %803 = vector.broadcast %802 : vector<2x16x1xf32> to vector<2x16x16xf32>
    %804 = arith.subf %800, %803 : vector<2x16x16xf32>
    %805 = math.exp %804 : vector<2x16x16xf32>
    %cst_433 = arith.constant dense<0.000000e+00> : vector<2x16xf32>
    %806 = vector.multi_reduction <add>, %805, %cst_433 [2] : vector<2x16x16xf32> to vector<2x16xf32>
    %807 = vector.shape_cast %806 : vector<2x16xf32> to vector<2x16x1xf32>
    %808 = tpu.reciprocal %807 {approx = true} : vector<2x16x1xf32> -> vector<2x16x1xf32>
    %809 = vector.broadcast %808 : vector<2x16x1xf32> to vector<2x16x16xf32>
    %810 = arith.mulf %805, %809 : vector<2x16x16xf32>
    %811 = arith.truncf %810 : vector<2x16x16xf32> to vector<2x16x16xbf16>
    "tpu.trace_start"() <{level = 10 : i32, message = "bqk,bkd->bqd"}> : () -> ()
    %cst_434 = arith.constant dense<0.000000e+00> : vector<2x16x8xf32>
    %812 = tpu.matmul %811, %799, %cst_434 {dimension_numbers = #tpu.dot_dimension_numbers<[2], [1], [1], [2], [0, 0, 0, 1, 1, 2], [0], [0]>} : vector<2x16x16xbf16>, vector<2x16x8xbf16>, vector<2x16x8xf32> -> vector<2x16x8xf32>
    "tpu.trace_stop"() : () -> ()
    %813 = vector.shape_cast %812 : vector<2x16x8xf32> to vector<32x8xf32>
    %814 = arith.truncf %813 : vector<32x8xf32> to vector<32x8xbf16>
    %c3_435 = arith.constant 3 : index
    %c1_436 = arith.constant 1 : index
    %c0_437 = arith.constant 0 : index
    %c0_438 = arith.constant 0 : index
    %815 = vector.load %arg7[%c3_435, %c1_436, %c0_437, %c0_438] : memref<4x4x8x32xbf16, #tpu.memory_space<vmem>>, vector<1x1x8x32xbf16>
    %816 = vector.shape_cast %815 : vector<1x1x8x32xbf16> to vector<8x32xbf16>
    %cst_439 = arith.constant dense<0.000000e+00> : vector<32x32xf32>
    %817 = tpu.matmul %814, %816, %cst_439 {dimension_numbers = #tpu.dot_dimension_numbers<[1], [0], [0], [1], [0, 0, 1, 1], [], []>} : vector<32x8xbf16>, vector<8x32xbf16>, vector<32x32xf32> -> vector<32x32xf32>
    %818 = arith.addf %784, %817 : vector<32x32xf32>
    %c3_440 = arith.constant 3 : index
    %c2_441 = arith.constant 2 : index
    %c0_442 = arith.constant 0 : index
    %c0_443 = arith.constant 0 : index
    %819 = vector.load %arg4[%c3_440, %c2_441, %c0_442, %c0_443] : memref<4x4x32x8xbf16, #tpu.memory_space<vmem>>, vector<1x1x32x8xbf16>
    %820 = vector.shape_cast %819 : vector<1x1x32x8xbf16> to vector<32x8xbf16>
    %cst_444 = arith.constant dense<0.000000e+00> : vector<32x8xf32>
    %821 = tpu.matmul %744, %820, %cst_444 {dimension_numbers = #tpu.dot_dimension_numbers<[1], [0], [0], [1], [0, 0, 1, 1], [], []>} : vector<32x32xbf16>, vector<32x8xbf16>, vector<32x8xf32> -> vector<32x8xf32>
    %c3_445 = arith.constant 3 : index
    %c2_446 = arith.constant 2 : index
    %c0_447 = arith.constant 0 : index
    %c0_448 = arith.constant 0 : index
    %822 = vector.load %arg5[%c3_445, %c2_446, %c0_447, %c0_448] : memref<4x4x32x8xbf16, #tpu.memory_space<vmem>>, vector<1x1x32x8xbf16>
    %823 = vector.shape_cast %822 : vector<1x1x32x8xbf16> to vector<32x8xbf16>
    %cst_449 = arith.constant dense<0.000000e+00> : vector<32x8xf32>
    %824 = tpu.matmul %749, %823, %cst_449 {dimension_numbers = #tpu.dot_dimension_numbers<[1], [0], [0], [1], [0, 0, 1, 1], [], []>} : vector<32x32xbf16>, vector<32x8xbf16>, vector<32x8xf32> -> vector<32x8xf32>
    %c3_450 = arith.constant 3 : index
    %c2_451 = arith.constant 2 : index
    %c0_452 = arith.constant 0 : index
    %c0_453 = arith.constant 0 : index
    %825 = vector.load %arg6[%c3_450, %c2_451, %c0_452, %c0_453] : memref<4x4x32x8xbf16, #tpu.memory_space<vmem>>, vector<1x1x32x8xbf16>
    %826 = vector.shape_cast %825 : vector<1x1x32x8xbf16> to vector<32x8xbf16>
    %cst_454 = arith.constant dense<0.000000e+00> : vector<32x8xf32>
    %827 = tpu.matmul %749, %826, %cst_454 {dimension_numbers = #tpu.dot_dimension_numbers<[1], [0], [0], [1], [0, 0, 1, 1], [], []>} : vector<32x32xbf16>, vector<32x8xbf16>, vector<32x8xf32> -> vector<32x8xf32>
    %828 = vector.shape_cast %821 : vector<32x8xf32> to vector<2x16x8xf32>
    %829 = arith.truncf %828 : vector<2x16x8xf32> to vector<2x16x8xbf16>
    %830 = vector.shape_cast %824 : vector<32x8xf32> to vector<2x16x8xf32>
    %831 = arith.truncf %830 : vector<2x16x8xf32> to vector<2x16x8xbf16>
    %832 = vector.shape_cast %827 : vector<32x8xf32> to vector<2x16x8xf32>
    %833 = arith.truncf %832 : vector<2x16x8xf32> to vector<2x16x8xbf16>
    "tpu.trace_start"() <{level = 10 : i32, message = "bqd,bkd->bqk"}> : () -> ()
    %cst_455 = arith.constant dense<0.000000e+00> : vector<2x16x16xf32>
    %834 = tpu.matmul %829, %831, %cst_455 {dimension_numbers = #tpu.dot_dimension_numbers<[2], [2], [1], [1], [0, 0, 0, 1, 1, 1], [0], [0]>} : vector<2x16x8xbf16>, vector<2x16x8xbf16>, vector<2x16x16xf32> -> vector<2x16x16xf32>
    "tpu.trace_stop"() : () -> ()
    %cst_456 = arith.constant dense<0xFF800000> : vector<2x16xf32>
    %835 = vector.multi_reduction <maximumf>, %834, %cst_456 [2] : vector<2x16x16xf32> to vector<2x16xf32>
    %836 = vector.shape_cast %835 : vector<2x16xf32> to vector<2x16x1xf32>
    %837 = vector.broadcast %836 : vector<2x16x1xf32> to vector<2x16x16xf32>
    %838 = arith.subf %834, %837 : vector<2x16x16xf32>
    %839 = math.exp %838 : vector<2x16x16xf32>
    %cst_457 = arith.constant dense<0.000000e+00> : vector<2x16xf32>
    %840 = vector.multi_reduction <add>, %839, %cst_457 [2] : vector<2x16x16xf32> to vector<2x16xf32>
    %841 = vector.shape_cast %840 : vector<2x16xf32> to vector<2x16x1xf32>
    %842 = tpu.reciprocal %841 {approx = true} : vector<2x16x1xf32> -> vector<2x16x1xf32>
    %843 = vector.broadcast %842 : vector<2x16x1xf32> to vector<2x16x16xf32>
    %844 = arith.mulf %839, %843 : vector<2x16x16xf32>
    %845 = arith.truncf %844 : vector<2x16x16xf32> to vector<2x16x16xbf16>
    "tpu.trace_start"() <{level = 10 : i32, message = "bqk,bkd->bqd"}> : () -> ()
    %cst_458 = arith.constant dense<0.000000e+00> : vector<2x16x8xf32>
    %846 = tpu.matmul %845, %833, %cst_458 {dimension_numbers = #tpu.dot_dimension_numbers<[2], [1], [1], [2], [0, 0, 0, 1, 1, 2], [0], [0]>} : vector<2x16x16xbf16>, vector<2x16x8xbf16>, vector<2x16x8xf32> -> vector<2x16x8xf32>
    "tpu.trace_stop"() : () -> ()
    %847 = vector.shape_cast %846 : vector<2x16x8xf32> to vector<32x8xf32>
    %848 = arith.truncf %847 : vector<32x8xf32> to vector<32x8xbf16>
    %c3_459 = arith.constant 3 : index
    %c2_460 = arith.constant 2 : index
    %c0_461 = arith.constant 0 : index
    %c0_462 = arith.constant 0 : index
    %849 = vector.load %arg7[%c3_459, %c2_460, %c0_461, %c0_462] : memref<4x4x8x32xbf16, #tpu.memory_space<vmem>>, vector<1x1x8x32xbf16>
    %850 = vector.shape_cast %849 : vector<1x1x8x32xbf16> to vector<8x32xbf16>
    %cst_463 = arith.constant dense<0.000000e+00> : vector<32x32xf32>
    %851 = tpu.matmul %848, %850, %cst_463 {dimension_numbers = #tpu.dot_dimension_numbers<[1], [0], [0], [1], [0, 0, 1, 1], [], []>} : vector<32x8xbf16>, vector<8x32xbf16>, vector<32x32xf32> -> vector<32x32xf32>
    %852 = arith.addf %818, %851 : vector<32x32xf32>
    %c3_464 = arith.constant 3 : index
    %c3_465 = arith.constant 3 : index
    %c0_466 = arith.constant 0 : index
    %c0_467 = arith.constant 0 : index
    %853 = vector.load %arg4[%c3_464, %c3_465, %c0_466, %c0_467] : memref<4x4x32x8xbf16, #tpu.memory_space<vmem>>, vector<1x1x32x8xbf16>
    %854 = vector.shape_cast %853 : vector<1x1x32x8xbf16> to vector<32x8xbf16>
    %cst_468 = arith.constant dense<0.000000e+00> : vector<32x8xf32>
    %855 = tpu.matmul %744, %854, %cst_468 {dimension_numbers = #tpu.dot_dimension_numbers<[1], [0], [0], [1], [0, 0, 1, 1], [], []>} : vector<32x32xbf16>, vector<32x8xbf16>, vector<32x8xf32> -> vector<32x8xf32>
    %c3_469 = arith.constant 3 : index
    %c3_470 = arith.constant 3 : index
    %c0_471 = arith.constant 0 : index
    %c0_472 = arith.constant 0 : index
    %856 = vector.load %arg5[%c3_469, %c3_470, %c0_471, %c0_472] : memref<4x4x32x8xbf16, #tpu.memory_space<vmem>>, vector<1x1x32x8xbf16>
    %857 = vector.shape_cast %856 : vector<1x1x32x8xbf16> to vector<32x8xbf16>
    %cst_473 = arith.constant dense<0.000000e+00> : vector<32x8xf32>
    %858 = tpu.matmul %749, %857, %cst_473 {dimension_numbers = #tpu.dot_dimension_numbers<[1], [0], [0], [1], [0, 0, 1, 1], [], []>} : vector<32x32xbf16>, vector<32x8xbf16>, vector<32x8xf32> -> vector<32x8xf32>
    %c3_474 = arith.constant 3 : index
    %c3_475 = arith.constant 3 : index
    %c0_476 = arith.constant 0 : index
    %c0_477 = arith.constant 0 : index
    %859 = vector.load %arg6[%c3_474, %c3_475, %c0_476, %c0_477] : memref<4x4x32x8xbf16, #tpu.memory_space<vmem>>, vector<1x1x32x8xbf16>
    %860 = vector.shape_cast %859 : vector<1x1x32x8xbf16> to vector<32x8xbf16>
    %cst_478 = arith.constant dense<0.000000e+00> : vector<32x8xf32>
    %861 = tpu.matmul %749, %860, %cst_478 {dimension_numbers = #tpu.dot_dimension_numbers<[1], [0], [0], [1], [0, 0, 1, 1], [], []>} : vector<32x32xbf16>, vector<32x8xbf16>, vector<32x8xf32> -> vector<32x8xf32>
    %862 = vector.shape_cast %855 : vector<32x8xf32> to vector<2x16x8xf32>
    %863 = arith.truncf %862 : vector<2x16x8xf32> to vector<2x16x8xbf16>
    %864 = vector.shape_cast %858 : vector<32x8xf32> to vector<2x16x8xf32>
    %865 = arith.truncf %864 : vector<2x16x8xf32> to vector<2x16x8xbf16>
    %866 = vector.shape_cast %861 : vector<32x8xf32> to vector<2x16x8xf32>
    %867 = arith.truncf %866 : vector<2x16x8xf32> to vector<2x16x8xbf16>
    "tpu.trace_start"() <{level = 10 : i32, message = "bqd,bkd->bqk"}> : () -> ()
    %cst_479 = arith.constant dense<0.000000e+00> : vector<2x16x16xf32>
    %868 = tpu.matmul %863, %865, %cst_479 {dimension_numbers = #tpu.dot_dimension_numbers<[2], [2], [1], [1], [0, 0, 0, 1, 1, 1], [0], [0]>} : vector<2x16x8xbf16>, vector<2x16x8xbf16>, vector<2x16x16xf32> -> vector<2x16x16xf32>
    "tpu.trace_stop"() : () -> ()
    %cst_480 = arith.constant dense<0xFF800000> : vector<2x16xf32>
    %869 = vector.multi_reduction <maximumf>, %868, %cst_480 [2] : vector<2x16x16xf32> to vector<2x16xf32>
    %870 = vector.shape_cast %869 : vector<2x16xf32> to vector<2x16x1xf32>
    %871 = vector.broadcast %870 : vector<2x16x1xf32> to vector<2x16x16xf32>
    %872 = arith.subf %868, %871 : vector<2x16x16xf32>
    %873 = math.exp %872 : vector<2x16x16xf32>
    %cst_481 = arith.constant dense<0.000000e+00> : vector<2x16xf32>
    %874 = vector.multi_reduction <add>, %873, %cst_481 [2] : vector<2x16x16xf32> to vector<2x16xf32>
    %875 = vector.shape_cast %874 : vector<2x16xf32> to vector<2x16x1xf32>
    %876 = tpu.reciprocal %875 {approx = true} : vector<2x16x1xf32> -> vector<2x16x1xf32>
    %877 = vector.broadcast %876 : vector<2x16x1xf32> to vector<2x16x16xf32>
    %878 = arith.mulf %873, %877 : vector<2x16x16xf32>
    %879 = arith.truncf %878 : vector<2x16x16xf32> to vector<2x16x16xbf16>
    "tpu.trace_start"() <{level = 10 : i32, message = "bqk,bkd->bqd"}> : () -> ()
    %cst_482 = arith.constant dense<0.000000e+00> : vector<2x16x8xf32>
    %880 = tpu.matmul %879, %867, %cst_482 {dimension_numbers = #tpu.dot_dimension_numbers<[2], [1], [1], [2], [0, 0, 0, 1, 1, 2], [0], [0]>} : vector<2x16x16xbf16>, vector<2x16x8xbf16>, vector<2x16x8xf32> -> vector<2x16x8xf32>
    "tpu.trace_stop"() : () -> ()
    %881 = vector.shape_cast %880 : vector<2x16x8xf32> to vector<32x8xf32>
    %882 = arith.truncf %881 : vector<32x8xf32> to vector<32x8xbf16>
    %c3_483 = arith.constant 3 : index
    %c3_484 = arith.constant 3 : index
    %c0_485 = arith.constant 0 : index
    %c0_486 = arith.constant 0 : index
    %883 = vector.load %arg7[%c3_483, %c3_484, %c0_485, %c0_486] : memref<4x4x8x32xbf16, #tpu.memory_space<vmem>>, vector<1x1x8x32xbf16>
    %884 = vector.shape_cast %883 : vector<1x1x8x32xbf16> to vector<8x32xbf16>
    %cst_487 = arith.constant dense<0.000000e+00> : vector<32x32xf32>
    %885 = tpu.matmul %882, %884, %cst_487 {dimension_numbers = #tpu.dot_dimension_numbers<[1], [0], [0], [1], [0, 0, 1, 1], [], []>} : vector<32x8xbf16>, vector<8x32xbf16>, vector<32x32xf32> -> vector<32x32xf32>
    %886 = arith.addf %852, %885 : vector<32x32xf32>
    %887 = arith.addf %471, %886 : vector<32x32xf32>
    %888 = vector.broadcast %734 : vector<1x32xf32> to vector<32x32xf32>
    %889 = arith.addf %887, %888 : vector<32x32xf32>
    %cst_488 = arith.constant dense<0.000000e+00> : vector<32xf32>
    %890 = vector.multi_reduction <add>, %889, %cst_488 [1] : vector<32x32xf32> to vector<32xf32>
    %891 = vector.shape_cast %890 : vector<32xf32> to vector<32x1xf32>
    %cst_489 = arith.constant 3.200000e+01 : f32
    %892 = vector.broadcast %cst_489 : f32 to vector<32x1xf32>
    %893 = arith.divf %891, %892 : vector<32x1xf32>
    %894 = vector.broadcast %893 : vector<32x1xf32> to vector<32x32xf32>
    %895 = arith.subf %889, %894 : vector<32x32xf32>
    %896 = vector.broadcast %893 : vector<32x1xf32> to vector<32x32xf32>
    %897 = arith.subf %889, %896 : vector<32x32xf32>
    %898 = arith.mulf %895, %897 : vector<32x32xf32>
    %cst_490 = arith.constant dense<0.000000e+00> : vector<32xf32>
    %899 = vector.multi_reduction <add>, %898, %cst_490 [1] : vector<32x32xf32> to vector<32xf32>
    %900 = vector.shape_cast %899 : vector<32xf32> to vector<32x1xf32>
    %cst_491 = arith.constant 3.200000e+01 : f32
    %901 = vector.broadcast %cst_491 : f32 to vector<32x1xf32>
    %902 = arith.divf %900, %901 : vector<32x1xf32>
    %903 = vector.broadcast %893 : vector<32x1xf32> to vector<32x32xf32>
    %904 = arith.subf %889, %903 : vector<32x32xf32>
    %cst_492 = arith.constant 9.99999974E-6 : f32
    %905 = vector.broadcast %cst_492 : f32 to vector<32x1xf32>
    %906 = arith.addf %902, %905 : vector<32x1xf32>
    %907 = math.rsqrt %906 : vector<32x1xf32>
    %908 = vector.broadcast %907 : vector<32x1xf32> to vector<32x32xf32>
    %909 = arith.mulf %904, %908 : vector<32x32xf32>
    %910 = vector.broadcast %732 : vector<1x32xf32> to vector<32x32xf32>
    %911 = arith.mulf %909, %910 : vector<32x32xf32>
    %912 = vector.broadcast %733 : vector<1x32xf32> to vector<32x32xf32>
    %913 = arith.addf %911, %912 : vector<32x32xf32>
    %914 = arith.truncf %913 : vector<32x32xf32> to vector<32x32xbf16>
    %c3_493 = arith.constant 3 : index
    %c0_494 = arith.constant 0 : index
    %c0_495 = arith.constant 0 : index
    %915 = vector.load %arg8[%c3_493, %c0_494, %c0_495] : memref<4x32x32xbf16, #tpu.memory_space<vmem>>, vector<1x32x32xbf16>
    %916 = vector.shape_cast %915 : vector<1x32x32xbf16> to vector<32x32xbf16>
    %cst_496 = arith.constant dense<0.000000e+00> : vector<32x32xf32>
    %917 = tpu.matmul %914, %916, %cst_496 {dimension_numbers = #tpu.dot_dimension_numbers<[1], [0], [0], [1], [0, 0, 1, 1], [], []>} : vector<32x32xbf16>, vector<32x32xbf16>, vector<32x32xf32> -> vector<32x32xf32>
    %918 = vector.broadcast %737 : vector<1x32xf32> to vector<32x32xf32>
    %919 = arith.addf %917, %918 : vector<32x32xf32>
    %920 = arith.mulf %919, %919 : vector<32x32xf32>
    %921 = arith.mulf %919, %920 : vector<32x32xf32>
    %cst_497 = arith.constant 4.471500e-02 : f32
    %922 = vector.broadcast %cst_497 : f32 to vector<32x32xf32>
    %923 = arith.mulf %922, %921 : vector<32x32xf32>
    %924 = arith.addf %919, %923 : vector<32x32xf32>
    %cst_498 = arith.constant 0.797884583 : f32
    %925 = vector.broadcast %cst_498 : f32 to vector<32x32xf32>
    %926 = arith.mulf %925, %924 : vector<32x32xf32>
    %927 = math.tanh %926 : vector<32x32xf32>
    %cst_499 = arith.constant 1.000000e+00 : f32
    %928 = vector.broadcast %cst_499 : f32 to vector<32x32xf32>
    %929 = arith.addf %928, %927 : vector<32x32xf32>
    %cst_500 = arith.constant 5.000000e-01 : f32
    %930 = vector.broadcast %cst_500 : f32 to vector<32x32xf32>
    %931 = arith.mulf %930, %929 : vector<32x32xf32>
    %932 = arith.mulf %919, %931 : vector<32x32xf32>
    %933 = arith.truncf %932 : vector<32x32xf32> to vector<32x32xbf16>
    %c3_501 = arith.constant 3 : index
    %c0_502 = arith.constant 0 : index
    %c0_503 = arith.constant 0 : index
    %934 = vector.load %arg9[%c3_501, %c0_502, %c0_503] : memref<4x32x32xbf16, #tpu.memory_space<vmem>>, vector<1x32x32xbf16>
    %935 = vector.shape_cast %934 : vector<1x32x32xbf16> to vector<32x32xbf16>
    %cst_504 = arith.constant dense<0.000000e+00> : vector<32x32xf32>
    %936 = tpu.matmul %933, %935, %cst_504 {dimension_numbers = #tpu.dot_dimension_numbers<[1], [0], [0], [1], [0, 0, 1, 1], [], []>} : vector<32x32xbf16>, vector<32x32xbf16>, vector<32x32xf32> -> vector<32x32xf32>
    %937 = vector.broadcast %735 : vector<1x32xf32> to vector<32x32xf32>
    %938 = arith.addf %936, %937 : vector<32x32xf32>
    %939 = arith.addf %889, %938 : vector<32x32xf32>
    %940 = vector.shape_cast %939 : vector<32x32xf32> to vector<2x16x32xf32>
    %c0_505 = arith.constant 0 : index
    %c0_506 = arith.constant 0 : index
    %c0_507 = arith.constant 0 : index
    %941 = vector.load %arg10[%c0_505, %c0_506, %c0_507] : memref<2x16x32xf32, #tpu.memory_space<vmem>>, vector<2x16x32xf32>
    tpu.vector_store %arg10[%c0_505, %c0_506, %c0_507], %940 {strides = array<i32>} : memref<2x16x32xf32, #tpu.memory_space<vmem>>, vector<2x16x32xf32>,
    %942 = vector.shape_cast %725 : vector<32x32xf32> to vector<2x16x32xf32>
    %c0_508 = arith.constant 0 : index
    %c0_509 = arith.constant 0 : index
    %c0_510 = arith.constant 0 : index
    %943 = vector.load %arg11[%c0_508, %c0_509, %c0_510] : memref<2x16x32xf32, #tpu.memory_space<vmem>>, vector<2x16x32xf32>
    tpu.vector_store %arg11[%c0_508, %c0_509, %c0_510], %942 {strides = array<i32>} : memref<2x16x32xf32, #tpu.memory_space<vmem>>, vector<2x16x32xf32>,
    return
  }
}

</mosaic_0001>

<bundles_post_ra>
// kernel: tpu_custom_call.1
= control target key start
LH: loop header
LB: loop body
LE: loop exit
PB: predicated region body
PF: predicated region fallthrough
CT: control target
= control target key end

     0   :  { %17 = vsyncpa [#allocation3], 0  ;;  %s13729_s0 = inlined_call_operand.hbm [shape: f32[2,16,32], index: 0, kind: input, shape index: {}]   ;;  %s13730_s1 = inlined_call_operand.hbm [shape: f32[2,16,32], index: 1, kind: input, shape index: {}]   ;;  %s13731_s2 = inlined_call_operand.hbm [shape: f32[4,8,32], index: 2, kind: input, shape index: {}]   ;;  %s13732_s3 = inlined_call_operand.hbm [shape: f32[4,1,32], index: 3, kind: input, shape index: {}]   ;;  %s13733_s4 = inlined_call_operand.hbm [shape: bf16[4,4,32,8], index: 4, kind: input, shape index: {}]   ;;  %s13734_s5 = inlined_call_operand.hbm [shape: bf16[4,4,32,8], index: 5, kind: input, shape index: {}]   ;;  %s13735_s6 = inlined_call_operand.hbm [shape: bf16[4,4,32,8], index: 6, kind: input, shape index: {}]   ;;  %s13736_s7 = inlined_call_operand.hbm [shape: bf16[4,4,8,32], index: 7, kind: input, shape index: {}]   ;;  %s13737_s8 = inlined_call_operand.hbm [shape: bf16[4,32,32], index: 8, kind: input, shape index: {}]   ;;  %s13738_s9 = inlined_call_operand.hbm [shape: bf16[4,32,32], index: 9, kind: input, shape index: {}]   ;;  %s13739_s10 = inlined_call_operand.hbm [shape: f32[2,16,32], index: 10, kind: output, shape index: {0}]   ;;  %s13740_s11 = inlined_call_operand.hbm [shape: f32[2,16,32], index: 11, kind: output, shape index: {1}]  }
   0x1   :  { %18 = vsyncpa [#allocation6], 0 }
   0x2   :  { %19 = vsyncpa [#allocation9], 0 }
   0x3   :  { %20 = vsyncpa [#allocation12], 0 }
   0x4   :  { %21 = vsyncpa [#allocation15], 0 }
   0x5   :  { %22 = vsyncpa [#allocation18], 0 }
   0x6   :  { %23 = vsyncpa [#allocation4], 0 }
   0x7   :  { %24 = vsyncpa [#allocation21], 0  ;;  %s12200_s17 = smov [#allocation5]   ;;  %s12201_s19 = smov [#allocation8]  }
   0x8   :  { %s42_s18 = sshll.u32 %s12200_s17, 4  ;;  %s66_s20 = sshll.u32 %s12201_s19, 4  ;;  %s43_s18 = int_to_ptr.vmem [resolvable:$true] %s42_s18  ;;  %s12280_s20 = int_to_ptr.vmem [resolvable:$true] %s66_s20 }
   0x9   :  { %s11920_s23 = scalar_lea.hbm %s13730_s1, 512 }
   0xa   :  { %p11921_p0 = scmp.ne.s32.totalorder %s13730_s1, %s11920_s23  ;;  %p11924_p1 = scmp.lt.u32.totalorder %s11920_s23, %s13730_s1 }
   0xc   :  { %p11926_p2 = pnand %p11924_p1, %p11921_p0 }
   0xe   :  { %11929 = shalt.err (!%p11926_p2)
}
   0xf   :  { %s11930_s28 = scalar_lea.vmem %s43_s18, 512  ;;  %p11935_p4 = scmp.lt.s32.totalorder %s43_s18, %s43_s18 }
  0x10   :  { %p11931_p3 = scmp.ne.s32.totalorder %s43_s18, %s11930_s28  ;;  %p11936_p5 = scmp.lt.s32.totalorder %s11930_s28, %s11930_s28 }
  0x12   :  { %p11937_p6 = por %p11936_p5, %p11935_p4 }
  0x14   :  { %p11938_p7 = pnand %p11937_p6, %p11931_p3 }
  0x16   :  { %11941 = shalt.err (!%p11938_p7)
}
  0x17   :  { %s12202_s29 = smov 128   ;;  %s12203_s30 = smov 8  }
  0x18   :  { %48 = dma.hbm_to_vmem [thread:$0]  %s13730_s1, 512, %s43_s18, [#allocation6], %s12202_s29, %s12202_s29, %s12203_s30  }
  0x19   :  { %s11942_s16 = scalar_lea.hbm %s13732_s3, 64 }
  0x1a   :  { %p11943_p8 = scmp.ne.s32.totalorder %s13732_s3, %s11942_s16  ;;  %p11946_p9 = scmp.lt.u32.totalorder %s11942_s16, %s13732_s3 }
  0x1c   :  { %p11948_p10 = pnand %p11946_p9, %p11943_p8 }
  0x1e   :  { %11951 = shalt.err (!%p11948_p10)
}
  0x1f   :  { %s11952_s23 = scalar_lea.vmem %s12280_s20, 64  ;;  %p11957_p12 = scmp.lt.s32.totalorder %s12280_s20, %s12280_s20 }
  0x20   :  { %p11953_p11 = scmp.ne.s32.totalorder %s12280_s20, %s11952_s23  ;;  %p11958_p13 = scmp.lt.s32.totalorder %s11952_s23, %s11952_s23 }
  0x22   :  { %p11959_p0 = por %p11958_p13, %p11957_p12 }
  0x24   :  { %p11960_p1 = pnand %p11959_p0, %p11953_p11 }
  0x26   :  { %11963 = shalt.err (!%p11960_p1)
}
  0x27   :  { %s12204_s1 = smov 16   ;;  %s12205_s18 = smov 1  }
  0x28   :  { %72 = dma.hbm_to_vmem [thread:$0]  %s13732_s3, 64, %s12280_s20, [#allocation9], %s12204_s1, %s12204_s1, %s12205_s18  }
  0x29   :  { %s12206_s26 = smov [#allocation11]   ;;  %s12207_s28 = smov [#allocation14]  }
  0x2a   :  { %s90_s27 = sshll.u32 %s12206_s26, 4  ;;  %s114_s12 = sshll.u32 %s12207_s28, 4  ;;  %s91_s27 = int_to_ptr.vmem [resolvable:$true] %s90_s27  ;;  %s12314_s12 = int_to_ptr.vmem [resolvable:$true] %s114_s12 }
  0x2b   :  { %s11964_s15 = scalar_lea.hbm %s13734_s5, 4096 }
  0x2c   :  { %p11965_p2 = scmp.ne.s32.totalorder %s13734_s5, %s11964_s15  ;;  %p11968_p3 = scmp.lt.u32.totalorder %s11964_s15, %s13734_s5 }
  0x2e   :  { %p11970_p4 = pnand %p11968_p3, %p11965_p2 }
  0x30   :  { %11973 = shalt.err (!%p11970_p4)
}
  0x31   :  { %s11974_s3 = scalar_lea.vmem %s91_s27, 4096  ;;  %p11979_p6 = scmp.lt.s32.totalorder %s91_s27, %s91_s27 }
  0x32   :  { %p11975_p5 = scmp.ne.s32.totalorder %s91_s27, %s11974_s3  ;;  %p11980_p7 = scmp.lt.s32.totalorder %s11974_s3, %s11974_s3 }
  0x34   :  { %p11981_p8 = por %p11980_p7, %p11979_p6 }
  0x36   :  { %p11982_p9 = pnand %p11981_p8, %p11975_p5 }
  0x38   :  { %11985 = shalt.err (!%p11982_p9)
}
  0x39   :  { %s12208_s20 = smov 64   ;;  %s12209_s22 = smov 4  }
  0x3a   :  { %96 = dma.hbm_to_vmem [thread:$0]  %s13734_s5, 4096, %s91_s27, [#allocation12], %s12208_s20, %s12208_s20, %s12209_s22  }
  0x3b   :  { %s11986_s25 = scalar_lea.hbm %s13736_s7, 1024 }
  0x3c   :  { %p11987_p10 = scmp.ne.s32.totalorder %s13736_s7, %s11986_s25  ;;  %p11990_p11 = scmp.lt.u32.totalorder %s11986_s25, %s13736_s7 }
  0x3e   :  { %p11992_p12 = pnand %p11990_p11, %p11987_p10 }
  0x40   :  { %11995 = shalt.err (!%p11992_p12)
}
  0x41   :  { %s11996_s15 = scalar_lea.vmem %s12314_s12, 1024  ;;  %p12001_p0 = scmp.lt.s32.totalorder %s12314_s12, %s12314_s12 }
  0x42   :  { %p11997_p13 = scmp.ne.s32.totalorder %s12314_s12, %s11996_s15  ;;  %p12002_p1 = scmp.lt.s32.totalorder %s11996_s15, %s11996_s15 }
  0x44   :  { %p12003_p2 = por %p12002_p1, %p12001_p0 }
  0x46   :  { %p12004_p3 = pnand %p12003_p2, %p11997_p13 }
  0x48   :  { %12007 = shalt.err (!%p12004_p3)
}
  0x49   :  { %120 = dma.hbm_to_vmem [thread:$0]  %s13736_s7, 1024, %s12314_s12, [#allocation15], %s12208_s20, %s12208_s20, %s12209_s22  }
  0x4a   :  { %s12210_s16 = smov [#allocation2]   ;;  %s12211_s19 = smov [#allocation7]  }
  0x4b   :  { %s30_s17 = sshll.u32 %s12210_s16, 4  ;;  %s54_s21 = sshll.u32 %s12211_s19, 4  ;;  %s31_s17 = int_to_ptr.vmem [resolvable:$true] %s30_s17  ;;  %s12351_s21 = int_to_ptr.vmem [resolvable:$true] %s54_s21 }
  0x4c   :  { %s12008_s1 = scalar_lea.hbm %s13729_s0, 512 }
  0x4d   :  { %p12009_p4 = scmp.ne.s32.totalorder %s13729_s0, %s12008_s1  ;;  %p12012_p5 = scmp.lt.u32.totalorder %s12008_s1, %s13729_s0 }
  0x4f   :  { %p12014_p6 = pnand %p12012_p5, %p12009_p4 }
  0x51   :  { %12017 = shalt.err (!%p12014_p6)
}
  0x52   :  { %s12018_s7 = scalar_lea.vmem %s31_s17, 512  ;;  %p12023_p8 = scmp.lt.s32.totalorder %s31_s17, %s31_s17 }
  0x53   :  { %p12019_p7 = scmp.ne.s32.totalorder %s31_s17, %s12018_s7  ;;  %p12024_p9 = scmp.lt.s32.totalorder %s12018_s7, %s12018_s7 }
  0x55   :  { %p12025_p10 = por %p12024_p9, %p12023_p8 }
  0x57   :  { %p12026_p11 = pnand %p12025_p10, %p12019_p7 }
  0x59   :  { %12029 = shalt.err (!%p12026_p11)
}
  0x5a   :  { %36 = dma.hbm_to_vmem [thread:$0]  %s13729_s0, 512, %s31_s17, [#allocation3], %s12202_s29, %s12202_s29, %s12203_s30  }
  0x5b   :  { %s12030_s15 = scalar_lea.hbm %s13731_s2, 512 }
  0x5c   :  { %p12031_p12 = scmp.ne.s32.totalorder %s13731_s2, %s12030_s15  ;;  %p12034_p13 = scmp.lt.u32.totalorder %s12030_s15, %s13731_s2 }
  0x5e   :  { %p12036_p0 = pnand %p12034_p13, %p12031_p12 }
  0x60   :  { %12039 = shalt.err (!%p12036_p0)
}
  0x61   :  { %s12040_s3 = scalar_lea.vmem %s12351_s21, 512  ;;  %p12045_p2 = scmp.lt.s32.totalorder %s12351_s21, %s12351_s21 }
  0x62   :  { %p12041_p1 = scmp.ne.s32.totalorder %s12351_s21, %s12040_s3  ;;  %p12046_p3 = scmp.lt.s32.totalorder %s12040_s3, %s12040_s3 }
  0x64   :  { %p12047_p4 = por %p12046_p3, %p12045_p2 }
  0x66   :  { %p12048_p5 = pnand %p12047_p4, %p12041_p1 }
  0x68   :  { %12051 = shalt.err (!%p12048_p5)
}
  0x69   :  { %60 = dma.hbm_to_vmem [thread:$0]  %s13731_s2, 512, %s12351_s21, [#allocation6], %s12202_s29, %s12202_s29, %s12203_s30  }
  0x6a   :  { %s12212_s23 = smov [#allocation10]   ;;  %s12213_s18 = smov [#allocation13]  }
  0x6b   :  { %s78_s1 = sshll.u32 %s12212_s23, 4  ;;  %s102_s24 = sshll.u32 %s12213_s18, 4  ;;  %s79_s1 = int_to_ptr.vmem [resolvable:$true] %s78_s1  ;;  %s12388_s24 = int_to_ptr.vmem [resolvable:$true] %s102_s24 }
  0x6c   :  { %s12052_s7 = scalar_lea.hbm %s13733_s4, 4096 }
  0x6d   :  { %p12053_p6 = scmp.ne.s32.totalorder %s13733_s4, %s12052_s7  ;;  %p12056_p7 = scmp.lt.u32.totalorder %s12052_s7, %s13733_s4 }
  0x6f   :  { %p12058_p8 = pnand %p12056_p7, %p12053_p6 }
  0x71   :  { %12061 = shalt.err (!%p12058_p8)
}
  0x72   :  { %s12062_s2 = scalar_lea.vmem %s79_s1, 4096  ;;  %p12067_p10 = scmp.lt.s32.totalorder %s79_s1, %s79_s1 }
  0x73   :  { %p12063_p9 = scmp.ne.s32.totalorder %s79_s1, %s12062_s2  ;;  %p12068_p11 = scmp.lt.s32.totalorder %s12062_s2, %s12062_s2 }
  0x75   :  { %p12069_p12 = por %p12068_p11, %p12067_p10 }
  0x77   :  { %p12070_p13 = pnand %p12069_p12, %p12063_p9 }
  0x79   :  { %12073 = shalt.err (!%p12070_p13)
}
  0x7a   :  { %84 = dma.hbm_to_vmem [thread:$0]  %s13733_s4, 4096, %s79_s1, [#allocation9], %s12208_s20, %s12208_s20, %s12209_s22  }
  0x7b   :  { %s12074_s16 = scalar_lea.hbm %s13735_s6, 4096 }
  0x7c   :  { %p12075_p0 = scmp.ne.s32.totalorder %s13735_s6, %s12074_s16  ;;  %p12078_p1 = scmp.lt.u32.totalorder %s12074_s16, %s13735_s6 }
  0x7e   :  { %p12080_p2 = pnand %p12078_p1, %p12075_p0 }
  0x80   :  { %12083 = shalt.err (!%p12080_p2)
}
  0x81   :  { %s12084_s23 = scalar_lea.vmem %s12388_s24, 4096  ;;  %p12089_p4 = scmp.lt.s32.totalorder %s12388_s24, %s12388_s24 }
  0x82   :  { %p12085_p3 = scmp.ne.s32.totalorder %s12388_s24, %s12084_s23  ;;  %p12090_p5 = scmp.lt.s32.totalorder %s12084_s23, %s12084_s23 }
  0x84   :  { %p12091_p6 = por %p12090_p5, %p12089_p4 }
  0x86   :  { %p12092_p7 = pnand %p12091_p6, %p12085_p3 }
  0x88   :  { %12095 = shalt.err (!%p12092_p7)
}
  0x89   :  { %108 = dma.hbm_to_vmem [thread:$0]  %s13735_s6, 4096, %s12388_s24, [#allocation12], %s12208_s20, %s12208_s20, %s12209_s22  }
  0x8a   :  { %s12214_s18 = smov [#allocation16]   ;;  %s12215_s26 = smov [#allocation17]  }
  0x8b   :  { %s126_s25 = sshll.u32 %s12214_s18, 4  ;;  %s138_s7 = sshll.u32 %s12215_s26, 4  ;;  %s127_s25 = int_to_ptr.vmem [resolvable:$true] %s126_s25  ;;  %s12425_s7 = int_to_ptr.vmem [resolvable:$true] %s138_s7 }
  0x8c   :  { %s12096_s13 = scalar_lea.hbm %s13737_s8, 1024 }
  0x8d   :  { %p12097_p8 = scmp.ne.s32.totalorder %s13737_s8, %s12096_s13  ;;  %p12100_p9 = scmp.lt.u32.totalorder %s12096_s13, %s13737_s8 }
  0x8f   :  { %p12102_p10 = pnand %p12100_p9, %p12097_p8 }
  0x91   :  { %12105 = shalt.err (!%p12102_p10)
}
  0x92   :  { %s12106_s6 = scalar_lea.vmem %s127_s25, 1024  ;;  %p12111_p12 = scmp.lt.s32.totalorder %s127_s25, %s127_s25 }
  0x93   :  { %p12107_p11 = scmp.ne.s32.totalorder %s127_s25, %s12106_s6  ;;  %p12112_p13 = scmp.lt.s32.totalorder %s12106_s6, %s12106_s6 }
  0x95   :  { %p12113_p0 = por %p12112_p13, %p12111_p12 }
  0x97   :  { %p12114_p1 = pnand %p12113_p0, %p12107_p11 }
  0x99   :  { %12117 = shalt.err (!%p12114_p1)
}
  0x9a   :  { %132 = dma.hbm_to_vmem [thread:$0]  %s13737_s8, 1024, %s127_s25, [#allocation15], %s12208_s20, %s12208_s20, %s12209_s22  }
  0x9b   :  { %s12118_s19 = scalar_lea.hbm %s13738_s9, 1024 }
  0x9c   :  { %p12119_p2 = scmp.ne.s32.totalorder %s13738_s9, %s12118_s19  ;;  %p12122_p3 = scmp.lt.u32.totalorder %s12118_s19, %s13738_s9 }
  0x9e   :  { %p12124_p4 = pnand %p12122_p3, %p12119_p2 }
  0xa0   :  { %12127 = shalt.err (!%p12124_p4)
}
  0xa1   :  { %s12128_s4 = scalar_lea.vmem %s12425_s7, 1024  ;;  %p12133_p6 = scmp.lt.s32.totalorder %s12425_s7, %s12425_s7 }
  0xa2   :  { %p12129_p5 = scmp.ne.s32.totalorder %s12425_s7, %s12128_s4  ;;  %p12134_p7 = scmp.lt.s32.totalorder %s12128_s4, %s12128_s4 }
  0xa4   :  { %p12135_p8 = por %p12134_p7, %p12133_p6 }
  0xa6   :  { %p12136_p9 = pnand %p12135_p8, %p12129_p5 }
  0xa8   :  { %12139 = shalt.err (!%p12136_p9)
}
  0xa9   :  { %144 = dma.hbm_to_vmem [thread:$0]  %s13738_s9, 1024, %s12425_s7, [#allocation18], %s12208_s20, %s12208_s20, %s12209_s22  }
  0xaa   :  { %12184 = dma.done.wait [#allocation3], 512  }
  0xab   :  { %12185 = vsyncadd [#allocation3], 4294966784 }
  0xac   :  { %12186 = dma.done.wait [#allocation6], 1024  }
  0xad   :  { %12187 = vsyncadd [#allocation6], 4294966272 }
  0xae   :  { %12188 = dma.done.wait [#allocation9], 4160  }
  0xaf   :  { %12189 = vsyncadd [#allocation9], 4294963136 }
  0xb0   :  { %12190 = dma.done.wait [#allocation12], 8192  }
  0xb1   :  { %12191 = vsyncadd [#allocation12], 4294959104 }
  0xb2   :  { %12192 = dma.done.wait [#allocation15], 2048  }
  0xb3   :  { %12193 = vsyncadd [#allocation15], 4294965248 }
  0xb4   :  { %12194 = dma.done.wait [#allocation18], 1024  }
  0xb5   :  { %12195 = vsyncadd [#allocation18], 4294966272  ;;  %vm184_vm0 = vcmask 261120   ;;  %v180_v0 = vld [vmem:[#allocation5] sm:$0xff]  ;;  %v182_v1 = vld [vmem:[#allocation5 + $0x10] sm:$0xff]  ;;  %v292_v63 = vlaneseq  ;;  %vm12217_vm1 = vmmov 0  }
  0xb6   :  { %v181_v2 = vld [vmem:[#allocation5 + $0x8] sm:$0xff]  ;;  %v238_v3 = vsel %vm184_vm0, %v180_v0, 0.0  ;;  %v244_v4 = vsel %vm184_vm0, %v182_v1, 0.0  ;;  %v183_v5 = vld [vmem:[#allocation5 + $0x18] sm:$0xff]  ;;  %v176_v6 = vld [vmem:[#allocation2] sm:$0xff]  ;;  %vm545_vm2 = vcmask 64512  }
  0xb7   :  { %v177_v7 = vld [vmem:[#allocation2 + $0x8] sm:$0xff]  ;;  %239 = vadd.xlane.f32.xlu0 %v238_v3  ;;  %245 = vadd.xlane.f32.xlu1 %v244_v4  ;;  %v241_v8 = vsel %vm184_vm0, %v181_v2, 0.0  ;;  %v247_v9 = vsel %vm184_vm0, %v183_v5, 0.0  ;;  %v185_v10 = vsel %vm184_vm0, %v176_v6, 0.0  ;;  %v178_v12 = vld [vmem:[#allocation2 + $0x10] sm:$0xff]  ;;  %v179_v13 = vld [vmem:[#allocation2 + $0x18] sm:$0xff] }
  0xb8   :  { %v188_v11 = vsel %vm184_vm0, %v177_v7, 0.0  ;;  %v191_v14 = vsel %vm184_vm0, %v178_v12, 0.0  ;;  %v194_v15 = vsel %vm184_vm0, %v179_v13, 0.0  ;;  %v11443_v56 = vld [vmem:[#allocation11] sm:$0xff]   ;;  %v11444_v57 = vld [vmem:[#allocation11 + $0x8] sm:$0xff]   ;;  %vm640_vm3 = vcmask 130048  }
  0xb9   :  { %10439 = vmatprep.subr.bf16.mxu1 %v11443_v56  ;;  %v11445_v58 = vld [vmem:[#allocation10] sm:$0xff]   ;;  %v11446_v59 = vld [vmem:[#allocation10 + $0x8] sm:$0xff]   ;;  %vm1220_vm4 = vcmask 1043456   ;;  %s12218_s9 = smov [#allocation20]  }
  0xba   :  { %10440 = vmatpush3.bf16.msra.mxu1 %v11443_v56  ;;  %10431 = vmatprep.subr.bf16.mxu0 %v11445_v58  ;;  %v12510_v60 = vld [vmem:[#allocation13] sm:$0xff]   ;;  %s9686_s20 = sshll.u32 %s12218_s9, 4  ;;  %s9687_s20 = int_to_ptr.vmem [resolvable:$true] %s9686_s20 }
  0xbb   :  { %242 = vadd.xlane.f32.xlu0 %v241_v8  ;;  %248 = vadd.xlane.f32.xlu1 %v247_v9  ;;  %s12140_s22 = scalar_lea.vmem %s9687_s20, 512  ;;  %p12145_p11 = scmp.lt.s32.totalorder %s9687_s20, %s9687_s20 }
  0xbc   :  { %10441 = vmatprep.subr.bf16.mxu1 %v11444_v57  ;;  %10432 = vmatpush3.bf16.msra.mxu0 %v11445_v58  ;;  %p12141_p10 = scmp.ne.s32.totalorder %s9687_s20, %s12140_s22  ;;  %p12146_p12 = scmp.lt.s32.totalorder %s12140_s22, %s12140_s22 }
  0xbd   :  { %10433 = vmatprep.subr.bf16.mxu0 %v11446_v59 }
  0xbe   :  { %10442 = vmatpush3.bf16.msra.mxu1 %v11444_v57  ;;  %p12147_p13 = por %p12146_p12, %p12145_p11 }
  0xbf   :  { %186 = vadd.xlane.f32.xlu0 %v185_v10  ;;  %189 = vadd.xlane.f32.xlu1 %v188_v11 }
  0xc0   :  { %10434 = vmatpush3.bf16.msra.mxu0 %v11446_v59  ;;  %p12148_p0 = pnand %p12147_p13, %p12141_p10 }
  0xc1   :  { %10447 = vmatprep.subr.bf16.mxu0 %v12510_v60 }
  0xc3   :  { %192 = vadd.xlane.f32.xlu0 %v191_v14  ;;  %195 = vadd.xlane.f32.xlu1 %v194_v15 }
 0x144   :  { %v240_v16 = vpop.xlane.xlu0 %239  ;;  %v246_v17 = vpop.xlane.xlu1 %245 }
 0x145   :  { %v250_v18 = vmul.f32 0.03125, %v240_v16  ;;  %v252_v19 = vmul.f32 0.03125, %v246_v17 }
 0x147   :  { %v12470_v20 = vsub.f32 %v180_v0, %v250_v18  ;;  %v12472_v21 = vsub.f32 %v182_v1, %v252_v19  ;;  %v290_v19 = vld [vmem:[#allocation7] sm:$0xff] }
 0x148   :  { %v243_v22 = vpop.xlane.xlu0 %242  ;;  %v249_v23 = vpop.xlane.xlu1 %248 }
 0x149   :  { %v251_v24 = vmul.f32 0.03125, %v243_v22  ;;  %v253_v25 = vmul.f32 0.03125, %v249_v23  ;;  %v258_v26 = vmul.f32 %v12470_v20, %v12470_v20  ;;  %v260_v27 = vmul.f32 %v12472_v21, %v12472_v21 }
 0x14b   :  { %v12478_v28 = vsub.f32 %v181_v2, %v251_v24  ;;  %v12480_v29 = vsub.f32 %v183_v5, %v253_v25  ;;  %v262_v30 = vsel %vm184_vm0, %v258_v26, 0.0  ;;  %v268_v33 = vsel %vm184_vm0, %v260_v27, 0.0 }
 0x14c   :  { %263 = vadd.xlane.f32.xlu0 %v262_v30  ;;  %v187_v31 = vpop.xlane.xlu0 %186  ;;  %v190_v32 = vpop.xlane.xlu1 %189  ;;  %v12513_v5 = vshrl.u32 %v292_v63, 7 }
 0x14d   :  { %v198_v34 = vmul.f32 0.03125, %v187_v31  ;;  %v259_v35 = vmul.f32 %v12478_v28, %v12478_v28  ;;  %v199_v36 = vmul.f32 0.03125, %v190_v32  ;;  %v261_v37 = vmul.f32 %v12480_v29, %v12480_v29 }
 0x14e   :  { %v12519_v16 = vsub.s32 2, %v12513_v5  ;;  %v12522_v24 = vsub.s32 1, %v12513_v5  ;;  %v12527_v32 = vsub.s32 3, %v12513_v5 }
 0x14f   :  { %v12488_v38 = vsub.f32 %v176_v6, %v198_v34  ;;  %v265_v39 = vsel %vm184_vm0, %v259_v35, 0.0  ;;  %v12491_v40 = vsub.f32 %v177_v7, %v199_v36  ;;  %v271_v42 = vsel %vm184_vm0, %v261_v37, 0.0 }
 0x150   :  { %266 = vadd.xlane.f32.xlu1 %v265_v39  ;;  %269 = vadd.xlane.f32.xlu0 %v268_v33  ;;  %v193_v41 = vpop.xlane.xlu0 %192  ;;  %v196_v43 = vpop.xlane.xlu1 %195  ;;  %v317_v31 = vrot.slane %v290_v19, %v12519_v16 }
 0x151   :  { %v200_v44 = vmul.f32 0.03125, %v193_v41  ;;  %v201_v45 = vmul.f32 0.03125, %v196_v43  ;;  %v206_v46 = vmul.f32 %v12488_v38, %v12488_v38  ;;  %v207_v47 = vmul.f32 %v12491_v40, %v12491_v40 }
 0x152   :  { %v325_v43 = vrot.slane %v290_v19, %v12527_v32 }
 0x153   :  { %v12498_v48 = vsub.f32 %v178_v12, %v200_v44  ;;  %v12500_v49 = vsub.f32 %v179_v13, %v201_v45  ;;  %v210_v50 = vsel %vm184_vm0, %v206_v46, 0.0  ;;  %v213_v51 = vsel %vm184_vm0, %v207_v47, 0.0  ;;  %v2604_v13 = vld [vmem:[#allocation7 + $0x8] sm:$0xff] }
 0x154   :  { %272 = vadd.xlane.f32.xlu1 %v271_v42  ;;  %211 = vadd.xlane.f32.xlu0 %v210_v50  ;;  %v12516_v12 = vsub.s32 0, %v12513_v5  ;;  %v2618_v36 = vrot.slane %v2604_v13, %v12522_v24 }
 0x155   :  { %v208_v52 = vmul.f32 %v12498_v48, %v12498_v48  ;;  %v209_v53 = vmul.f32 %v12500_v49, %v12500_v49 }
 0x156   :  { %v2610_v25 = vrot.slane %v2604_v13, %v12516_v12 }
 0x157   :  { %v216_v54 = vsel %vm184_vm0, %v208_v52, 0.0  ;;  %v219_v55 = vsel %vm184_vm0, %v209_v53, 0.0 }
 0x158   :  { %214 = vadd.xlane.f32.xlu1 %v213_v51  ;;  %217 = vadd.xlane.f32.xlu0 %v216_v54  ;;  %v2632_v54 = vrot.slane %v2604_v13, %v12519_v16 }
 0x15c   :  { %220 = vadd.xlane.f32.xlu1 %v219_v55  ;;  %v295_v55 = vrot.slane %v290_v19, %v12516_v12 }
 0x1d9   :  { %v264_v61 = vpop.xlane.xlu0 %263 }
 0x1da   :  { %v274_v62 = vmul.f32 0.03125, %v264_v61 }
 0x1dc   :  { %v278_v0 = vadd.f32 1e-05, %v274_v62 }
 0x1dd   :  { %v267_v1 = vpop.xlane.xlu1 %266  ;;  %v270_v2 = vpop.xlane.xlu0 %269 }
 0x1de   :  { %11555 = vrsqrt.f32 %v278_v0  ;;  %v275_v3 = vmul.f32 0.03125, %v267_v1  ;;  %v276_v4 = vmul.f32 0.03125, %v270_v2 }
 0x1e0   :  { %v279_v6 = vadd.f32 1e-05, %v275_v3  ;;  %v280_v7 = vadd.f32 1e-05, %v276_v4 }
 0x1e1   :  { %v273_v8 = vpop.xlane.xlu1 %272  ;;  %v212_v9 = vpop.xlane.xlu0 %211 }
 0x1e2   :  { %11557 = vrsqrt.f32 %v279_v6  ;;  %v277_v10 = vmul.f32 0.03125, %v273_v8  ;;  %v222_v11 = vmul.f32 0.03125, %v212_v9 }
 0x1e3   :  { %11559 = vrsqrt.f32 %v280_v7  ;;  %v2640_v7 = vrot.slane %v2604_v13, %v12527_v32 }
 0x1e4   :  { %v281_v14 = vadd.f32 1e-05, %v277_v10  ;;  %v226_v15 = vadd.f32 1e-05, %v222_v11 }
 0x1e5   :  { %v215_v17 = vpop.xlane.xlu1 %214  ;;  %v218_v18 = vpop.xlane.xlu0 %217 }
 0x1e6   :  { %11561 = vrsqrt.f32 %v281_v14  ;;  %v223_v22 = vmul.f32 0.03125, %v215_v17  ;;  %v224_v23 = vmul.f32 0.03125, %v218_v18 }
 0x1e7   :  { %11563 = vrsqrt.f32 %v226_v15 }
 0x1e8   :  { %v11556_v26 = vpop.eup %11555  ;;  %v227_v27 = vadd.f32 1e-05, %v223_v22  ;;  %v228_v30 = vadd.f32 1e-05, %v224_v23 }
 0x1e9   :  { %v286_v33 = vmul.f32 %v11556_v26, %v12470_v20  ;;  %v221_v34 = vpop.xlane.xlu1 %220 }
 0x1ea   :  { %11565 = vrsqrt.f32 %v227_v27  ;;  %v225_v35 = vmul.f32 0.03125, %v221_v34 }
 0x1eb   :  { %11567 = vrsqrt.f32 %v228_v30  ;;  %v2611_v37 = vmul.f32 %v2610_v25, %v286_v33  ;;  %v318_v44 = vmul.f32 %v317_v31, %v286_v33 }
 0x1ec   :  { %v11558_v39 = vpop.eup %11557  ;;  %v229_v41 = vadd.f32 1e-05, %v225_v35 }
 0x1ed   :  { %v11560_v42 = vpop.eup %11559  ;;  %v287_v45 = vmul.f32 %v11558_v39, %v12478_v28  ;;  %v2619_v47 = vadd.f32 %v2618_v36, %v2611_v37  ;;  %v326_v57 = vadd.f32 %v325_v43, %v318_v44 }
 0x1ee   :  { %v288_v46 = vmul.f32 %v11560_v42, %v12472_v21  ;;  %11569 = vrsqrt.f32 %v229_v41  ;;  %v303_v21 = vrot.slane %v290_v19, %v12522_v24 }
 0x1ef   :  { %v319_v20 = vmul.f32 %v317_v31, %v287_v45  ;;  %v2612_v50 = vmul.f32 %v2610_v25, %v287_v45  ;;  %v2623_v62 = vmul.f32 0.35355338, %v2619_v47 }
 0x1f0   :  { %v11562_v51 = vpop.eup %11561  ;;  %v320_v52 = vmul.f32 %v317_v31, %v288_v46  ;;  %v2613_v53 = vmul.f32 %v2610_v25, %v288_v46 }
 0x1f1   :  { %v11564_v56 = vpop.eup %11563  ;;  %v327_v58 = vadd.f32 %v325_v43, %v319_v20  ;;  %v289_v59 = vmul.f32 %v11562_v51, %v12480_v29  ;;  %v2620_v61 = vadd.f32 %v2618_v36, %v2612_v50  ;;  %v11448_v50 = vld [vmem:[#allocation13 + $0x8] sm:$0xff]   ;;  %v12216_v51 = vmov 0.0  }
 0x1f2   :  { %v234_v28 = vmul.f32 %v11564_v56, %v12488_v38  ;;  %v2621_v63 = vadd.f32 %v2618_v36, %v2613_v53  ;;  %v328_v6 = vadd.f32 %v325_v43, %v320_v52  ;;  %10455 = vmatprep.subr.bf16.mxu1 %v12216_v51 }
 0x1f3   :  { %v12539_v0 = vpack.c.bf16 %v327_v58, %v326_v57  ;;  %v321_v1 = vmul.f32 %v317_v31, %v289_v59  ;;  %v2614_v2 = vmul.f32 %v2610_v25, %v289_v59  ;;  %v2624_v3 = vmul.f32 0.35355338, %v2620_v61 }
 0x1f4   :  { %v11566_v4 = vpop.eup %11565  ;;  %v2633_v8 = vmul.f32 %v2632_v54, %v234_v28  ;;  %v296_v9 = vmul.f32 %v295_v55, %v234_v28  ;;  %v2625_v18 = vmul.f32 0.35355338, %v2621_v63 }
 0x1f5   :  { %v11568_v10 = vpop.eup %11567  ;;  %v329_v29 = vadd.f32 %v325_v43, %v321_v1  ;;  %v235_v11 = vmul.f32 %v11566_v4, %v12491_v40  ;;  %10443 = vmatprep.mubr.msk.bf16.mxu1 %vm184_vm0, %v12539_v0  ;;  %v12545_v38 = vpack.c.bf16 %v2624_v3, %v2623_v62  ;;  %v2622_v14 = vadd.f32 %v2618_v36, %v2614_v2 }
 0x1f6   :  { %v236_v15 = vmul.f32 %v11568_v10, %v12498_v48  ;;  %v304_v17 = vadd.f32 %v303_v21, %v296_v9  ;;  %v2641_v26 = vadd.f32 %v2640_v7, %v2633_v8 }
 0x1f7   :  { %v12548_v19 = vpack.c.bf16 %v329_v29, %v328_v6  ;;  %v2634_v22 = vmul.f32 %v2632_v54, %v235_v11  ;;  %v297_v13 = vmul.f32 %v295_v55, %v235_v11  ;;  %v2626_v23 = vmul.f32 0.35355338, %v2622_v14 }
 0x1f8   :  { %v11570_v25 = vpop.eup %11569  ;;  %v2635_v27 = vmul.f32 %v2632_v54, %v236_v15  ;;  %v298_v30 = vmul.f32 %v295_v55, %v236_v15  ;;  %v308_v48 = vmul.f32 0.35355338, %v304_v17 }
 0x1f9   :  { %v2642_v40 = vadd.f32 %v2640_v7, %v2634_v22  ;;  %v237_v31 = vmul.f32 %v11570_v25, %v12500_v49  ;;  %10444 = vmatmul.mubr.msk.bf16.vlgmr.msra.gmra.mrb[0].mxu1 %vm184_vm0, %v12548_v19  ;;  %v305_v33 = vadd.f32 %v303_v21, %v297_v13  ;;  %v12553_v34 = vpack.c.bf16 %v2626_v23, %v2625_v18 }
 0x1fa   :  { %v306_v35 = vadd.f32 %v303_v21, %v298_v30  ;;  %v2643_v42 = vadd.f32 %v2640_v7, %v2635_v27  ;;  %10457 = vmatprep.mubr.msk.bf16.mxu1 %vm12217_vm1, %v12216_v51 }
 0x1fb   :  { %v12555_v36 = vpack.c.bf16 %v2642_v40, %v2641_v26  ;;  %v2636_v37 = vmul.f32 %v2632_v54, %v237_v31  ;;  %v309_v39 = vmul.f32 0.35355338, %v305_v33  ;;  %v299_v41 = vmul.f32 %v295_v55, %v237_v31 }
 0x1fc   :  { %v310_v49 = vmul.f32 0.35355338, %v306_v35 }
 0x1fd   :  { %v2644_v43 = vadd.f32 %v2640_v7, %v2636_v37  ;;  %v12557_v44 = vpack.c.bf16 %v309_v39, %v308_v48  ;;  %v307_v45 = vadd.f32 %v303_v21, %v299_v41 }
 0x1ff   :  { %v12559_v46 = vpack.c.bf16 %v2644_v43, %v2643_v42  ;;  %10435 = vmatprep.mubr.msk.bf16.mxu0 %vm184_vm0, %v12557_v44  ;;  %v311_v47 = vmul.f32 0.35355338, %v307_v45 }
 0x201   :  { %v12563_v20 = vpack.c.bf16 %v311_v47, %v310_v49 }
 0x203   :  { %10436 = vmatmul.mubr.msk.bf16.vlgmr.msra.gmra.mrb[0].mxu0 %vm184_vm0, %v12563_v20 }
 0x204   :  { %10448 = vmatpush3.bf16.msra.mxu0 %v12510_v60  ;;  %10451 = vmatprep.mubr.msk.bf16.mxu0 %vm184_vm0, %v12539_v0 }
 0x205   :  { %10449 = vmatprep.subr.bf16.mxu0 %v11448_v50 }
 0x208   :  { %10450 = vmatpush3.bf16.msra.mxu0 %v11448_v50 }
 0x209   :  { %10461 = vmatprep.subr.bf16.mxu0 %v12216_v51 }
 0x20b   :  { %10452 = vmatmul.mubr.msk.bf16.vlgmr.msra.gmra.mrb[4].mxu0 %vm184_vm0, %v12548_v19 }
 0x20c   :  { %10463 = vmatprep.mubr.msk.bf16.mxu0 %vm12217_vm1, %v12216_v51 }
 0x2cc   :  { %v10445_v60 = vpop.f32.mrb[0].mxu1 }
 0x2cd   :  { %v459_v52 = vpop.f32.mrb[1].mxu1 }
 0x2ce   :  { %v10446_v53 = vpop.f32.mrb[2].mxu1 }
 0x2cf   :  { %v542_v54 = vpack.c.bf16 %v10446_v53, %v10445_v60  ;;  %v462_v55 = vpop.f32.mrb[3].mxu1  ;;  %v11449_v53 = vld [vmem:[#allocation11 + $0x10] sm:$0xff]  }
 0x2d0   :  { %v541_v56 = vpack.c.bf16 %v462_v55, %v459_v52 }
 0x2d1   :  { %v597_v57 = vsel %vm545_vm2, %v542_v54, 0  ;;  %v11450_v54 = vld [vmem:[#allocation10 + $0x10] sm:$0xff]  }
 0x2d2   :  { %10462 = vmatpush3.bf16.xpose.msra.mxu0 %v597_v57  ;;  %v550_v58 = vsel %vm545_vm2, %v541_v56, 0 }
 0x2d3   :  { %10456 = vmatpush3.bf16.xpose.msra.mxu1 %v550_v58  ;;  %10473 = vmatprep.subr.bf16.mxu0 %v12216_v51 }
 0x2d4   :  { %10467 = vmatprep.subr.bf16.mxu1 %v12216_v51 }
 0x2d6   :  { %v10437_v59 = vpop.f32.mrb[0].mxu0 }
 0x2d7   :  { %v388_v61 = vpop.f32.mrb[1].mxu0 }
 0x2d8   :  { %v10438_v28 = vpop.f32.mrb[2].mxu0 }
 0x2d9   :  { %v540_v21 = vpack.c.bf16 %v10438_v28, %v10437_v59  ;;  %v391_v62 = vpop.f32.mrb[3].mxu0 }
 0x2da   :  { %v539_v63 = vpack.c.bf16 %v391_v62, %v388_v61 }
 0x2db   :  { %10464 = vmatmul.mubr.msk.bf16.vlgmr.msra.gmra.mrb[8].mxu0 %vm545_vm2, %v540_v21 }
 0x2dc   :  { %10458 = vmatmul.mubr.msk.bf16.vlgmr.msra.gmra.mrb[4].mxu1 %vm545_vm2, %v539_v63  ;;  %10475 = vmatprep.mubr.msk.bf16.mxu0 %vm12217_vm1, %v12216_v51 }
 0x2dd   :  { %10469 = vmatprep.mubr.msk.bf16.mxu1 %vm12217_vm1, %v12216_v51 }
 0x2de   :  { %v10453_v1 = vpop.f32.mrb[4].mxu0 }
 0x2df   :  { %v524_v2 = vpop.f32.mrb[5].mxu0 }
 0x2e0   :  { %v10454_v3 = vpop.f32.mrb[6].mxu0 }
 0x2e1   :  { %v544_v4 = vpack.c.bf16 %v10454_v3, %v10453_v1  ;;  %v527_v6 = vpop.f32.mrb[7].mxu0  ;;  %v11451_v1 = vld [vmem:[#allocation11 + $0x18] sm:$0xff]  }
 0x2e2   :  { %v543_v7 = vpack.c.bf16 %v527_v6, %v524_v2 }
 0x2e3   :  { %10474 = vmatpush3.bf16.msra.mxu0 %v544_v4 }
 0x2e4   :  { %10468 = vmatpush3.bf16.msra.mxu1 %v543_v7  ;;  %10487 = vmatprep.subr.bf16.mxu0 %v11449_v53  ;;  %v11452_v7 = vld [vmem:[#allocation10 + $0x18] sm:$0xff]  }
 0x2e5   :  { %10479 = vmatprep.subr.bf16.mxu1 %v11450_v54 }
 0x3ae   :  { %v633_v8 = vpop.f32.mrb[8].mxu0 }
 0x3af   :  { %v586_v9 = vpop.f32.mrb[4].mxu1  ;;  %v10465_v10 = vpop.f32.mrb[9].mxu0  ;;  %v647_v29 = vsel %vm640_vm3, %v633_v8, -inf }
 0x3b0   :  { %v10459_v11 = vpop.f32.mrb[5].mxu1  ;;  %648 = vmax.xlane.f32.xlu0 %v647_v29  ;;  %v636_v14 = vpop.f32.mrb[10].mxu0  ;;  %v641_v13 = vsel %vm640_vm3, %v586_v9, -inf }
 0x3b1   :  { %v589_v15 = vpop.f32.mrb[6].mxu1  ;;  %v10466_v17 = vpop.f32.mrb[11].mxu0  ;;  %v650_v18 = vsel %vm640_vm3, %v636_v14, -inf }
 0x3b2   :  { %v10460_v22 = vpop.f32.mrb[7].mxu1  ;;  %651 = vmax.xlane.f32.xlu1 %v650_v18  ;;  %v644_v23 = vsel %vm640_vm3, %v589_v15, -inf }
 0x3b4   :  { %642 = vmax.xlane.f32.xlu0 %v641_v13 }
 0x3b6   :  { %645 = vmax.xlane.f32.xlu1 %v644_v23 }
 0x43d   :  { %v649_v25 = vpop.xlane.xlu0 %648 }
 0x43e   :  { %v655_v26 = vsub.f32 %v633_v8, %v649_v25  ;;  %v11453_v8 = vld [vmem:[#allocation13 + $0x10] sm:$0xff]  }
 0x43f   :  { %v652_v27 = vpop.xlane.xlu1 %651 }
 0x440   :  { %v661_v30 = vmul.f32 1.442695, %v655_v26  ;;  %v656_v40 = vsub.f32 %v636_v14, %v652_v27 }
 0x441   :  { %v643_v31 = vpop.xlane.xlu0 %642 }
 0x442   :  { %11571 = vpow2.f32 %v661_v30  ;;  %v663_v33 = vmul.f32 1.442695, %v656_v40  ;;  %v653_v48 = vsub.f32 %v586_v9, %v643_v31  ;;  %v11454_v9 = vld [vmem:[#allocation13 + $0x18] sm:$0xff]  }
 0x443   :  { %v646_v35 = vpop.xlane.xlu1 %645 }
 0x444   :  { %11573 = vpow2.f32 %v663_v33  ;;  %v657_v37 = vmul.f32 1.442695, %v653_v48  ;;  %v654_v39 = vsub.f32 %v589_v15, %v646_v35 }
 0x446   :  { %11575 = vpow2.f32 %v657_v37  ;;  %v659_v41 = vmul.f32 1.442695, %v654_v39 }
 0x448   :  { %11577 = vpow2.f32 %v659_v41 }
 0x44c   :  { %v11572_v42 = vpop.eup %11571 }
 0x44d   :  { %v671_v43 = vsel %vm640_vm3, %v11572_v42, 0.0 }
 0x44e   :  { %v11574_v45 = vpop.eup %11573  ;;  %672 = vadd.xlane.f32.xlu0 %v671_v43 }
 0x44f   :  { %v674_v49 = vsel %vm640_vm3, %v11574_v45, 0.0 }
 0x450   :  { %v11576_v47 = vpop.eup %11575  ;;  %675 = vadd.xlane.f32.xlu1 %v674_v49 }
 0x451   :  { %v665_v50 = vsel %vm640_vm3, %v11576_v47, 0.0 }
 0x452   :  { %v11578_v60 = vpop.eup %11577  ;;  %666 = vadd.xlane.f32.xlu0 %v665_v50 }
 0x453   :  { %v668_v52 = vsel %vm640_vm3, %v11578_v60, 0.0 }
 0x454   :  { %669 = vadd.xlane.f32.xlu1 %v668_v52 }
 0x4db   :  { %v673_v55 = vpop.xlane.xlu0 %672 }
 0x4dc   :  { %11579 = vrcp.f32 %v673_v55 }
 0x4dd   :  { %v676_v56 = vpop.xlane.xlu1 %675 }
 0x4de   :  { %11581 = vrcp.f32 %v676_v56 }
 0x4df   :  { %v667_v57 = vpop.xlane.xlu0 %666 }
 0x4e0   :  { %11583 = vrcp.f32 %v667_v57 }
 0x4e1   :  { %v670_v58 = vpop.xlane.xlu1 %669 }
 0x4e2   :  { %11585 = vrcp.f32 %v670_v58 }
 0x4e6   :  { %v11580_v59 = vpop.eup %11579 }
 0x4e7   :  { %v683_v28 = vmul.f32 %v11580_v59, %v11572_v42 }
 0x4e8   :  { %v11582_v61 = vpop.eup %11581 }
 0x4e9   :  { %v684_v21 = vmul.f32 %v11582_v61, %v11574_v45 }
 0x4ea   :  { %v11584_v62 = vpop.eup %11583 }
 0x4eb   :  { %v686_v63 = vpack.c.bf16 %v684_v21, %v683_v28  ;;  %v681_v3 = vmul.f32 %v11584_v62, %v11576_v47 }
 0x4ec   :  { %v11586_v2 = vpop.eup %11585 }
 0x4ed   :  { %v682_v4 = vmul.f32 %v11586_v2, %v11578_v60  ;;  %10476 = vmatmul.mubr.msk.bf16.vlgmr.msra.gmra.mrb[12].mxu0 %vm640_vm3, %v686_v63 }
 0x4ee   :  { %10488 = vmatpush3.bf16.msra.mxu0 %v11449_v53  ;;  %10491 = vmatprep.mubr.msk.bf16.mxu0 %vm184_vm0, %v12539_v0 }
 0x4ef   :  { %v685_v6 = vpack.c.bf16 %v682_v4, %v681_v3  ;;  %10489 = vmatprep.subr.bf16.mxu0 %v11451_v1 }
 0x4f1   :  { %10470 = vmatmul.mubr.msk.bf16.vlgmr.msra.gmra.mrb[8].mxu1 %vm640_vm3, %v685_v6 }
 0x4f2   :  { %10480 = vmatpush3.bf16.msra.mxu1 %v11450_v54  ;;  %10483 = vmatprep.mubr.msk.bf16.mxu1 %vm184_vm0, %v12557_v44 }
 0x4f3   :  { %10490 = vmatpush3.bf16.msra.mxu0 %v11451_v1  ;;  %10481 = vmatprep.subr.bf16.mxu1 %v11452_v7 }
 0x4f4   :  { %10503 = vmatprep.subr.bf16.mxu0 %v12216_v51 }
 0x4f6   :  { %10492 = vmatmul.mubr.msk.bf16.vlgmr.msra.gmra.mrb[16].mxu0 %vm184_vm0, %v12548_v19  ;;  %10482 = vmatpush3.bf16.msra.mxu1 %v11452_v7 }
 0x4f7   :  { %10495 = vmatprep.subr.bf16.mxu1 %v11453_v8  ;;  %10505 = vmatprep.mubr.msk.bf16.mxu0 %vm12217_vm1, %v12216_v51 }
 0x4f9   :  { %10484 = vmatmul.mubr.msk.bf16.vlgmr.msra.gmra.mrb[12].mxu1 %vm184_vm0, %v12563_v20 }
 0x4fa   :  { %10496 = vmatpush3.bf16.msra.mxu1 %v11453_v8  ;;  %10499 = vmatprep.mubr.msk.bf16.mxu1 %vm184_vm0, %v12539_v0 }
 0x4fb   :  { %10497 = vmatprep.subr.bf16.mxu1 %v11454_v9 }
 0x4fe   :  { %10498 = vmatpush3.bf16.msra.mxu1 %v11454_v9 }
 0x4ff   :  { %10509 = vmatprep.subr.bf16.mxu1 %v12216_v51 }
 0x501   :  { %10500 = vmatmul.mubr.msk.bf16.vlgmr.msra.gmra.mrb[16].mxu1 %vm184_vm0, %v12548_v19 }
 0x502   :  { %10511 = vmatprep.mubr.msk.bf16.mxu1 %vm12217_vm1, %v12216_v51 }
 0x5c0   :  { %v12616_v10 = vpop.f32.mrb[12].mxu0 }
 0x5c1   :  { %v10477_v29 = vpop.f32.mrb[13].mxu0 }
 0x5c2   :  { %v12618_v11 = vpop.f32.mrb[14].mxu0 }
 0x5c3   :  { %v776_v14 = vpack.c.bf16 %v12618_v11, %v12616_v10  ;;  %v10478_v15 = vpop.f32.mrb[15].mxu0 }
 0x5c4   :  { %v12622_v17 = vpop.f32.mrb[8].mxu1 }
 0x5c5   :  { %v10471_v18 = vpop.f32.mrb[9].mxu1 }
 0x5c6   :  { %v12624_v22 = vpop.f32.mrb[10].mxu1 }
 0x5c7   :  { %v775_v13 = vpack.c.bf16 %v12624_v22, %v12622_v17  ;;  %v10472_v23 = vpop.f32.mrb[11].mxu1 }
 0x5c9   :  { %v10493_v25 = vpop.f32.mrb[16].mxu0 }
 0x5ca   :  { %v895_v26 = vpop.f32.mrb[17].mxu0 }
 0x5cb   :  { %v10494_v27 = vpop.f32.mrb[18].mxu0 }
 0x5cc   :  { %v979_v30 = vpack.c.bf16 %v10494_v27, %v10493_v25  ;;  %v898_v40 = vpop.f32.mrb[19].mxu0  ;;  %v10485_v31 = vpop.f32.mrb[12].mxu1 }
 0x5cd   :  { %v978_v33 = vpack.c.bf16 %v898_v40, %v895_v26  ;;  %v829_v48 = vpop.f32.mrb[13].mxu1 }
 0x5ce   :  { %v1033_v35 = vsel %vm545_vm2, %v979_v30, 0  ;;  %v10486_v37 = vpop.f32.mrb[14].mxu1 }
 0x5cf   :  { %v986_v39 = vsel %vm545_vm2, %v978_v33, 0  ;;  %v977_v41 = vpack.c.bf16 %v10486_v37, %v10485_v31  ;;  %10510 = vmatpush3.bf16.xpose.msra.mxu1 %v1033_v35  ;;  %v832_v42 = vpop.f32.mrb[15].mxu1  ;;  %v11455_v35 = vld [vmem:[#allocation10 + $0x20] sm:$0xff]  }
 0x5d0   :  { %v976_v43 = vpack.c.bf16 %v832_v42, %v829_v48  ;;  %10504 = vmatpush3.bf16.xpose.msra.mxu0 %v986_v39  ;;  %10521 = vmatprep.subr.bf16.mxu1 %v12216_v51 }
 0x5d1   :  { %10515 = vmatprep.subr.bf16.mxu0 %v12216_v51 }
 0x5d4   :  { %v10501_v45 = vpop.f32.mrb[16].mxu1 }
 0x5d5   :  { %v961_v49 = vpop.f32.mrb[17].mxu1 }
 0x5d6   :  { %10512 = vmatmul.mubr.msk.bf16.vlgmr.msra.gmra.mrb[20].mxu1 %vm545_vm2, %v977_v41  ;;  %v10502_v47 = vpop.f32.mrb[18].mxu1 }
 0x5d7   :  { %v981_v50 = vpack.c.bf16 %v10502_v47, %v10501_v45  ;;  %10506 = vmatmul.mubr.msk.bf16.vlgmr.msra.gmra.mrb[20].mxu0 %vm545_vm2, %v976_v43  ;;  %v964_v60 = vpop.f32.mrb[19].mxu1  ;;  %10523 = vmatprep.mubr.msk.bf16.mxu1 %vm12217_vm1, %v12216_v51 }
 0x5d8   :  { %v980_v52 = vpack.c.bf16 %v964_v60, %v961_v49  ;;  %10517 = vmatprep.mubr.msk.bf16.mxu0 %vm12217_vm1, %v12216_v51 }
 0x5d9   :  { %10522 = vmatpush3.bf16.msra.mxu1 %v981_v50 }
 0x5da   :  { %10516 = vmatpush3.bf16.msra.mxu0 %v980_v52  ;;  %10539 = vmatprep.subr.bf16.mxu1 %v11455_v35 }
 0x6a9   :  { %v1069_v53 = vpop.f32.mrb[20].mxu1 }
 0x6aa   :  { %v1022_v54 = vpop.f32.mrb[20].mxu0  ;;  %v10513_v55 = vpop.f32.mrb[21].mxu1  ;;  %v1082_v62 = vsel %vm640_vm3, %v1069_v53, -inf }
 0x6ab   :  { %v10507_v56 = vpop.f32.mrb[21].mxu0  ;;  %v1072_v57 = vpop.f32.mrb[22].mxu1  ;;  %v1076_v58 = vsel %vm640_vm3, %v1022_v54, -inf }
 0x6ac   :  { %1077 = vmax.xlane.f32.xlu0 %v1076_v58  ;;  %v1025_v59 = vpop.f32.mrb[22].mxu0  ;;  %v10514_v61 = vpop.f32.mrb[23].mxu1  ;;  %v1085_v63 = vsel %vm640_vm3, %v1072_v57, -inf  ;;  %v11456_v56 = vld [vmem:[#allocation10 + $0x28] sm:$0xff]  }
 0x6ad   :  { %v10508_v28 = vpop.f32.mrb[23].mxu0  ;;  %v1079_v21 = vsel %vm640_vm3, %v1025_v59, -inf  ;;  %v11458_v58 = vld [vmem:[#allocation11 + $0x28] sm:$0xff]  }
 0x6ae   :  { %1080 = vmax.xlane.f32.xlu1 %v1079_v21  ;;  %v777_v28 = vld [vmem:[#allocation14] sm:$0xf] }
 0x6b0   :  { %1083 = vmax.xlane.f32.xlu0 %v1082_v62 }
 0x6b2   :  { %1086 = vmax.xlane.f32.xlu1 %v1085_v63 }
 0x739   :  { %v1078_v1 = vpop.xlane.xlu0 %1077 }
 0x73a   :  { %v1088_v2 = vsub.f32 %v1022_v54, %v1078_v1 }
 0x73b   :  { %v1081_v3 = vpop.xlane.xlu1 %1080 }
 0x73c   :  { %v1092_v4 = vmul.f32 1.442695, %v1088_v2  ;;  %v1089_v6 = vsub.f32 %v1025_v59, %v1081_v3  ;;  %v1213_v59 = vld [vmem:[#allocation14 + $0x4] sm:$0xf] }
 0x73d   :  { %v1084_v7 = vpop.xlane.xlu0 %1083  ;;  %11407 = vmatprep.subr.msk.bf16.mxu0 %vm1220_vm4, %v1213_v59  ;;  %v1222_v61 = vsel %vm1220_vm4, %v1213_v59, 0 }
 0x73e   :  { %11587 = vpow2.f32 %v1092_v4  ;;  %v1094_v8 = vmul.f32 1.442695, %v1089_v6  ;;  %v1090_v9 = vsub.f32 %v1069_v53, %v1084_v7 }
 0x73f   :  { %v1087_v29 = vpop.xlane.xlu1 %1086 }
 0x740   :  { %11589 = vpow2.f32 %v1094_v8  ;;  %v1096_v15 = vmul.f32 1.442695, %v1090_v9  ;;  %v1091_v18 = vsub.f32 %v1072_v57, %v1087_v29  ;;  %v11457_v57 = vld [vmem:[#allocation11 + $0x20] sm:$0xff]   ;;  %v1280_v9 = vsel %vm1220_vm4, %v777_v28, 0 }
 0x741   :  { %v11459_v29 = vld [vmem:[#allocation13 + $0x20] sm:$0xff]  }
 0x742   :  { %11591 = vpow2.f32 %v1096_v15  ;;  %v1098_v23 = vmul.f32 1.442695, %v1091_v18 }
 0x744   :  { %11593 = vpow2.f32 %v1098_v23 }
 0x748   :  { %v11588_v25 = vpop.eup %11587 }
 0x749   :  { %v1100_v26 = vsel %vm640_vm3, %v11588_v25, 0.0 }
 0x74a   :  { %v11590_v27 = vpop.eup %11589  ;;  %1101 = vadd.xlane.f32.xlu0 %v1100_v26 }
 0x74b   :  { %v1103_v30 = vsel %vm640_vm3, %v11590_v27, 0.0 }
 0x74c   :  { %v11592_v40 = vpop.eup %11591  ;;  %1104 = vadd.xlane.f32.xlu1 %v1103_v30  ;;  %v11460_v30 = vld [vmem:[#allocation13 + $0x28] sm:$0xff]  }
 0x74d   :  { %v1106_v31 = vsel %vm640_vm3, %v11592_v40, 0.0 }
 0x74e   :  { %v11594_v33 = vpop.eup %11593  ;;  %1107 = vadd.xlane.f32.xlu0 %v1106_v31 }
 0x74f   :  { %v1109_v48 = vsel %vm640_vm3, %v11594_v33, 0.0 }
 0x750   :  { %1110 = vadd.xlane.f32.xlu1 %v1109_v48 }
 0x7d7   :  { %v1102_v37 = vpop.xlane.xlu0 %1101 }
 0x7d8   :  { %11595 = vrcp.f32 %v1102_v37 }
 0x7d9   :  { %v1105_v39 = vpop.xlane.xlu1 %1104 }
 0x7da   :  { %11597 = vrcp.f32 %v1105_v39 }
 0x7db   :  { %v1108_v41 = vpop.xlane.xlu0 %1107 }
 0x7dc   :  { %11599 = vrcp.f32 %v1108_v41 }
 0x7dd   :  { %v1111_v42 = vpop.xlane.xlu1 %1110 }
 0x7de   :  { %11601 = vrcp.f32 %v1111_v42 }
 0x7e2   :  { %v11596_v43 = vpop.eup %11595 }
 0x7e3   :  { %v1116_v49 = vmul.f32 %v11596_v43, %v11588_v25 }
 0x7e4   :  { %v11598_v45 = vpop.eup %11597 }
 0x7e5   :  { %v1117_v47 = vmul.f32 %v11598_v45, %v11590_v27 }
 0x7e6   :  { %v11600_v50 = vpop.eup %11599 }
 0x7e7   :  { %v1120_v60 = vpack.c.bf16 %v1117_v47, %v1116_v49  ;;  %v1118_v53 = vmul.f32 %v11600_v50, %v11592_v40 }
 0x7e8   :  { %v11602_v52 = vpop.eup %11601 }
 0x7e9   :  { %v1119_v54 = vmul.f32 %v11602_v52, %v11594_v33  ;;  %10518 = vmatmul.mubr.msk.bf16.vlgmr.msra.gmra.mrb[24].mxu0 %vm640_vm3, %v1120_v60 }
 0x7ea   :  { %10528 = vmatpush3.bf16.msra.mxu0 %v1222_v61 }
 0x7eb   :  { %v1121_v55 = vpack.c.bf16 %v1119_v54, %v1118_v53  ;;  %11408 = vmatprep.subr.msk.bf16.mxu0 %vm1220_vm4, %v777_v28 }
 0x7ed   :  { %10524 = vmatmul.mubr.msk.bf16.vlgmr.msra.gmra.mrb[24].mxu1 %vm640_vm3, %v1121_v55 }
 0x7ee   :  { %10540 = vmatpush3.bf16.msra.mxu1 %v11455_v35  ;;  %10543 = vmatprep.mubr.msk.bf16.mxu1 %vm184_vm0, %v12557_v44 }
 0x7ef   :  { %10541 = vmatprep.subr.bf16.mxu1 %v11456_v56 }
 0x7f2   :  { %10542 = vmatpush3.bf16.msra.mxu1 %v11456_v56 }
 0x7f3   :  { %10547 = vmatprep.subr.bf16.mxu1 %v11457_v57 }
 0x7f5   :  { %10544 = vmatmul.mubr.msk.bf16.vlgmr.msra.gmra.mrb[28].mxu1 %vm184_vm0, %v12563_v20 }
 0x7f6   :  { %10548 = vmatpush3.bf16.msra.mxu1 %v11457_v57  ;;  %10551 = vmatprep.mubr.msk.bf16.mxu1 %vm184_vm0, %v12539_v0 }
 0x7f7   :  { %10549 = vmatprep.subr.bf16.mxu1 %v11458_v58 }
 0x7fa   :  { %10550 = vmatpush3.bf16.msra.mxu1 %v11458_v58 }
 0x7fb   :  { %10563 = vmatprep.subr.bf16.mxu1 %v12216_v51 }
 0x7fd   :  { %10552 = vmatmul.mubr.msk.bf16.vlgmr.msra.gmra.mrb[32].mxu1 %vm184_vm0, %v12548_v19 }
 0x7fe   :  { %10565 = vmatprep.mubr.msk.bf16.mxu1 %vm12217_vm1, %v12216_v51 }
 0x8bc   :  { %v1159_v21 = vpop.f32.mrb[24].mxu0 }
 0x8bd   :  { %v10519_v62 = vpop.f32.mrb[25].mxu0 }
 0x8be   :  { %v1162_v63 = vpop.f32.mrb[26].mxu0 }
 0x8bf   :  { %v1210_v1 = vpack.c.bf16 %v1162_v63, %v1159_v21  ;;  %v10520_v2 = vpop.f32.mrb[27].mxu0 }
 0x8c0   :  { %v1203_v3 = vpop.f32.mrb[24].mxu1 }
 0x8c1   :  { %v10525_v4 = vpop.f32.mrb[25].mxu1  ;;  %10529 = vmatprep.mubr.msk.bf16.mxu0 %vm545_vm2, %v1210_v1 }
 0x8c2   :  { %v1206_v6 = vpop.f32.mrb[26].mxu1 }
 0x8c3   :  { %v1211_v7 = vpack.c.bf16 %v1206_v6, %v1203_v3  ;;  %v10526_v8 = vpop.f32.mrb[27].mxu1 }
 0x8c5   :  { %10530 = vmatmul.mubr.msk.bf16.vlgmr.msra.gmra.mrb[28].mxu0 %vm545_vm2, %v1211_v7 }
 0x8c6   :  { %10535 = vmatprep.mubr.msk.bf16.mxu0 %vm545_vm2, %v775_v13  ;;  %10534 = vmatpush3.bf16.msra.mxu0 %v1280_v9 }
 0x8c7   :  { %10555 = vmatprep.subr.bf16.mxu0 %v11459_v29 }
 0x8c8   :  { %v10545_v15 = vpop.f32.mrb[28].mxu1 }
 0x8c9   :  { %v1382_v18 = vpop.f32.mrb[29].mxu1 }
 0x8ca   :  { %v10546_v23 = vpop.f32.mrb[30].mxu1 }
 0x8cb   :  { %v1530_v25 = vpack.c.bf16 %v10546_v23, %v10545_v15  ;;  %v1385_v26 = vpop.f32.mrb[31].mxu1 }
 0x8cc   :  { %v1529_v27 = vpack.c.bf16 %v1385_v26, %v1382_v18 }
 0x8d0   :  { %v10553_v40 = vpop.f32.mrb[32].mxu1 }
 0x8d1   :  { %10536 = vmatmul.mubr.msk.bf16.vlgmr.msra.gmra.mrb[28].mxu0 %vm545_vm2, %v776_v14  ;;  %v1448_v31 = vpop.f32.mrb[33].mxu1 }
 0x8d2   :  { %10556 = vmatpush3.bf16.msra.mxu0 %v11459_v29  ;;  %v10554_v17 = vpop.f32.mrb[34].mxu1  ;;  %10559 = vmatprep.mubr.msk.bf16.mxu0 %vm184_vm0, %v12539_v0 }
 0x8d3   :  { %v1532_v22 = vpack.c.bf16 %v10554_v17, %v10553_v40  ;;  %v1451_v13 = vpop.f32.mrb[35].mxu1  ;;  %10557 = vmatprep.subr.bf16.mxu0 %v11460_v30 }
 0x8d4   :  { %v1531_v33 = vpack.c.bf16 %v1451_v13, %v1448_v31 }
 0x8d5   :  { %v1586_v10 = vsel %vm545_vm2, %v1532_v22, 0 }
 0x8d6   :  { %v1539_v48 = vsel %vm545_vm2, %v1531_v33, 0  ;;  %10558 = vmatpush3.bf16.msra.mxu0 %v11460_v30 }
 0x8d7   :  { %10564 = vmatpush3.bf16.xpose.msra.mxu1 %v1539_v48  ;;  %10569 = vmatprep.subr.bf16.mxu0 %v12216_v51  ;;  %v11462_v48 = vld [vmem:[#allocation10 + $0x38] sm:$0xff]  }
 0x8d8   :  { %10575 = vmatprep.subr.bf16.mxu1 %v12216_v51 }
 0x8d9   :  { %10560 = vmatmul.mubr.msk.bf16.vlgmr.msra.gmra.mrb[32].mxu0 %vm184_vm0, %v12548_v19 }
 0x8da   :  { %10571 = vmatprep.mubr.msk.bf16.mxu0 %vm12217_vm1, %v12216_v51 }
 0x8de   :  { %10566 = vmatmul.mubr.msk.bf16.vlgmr.msra.gmra.mrb[36].mxu1 %vm545_vm2, %v1529_v27 }
 0x8df   :  { %10570 = vmatpush3.bf16.xpose.msra.mxu0 %v1586_v10  ;;  %10577 = vmatprep.mubr.msk.bf16.mxu1 %vm12217_vm1, %v12216_v51 }
 0x8e0   :  { %10581 = vmatprep.subr.bf16.mxu0 %v12216_v51 }
 0x8e6   :  { %10572 = vmatmul.mubr.msk.bf16.vlgmr.msra.gmra.mrb[36].mxu0 %vm545_vm2, %v1530_v25  ;;  %v11461_v25 = vld [vmem:[#allocation10 + $0x30] sm:$0xff]  }
 0x8e7   :  { %10583 = vmatprep.mubr.msk.bf16.mxu0 %vm12217_vm1, %v12216_v51 }
 0x9ac   :  { %v10561_v11 = vpop.f32.mrb[32].mxu0 }
 0x9ad   :  { %v1514_v14 = vpop.f32.mrb[33].mxu0 }
 0x9ae   :  { %v10562_v35 = vpop.f32.mrb[34].mxu0 }
 0x9af   :  { %v1534_v37 = vpack.c.bf16 %v10562_v35, %v10561_v11  ;;  %v1517_v39 = vpop.f32.mrb[35].mxu0  ;;  %v11463_v11 = vld [vmem:[#allocation11 + $0x30] sm:$0xff]  }
 0x9b0   :  { %v1533_v41 = vpack.c.bf16 %v1517_v39, %v1514_v14 }
 0x9b1   :  { %v1575_v42 = vpop.f32.mrb[36].mxu1  ;;  %10582 = vmatpush3.bf16.msra.mxu0 %v1534_v37 }
 0x9b2   :  { %v10567_v43 = vpop.f32.mrb[37].mxu1  ;;  %10576 = vmatpush3.bf16.msra.mxu1 %v1533_v41  ;;  %v1629_v45 = vsel %vm640_vm3, %v1575_v42, -inf  ;;  %v11464_v41 = vld [vmem:[#allocation11 + $0x38] sm:$0xff]  }
 0x9b3   :  { %1630 = vmax.xlane.f32.xlu0 %v1629_v45  ;;  %v1578_v49 = vpop.f32.mrb[38].mxu1  ;;  %10593 = vmatprep.subr.bf16.mxu1 %v11461_v25 }
 0x9b4   :  { %v10568_v47 = vpop.f32.mrb[39].mxu1  ;;  %v1632_v50 = vsel %vm640_vm3, %v1578_v49, -inf }
 0x9b5   :  { %1633 = vmax.xlane.f32.xlu1 %v1632_v50 }
 0x9b9   :  { %v1622_v60 = vpop.f32.mrb[36].mxu0 }
 0x9ba   :  { %v10573_v52 = vpop.f32.mrb[37].mxu0  ;;  %v1635_v53 = vsel %vm640_vm3, %v1622_v60, -inf }
 0x9bb   :  { %1636 = vmax.xlane.f32.xlu0 %v1635_v53  ;;  %v1625_v54 = vpop.f32.mrb[38].mxu0 }
 0x9bc   :  { %v10574_v55 = vpop.f32.mrb[39].mxu0  ;;  %v1638_v56 = vsel %vm640_vm3, %v1625_v54, -inf }
 0x9bd   :  { %1639 = vmax.xlane.f32.xlu1 %v1638_v56 }
 0xa40   :  { %v1631_v57 = vpop.xlane.xlu0 %1630 }
 0xa41   :  { %v1641_v58 = vsub.f32 %v1575_v42, %v1631_v57 }
 0xa42   :  { %v1634_v59 = vpop.xlane.xlu1 %1633 }
 0xa43   :  { %v1645_v61 = vmul.f32 1.442695, %v1641_v58  ;;  %v1642_v28 = vsub.f32 %v1578_v49, %v1634_v59 }
 0xa45   :  { %11603 = vpow2.f32 %v1645_v61  ;;  %v1647_v21 = vmul.f32 1.442695, %v1642_v28  ;;  %v11466_v28 = vld [vmem:[#allocation13 + $0x38] sm:$0xff]  }
 0xa47   :  { %11605 = vpow2.f32 %v1647_v21 }
 0xa48   :  { %v1637_v62 = vpop.xlane.xlu0 %1636 }
 0xa49   :  { %v1643_v63 = vsub.f32 %v1622_v60, %v1637_v62 }
 0xa4a   :  { %v1640_v1 = vpop.xlane.xlu1 %1639 }
 0xa4b   :  { %v1649_v2 = vmul.f32 1.442695, %v1643_v63  ;;  %v1644_v3 = vsub.f32 %v1625_v54, %v1640_v1 }
 0xa4d   :  { %11607 = vpow2.f32 %v1649_v2  ;;  %v1651_v4 = vmul.f32 1.442695, %v1644_v3 }
 0xa4f   :  { %v11604_v6 = vpop.eup %11603  ;;  %11609 = vpow2.f32 %v1651_v4 }
 0xa50   :  { %v1653_v7 = vsel %vm640_vm3, %v11604_v6, 0.0 }
 0xa51   :  { %v11606_v8 = vpop.eup %11605  ;;  %1654 = vadd.xlane.f32.xlu0 %v1653_v7 }
 0xa52   :  { %v1656_v9 = vsel %vm640_vm3, %v11606_v8, 0.0 }
 0xa53   :  { %1657 = vadd.xlane.f32.xlu1 %v1656_v9 }
 0xa57   :  { %v11608_v29 = vpop.eup %11607 }
 0xa58   :  { %v1659_v15 = vsel %vm640_vm3, %v11608_v29, 0.0 }
 0xa59   :  { %v11610_v18 = vpop.eup %11609  ;;  %1660 = vadd.xlane.f32.xlu0 %v1659_v15 }
 0xa5a   :  { %v1662_v23 = vsel %vm640_vm3, %v11610_v18, 0.0 }
 0xa5b   :  { %1663 = vadd.xlane.f32.xlu1 %v1662_v23 }
 0xade   :  { %v1655_v26 = vpop.xlane.xlu0 %1654 }
 0xadf   :  { %11611 = vrcp.f32 %v1655_v26 }
 0xae0   :  { %v1658_v27 = vpop.xlane.xlu1 %1657 }
 0xae1   :  { %11613 = vrcp.f32 %v1658_v27 }
 0xae6   :  { %v1661_v30 = vpop.xlane.xlu0 %1660 }
 0xae7   :  { %11615 = vrcp.f32 %v1661_v30 }
 0xae8   :  { %v1664_v40 = vpop.xlane.xlu1 %1663 }
 0xae9   :  { %v11612_v31 = vpop.eup %11611  ;;  %11617 = vrcp.f32 %v1664_v40 }
 0xaea   :  { %v1669_v22 = vmul.f32 %v11612_v31, %v11604_v6 }
 0xaeb   :  { %v11614_v17 = vpop.eup %11613 }
 0xaec   :  { %v1670_v13 = vmul.f32 %v11614_v17, %v11606_v8 }
 0xaee   :  { %v1673_v33 = vpack.c.bf16 %v1670_v13, %v1669_v22 }
 0xaf0   :  { %10578 = vmatmul.mubr.msk.bf16.vlgmr.msra.gmra.mrb[40].mxu1 %vm640_vm3, %v1673_v33 }
 0xaf1   :  { %v11616_v10 = vpop.eup %11615  ;;  %10594 = vmatpush3.bf16.msra.mxu1 %v11461_v25  ;;  %10597 = vmatprep.mubr.msk.bf16.mxu1 %vm184_vm0, %v12557_v44  ;;  %v1766_v44 = vld [vmem:[#allocation14 + $0x8] sm:$0xf] }
 0xaf2   :  { %10595 = vmatprep.subr.bf16.mxu1 %v11462_v48  ;;  %v1671_v35 = vmul.f32 %v11616_v10, %v11608_v29  ;;  %11409 = vmatprep.subr.msk.bf16.mxu0 %vm1220_vm4, %v1766_v44  ;;  %v1774_v42 = vsel %vm1220_vm4, %v1766_v44, 0 }
 0xaf3   :  { %v11618_v14 = vpop.eup %11617 }
 0xaf4   :  { %v1672_v37 = vmul.f32 %v11618_v14, %v11610_v18 }
 0xaf5   :  { %10596 = vmatpush3.bf16.msra.mxu1 %v11462_v48 }
 0xaf6   :  { %v1674_v39 = vpack.c.bf16 %v1672_v37, %v1671_v35  ;;  %10601 = vmatprep.subr.bf16.mxu1 %v11463_v11 }
 0xaf8   :  { %10584 = vmatmul.mubr.msk.bf16.vlgmr.msra.gmra.mrb[40].mxu0 %vm640_vm3, %v1674_v39  ;;  %10598 = vmatmul.mubr.msk.bf16.vlgmr.msra.gmra.mrb[44].mxu1 %vm184_vm0, %v12563_v20  ;;  %v11465_v20 = vld [vmem:[#allocation13 + $0x30] sm:$0xff]  }
 0xaf9   :  { %10602 = vmatpush3.bf16.msra.mxu1 %v11463_v11  ;;  %10605 = vmatprep.mubr.msk.bf16.mxu1 %vm184_vm0, %v12539_v0 }
 0xafa   :  { %10603 = vmatprep.subr.bf16.mxu1 %v11464_v41  ;;  %10588 = vmatpush3.bf16.msra.mxu0 %v1774_v42 }
 0xafb   :  { %10609 = vmatprep.subr.bf16.mxu0 %v11465_v20 }
 0xafd   :  { %10604 = vmatpush3.bf16.msra.mxu1 %v11464_v41 }
 0xafe   :  { %10617 = vmatprep.subr.bf16.mxu1 %v12216_v51 }
 0xb00   :  { %10606 = vmatmul.mubr.msk.bf16.vlgmr.msra.gmra.mrb[48].mxu1 %vm184_vm0, %v12548_v19 }
 0xb01   :  { %10619 = vmatprep.mubr.msk.bf16.mxu1 %vm12217_vm1, %v12216_v51 }
 0xbc3   :  { %v1712_v43 = vpop.f32.mrb[40].mxu1 }
 0xbc4   :  { %v10579_v45 = vpop.f32.mrb[41].mxu1 }
 0xbc5   :  { %v1715_v49 = vpop.f32.mrb[42].mxu1 }
 0xbc6   :  { %v1763_v47 = vpack.c.bf16 %v1715_v49, %v1712_v43  ;;  %v10580_v50 = vpop.f32.mrb[43].mxu1 }
 0xbc8   :  { %10589 = vmatprep.mubr.msk.bf16.mxu0 %vm545_vm2, %v1763_v47 }
 0xbcb   :  { %v1756_v60 = vpop.f32.mrb[40].mxu0  ;;  %v10599_v52 = vpop.f32.mrb[44].mxu1 }
 0xbcc   :  { %v10585_v53 = vpop.f32.mrb[41].mxu0  ;;  %v1880_v54 = vpop.f32.mrb[45].mxu1 }
 0xbcd   :  { %v1759_v55 = vpop.f32.mrb[42].mxu0  ;;  %v10600_v56 = vpop.f32.mrb[46].mxu1 }
 0xbce   :  { %v1764_v57 = vpack.c.bf16 %v1759_v55, %v1756_v60  ;;  %v10586_v58 = vpop.f32.mrb[43].mxu0  ;;  %v2028_v59 = vpack.c.bf16 %v10600_v56, %v10599_v52  ;;  %v1883_v61 = vpop.f32.mrb[47].mxu1 }
 0xbcf   :  { %v2027_v21 = vpack.c.bf16 %v1883_v61, %v1880_v54 }
 0xbd0   :  { %10590 = vmatmul.mubr.msk.bf16.vlgmr.msra.gmra.mrb[28].mxu0 %vm545_vm2, %v1764_v57 }
 0xbd1   :  { %10610 = vmatpush3.bf16.msra.mxu0 %v11465_v20  ;;  %10613 = vmatprep.mubr.msk.bf16.mxu0 %vm184_vm0, %v12539_v0 }
 0xbd2   :  { %10611 = vmatprep.subr.bf16.mxu0 %v11466_v28 }
 0xbd3   :  { %v10607_v62 = vpop.f32.mrb[48].mxu1 }
 0xbd4   :  { %v1946_v63 = vpop.f32.mrb[49].mxu1 }
 0xbd5   :  { %10612 = vmatpush3.bf16.msra.mxu0 %v11466_v28  ;;  %v10608_v1 = vpop.f32.mrb[50].mxu1 }
 0xbd6   :  { %v2030_v2 = vpack.c.bf16 %v10608_v1, %v10607_v62  ;;  %v1949_v3 = vpop.f32.mrb[51].mxu1  ;;  %10623 = vmatprep.subr.bf16.mxu0 %v12216_v51 }
 0xbd7   :  { %v2029_v4 = vpack.c.bf16 %v1949_v3, %v1946_v63 }
 0xbd8   :  { %10614 = vmatmul.mubr.msk.bf16.vlgmr.msra.gmra.mrb[44].mxu0 %vm184_vm0, %v12548_v19  ;;  %v2084_v0 = vsel %vm545_vm2, %v2030_v2, 0 }
 0xbd9   :  { %v2037_v6 = vsel %vm545_vm2, %v2029_v4, 0  ;;  %10625 = vmatprep.mubr.msk.bf16.mxu0 %vm12217_vm1, %v12216_v51 }
 0xbda   :  { %10618 = vmatpush3.bf16.xpose.msra.mxu1 %v2037_v6  ;;  %v2264_v6 = vld [vmem:[#allocation14 + $0xc] sm:$0xf] }
 0xbdb   :  { %10629 = vmatprep.subr.bf16.mxu1 %v12216_v51 }
 0xbde   :  { %10624 = vmatpush3.bf16.xpose.msra.mxu0 %v2084_v0  ;;  %v2272_v0 = vsel %vm1220_vm4, %v2264_v6, 0 }
 0xbdf   :  { %10635 = vmatprep.subr.bf16.mxu0 %v12216_v51 }
 0xbe1   :  { %10620 = vmatmul.mubr.msk.bf16.vlgmr.msra.gmra.mrb[52].mxu1 %vm545_vm2, %v2027_v21 }
 0xbe2   :  { %10631 = vmatprep.mubr.msk.bf16.mxu1 %vm12217_vm1, %v12216_v51 }
 0xbe5   :  { %10626 = vmatmul.mubr.msk.bf16.vlgmr.msra.gmra.mrb[48].mxu0 %vm545_vm2, %v2028_v59 }
 0xbe6   :  { %10637 = vmatprep.mubr.msk.bf16.mxu0 %vm12217_vm1, %v12216_v51 }
 0xcab   :  { %v10615_v19 = vpop.f32.mrb[44].mxu0 }
 0xcac   :  { %v2012_v7 = vpop.f32.mrb[45].mxu0 }
 0xcad   :  { %v10616_v8 = vpop.f32.mrb[46].mxu0 }
 0xcae   :  { %v2032_v9 = vpack.c.bf16 %v10616_v8, %v10615_v19  ;;  %v2015_v29 = vpop.f32.mrb[47].mxu0  ;;  %v11467_v19 = vld [vmem:[#allocation10 + $0x40] sm:$0xff]  }
 0xcaf   :  { %v2031_v15 = vpack.c.bf16 %v2015_v29, %v2012_v7 }
 0xcb0   :  { %10636 = vmatpush3.bf16.msra.mxu0 %v2032_v9 }
 0xcb1   :  { %10630 = vmatpush3.bf16.msra.mxu1 %v2031_v15  ;;  %11410 = vmatprep.subr.msk.bf16.mxu0 %vm1220_vm4, %v2264_v6 }
 0xcb4   :  { %v2073_v18 = vpop.f32.mrb[52].mxu1 }
 0xcb5   :  { %v10621_v23 = vpop.f32.mrb[53].mxu1  ;;  %v2127_v25 = vsel %vm640_vm3, %v2073_v18, -inf }
 0xcb6   :  { %2128 = vmax.xlane.f32.xlu0 %v2127_v25  ;;  %v2076_v26 = vpop.f32.mrb[54].mxu1 }
 0xcb7   :  { %v10622_v27 = vpop.f32.mrb[55].mxu1  ;;  %v2130_v30 = vsel %vm640_vm3, %v2076_v26, -inf }
 0xcb8   :  { %v2120_v40 = vpop.f32.mrb[48].mxu0  ;;  %2131 = vmax.xlane.f32.xlu1 %v2130_v30  ;;  %v11468_v30 = vld [vmem:[#allocation10 + $0x48] sm:$0xff]  }
 0xcb9   :  { %v10627_v31 = vpop.f32.mrb[49].mxu0  ;;  %v2133_v17 = vsel %vm640_vm3, %v2120_v40, -inf }
 0xcba   :  { %v2123_v22 = vpop.f32.mrb[50].mxu0  ;;  %2134 = vmax.xlane.f32.xlu0 %v2133_v17  ;;  %v11470_v31 = vld [vmem:[#allocation13 + $0x48] sm:$0xff]   ;;  %v12758_v17 = vsub.s32 6, %v12513_v5 }
 0xcbb   :  { %v10628_v13 = vpop.f32.mrb[51].mxu0  ;;  %v2136_v33 = vsel %vm640_vm3, %v2123_v22, -inf }
 0xcbc   :  { %2137 = vmax.xlane.f32.xlu1 %v2136_v33  ;;  %v12760_v13 = vld [vmem:[#allocation7] sm:$0xff] }
 0xcbd   :  { %v2334_v33 = vrot.slane %v12760_v13, %v12758_v17 }
 0xd43   :  { %v2129_v48 = vpop.xlane.xlu0 %2128 }
 0xd44   :  { %v2139_v10 = vsub.f32 %v2073_v18, %v2129_v48 }
 0xd45   :  { %v2132_v11 = vpop.xlane.xlu1 %2131 }
 0xd46   :  { %v2143_v14 = vmul.f32 1.442695, %v2139_v10  ;;  %v2140_v35 = vsub.f32 %v2076_v26, %v2132_v11  ;;  %v11908_v10 = vld [vmem:[#allocation2 + $0x10] sm:$0xff] }
 0xd47   :  { %v2135_v37 = vpop.xlane.xlu0 %2134 }
 0xd48   :  { %11619 = vpow2.f32 %v2143_v14  ;;  %v2145_v39 = vmul.f32 1.442695, %v2140_v35  ;;  %v2141_v41 = vsub.f32 %v2120_v40, %v2135_v37  ;;  %v11469_v40 = vld [vmem:[#allocation13 + $0x40] sm:$0xff]  }
 0xd49   :  { %v2138_v44 = vpop.xlane.xlu1 %2137  ;;  %v11909_v14 = vld [vmem:[#allocation2] sm:$0xff] }
 0xd4a   :  { %11621 = vpow2.f32 %v2145_v39  ;;  %v2147_v42 = vmul.f32 1.442695, %v2141_v41  ;;  %v2142_v20 = vsub.f32 %v2123_v22, %v2138_v44  ;;  %v11910_v44 = vld [vmem:[#allocation2 + $0x18] sm:$0xff] }
 0xd4c   :  { %11623 = vpow2.f32 %v2147_v42  ;;  %v2149_v43 = vmul.f32 1.442695, %v2142_v20  ;;  %v11911_v20 = vld [vmem:[#allocation2 + $0x8] sm:$0xff] }
 0xd4e   :  { %11625 = vpow2.f32 %v2149_v43 }
 0xd52   :  { %v11620_v45 = vpop.eup %11619 }
 0xd53   :  { %v2151_v49 = vsel %vm640_vm3, %v11620_v45, 0.0 }
 0xd54   :  { %v11622_v47 = vpop.eup %11621  ;;  %2152 = vadd.xlane.f32.xlu0 %v2151_v49 }
 0xd55   :  { %v2154_v50 = vsel %vm640_vm3, %v11622_v47, 0.0 }
 0xd56   :  { %v11624_v60 = vpop.eup %11623  ;;  %2155 = vadd.xlane.f32.xlu1 %v2154_v50 }
 0xd57   :  { %v2157_v52 = vsel %vm640_vm3, %v11624_v60, 0.0 }
 0xd58   :  { %v11626_v53 = vpop.eup %11625  ;;  %2158 = vadd.xlane.f32.xlu0 %v2157_v52 }
 0xd59   :  { %v2160_v54 = vsel %vm640_vm3, %v11626_v53, 0.0 }
 0xd5a   :  { %2161 = vadd.xlane.f32.xlu1 %v2160_v54 }
 0xde1   :  { %v2153_v55 = vpop.xlane.xlu0 %2152 }
 0xde2   :  { %11627 = vrcp.f32 %v2153_v55 }
 0xde3   :  { %v2156_v56 = vpop.xlane.xlu1 %2155 }
 0xde4   :  { %11629 = vrcp.f32 %v2156_v56 }
 0xde5   :  { %v2159_v57 = vpop.xlane.xlu0 %2158 }
 0xde6   :  { %11631 = vrcp.f32 %v2159_v57 }
 0xde7   :  { %v2162_v58 = vpop.xlane.xlu1 %2161 }
 0xde8   :  { %11633 = vrcp.f32 %v2162_v58 }
 0xdec   :  { %v11628_v59 = vpop.eup %11627 }
 0xded   :  { %v2167_v28 = vmul.f32 %v11628_v59, %v11620_v45 }
 0xdee   :  { %v11630_v61 = vpop.eup %11629 }
 0xdef   :  { %v2168_v21 = vmul.f32 %v11630_v61, %v11622_v47 }
 0xdf0   :  { %v11632_v62 = vpop.eup %11631 }
 0xdf1   :  { %v2171_v63 = vpack.c.bf16 %v2168_v21, %v2167_v28  ;;  %v2169_v2 = vmul.f32 %v11632_v62, %v11624_v60 }
 0xdf2   :  { %v11634_v1 = vpop.eup %11633 }
 0xdf3   :  { %v2170_v3 = vmul.f32 %v11634_v1, %v11626_v53  ;;  %10632 = vmatmul.mubr.msk.bf16.vlgmr.msra.gmra.mrb[56].mxu1 %vm640_vm3, %v2171_v63 }
 0xdf5   :  { %v2172_v4 = vpack.c.bf16 %v2170_v3, %v2169_v2 }
 0xdf7   :  { %10638 = vmatmul.mubr.msk.bf16.vlgmr.msra.gmra.mrb[52].mxu0 %vm640_vm3, %v2172_v4 }
 0xdf8   :  { %10642 = vmatpush3.bf16.msra.mxu0 %v2272_v0 }
 0xdf9   :  { %10663 = vmatprep.subr.bf16.mxu0 %v11467_v19 }
 0xec6   :  { %v2210_v7 = vpop.f32.mrb[56].mxu1 }
 0xec7   :  { %v10633_v8 = vpop.f32.mrb[57].mxu1 }
 0xec8   :  { %v2213_v9 = vpop.f32.mrb[58].mxu1 }
 0xec9   :  { %v2261_v29 = vpack.c.bf16 %v2213_v9, %v2210_v7  ;;  %v10634_v15 = vpop.f32.mrb[59].mxu1 }
 0xeca   :  { %v2254_v18 = vpop.f32.mrb[52].mxu0 }
 0xecb   :  { %v10639_v23 = vpop.f32.mrb[53].mxu0  ;;  %10643 = vmatprep.mubr.msk.bf16.mxu0 %vm545_vm2, %v2261_v29 }
 0xecc   :  { %v2257_v25 = vpop.f32.mrb[54].mxu0 }
 0xecd   :  { %v2262_v26 = vpack.c.bf16 %v2257_v25, %v2254_v18  ;;  %v10640_v27 = vpop.f32.mrb[55].mxu0 }
 0xecf   :  { %10644 = vmatmul.mubr.msk.bf16.vlgmr.msra.gmra.mrb[28].mxu0 %vm545_vm2, %v2262_v26 }
 0xed0   :  { %10664 = vmatpush3.bf16.msra.mxu0 %v11467_v19  ;;  %10667 = vmatprep.mubr.msk.bf16.mxu0 %vm184_vm0, %v12545_v38 }
 0xed1   :  { %10665 = vmatprep.subr.bf16.mxu0 %v11468_v30 }
 0xed4   :  { %10666 = vmatpush3.bf16.msra.mxu0 %v11468_v30 }
 0xed5   :  { %10679 = vmatprep.subr.bf16.mxu0 %v11469_v40 }
 0xed7   :  { %10668 = vmatmul.mubr.msk.bf16.vlgmr.msra.gmra.mrb[56].mxu0 %vm184_vm0, %v12553_v34 }
 0xed8   :  { %10680 = vmatpush3.bf16.msra.mxu0 %v11469_v40  ;;  %10683 = vmatprep.mubr.msk.bf16.mxu0 %vm184_vm0, %v12555_v36 }
 0xed9   :  { %10681 = vmatprep.subr.bf16.mxu0 %v11470_v31 }
 0xedc   :  { %10682 = vmatpush3.bf16.msra.mxu0 %v11470_v31 }
 0xedd   :  { %10693 = vmatprep.subr.bf16.mxu0 %v12216_v51 }
 0xedf   :  { %10684 = vmatmul.mubr.msk.bf16.vlgmr.msra.gmra.mrb[60].mxu0 %vm184_vm0, %v12559_v46 }
 0xee0   :  { %10695 = vmatprep.mubr.msk.bf16.mxu0 %vm12217_vm1, %v12216_v51 }
 0xfa2   :  { %v10645_v22 = vpop.f32.mrb[28].mxu0 }
 0xfa3   :  { %v2308_v48 = vpop.f32.mrb[29].mxu0  ;;  %v2329_v11 = vadd.f32 %v11908_v10, %v10645_v22 }
 0xfa4   :  { %v2327_v35 = vadd.f32 %v11909_v14, %v2308_v48  ;;  %v10646_v37 = vpop.f32.mrb[30].mxu0  ;;  %v11472_v48 = vld [vmem:[#allocation16 + $0x8] sm:$0xff]  }
 0xfa5   :  { %v2311_v39 = vpop.f32.mrb[31].mxu0  ;;  %v2330_v42 = vadd.f32 %v11910_v44, %v10646_v37  ;;  %v12766_v45 = vadd.f32 %v2334_v33, %v2329_v11 }
 0xfa6   :  { %v12764_v41 = vadd.f32 %v2334_v33, %v2327_v35  ;;  %v2328_v43 = vadd.f32 %v11911_v20, %v2311_v39 }
 0xfa7   :  { %v12772_v50 = vadd.f32 %v2334_v33, %v2330_v42  ;;  %v2345_v55 = vsel %vm184_vm0, %v12766_v45, 0.0 }
 0xfa8   :  { %v12768_v49 = vadd.f32 %v2334_v33, %v2328_v43  ;;  %v2339_v47 = vsel %vm184_vm0, %v12764_v41, 0.0  ;;  %v11471_v33 = vld [vmem:[#allocation16] sm:$0xff]  }
 0xfa9   :  { %2340 = vadd.xlane.f32.xlu0 %v2339_v47  ;;  %v2348_v59 = vsel %vm184_vm0, %v12772_v50, 0.0  ;;  %10647 = vmatprep.subr.bf16.mxu1 %v11471_v33 }
 0xfaa   :  { %v12774_v60 = vpop.f32.mrb[56].mxu0  ;;  %v2342_v52 = vsel %vm184_vm0, %v12768_v49, 0.0  ;;  %10648 = vmatpush3.bf16.msra.mxu1 %v11471_v33 }
 0xfab   :  { %v12778_v53 = vpop.f32.mrb[57].mxu0  ;;  %2343 = vadd.xlane.f32.xlu1 %v2342_v52  ;;  %10649 = vmatprep.subr.bf16.mxu1 %v11472_v48 }
 0xfac   :  { %v12780_v54 = vpop.f32.mrb[58].mxu0 }
 0xfad   :  { %v2858_v56 = vpack.c.bf16 %v12780_v54, %v12774_v60  ;;  %2346 = vadd.xlane.f32.xlu0 %v2345_v55  ;;  %v12786_v57 = vpop.f32.mrb[59].mxu0  ;;  %v12813_v55 = vsub.s32 4, %v12513_v5 }
 0xfae   :  { %v2857_v58 = vpack.c.bf16 %v12786_v57, %v12778_v53  ;;  %10650 = vmatpush3.bf16.msra.mxu1 %v11472_v48 }
 0xfaf   :  { %2349 = vadd.xlane.f32.xlu1 %v2348_v59  ;;  %v2394_v59 = vrot.slane %v12760_v13, %v12813_v55 }
 0xfb2   :  { %v12792_v61 = vpop.f32.mrb[60].mxu0 }
 0xfb3   :  { %v12794_v28 = vpop.f32.mrb[61].mxu0 }
 0xfb4   :  { %v12796_v21 = vpop.f32.mrb[62].mxu0 }
 0xfb5   :  { %v2862_v62 = vpack.c.bf16 %v12796_v21, %v12792_v61  ;;  %v12800_v63 = vpop.f32.mrb[63].mxu0 }
 0xfb6   :  { %v2861_v1 = vpack.c.bf16 %v12800_v63, %v12794_v28 }
0x1036   :  { %v2341_v2 = vpop.xlane.xlu0 %2340 }
0x1037   :  { %v2351_v3 = vmul.f32 0.03125, %v2341_v2  ;;  %v12818_v2 = vsub.s32 5, %v12513_v5 }
0x1038   :  { %v2344_v4 = vpop.xlane.xlu1 %2343 }
0x1039   :  { %v2355_v6 = vsub.f32 %v12764_v41, %v2351_v3  ;;  %v2352_v0 = vmul.f32 0.03125, %v2344_v4 }
0x103a   :  { %v2347_v19 = vpop.xlane.xlu0 %2346 }
0x103b   :  { %v2356_v7 = vsub.f32 %v12768_v49, %v2352_v0  ;;  %v2353_v8 = vmul.f32 0.03125, %v2347_v19  ;;  %v2359_v9 = vmul.f32 %v2355_v6, %v2355_v6 }
0x103c   :  { %v2350_v29 = vpop.xlane.xlu1 %2349 }
0x103d   :  { %v2357_v15 = vsub.f32 %v12766_v45, %v2353_v8  ;;  %v2354_v18 = vmul.f32 0.03125, %v2350_v29  ;;  %v2363_v23 = vsel %vm184_vm0, %v2359_v9, 0.0  ;;  %v2360_v25 = vmul.f32 %v2356_v7, %v2356_v7 }
0x103e   :  { %2364 = vadd.xlane.f32.xlu0 %v2363_v23  ;;  %v2402_v9 = vrot.slane %v12760_v13, %v12818_v2  ;;  %v11474_v13 = vld [vmem:[#allocation17 + $0x8] sm:$0xff]  }
0x103f   :  { %v2358_v26 = vsub.f32 %v12772_v50, %v2354_v18  ;;  %v2366_v27 = vsel %vm184_vm0, %v2360_v25, 0.0  ;;  %v2361_v30 = vmul.f32 %v2357_v15, %v2357_v15 }
0x1040   :  { %2367 = vadd.xlane.f32.xlu1 %v2366_v27 }
0x1041   :  { %v2369_v40 = vsel %vm184_vm0, %v2361_v30, 0.0  ;;  %v2362_v31 = vmul.f32 %v2358_v26, %v2358_v26 }
0x1042   :  { %2370 = vadd.xlane.f32.xlu0 %v2369_v40 }
0x1043   :  { %v2372_v22 = vsel %vm184_vm0, %v2362_v31, 0.0 }
0x1044   :  { %2373 = vadd.xlane.f32.xlu1 %v2372_v22 }
0x10cb   :  { %v2365_v10 = vpop.xlane.xlu0 %2364 }
0x10cc   :  { %v2375_v11 = vmul.f32 0.03125, %v2365_v10 }
0x10cd   :  { %v2368_v14 = vpop.xlane.xlu1 %2367 }
0x10ce   :  { %v2379_v35 = vadd.f32 1e-05, %v2375_v11  ;;  %v2376_v37 = vmul.f32 0.03125, %v2368_v14 }
0x10cf   :  { %v2371_v39 = vpop.xlane.xlu0 %2370 }
0x10d0   :  { %11635 = vrsqrt.f32 %v2379_v35  ;;  %v2380_v44 = vadd.f32 1e-05, %v2376_v37  ;;  %v2377_v42 = vmul.f32 0.03125, %v2371_v39 }
0x10d1   :  { %v2374_v20 = vpop.xlane.xlu1 %2373 }
0x10d2   :  { %11637 = vrsqrt.f32 %v2380_v44  ;;  %v2381_v43 = vadd.f32 1e-05, %v2377_v42  ;;  %v2378_v47 = vmul.f32 0.03125, %v2374_v20 }
0x10d4   :  { %11639 = vrsqrt.f32 %v2381_v43  ;;  %v2382_v52 = vadd.f32 1e-05, %v2378_v47 }
0x10d6   :  { %11641 = vrsqrt.f32 %v2382_v52 }
0x10da   :  { %v11636_v3 = vpop.eup %11635 }
0x10db   :  { %v2387_v4 = vmul.f32 %v11636_v3, %v2355_v6 }
0x10dc   :  { %v11638_v0 = vpop.eup %11637 }
0x10dd   :  { %v2388_v19 = vmul.f32 %v11638_v0, %v2356_v7  ;;  %v2395_v8 = vmul.f32 %v2394_v59, %v2387_v4  ;;  %v11473_v7 = vld [vmem:[#allocation17] sm:$0xff]  }
0x10de   :  { %v11640_v29 = vpop.eup %11639  ;;  %10655 = vmatprep.subr.bf16.mxu1 %v11473_v7 }
0x10df   :  { %v2389_v18 = vmul.f32 %v11640_v29, %v2357_v15  ;;  %v2396_v23 = vmul.f32 %v2394_v59, %v2388_v19  ;;  %v2403_v40 = vadd.f32 %v2402_v9, %v2395_v8  ;;  %v11475_v15 = vld [vmem:[#allocation11 + $0x40] sm:$0xff]  }
0x10e0   :  { %v11642_v25 = vpop.eup %11641 }
0x10e1   :  { %v2397_v27 = vmul.f32 %v2394_v59, %v2389_v18  ;;  %v2390_v30 = vmul.f32 %v11642_v25, %v2358_v26  ;;  %v2404_v31 = vadd.f32 %v2402_v9, %v2396_v23  ;;  %v9779_v26 = vld [vmem:[#allocation8] ss:$0 sm:$0xff] }
0x10e3   :  { %v2398_v22 = vmul.f32 %v2394_v59, %v2390_v30  ;;  %v2407_v33 = vpack.c.bf16 %v2404_v31, %v2403_v40  ;;  %v2405_v48 = vadd.f32 %v2402_v9, %v2397_v27 }
0x10e5   :  { %10651 = vmatprep.mubr.msk.bf16.mxu1 %vm184_vm0, %v2407_v33  ;;  %v2406_v6 = vadd.f32 %v2402_v9, %v2398_v22 }
0x10e7   :  { %v2408_v10 = vpack.c.bf16 %v2406_v6, %v2405_v48 }
0x10e9   :  { %10652 = vmatmul.mubr.msk.bf16.vlgmr.msra.gmra.mrb[60].mxu1 %vm184_vm0, %v2408_v10 }
0x10ea   :  { %10656 = vmatpush3.bf16.msra.mxu1 %v11473_v7 }
0x10eb   :  { %10657 = vmatprep.subr.bf16.mxu1 %v11474_v13 }
0x10ee   :  { %10658 = vmatpush3.bf16.msra.mxu1 %v11474_v13 }
0x10ef   :  { %10671 = vmatprep.subr.bf16.mxu1 %v11475_v15 }
0x11bc   :  { %v10653_v11 = vpop.f32.mrb[60].mxu1 }
0x11bd   :  { %v2480_v14 = vadd.f32 %v10653_v11, %v9779_v26  ;;  %v2471_v35 = vpop.f32.mrb[61].mxu1 }
0x11be   :  { %v2472_v37 = vadd.f32 %v9779_v26, %v2471_v35  ;;  %v10654_v39 = vpop.f32.mrb[62].mxu1 }
0x11bf   :  { %v2488_v44 = vmul.f32 %v2480_v14, %v2480_v14  ;;  %v2483_v42 = vadd.f32 %v10654_v39, %v9779_v26  ;;  %v2474_v20 = vpop.f32.mrb[63].mxu1 }
0x11c0   :  { %v2486_v43 = vmul.f32 %v2472_v37, %v2472_v37  ;;  %v2475_v47 = vadd.f32 %v9779_v26, %v2474_v20 }
0x11c1   :  { %v2492_v52 = vmul.f32 %v2488_v44, %v2480_v14  ;;  %v2489_v59 = vmul.f32 %v2483_v42, %v2483_v42 }
0x11c2   :  { %v2490_v3 = vmul.f32 %v2486_v43, %v2472_v37  ;;  %v2487_v4 = vmul.f32 %v2475_v47, %v2475_v47 }
0x11c3   :  { %v2496_v0 = vmul.f32 0.044715, %v2492_v52  ;;  %v2493_v19 = vmul.f32 %v2489_v59, %v2483_v42 }
0x11c4   :  { %v2494_v8 = vmul.f32 0.044715, %v2490_v3  ;;  %v2491_v9 = vmul.f32 %v2487_v4, %v2475_v47 }
0x11c5   :  { %v2500_v29 = vadd.f32 %v2496_v0, %v2480_v14  ;;  %v2497_v18 = vmul.f32 0.044715, %v2493_v19 }
0x11c6   :  { %v2498_v23 = vadd.f32 %v2494_v8, %v2472_v37  ;;  %v2495_v25 = vmul.f32 0.044715, %v2491_v9  ;;  %v11476_v8 = vld [vmem:[#allocation11 + $0x48] sm:$0xff]  }
0x11c7   :  { %v2504_v27 = vmul.f32 0.7978846, %v2500_v29  ;;  %v2501_v30 = vadd.f32 %v2497_v18, %v2483_v42 }
0x11c8   :  { %v2502_v40 = vmul.f32 0.7978846, %v2498_v23  ;;  %v2499_v31 = vadd.f32 %v2495_v25, %v2475_v47 }
0x11c9   :  { %11643 = vtanh.f32 %v2504_v27  ;;  %v2505_v22 = vmul.f32 0.7978846, %v2501_v30 }
0x11ca   :  { %11645 = vtanh.f32 %v2502_v40  ;;  %v2503_v33 = vmul.f32 0.7978846, %v2499_v31 }
0x11cb   :  { %11647 = vtanh.f32 %v2505_v22 }
0x11cc   :  { %11649 = vtanh.f32 %v2503_v33 }
0x11d3   :  { %v11644_v48 = vpop.eup %11643 }
0x11d4   :  { %v11646_v6 = vpop.eup %11645  ;;  %v2512_v10 = vadd.f32 1.0, %v11644_v48 }
0x11d5   :  { %v11648_v7 = vpop.eup %11647  ;;  %v2510_v13 = vadd.f32 1.0, %v11646_v6 }
0x11d6   :  { %v11650_v26 = vpop.eup %11649  ;;  %v2516_v11 = vmul.f32 0.5, %v2512_v10  ;;  %v2513_v35 = vadd.f32 1.0, %v11648_v7 }
0x11d7   :  { %v2514_v39 = vmul.f32 0.5, %v2510_v13  ;;  %v2511_v44 = vadd.f32 1.0, %v11650_v26 }
0x11d8   :  { %v2517_v20 = vmul.f32 0.5, %v2513_v35  ;;  %v2520_v52 = vmul.f32 %v2516_v11, %v2480_v14 }
0x11d9   :  { %v2515_v43 = vmul.f32 0.5, %v2511_v44  ;;  %v2518_v3 = vmul.f32 %v2514_v39, %v2472_v37 }
0x11da   :  { %v2521_v59 = vmul.f32 %v2517_v20, %v2483_v42 }
0x11db   :  { %v2519_v4 = vmul.f32 %v2515_v43, %v2475_v47 }
0x11dc   :  { %v2523_v0 = vpack.c.bf16 %v2521_v59, %v2520_v52 }
0x11dd   :  { %v2522_v19 = vpack.c.bf16 %v2519_v4, %v2518_v3 }
0x11df   :  { %10659 = vmatprep.mubr.msk.bf16.mxu1 %vm184_vm0, %v2522_v19  ;;  %v11478_v19 = vld [vmem:[#allocation10 + $0x50] sm:$0xff]  }
0x11e0   :  { %10660 = vmatmul.mubr.msk.bf16.vlgmr.msra.gmra.mrb[64].mxu1 %vm184_vm0, %v2523_v0  ;;  %v11477_v0 = vld [vmem:[#allocation11 + $0x50] sm:$0xff]  }
0x11e1   :  { %10672 = vmatpush3.bf16.msra.mxu1 %v11475_v15  ;;  %10675 = vmatprep.mubr.msk.bf16.mxu1 %vm184_vm0, %v12555_v36 }
0x11e2   :  { %10673 = vmatprep.subr.bf16.mxu1 %v11476_v8 }
0x11e5   :  { %10674 = vmatpush3.bf16.msra.mxu1 %v11476_v8 }
0x11e6   :  { %10687 = vmatprep.subr.bf16.mxu1 %v12216_v51 }
0x11e8   :  { %10676 = vmatmul.mubr.msk.bf16.vlgmr.msra.gmra.mrb[68].mxu1 %vm184_vm0, %v12559_v46 }
0x11e9   :  { %10689 = vmatprep.mubr.msk.bf16.mxu1 %vm12217_vm1, %v12216_v51 }
0x12b3   :  { %v12833_v14 = vpop.f32.mrb[64].mxu1 }
0x12b4   :  { %v12835_v37 = vpop.f32.mrb[65].mxu1 }
0x12b5   :  { %v12837_v42 = vpop.f32.mrb[66].mxu1 }
0x12b6   :  { %v12839_v15 = vpop.f32.mrb[67].mxu1 }
0x12bb   :  { %v10677_v47 = vpop.f32.mrb[68].mxu1 }
0x12bc   :  { %v2776_v9 = vpop.f32.mrb[69].mxu1 }
0x12bd   :  { %v10678_v29 = vpop.f32.mrb[70].mxu1 }
0x12be   :  { %v2860_v18 = vpack.c.bf16 %v10678_v29, %v10677_v47  ;;  %v2779_v23 = vpop.f32.mrb[71].mxu1 }
0x12bf   :  { %v2859_v25 = vpack.c.bf16 %v2779_v23, %v2776_v9 }
0x12c0   :  { %v2914_v27 = vsel %vm545_vm2, %v2860_v18, 0 }
0x12c1   :  { %v2867_v30 = vsel %vm545_vm2, %v2859_v25, 0  ;;  %10694 = vmatpush3.bf16.xpose.msra.mxu0 %v2914_v27 }
0x12c2   :  { %10688 = vmatpush3.bf16.xpose.msra.mxu1 %v2867_v30  ;;  %10705 = vmatprep.subr.bf16.mxu0 %v12216_v51 }
0x12c3   :  { %10699 = vmatprep.subr.bf16.mxu1 %v12216_v51 }
0x12c8   :  { %10696 = vmatmul.mubr.msk.bf16.vlgmr.msra.gmra.mrb[64].mxu0 %vm545_vm2, %v2858_v56 }
0x12c9   :  { %10690 = vmatmul.mubr.msk.bf16.vlgmr.msra.gmra.mrb[72].mxu1 %vm545_vm2, %v2857_v58  ;;  %10706 = vmatpush3.bf16.msra.mxu0 %v2862_v62 }
0x12ca   :  { %10700 = vmatpush3.bf16.msra.mxu1 %v2861_v1  ;;  %10707 = vmatprep.mubr.msk.bf16.mxu0 %vm12217_vm1, %v12216_v51 }
0x12cb   :  { %10701 = vmatprep.mubr.msk.bf16.mxu1 %vm12217_vm1, %v12216_v51  ;;  %10719 = vmatprep.subr.bf16.mxu0 %v11477_v0 }
0x12cc   :  { %10711 = vmatprep.subr.bf16.mxu1 %v11478_v19 }
0x139b   :  { %v2950_v60 = vpop.f32.mrb[64].mxu0 }
0x139c   :  { %v2903_v54 = vpop.f32.mrb[72].mxu1  ;;  %v10697_v56 = vpop.f32.mrb[65].mxu0  ;;  %v2963_v53 = vsel %vm640_vm3, %v2950_v60, -inf }
0x139d   :  { %2964 = vmax.xlane.f32.xlu0 %v2963_v53  ;;  %v10691_v57 = vpop.f32.mrb[73].mxu1  ;;  %v2953_v58 = vpop.f32.mrb[66].mxu0  ;;  %v2957_v63 = vsel %vm640_vm3, %v2903_v54, -inf }
0x139e   :  { %v2906_v61 = vpop.f32.mrb[74].mxu1  ;;  %v10698_v21 = vpop.f32.mrb[67].mxu0  ;;  %v2966_v62 = vsel %vm640_vm3, %v2953_v58, -inf }
0x139f   :  { %2967 = vmax.xlane.f32.xlu1 %v2966_v62  ;;  %v10692_v28 = vpop.f32.mrb[75].mxu1  ;;  %v2960_v1 = vsel %vm640_vm3, %v2906_v61, -inf  ;;  %v11481_v21 = vld [vmem:[#allocation13 + $0x50] sm:$0xff]   ;;  %v11482_v62 = vld [vmem:[#allocation13 + $0x58] sm:$0xff]  }
0x13a1   :  { %2958 = vmax.xlane.f32.xlu0 %v2957_v63 }
0x13a3   :  { %2961 = vmax.xlane.f32.xlu1 %v2960_v1 }
0x142a   :  { %v2965_v40 = vpop.xlane.xlu0 %2964 }
0x142b   :  { %v2971_v31 = vsub.f32 %v2950_v60, %v2965_v40 }
0x142c   :  { %v2968_v22 = vpop.xlane.xlu1 %2967 }
0x142d   :  { %v2977_v33 = vmul.f32 1.442695, %v2971_v31  ;;  %v2972_v48 = vsub.f32 %v2953_v58, %v2968_v22 }
0x142e   :  { %v2959_v6 = vpop.xlane.xlu0 %2958 }
0x142f   :  { %11651 = vpow2.f32 %v2977_v33  ;;  %v2979_v10 = vmul.f32 1.442695, %v2972_v48  ;;  %v2969_v7 = vsub.f32 %v2903_v54, %v2959_v6  ;;  %v11479_v54 = vld [vmem:[#allocation11 + $0x58] sm:$0xff]  }
0x1430   :  { %v2962_v13 = vpop.xlane.xlu1 %2961 }
0x1431   :  { %11653 = vpow2.f32 %v2979_v10  ;;  %v2973_v26 = vmul.f32 1.442695, %v2969_v7  ;;  %v2970_v11 = vsub.f32 %v2906_v61, %v2962_v13  ;;  %v11480_v61 = vld [vmem:[#allocation10 + $0x58] sm:$0xff]  }
0x1433   :  { %11655 = vpow2.f32 %v2973_v26  ;;  %v2975_v35 = vmul.f32 1.442695, %v2970_v11 }
0x1435   :  { %11657 = vpow2.f32 %v2975_v35 }
0x1439   :  { %v11652_v39 = vpop.eup %11651 }
0x143a   :  { %v2987_v44 = vsel %vm640_vm3, %v11652_v39, 0.0 }
0x143b   :  { %v11654_v20 = vpop.eup %11653  ;;  %2988 = vadd.xlane.f32.xlu0 %v2987_v44 }
0x143c   :  { %v2990_v43 = vsel %vm640_vm3, %v11654_v20, 0.0 }
0x143d   :  { %v11656_v52 = vpop.eup %11655  ;;  %2991 = vadd.xlane.f32.xlu1 %v2990_v43 }
0x143e   :  { %v2981_v59 = vsel %vm640_vm3, %v11656_v52, 0.0 }
0x143f   :  { %v11658_v3 = vpop.eup %11657  ;;  %2982 = vadd.xlane.f32.xlu0 %v2981_v59 }
0x1440   :  { %v2984_v4 = vsel %vm640_vm3, %v11658_v3, 0.0 }
0x1441   :  { %2985 = vadd.xlane.f32.xlu1 %v2984_v4 }
0x14c8   :  { %v2989_v8 = vpop.xlane.xlu0 %2988 }
0x14c9   :  { %11659 = vrcp.f32 %v2989_v8 }
0x14ca   :  { %v2992_v47 = vpop.xlane.xlu1 %2991 }
0x14cb   :  { %11661 = vrcp.f32 %v2992_v47 }
0x14cc   :  { %v2983_v9 = vpop.xlane.xlu0 %2982 }
0x14cd   :  { %11663 = vrcp.f32 %v2983_v9 }
0x14ce   :  { %v2986_v29 = vpop.xlane.xlu1 %2985 }
0x14cf   :  { %11665 = vrcp.f32 %v2986_v29 }
0x14d3   :  { %v11660_v18 = vpop.eup %11659 }
0x14d4   :  { %v2999_v25 = vmul.f32 %v11660_v18, %v11652_v39 }
0x14d5   :  { %v11662_v23 = vpop.eup %11661 }
0x14d6   :  { %v3000_v27 = vmul.f32 %v11662_v23, %v11654_v20 }
0x14d7   :  { %v11664_v30 = vpop.eup %11663 }
0x14d8   :  { %v3002_v60 = vpack.c.bf16 %v3000_v27, %v2999_v25  ;;  %v2997_v53 = vmul.f32 %v11664_v30, %v11656_v52 }
0x14d9   :  { %v11666_v56 = vpop.eup %11665 }
0x14da   :  { %v2998_v57 = vmul.f32 %v11666_v56, %v11658_v3  ;;  %10708 = vmatmul.mubr.msk.bf16.vlgmr.msra.gmra.mrb[68].mxu0 %vm640_vm3, %v3002_v60 }
0x14db   :  { %10720 = vmatpush3.bf16.msra.mxu0 %v11477_v0  ;;  %10723 = vmatprep.mubr.msk.bf16.mxu0 %vm184_vm0, %v12555_v36 }
0x14dc   :  { %v3001_v58 = vpack.c.bf16 %v2998_v57, %v2997_v53  ;;  %10721 = vmatprep.subr.bf16.mxu0 %v11479_v54 }
0x14de   :  { %10702 = vmatmul.mubr.msk.bf16.vlgmr.msra.gmra.mrb[76].mxu1 %vm640_vm3, %v3001_v58 }
0x14df   :  { %10712 = vmatpush3.bf16.msra.mxu1 %v11478_v19  ;;  %10715 = vmatprep.mubr.msk.bf16.mxu1 %vm184_vm0, %v12545_v38 }
0x14e0   :  { %10722 = vmatpush3.bf16.msra.mxu0 %v11479_v54  ;;  %10713 = vmatprep.subr.bf16.mxu1 %v11480_v61 }
0x14e1   :  { %10735 = vmatprep.subr.bf16.mxu0 %v12216_v51 }
0x14e3   :  { %10724 = vmatmul.mubr.msk.bf16.vlgmr.msra.gmra.mrb[72].mxu0 %vm184_vm0, %v12559_v46  ;;  %10714 = vmatpush3.bf16.msra.mxu1 %v11480_v61 }
0x14e4   :  { %10727 = vmatprep.subr.bf16.mxu1 %v11481_v21  ;;  %10737 = vmatprep.mubr.msk.bf16.mxu0 %vm12217_vm1, %v12216_v51 }
0x14e6   :  { %10716 = vmatmul.mubr.msk.bf16.vlgmr.msra.gmra.mrb[80].mxu1 %vm184_vm0, %v12553_v34 }
0x14e7   :  { %10728 = vmatpush3.bf16.msra.mxu1 %v11481_v21  ;;  %10731 = vmatprep.mubr.msk.bf16.mxu1 %vm184_vm0, %v12555_v36 }
0x14e8   :  { %10729 = vmatprep.subr.bf16.mxu1 %v11482_v62 }
0x14eb   :  { %10730 = vmatpush3.bf16.msra.mxu1 %v11482_v62 }
0x14ec   :  { %10741 = vmatprep.subr.bf16.mxu1 %v12216_v51 }
0x14ee   :  { %10732 = vmatmul.mubr.msk.bf16.vlgmr.msra.gmra.mrb[84].mxu1 %vm184_vm0, %v12559_v46 }
0x14ef   :  { %10743 = vmatprep.mubr.msk.bf16.mxu1 %vm12217_vm1, %v12216_v51 }
0x15ad   :  { %v12891_v28 = vpop.f32.mrb[68].mxu0 }
0x15ae   :  { %v10709_v63 = vpop.f32.mrb[69].mxu0 }
0x15af   :  { %v12893_v1 = vpop.f32.mrb[70].mxu0 }
0x15b0   :  { %v3092_v40 = vpack.c.bf16 %v12893_v1, %v12891_v28  ;;  %v10710_v31 = vpop.f32.mrb[71].mxu0 }
0x15b1   :  { %v12897_v22 = vpop.f32.mrb[76].mxu1 }
0x15b2   :  { %v10703_v33 = vpop.f32.mrb[77].mxu1 }
0x15b3   :  { %v12899_v48 = vpop.f32.mrb[78].mxu1 }
0x15b4   :  { %v3091_v6 = vpack.c.bf16 %v12899_v48, %v12897_v22  ;;  %v10704_v10 = vpop.f32.mrb[79].mxu1 }
0x15b6   :  { %v10725_v7 = vpop.f32.mrb[72].mxu0 }
0x15b7   :  { %v3212_v13 = vpop.f32.mrb[73].mxu0 }
0x15b8   :  { %v10726_v26 = vpop.f32.mrb[74].mxu0 }
0x15b9   :  { %v3296_v11 = vpack.c.bf16 %v10726_v26, %v10725_v7  ;;  %v3215_v35 = vpop.f32.mrb[75].mxu0  ;;  %v10717_v39 = vpop.f32.mrb[80].mxu1 }
0x15ba   :  { %v3295_v44 = vpack.c.bf16 %v3215_v35, %v3212_v13  ;;  %v3146_v20 = vpop.f32.mrb[81].mxu1 }
0x15bb   :  { %v3350_v43 = vsel %vm545_vm2, %v3296_v11, 0  ;;  %v10718_v52 = vpop.f32.mrb[82].mxu1 }
0x15bc   :  { %v3303_v59 = vsel %vm545_vm2, %v3295_v44, 0  ;;  %v3294_v3 = vpack.c.bf16 %v10718_v52, %v10717_v39  ;;  %10742 = vmatpush3.bf16.xpose.msra.mxu1 %v3350_v43  ;;  %v3149_v4 = vpop.f32.mrb[83].mxu1 }
0x15bd   :  { %v3293_v0 = vpack.c.bf16 %v3149_v4, %v3146_v20  ;;  %10736 = vmatpush3.bf16.xpose.msra.mxu0 %v3303_v59  ;;  %10753 = vmatprep.subr.bf16.mxu1 %v12216_v51 }
0x15be   :  { %10747 = vmatprep.subr.bf16.mxu0 %v12216_v51 }
0x15c1   :  { %v10733_v19 = vpop.f32.mrb[84].mxu1 }
0x15c2   :  { %v3278_v8 = vpop.f32.mrb[85].mxu1 }
0x15c3   :  { %10744 = vmatmul.mubr.msk.bf16.vlgmr.msra.gmra.mrb[88].mxu1 %vm545_vm2, %v3294_v3  ;;  %v10734_v47 = vpop.f32.mrb[86].mxu1 }
0x15c4   :  { %v3298_v9 = vpack.c.bf16 %v10734_v47, %v10733_v19  ;;  %10738 = vmatmul.mubr.msk.bf16.vlgmr.msra.gmra.mrb[76].mxu0 %vm545_vm2, %v3293_v0  ;;  %v3281_v29 = vpop.f32.mrb[87].mxu1  ;;  %10755 = vmatprep.mubr.msk.bf16.mxu1 %vm12217_vm1, %v12216_v51 }
0x15c5   :  { %v3297_v18 = vpack.c.bf16 %v3281_v29, %v3278_v8  ;;  %10749 = vmatprep.mubr.msk.bf16.mxu0 %vm12217_vm1, %v12216_v51  ;;  %v11483_v8 = vld [vmem:[#allocation10 + $0x60] sm:$0xff]  }
0x15c6   :  { %10754 = vmatpush3.bf16.msra.mxu1 %v3298_v9 }
0x15c7   :  { %10748 = vmatpush3.bf16.msra.mxu0 %v3297_v18  ;;  %10771 = vmatprep.subr.bf16.mxu1 %v11483_v8 }
0x1696   :  { %v3386_v23 = vpop.f32.mrb[88].mxu1 }
0x1697   :  { %v3339_v25 = vpop.f32.mrb[76].mxu0  ;;  %v10745_v27 = vpop.f32.mrb[89].mxu1  ;;  %v3399_v61 = vsel %vm640_vm3, %v3386_v23, -inf }
0x1698   :  { %v10739_v30 = vpop.f32.mrb[77].mxu0  ;;  %v3389_v60 = vpop.f32.mrb[90].mxu1  ;;  %v3393_v54 = vsel %vm640_vm3, %v3339_v25, -inf }
0x1699   :  { %3394 = vmax.xlane.f32.xlu0 %v3393_v54  ;;  %v3342_v56 = vpop.f32.mrb[78].mxu0  ;;  %v10746_v53 = vpop.f32.mrb[91].mxu1  ;;  %v3402_v21 = vsel %vm640_vm3, %v3389_v60, -inf }
0x169a   :  { %v10740_v57 = vpop.f32.mrb[79].mxu0  ;;  %v3396_v58 = vsel %vm640_vm3, %v3342_v56, -inf }
0x169b   :  { %3397 = vmax.xlane.f32.xlu1 %v3396_v58 }
0x169d   :  { %3400 = vmax.xlane.f32.xlu0 %v3399_v61  ;;  %v11484_v61 = vld [vmem:[#allocation10 + $0x68] sm:$0xff]  }
0x169f   :  { %3403 = vmax.xlane.f32.xlu1 %v3402_v21  ;;  %v11485_v21 = vld [vmem:[#allocation11 + $0x60] sm:$0xff]  }
0x1726   :  { %v3395_v62 = vpop.xlane.xlu0 %3394 }
0x1727   :  { %v3405_v63 = vsub.f32 %v3339_v25, %v3395_v62  ;;  %v11486_v62 = vld [vmem:[#allocation11 + $0x68] sm:$0xff]  }
0x1728   :  { %v3398_v31 = vpop.xlane.xlu1 %3397 }
0x1729   :  { %v3409_v33 = vmul.f32 1.442695, %v3405_v63  ;;  %v3406_v10 = vsub.f32 %v3342_v56, %v3398_v31  ;;  %v3530_v63 = vld [vmem:[#allocation14 + $0x14] sm:$0xf] }
0x172a   :  { %v3401_v7 = vpop.xlane.xlu0 %3400  ;;  %11411 = vmatprep.subr.msk.bf16.mxu0 %vm1220_vm4, %v3530_v63  ;;  %v3538_v31 = vsel %vm1220_vm4, %v3530_v63, 0 }
0x172b   :  { %11667 = vpow2.f32 %v3409_v33  ;;  %v3411_v13 = vmul.f32 1.442695, %v3406_v10  ;;  %v3407_v26 = vsub.f32 %v3386_v23, %v3401_v7  ;;  %v3094_v33 = vld [vmem:[#allocation14 + $0x10] sm:$0xf] }
0x172c   :  { %v3404_v11 = vpop.xlane.xlu1 %3403 }
0x172d   :  { %11669 = vpow2.f32 %v3411_v13  ;;  %v3413_v35 = vmul.f32 1.442695, %v3407_v26  ;;  %v3408_v39 = vsub.f32 %v3389_v60, %v3404_v11 }
0x172f   :  { %11671 = vpow2.f32 %v3413_v35  ;;  %v3415_v44 = vmul.f32 1.442695, %v3408_v39 }
0x1731   :  { %11673 = vpow2.f32 %v3415_v44 }
0x1735   :  { %v11668_v20 = vpop.eup %11667 }
0x1736   :  { %v3417_v43 = vsel %vm640_vm3, %v11668_v20, 0.0 }
0x1737   :  { %v11670_v52 = vpop.eup %11669  ;;  %3418 = vadd.xlane.f32.xlu0 %v3417_v43 }
0x1738   :  { %v3420_v59 = vsel %vm640_vm3, %v11670_v52, 0.0 }
0x1739   :  { %v11672_v3 = vpop.eup %11671  ;;  %3421 = vadd.xlane.f32.xlu1 %v3420_v59  ;;  %v11487_v59 = vld [vmem:[#allocation13 + $0x60] sm:$0xff]  }
0x173a   :  { %v3423_v4 = vsel %vm640_vm3, %v11672_v3, 0.0 }
0x173b   :  { %v11674_v0 = vpop.eup %11673  ;;  %3424 = vadd.xlane.f32.xlu0 %v3423_v4 }
0x173c   :  { %v3426_v19 = vsel %vm640_vm3, %v11674_v0, 0.0 }
0x173d   :  { %3427 = vadd.xlane.f32.xlu1 %v3426_v19 }
0x17c4   :  { %v3419_v47 = vpop.xlane.xlu0 %3418 }
0x17c5   :  { %11675 = vrcp.f32 %v3419_v47 }
0x17c6   :  { %v3422_v9 = vpop.xlane.xlu1 %3421 }
0x17c7   :  { %11677 = vrcp.f32 %v3422_v9  ;;  %v11488_v9 = vld [vmem:[#allocation13 + $0x68] sm:$0xff]  }
0x17c8   :  { %v3425_v29 = vpop.xlane.xlu0 %3424 }
0x17c9   :  { %11679 = vrcp.f32 %v3425_v29 }
0x17ca   :  { %v3428_v18 = vpop.xlane.xlu1 %3427 }
0x17cb   :  { %11681 = vrcp.f32 %v3428_v18 }
0x17cf   :  { %v11676_v23 = vpop.eup %11675 }
0x17d0   :  { %v3433_v27 = vmul.f32 %v11676_v23, %v11668_v20 }
0x17d1   :  { %v11678_v25 = vpop.eup %11677 }
0x17d2   :  { %v3434_v30 = vmul.f32 %v11678_v25, %v11670_v52  ;;  %v3596_v52 = vsel %vm1220_vm4, %v3094_v33, 0 }
0x17d3   :  { %v11680_v60 = vpop.eup %11679 }
0x17d4   :  { %v3437_v54 = vpack.c.bf16 %v3434_v30, %v3433_v27  ;;  %v3435_v53 = vmul.f32 %v11680_v60, %v11672_v3 }
0x17d5   :  { %v11682_v56 = vpop.eup %11681 }
0x17d6   :  { %v3436_v57 = vmul.f32 %v11682_v56, %v11674_v0  ;;  %10750 = vmatmul.mubr.msk.bf16.vlgmr.msra.gmra.mrb[80].mxu0 %vm640_vm3, %v3437_v54 }
0x17d7   :  { %10760 = vmatpush3.bf16.msra.mxu0 %v3538_v31 }
0x17d8   :  { %v3438_v58 = vpack.c.bf16 %v3436_v57, %v3435_v53  ;;  %11412 = vmatprep.subr.msk.bf16.mxu0 %vm1220_vm4, %v3094_v33 }
0x17da   :  { %10756 = vmatmul.mubr.msk.bf16.vlgmr.msra.gmra.mrb[92].mxu1 %vm640_vm3, %v3438_v58 }
0x17db   :  { %10772 = vmatpush3.bf16.msra.mxu1 %v11483_v8  ;;  %10775 = vmatprep.mubr.msk.bf16.mxu1 %vm184_vm0, %v12545_v38 }
0x17dc   :  { %10773 = vmatprep.subr.bf16.mxu1 %v11484_v61 }
0x17df   :  { %10774 = vmatpush3.bf16.msra.mxu1 %v11484_v61 }
0x17e0   :  { %10779 = vmatprep.subr.bf16.mxu1 %v11485_v21 }
0x17e2   :  { %10776 = vmatmul.mubr.msk.bf16.vlgmr.msra.gmra.mrb[96].mxu1 %vm184_vm0, %v12553_v34 }
0x17e3   :  { %10780 = vmatpush3.bf16.msra.mxu1 %v11485_v21  ;;  %10783 = vmatprep.mubr.msk.bf16.mxu1 %vm184_vm0, %v12555_v36 }
0x17e4   :  { %10781 = vmatprep.subr.bf16.mxu1 %v11486_v62 }
0x17e7   :  { %10782 = vmatpush3.bf16.msra.mxu1 %v11486_v62 }
0x17e8   :  { %10795 = vmatprep.subr.bf16.mxu1 %v12216_v51 }
0x17ea   :  { %10784 = vmatmul.mubr.msk.bf16.vlgmr.msra.gmra.mrb[100].mxu1 %vm184_vm0, %v12559_v46 }
0x17eb   :  { %10797 = vmatprep.mubr.msk.bf16.mxu1 %vm12217_vm1, %v12216_v51 }
0x18a9   :  { %v3476_v10 = vpop.f32.mrb[80].mxu0 }
0x18aa   :  { %v10751_v7 = vpop.f32.mrb[81].mxu0 }
0x18ab   :  { %v3479_v13 = vpop.f32.mrb[82].mxu0 }
0x18ac   :  { %v3527_v26 = vpack.c.bf16 %v3479_v13, %v3476_v10  ;;  %v10752_v11 = vpop.f32.mrb[83].mxu0 }
0x18ad   :  { %v3520_v35 = vpop.f32.mrb[92].mxu1 }
0x18ae   :  { %v10757_v39 = vpop.f32.mrb[93].mxu1  ;;  %10761 = vmatprep.mubr.msk.bf16.mxu0 %vm545_vm2, %v3527_v26 }
0x18af   :  { %v3523_v44 = vpop.f32.mrb[94].mxu1 }
0x18b0   :  { %v3528_v20 = vpack.c.bf16 %v3523_v44, %v3520_v35  ;;  %v10758_v43 = vpop.f32.mrb[95].mxu1 }
0x18b2   :  { %10762 = vmatmul.mubr.msk.bf16.vlgmr.msra.gmra.mrb[84].mxu0 %vm545_vm2, %v3528_v20 }
0x18b3   :  { %10767 = vmatprep.mubr.msk.bf16.mxu0 %vm545_vm2, %v3091_v6  ;;  %10766 = vmatpush3.bf16.msra.mxu0 %v3596_v52 }
0x18b4   :  { %10787 = vmatprep.subr.bf16.mxu0 %v11487_v59 }
0x18b5   :  { %v10777_v3 = vpop.f32.mrb[96].mxu1 }
0x18b6   :  { %v3698_v4 = vpop.f32.mrb[97].mxu1 }
0x18b7   :  { %v10778_v0 = vpop.f32.mrb[98].mxu1 }
0x18b8   :  { %v3846_v19 = vpack.c.bf16 %v10778_v0, %v10777_v3  ;;  %v3701_v8 = vpop.f32.mrb[99].mxu1 }
0x18b9   :  { %v3845_v47 = vpack.c.bf16 %v3701_v8, %v3698_v4 }
0x18bd   :  { %v10785_v29 = vpop.f32.mrb[100].mxu1 }
0x18be   :  { %10768 = vmatmul.mubr.msk.bf16.vlgmr.msra.gmra.mrb[84].mxu0 %vm545_vm2, %v3092_v40  ;;  %v3764_v18 = vpop.f32.mrb[101].mxu1 }
0x18bf   :  { %10788 = vmatpush3.bf16.msra.mxu0 %v11487_v59  ;;  %v10786_v22 = vpop.f32.mrb[102].mxu1  ;;  %10791 = vmatprep.mubr.msk.bf16.mxu0 %vm184_vm0, %v12555_v36 }
0x18c0   :  { %v3848_v48 = vpack.c.bf16 %v10786_v22, %v10785_v29  ;;  %v3767_v6 = vpop.f32.mrb[103].mxu1  ;;  %10789 = vmatprep.subr.bf16.mxu0 %v11488_v9 }
0x18c1   :  { %v3847_v23 = vpack.c.bf16 %v3767_v6, %v3764_v18 }
0x18c2   :  { %v3902_v28 = vsel %vm545_vm2, %v3848_v48, 0  ;;  %v11489_v48 = vld [vmem:[#allocation10 + $0x70] sm:$0xff]  }
0x18c3   :  { %v3855_v25 = vsel %vm545_vm2, %v3847_v23, 0  ;;  %10790 = vmatpush3.bf16.msra.mxu0 %v11488_v9 }
0x18c4   :  { %10796 = vmatpush3.bf16.xpose.msra.mxu1 %v3855_v25  ;;  %10801 = vmatprep.subr.bf16.mxu0 %v12216_v51 }
0x18c5   :  { %10807 = vmatprep.subr.bf16.mxu1 %v12216_v51 }
0x18c6   :  { %10792 = vmatmul.mubr.msk.bf16.vlgmr.msra.gmra.mrb[88].mxu0 %vm184_vm0, %v12559_v46 }
0x18c7   :  { %10803 = vmatprep.mubr.msk.bf16.mxu0 %vm12217_vm1, %v12216_v51 }
0x18cb   :  { %10798 = vmatmul.mubr.msk.bf16.vlgmr.msra.gmra.mrb[104].mxu1 %vm545_vm2, %v3845_v47 }
0x18cc   :  { %10802 = vmatpush3.bf16.xpose.msra.mxu0 %v3902_v28  ;;  %10809 = vmatprep.mubr.msk.bf16.mxu1 %vm12217_vm1, %v12216_v51 }
0x18cd   :  { %10813 = vmatprep.subr.bf16.mxu0 %v12216_v51 }
0x18d3   :  { %10804 = vmatmul.mubr.msk.bf16.vlgmr.msra.gmra.mrb[92].mxu0 %vm545_vm2, %v3846_v19 }
0x18d4   :  { %10815 = vmatprep.mubr.msk.bf16.mxu0 %vm12217_vm1, %v12216_v51 }
0x1999   :  { %v10793_v1 = vpop.f32.mrb[88].mxu0 }
0x199a   :  { %v3830_v40 = vpop.f32.mrb[89].mxu0 }
0x199b   :  { %v10794_v27 = vpop.f32.mrb[90].mxu0 }
0x199c   :  { %v3850_v30 = vpack.c.bf16 %v10794_v27, %v10793_v1  ;;  %v3833_v60 = vpop.f32.mrb[91].mxu0 }
0x199d   :  { %v3849_v54 = vpack.c.bf16 %v3833_v60, %v3830_v40 }
0x199e   :  { %v3891_v56 = vpop.f32.mrb[104].mxu1  ;;  %10814 = vmatpush3.bf16.msra.mxu0 %v3850_v30 }
0x199f   :  { %v10799_v53 = vpop.f32.mrb[105].mxu1  ;;  %10808 = vmatpush3.bf16.msra.mxu1 %v3849_v54  ;;  %v3945_v57 = vsel %vm640_vm3, %v3891_v56, -inf  ;;  %v11490_v54 = vld [vmem:[#allocation10 + $0x78] sm:$0xff]  }
0x19a0   :  { %3946 = vmax.xlane.f32.xlu0 %v3945_v57  ;;  %v3894_v58 = vpop.f32.mrb[106].mxu1  ;;  %10825 = vmatprep.subr.bf16.mxu1 %v11489_v48  ;;  %v11491_v53 = vld [vmem:[#allocation11 + $0x70] sm:$0xff]  }
0x19a1   :  { %v10800_v61 = vpop.f32.mrb[107].mxu1  ;;  %v3948_v21 = vsel %vm640_vm3, %v3894_v58, -inf }
0x19a2   :  { %3949 = vmax.xlane.f32.xlu1 %v3948_v21 }
0x19a6   :  { %v3938_v62 = vpop.f32.mrb[92].mxu0 }
0x19a7   :  { %v10805_v63 = vpop.f32.mrb[93].mxu0  ;;  %v3951_v31 = vsel %vm640_vm3, %v3938_v62, -inf }
0x19a8   :  { %3952 = vmax.xlane.f32.xlu0 %v3951_v31  ;;  %v3941_v33 = vpop.f32.mrb[94].mxu0 }
0x19a9   :  { %v10806_v10 = vpop.f32.mrb[95].mxu0  ;;  %v3954_v7 = vsel %vm640_vm3, %v3941_v33, -inf }
0x19aa   :  { %3955 = vmax.xlane.f32.xlu1 %v3954_v7 }
0x1a2d   :  { %v3947_v13 = vpop.xlane.xlu0 %3946 }
0x1a2e   :  { %v3957_v26 = vsub.f32 %v3891_v56, %v3947_v13 }
0x1a2f   :  { %v3950_v11 = vpop.xlane.xlu1 %3949 }
0x1a30   :  { %v3961_v35 = vmul.f32 1.442695, %v3957_v26  ;;  %v3958_v39 = vsub.f32 %v3894_v58, %v3950_v11 }
0x1a32   :  { %11683 = vpow2.f32 %v3961_v35  ;;  %v3963_v44 = vmul.f32 1.442695, %v3958_v39 }
0x1a34   :  { %11685 = vpow2.f32 %v3963_v44 }
0x1a35   :  { %v3953_v20 = vpop.xlane.xlu0 %3952 }
0x1a36   :  { %v3959_v43 = vsub.f32 %v3938_v62, %v3953_v20  ;;  %v11492_v62 = vld [vmem:[#allocation11 + $0x78] sm:$0xff]  }
0x1a37   :  { %v3956_v52 = vpop.xlane.xlu1 %3955 }
0x1a38   :  { %v3965_v59 = vmul.f32 1.442695, %v3959_v43  ;;  %v3960_v3 = vsub.f32 %v3941_v33, %v3956_v52 }
0x1a3a   :  { %11687 = vpow2.f32 %v3965_v59  ;;  %v3967_v4 = vmul.f32 1.442695, %v3960_v3 }
0x1a3c   :  { %v11684_v0 = vpop.eup %11683  ;;  %11689 = vpow2.f32 %v3967_v4  ;;  %v11494_v4 = vld [vmem:[#allocation13 + $0x78] sm:$0xff]  }
0x1a3d   :  { %v3969_v19 = vsel %vm640_vm3, %v11684_v0, 0.0 }
0x1a3e   :  { %v11686_v8 = vpop.eup %11685  ;;  %3970 = vadd.xlane.f32.xlu0 %v3969_v19 }
0x1a3f   :  { %v3972_v47 = vsel %vm640_vm3, %v11686_v8, 0.0 }
0x1a40   :  { %3973 = vadd.xlane.f32.xlu1 %v3972_v47 }
0x1a44   :  { %v11688_v9 = vpop.eup %11687 }
0x1a45   :  { %v3975_v29 = vsel %vm640_vm3, %v11688_v9, 0.0 }
0x1a46   :  { %v11690_v18 = vpop.eup %11689  ;;  %3976 = vadd.xlane.f32.xlu0 %v3975_v29 }
0x1a47   :  { %v3978_v22 = vsel %vm640_vm3, %v11690_v18, 0.0 }
0x1a48   :  { %3979 = vadd.xlane.f32.xlu1 %v3978_v22 }
0x1acb   :  { %v3971_v6 = vpop.xlane.xlu0 %3970 }
0x1acc   :  { %11691 = vrcp.f32 %v3971_v6 }
0x1acd   :  { %v3974_v23 = vpop.xlane.xlu1 %3973 }
0x1ace   :  { %11693 = vrcp.f32 %v3974_v23 }
0x1ad3   :  { %v3977_v25 = vpop.xlane.xlu0 %3976 }
0x1ad4   :  { %11695 = vrcp.f32 %v3977_v25 }
0x1ad5   :  { %v3980_v28 = vpop.xlane.xlu1 %3979 }
0x1ad6   :  { %v11692_v1 = vpop.eup %11691  ;;  %11697 = vrcp.f32 %v3980_v28 }
0x1ad7   :  { %v3985_v27 = vmul.f32 %v11692_v1, %v11684_v0 }
0x1ad8   :  { %v11694_v40 = vpop.eup %11693 }
0x1ad9   :  { %v3986_v30 = vmul.f32 %v11694_v40, %v11686_v8 }
0x1adb   :  { %v3989_v60 = vpack.c.bf16 %v3986_v30, %v3985_v27 }
0x1add   :  { %10810 = vmatmul.mubr.msk.bf16.vlgmr.msra.gmra.mrb[108].mxu1 %vm640_vm3, %v3989_v60 }
0x1ade   :  { %v11696_v56 = vpop.eup %11695  ;;  %10826 = vmatpush3.bf16.msra.mxu1 %v11489_v48  ;;  %10829 = vmatprep.mubr.msk.bf16.mxu1 %vm184_vm0, %v12545_v38  ;;  %v4082_v38 = vld [vmem:[#allocation14 + $0x18] sm:$0xf] }
0x1adf   :  { %10827 = vmatprep.subr.bf16.mxu1 %v11490_v54  ;;  %v3987_v58 = vmul.f32 %v11696_v56, %v11688_v9  ;;  %11413 = vmatprep.subr.msk.bf16.mxu0 %vm1220_vm4, %v4082_v38  ;;  %v4090_v63 = vsel %vm1220_vm4, %v4082_v38, 0 }
0x1ae0   :  { %v11698_v57 = vpop.eup %11697 }
0x1ae1   :  { %v3988_v61 = vmul.f32 %v11698_v57, %v11690_v18 }
0x1ae2   :  { %10828 = vmatpush3.bf16.msra.mxu1 %v11490_v54 }
0x1ae3   :  { %v3990_v21 = vpack.c.bf16 %v3988_v61, %v3987_v58  ;;  %10833 = vmatprep.subr.bf16.mxu1 %v11491_v53 }
0x1ae5   :  { %10816 = vmatmul.mubr.msk.bf16.vlgmr.msra.gmra.mrb[96].mxu0 %vm640_vm3, %v3990_v21  ;;  %10830 = vmatmul.mubr.msk.bf16.vlgmr.msra.gmra.mrb[112].mxu1 %vm184_vm0, %v12553_v34  ;;  %v11493_v34 = vld [vmem:[#allocation13 + $0x70] sm:$0xff]  }
0x1ae6   :  { %10834 = vmatpush3.bf16.msra.mxu1 %v11491_v53  ;;  %10837 = vmatprep.mubr.msk.bf16.mxu1 %vm184_vm0, %v12555_v36 }
0x1ae7   :  { %10835 = vmatprep.subr.bf16.mxu1 %v11492_v62  ;;  %10820 = vmatpush3.bf16.msra.mxu0 %v4090_v63 }
0x1ae8   :  { %10841 = vmatprep.subr.bf16.mxu0 %v11493_v34 }
0x1aea   :  { %10836 = vmatpush3.bf16.msra.mxu1 %v11492_v62 }
0x1aeb   :  { %10849 = vmatprep.subr.bf16.mxu1 %v12216_v51 }
0x1aed   :  { %10838 = vmatmul.mubr.msk.bf16.vlgmr.msra.gmra.mrb[116].mxu1 %vm184_vm0, %v12559_v46 }
0x1aee   :  { %10851 = vmatprep.mubr.msk.bf16.mxu1 %vm12217_vm1, %v12216_v51 }
0x1bb0   :  { %v4028_v31 = vpop.f32.mrb[108].mxu1 }
0x1bb1   :  { %v10811_v33 = vpop.f32.mrb[109].mxu1 }
0x1bb2   :  { %v4031_v10 = vpop.f32.mrb[110].mxu1 }
0x1bb3   :  { %v4079_v7 = vpack.c.bf16 %v4031_v10, %v4028_v31  ;;  %v10812_v13 = vpop.f32.mrb[111].mxu1 }
0x1bb5   :  { %10821 = vmatprep.mubr.msk.bf16.mxu0 %vm545_vm2, %v4079_v7 }
0x1bb8   :  { %v4072_v26 = vpop.f32.mrb[96].mxu0  ;;  %v10831_v11 = vpop.f32.mrb[112].mxu1 }
0x1bb9   :  { %v10817_v35 = vpop.f32.mrb[97].mxu0  ;;  %v4196_v39 = vpop.f32.mrb[113].mxu1 }
0x1bba   :  { %v4075_v44 = vpop.f32.mrb[98].mxu0  ;;  %v10832_v20 = vpop.f32.mrb[114].mxu1 }
0x1bbb   :  { %v4080_v43 = vpack.c.bf16 %v4075_v44, %v4072_v26  ;;  %v10818_v52 = vpop.f32.mrb[99].mxu0  ;;  %v4344_v59 = vpack.c.bf16 %v10832_v20, %v10831_v11  ;;  %v4199_v3 = vpop.f32.mrb[115].mxu1 }
0x1bbc   :  { %v4343_v0 = vpack.c.bf16 %v4199_v3, %v4196_v39 }
0x1bbd   :  { %10822 = vmatmul.mubr.msk.bf16.vlgmr.msra.gmra.mrb[84].mxu0 %vm545_vm2, %v4080_v43 }
0x1bbe   :  { %10842 = vmatpush3.bf16.msra.mxu0 %v11493_v34  ;;  %10845 = vmatprep.mubr.msk.bf16.mxu0 %vm184_vm0, %v12555_v36 }
0x1bbf   :  { %10843 = vmatprep.subr.bf16.mxu0 %v11494_v4 }
0x1bc0   :  { %v10839_v19 = vpop.f32.mrb[116].mxu1 }
0x1bc1   :  { %v4262_v8 = vpop.f32.mrb[117].mxu1 }
0x1bc2   :  { %10844 = vmatpush3.bf16.msra.mxu0 %v11494_v4  ;;  %v10840_v47 = vpop.f32.mrb[118].mxu1 }
0x1bc3   :  { %v4346_v9 = vpack.c.bf16 %v10840_v47, %v10839_v19  ;;  %v4265_v29 = vpop.f32.mrb[119].mxu1  ;;  %10855 = vmatprep.subr.bf16.mxu0 %v12216_v51 }
0x1bc4   :  { %v4345_v18 = vpack.c.bf16 %v4265_v29, %v4262_v8 }
0x1bc5   :  { %10846 = vmatmul.mubr.msk.bf16.vlgmr.msra.gmra.mrb[100].mxu0 %vm184_vm0, %v12559_v46  ;;  %v4400_v36 = vsel %vm545_vm2, %v4346_v9, 0 }
0x1bc6   :  { %v4353_v22 = vsel %vm545_vm2, %v4345_v18, 0  ;;  %10857 = vmatprep.mubr.msk.bf16.mxu0 %vm12217_vm1, %v12216_v51 }
0x1bc7   :  { %10850 = vmatpush3.bf16.xpose.msra.mxu1 %v4353_v22 }
0x1bc8   :  { %10861 = vmatprep.subr.bf16.mxu1 %v12216_v51 }
0x1bcb   :  { %10856 = vmatpush3.bf16.xpose.msra.mxu0 %v4400_v36 }
0x1bcc   :  { %10867 = vmatprep.subr.bf16.mxu0 %v12216_v51 }
0x1bce   :  { %10852 = vmatmul.mubr.msk.bf16.vlgmr.msra.gmra.mrb[120].mxu1 %vm545_vm2, %v4343_v0 }
0x1bcf   :  { %10863 = vmatprep.mubr.msk.bf16.mxu1 %vm12217_vm1, %v12216_v51 }
0x1bd2   :  { %10858 = vmatmul.mubr.msk.bf16.vlgmr.msra.gmra.mrb[104].mxu0 %vm545_vm2, %v4344_v59 }
0x1bd3   :  { %10869 = vmatprep.mubr.msk.bf16.mxu0 %vm12217_vm1, %v12216_v51 }
0x1c98   :  { %v10847_v46 = vpop.f32.mrb[100].mxu0 }
0x1c99   :  { %v4328_v48 = vpop.f32.mrb[101].mxu0 }
0x1c9a   :  { %v10848_v6 = vpop.f32.mrb[102].mxu0 }
0x1c9b   :  { %v4348_v23 = vpack.c.bf16 %v10848_v6, %v10847_v46  ;;  %v4331_v25 = vpop.f32.mrb[103].mxu0 }
0x1c9c   :  { %v4347_v28 = vpack.c.bf16 %v4331_v25, %v4328_v48 }
0x1c9d   :  { %10868 = vmatpush3.bf16.msra.mxu0 %v4348_v23 }
0x1c9e   :  { %10862 = vmatpush3.bf16.msra.mxu1 %v4347_v28  ;;  %v4580_v28 = vld [vmem:[#allocation14 + $0x1c] sm:$0xf] }
0x1c9f   :  { %11414 = vmatprep.subr.msk.bf16.mxu0 %vm1220_vm4, %v4580_v28 }
0x1ca1   :  { %v4389_v1 = vpop.f32.mrb[120].mxu1 }
0x1ca2   :  { %v10853_v40 = vpop.f32.mrb[121].mxu1  ;;  %v4443_v27 = vsel %vm640_vm3, %v4389_v1, -inf }
0x1ca3   :  { %4444 = vmax.xlane.f32.xlu0 %v4443_v27  ;;  %v4392_v30 = vpop.f32.mrb[122].mxu1 }
0x1ca4   :  { %v10854_v60 = vpop.f32.mrb[123].mxu1  ;;  %v4446_v54 = vsel %vm640_vm3, %v4392_v30, -inf }
0x1ca5   :  { %v4436_v56 = vpop.f32.mrb[104].mxu0  ;;  %4447 = vmax.xlane.f32.xlu1 %v4446_v54 }
0x1ca6   :  { %v10859_v53 = vpop.f32.mrb[105].mxu0  ;;  %v4449_v57 = vsel %vm640_vm3, %v4436_v56, -inf }
0x1ca7   :  { %v4439_v58 = vpop.f32.mrb[106].mxu0  ;;  %4450 = vmax.xlane.f32.xlu0 %v4449_v57 }
0x1ca8   :  { %v10860_v61 = vpop.f32.mrb[107].mxu0  ;;  %v4452_v21 = vsel %vm640_vm3, %v4439_v58, -inf }
0x1ca9   :  { %4453 = vmax.xlane.f32.xlu1 %v4452_v21 }
0x1d30   :  { %v4445_v62 = vpop.xlane.xlu0 %4444 }
0x1d31   :  { %v4455_v38 = vsub.f32 %v4389_v1, %v4445_v62  ;;  %v4588_v1 = vsel %vm1220_vm4, %v4580_v28, 0  ;;  %v13021_v62 = vld [vmem:[#allocation7 + $0x8] sm:$0xff] }
0x1d32   :  { %v4448_v63 = vpop.xlane.xlu1 %4447 }
0x1d33   :  { %v4459_v34 = vmul.f32 1.442695, %v4455_v38  ;;  %v4456_v31 = vsub.f32 %v4392_v30, %v4448_v63  ;;  %v4650_v38 = vrot.slane %v13021_v62, %v12758_v17 }
0x1d34   :  { %v4451_v33 = vpop.xlane.xlu0 %4450 }
0x1d35   :  { %11699 = vpow2.f32 %v4459_v34  ;;  %v4461_v10 = vmul.f32 1.442695, %v4456_v31  ;;  %v4457_v7 = vsub.f32 %v4436_v56, %v4451_v33  ;;  %v11913_v34 = vld [vmem:[#allocation5 + $0x10] sm:$0xff]  ;;  %v11914_v33 = vld [vmem:[#allocation5] sm:$0xff] }
0x1d36   :  { %v4454_v13 = vpop.xlane.xlu1 %4453 }
0x1d37   :  { %11701 = vpow2.f32 %v4461_v10  ;;  %v4463_v26 = vmul.f32 1.442695, %v4457_v7  ;;  %v4458_v11 = vsub.f32 %v4439_v58, %v4454_v13 }
0x1d39   :  { %11703 = vpow2.f32 %v4463_v26  ;;  %v4465_v35 = vmul.f32 1.442695, %v4458_v11  ;;  %v11915_v11 = vld [vmem:[#allocation5 + $0x18] sm:$0xff] }
0x1d3b   :  { %11705 = vpow2.f32 %v4465_v35 }
0x1d3f   :  { %v11700_v39 = vpop.eup %11699 }
0x1d40   :  { %v4467_v44 = vsel %vm640_vm3, %v11700_v39, 0.0 }
0x1d41   :  { %v11702_v20 = vpop.eup %11701  ;;  %4468 = vadd.xlane.f32.xlu0 %v4467_v44 }
0x1d42   :  { %v4470_v43 = vsel %vm640_vm3, %v11702_v20, 0.0 }
0x1d43   :  { %v11704_v52 = vpop.eup %11703  ;;  %4471 = vadd.xlane.f32.xlu1 %v4470_v43 }
0x1d44   :  { %v4473_v59 = vsel %vm640_vm3, %v11704_v52, 0.0 }
0x1d45   :  { %v11706_v3 = vpop.eup %11705  ;;  %4474 = vadd.xlane.f32.xlu0 %v4473_v59 }
0x1d46   :  { %v4476_v4 = vsel %vm640_vm3, %v11706_v3, 0.0 }
0x1d47   :  { %4477 = vadd.xlane.f32.xlu1 %v4476_v4 }
0x1dce   :  { %v4469_v0 = vpop.xlane.xlu0 %4468 }
0x1dcf   :  { %11707 = vrcp.f32 %v4469_v0 }
0x1dd0   :  { %v4472_v19 = vpop.xlane.xlu1 %4471 }
0x1dd1   :  { %11709 = vrcp.f32 %v4472_v19 }
0x1dd2   :  { %v4475_v8 = vpop.xlane.xlu0 %4474 }
0x1dd3   :  { %11711 = vrcp.f32 %v4475_v8 }
0x1dd4   :  { %v4478_v47 = vpop.xlane.xlu1 %4477 }
0x1dd5   :  { %11713 = vrcp.f32 %v4478_v47 }
0x1dd9   :  { %v11708_v9 = vpop.eup %11707 }
0x1dda   :  { %v4483_v18 = vmul.f32 %v11708_v9, %v11700_v39  ;;  %v11916_v39 = vld [vmem:[#allocation5 + $0x8] sm:$0xff] }
0x1ddb   :  { %v11710_v29 = vpop.eup %11709 }
0x1ddc   :  { %v4484_v22 = vmul.f32 %v11710_v29, %v11702_v20 }
0x1ddd   :  { %v11712_v36 = vpop.eup %11711 }
0x1dde   :  { %v4487_v46 = vpack.c.bf16 %v4484_v22, %v4483_v18  ;;  %v4485_v6 = vmul.f32 %v11712_v36, %v11704_v52 }
0x1ddf   :  { %v11714_v48 = vpop.eup %11713 }
0x1de0   :  { %v4486_v23 = vmul.f32 %v11714_v48, %v11706_v3  ;;  %10864 = vmatmul.mubr.msk.bf16.vlgmr.msra.gmra.mrb[124].mxu1 %vm640_vm3, %v4487_v46 }
0x1de2   :  { %v4488_v25 = vpack.c.bf16 %v4486_v23, %v4485_v6 }
0x1de4   :  { %10870 = vmatmul.mubr.msk.bf16.vlgmr.msra.gmra.mrb[108].mxu0 %vm640_vm3, %v4488_v25 }
0x1de5   :  { %10874 = vmatpush3.bf16.msra.mxu0 %v4588_v1 }
0x1eb3   :  { %v4526_v40 = vpop.f32.mrb[124].mxu1 }
0x1eb4   :  { %v10865_v27 = vpop.f32.mrb[125].mxu1 }
0x1eb5   :  { %v4529_v30 = vpop.f32.mrb[126].mxu1 }
0x1eb6   :  { %v4577_v60 = vpack.c.bf16 %v4529_v30, %v4526_v40  ;;  %v10866_v54 = vpop.f32.mrb[127].mxu1 }
0x1eb7   :  { %v4570_v56 = vpop.f32.mrb[108].mxu0 }
0x1eb8   :  { %v10871_v53 = vpop.f32.mrb[109].mxu0  ;;  %10875 = vmatprep.mubr.msk.bf16.mxu0 %vm545_vm2, %v4577_v60 }
0x1eb9   :  { %v4573_v57 = vpop.f32.mrb[110].mxu0  ;;  %v11496_v53 = vld [vmem:[#allocation16 + $0x18] sm:$0xff]  }
0x1eba   :  { %v4578_v58 = vpack.c.bf16 %v4573_v57, %v4570_v56  ;;  %v10872_v61 = vpop.f32.mrb[111].mxu0  ;;  %v11495_v56 = vld [vmem:[#allocation16 + $0x10] sm:$0xff]  }
0x1ebb   :  { %10879 = vmatprep.subr.bf16.mxu1 %v11495_v56 }
0x1ebc   :  { %10876 = vmatmul.mubr.msk.bf16.vlgmr.msra.gmra.mrb[84].mxu0 %vm545_vm2, %v4578_v58  ;;  %10880 = vmatpush3.bf16.msra.mxu1 %v11495_v56 }
0x1ebd   :  { %10881 = vmatprep.subr.bf16.mxu1 %v11496_v53 }
0x1ec0   :  { %10882 = vmatpush3.bf16.msra.mxu1 %v11496_v53 }
0x1f8f   :  { %v10877_v21 = vpop.f32.mrb[84].mxu0 }
0x1f90   :  { %v4624_v63 = vpop.f32.mrb[85].mxu0  ;;  %v4645_v31 = vadd.f32 %v11913_v34, %v10877_v21 }
0x1f91   :  { %v4643_v10 = vadd.f32 %v11914_v33, %v4624_v63  ;;  %v10878_v7 = vpop.f32.mrb[86].mxu0 }
0x1f92   :  { %v4627_v13 = vpop.f32.mrb[87].mxu0  ;;  %v4646_v35 = vadd.f32 %v11915_v11, %v10878_v7  ;;  %v13027_v20 = vadd.f32 %v4650_v38, %v4645_v31  ;;  %v4710_v11 = vrot.slane %v13021_v62, %v12813_v55 }
0x1f93   :  { %v13025_v26 = vadd.f32 %v4650_v38, %v4643_v10  ;;  %v4644_v44 = vadd.f32 %v11916_v39, %v4627_v13 }
0x1f94   :  { %v13033_v59 = vadd.f32 %v4650_v38, %v4646_v35  ;;  %v4661_v4 = vsel %vm184_vm0, %v13027_v20, 0.0 }
0x1f95   :  { %v13029_v43 = vadd.f32 %v4650_v38, %v4644_v44  ;;  %v4655_v52 = vsel %vm184_vm0, %v13025_v26, 0.0 }
0x1f96   :  { %4656 = vadd.xlane.f32.xlu0 %v4655_v52  ;;  %v4664_v0 = vsel %vm184_vm0, %v13033_v59, 0.0 }
0x1f97   :  { %v4658_v3 = vsel %vm184_vm0, %v13029_v43, 0.0 }
0x1f98   :  { %4659 = vadd.xlane.f32.xlu1 %v4658_v3 }
0x1f9a   :  { %4662 = vadd.xlane.f32.xlu0 %v4661_v4  ;;  %v4718_v4 = vrot.slane %v13021_v62, %v12818_v2 }
0x1f9c   :  { %4665 = vadd.xlane.f32.xlu1 %v4664_v0 }
0x2023   :  { %v4657_v19 = vpop.xlane.xlu0 %4656 }
0x2024   :  { %v4667_v8 = vmul.f32 0.03125, %v4657_v19 }
0x2025   :  { %v4660_v47 = vpop.xlane.xlu1 %4659 }
0x2026   :  { %v4671_v9 = vsub.f32 %v13025_v26, %v4667_v8  ;;  %v4668_v29 = vmul.f32 0.03125, %v4660_v47 }
0x2027   :  { %v4663_v18 = vpop.xlane.xlu0 %4662 }
0x2028   :  { %v4672_v22 = vsub.f32 %v13029_v43, %v4668_v29  ;;  %v4669_v36 = vmul.f32 0.03125, %v4663_v18  ;;  %v4675_v46 = vmul.f32 %v4671_v9, %v4671_v9 }
0x2029   :  { %v4666_v48 = vpop.xlane.xlu1 %4665 }
0x202a   :  { %v4673_v6 = vsub.f32 %v13027_v20, %v4669_v36  ;;  %v4670_v23 = vmul.f32 0.03125, %v4666_v48  ;;  %v4679_v25 = vsel %vm184_vm0, %v4675_v46, 0.0  ;;  %v4676_v28 = vmul.f32 %v4672_v22, %v4672_v22 }
0x202b   :  { %4680 = vadd.xlane.f32.xlu0 %v4679_v25 }
0x202c   :  { %v4674_v1 = vsub.f32 %v13033_v59, %v4670_v23  ;;  %v4682_v40 = vsel %vm184_vm0, %v4676_v28, 0.0  ;;  %v4677_v27 = vmul.f32 %v4673_v6, %v4673_v6 }
0x202d   :  { %4683 = vadd.xlane.f32.xlu1 %v4682_v40  ;;  %v11498_v40 = vld [vmem:[#allocation17 + $0x18] sm:$0xff]  }
0x202e   :  { %v4685_v30 = vsel %vm184_vm0, %v4677_v27, 0.0  ;;  %v4678_v60 = vmul.f32 %v4674_v1, %v4674_v1 }
0x202f   :  { %4686 = vadd.xlane.f32.xlu0 %v4685_v30 }
0x2030   :  { %v4688_v54 = vsel %vm184_vm0, %v4678_v60, 0.0 }
0x2031   :  { %4689 = vadd.xlane.f32.xlu1 %v4688_v54 }
0x20b8   :  { %v4681_v57 = vpop.xlane.xlu0 %4680 }
0x20b9   :  { %v4691_v58 = vmul.f32 0.03125, %v4681_v57 }
0x20ba   :  { %v4684_v61 = vpop.xlane.xlu1 %4683 }
0x20bb   :  { %v4695_v21 = vadd.f32 1e-05, %v4691_v58  ;;  %v4692_v38 = vmul.f32 0.03125, %v4684_v61 }
0x20bc   :  { %v4687_v63 = vpop.xlane.xlu0 %4686 }
0x20bd   :  { %11715 = vrsqrt.f32 %v4695_v21  ;;  %v4696_v34 = vadd.f32 1e-05, %v4692_v38  ;;  %v4693_v31 = vmul.f32 0.03125, %v4687_v63 }
0x20be   :  { %v4690_v33 = vpop.xlane.xlu1 %4689 }
0x20bf   :  { %11717 = vrsqrt.f32 %v4696_v34  ;;  %v4697_v10 = vadd.f32 1e-05, %v4693_v31  ;;  %v4694_v7 = vmul.f32 0.03125, %v4690_v33 }
0x20c1   :  { %11719 = vrsqrt.f32 %v4697_v10  ;;  %v4698_v13 = vadd.f32 1e-05, %v4694_v7 }
0x20c3   :  { %11721 = vrsqrt.f32 %v4698_v13 }
0x20c7   :  { %v11716_v35 = vpop.eup %11715 }
0x20c8   :  { %v4703_v39 = vmul.f32 %v11716_v35, %v4671_v9 }
0x20c9   :  { %v11718_v44 = vpop.eup %11717 }
0x20ca   :  { %v4704_v52 = vmul.f32 %v11718_v44, %v4672_v22  ;;  %v4711_v3 = vmul.f32 %v4710_v11, %v4703_v39  ;;  %v11497_v22 = vld [vmem:[#allocation17 + $0x10] sm:$0xff]  }
0x20cb   :  { %v11720_v0 = vpop.eup %11719  ;;  %10887 = vmatprep.subr.bf16.mxu1 %v11497_v22 }
0x20cc   :  { %v4705_v19 = vmul.f32 %v11720_v0, %v4673_v6  ;;  %v4712_v8 = vmul.f32 %v4710_v11, %v4704_v52  ;;  %v4719_v36 = vadd.f32 %v4718_v4, %v4711_v3  ;;  %v9860_v6 = vld [vmem:[#allocation8 + $0x1] ss:$0 sm:$0xff] }
0x20cd   :  { %v11722_v47 = vpop.eup %11721 }
0x20ce   :  { %v4713_v29 = vmul.f32 %v4710_v11, %v4705_v19  ;;  %v4706_v18 = vmul.f32 %v11722_v47, %v4674_v1  ;;  %v4720_v46 = vadd.f32 %v4718_v4, %v4712_v8 }
0x20d0   :  { %v4714_v48 = vmul.f32 %v4710_v11, %v4706_v18  ;;  %v4723_v23 = vpack.c.bf16 %v4720_v46, %v4719_v36  ;;  %v4721_v25 = vadd.f32 %v4718_v4, %v4713_v29 }
0x20d2   :  { %10883 = vmatprep.mubr.msk.bf16.mxu1 %vm184_vm0, %v4723_v23  ;;  %v4722_v9 = vadd.f32 %v4718_v4, %v4714_v48 }
0x20d4   :  { %v4724_v28 = vpack.c.bf16 %v4722_v9, %v4721_v25 }
0x20d6   :  { %10884 = vmatmul.mubr.msk.bf16.vlgmr.msra.gmra.mrb[128].mxu1 %vm184_vm0, %v4724_v28 }
0x20d7   :  { %10888 = vmatpush3.bf16.msra.mxu1 %v11497_v22 }
0x20d8   :  { %10889 = vmatprep.subr.bf16.mxu1 %v11498_v40 }
0x20db   :  { %10890 = vmatpush3.bf16.msra.mxu1 %v11498_v40 }
0x21a9   :  { %v10885_v27 = vpop.f32.mrb[128].mxu1 }
0x21aa   :  { %v4797_v1 = vadd.f32 %v10885_v27, %v9860_v6  ;;  %v4788_v30 = vpop.f32.mrb[129].mxu1 }
0x21ab   :  { %v4789_v60 = vadd.f32 %v9860_v6, %v4788_v30  ;;  %v10886_v54 = vpop.f32.mrb[130].mxu1 }
0x21ac   :  { %v4805_v56 = vmul.f32 %v4797_v1, %v4797_v1  ;;  %v4800_v53 = vadd.f32 %v10886_v54, %v9860_v6  ;;  %v4791_v57 = vpop.f32.mrb[131].mxu1 }
0x21ad   :  { %v4803_v58 = vmul.f32 %v4789_v60, %v4789_v60  ;;  %v4792_v61 = vadd.f32 %v9860_v6, %v4791_v57  ;;  %v13058_v57 = vsub.s32 7, %v12513_v5 }
0x21ae   :  { %v4809_v21 = vmul.f32 %v4805_v56, %v4797_v1  ;;  %v4806_v38 = vmul.f32 %v4800_v53, %v4800_v53 }
0x21af   :  { %v4807_v63 = vmul.f32 %v4803_v58, %v4789_v60  ;;  %v4804_v34 = vmul.f32 %v4792_v61, %v4792_v61  ;;  %v4849_v58 = vrot.slane %v13021_v62, %v13058_v57 }
0x21b0   :  { %v4813_v31 = vmul.f32 0.044715, %v4809_v21  ;;  %v4810_v33 = vmul.f32 %v4806_v38, %v4800_v53  ;;  %v11917_v38 = vld [vmem:[#allocation7] sm:$0xff] }
0x21b1   :  { %v4811_v10 = vmul.f32 0.044715, %v4807_v63  ;;  %v4808_v7 = vmul.f32 %v4804_v34, %v4792_v61  ;;  %v2531_v63 = vrot.slane %v11917_v38, %v13058_v57 }
0x21b2   :  { %v4817_v13 = vadd.f32 %v4813_v31, %v4797_v1  ;;  %v4814_v11 = vmul.f32 0.044715, %v4810_v33 }
0x21b3   :  { %v4815_v35 = vadd.f32 %v4811_v10, %v4789_v60  ;;  %v4812_v39 = vmul.f32 0.044715, %v4808_v7  ;;  %v2585_v5 = vadd.f32 %v12835_v37, %v2531_v63  ;;  %v2593_v37 = vadd.f32 %v12833_v14, %v2531_v63 }
0x21b4   :  { %v4821_v44 = vmul.f32 0.7978846, %v4817_v13  ;;  %v4818_v52 = vadd.f32 %v4814_v11, %v4800_v53  ;;  %v2588_v11 = vadd.f32 %v12839_v15, %v2531_v63 }
0x21b5   :  { %v4819_v3 = vmul.f32 0.7978846, %v4815_v35  ;;  %v4816_v4 = vadd.f32 %v4812_v39, %v4792_v61  ;;  %v2596_v39 = vadd.f32 %v12837_v42, %v2531_v63 }
0x21b6   :  { %11723 = vtanh.f32 %v4821_v44  ;;  %v4822_v0 = vmul.f32 0.7978846, %v4818_v52  ;;  %v13089_v15 = vadd.f32 %v2588_v11, %v12768_v49  ;;  %v13094_v44 = vadd.f32 %v2593_v37, %v12766_v45 }
0x21b7   :  { %11725 = vtanh.f32 %v4819_v3  ;;  %v4820_v19 = vmul.f32 0.7978846, %v4816_v4  ;;  %v13099_v14 = vadd.f32 %v2596_v39, %v12772_v50  ;;  %v11500_v39 = vld [vmem:[#allocation11 + $0x88] sm:$0xff]  }
0x21b8   :  { %11727 = vtanh.f32 %v4822_v0  ;;  %v4924_v42 = vsel %vm184_vm0, %v13089_v15, 0.0  ;;  %v4927_v49 = vsel %vm184_vm0, %v13094_v44, 0.0 }
0x21b9   :  { %11729 = vtanh.f32 %v4820_v19  ;;  %v4930_v52 = vsel %vm184_vm0, %v13099_v14, 0.0 }
0x21c0   :  { %v11724_v8 = vpop.eup %11723 }
0x21c1   :  { %v11726_v47 = vpop.eup %11725  ;;  %v4829_v29 = vadd.f32 1.0, %v11724_v8 }
0x21c2   :  { %v11728_v18 = vpop.eup %11727  ;;  %v4827_v36 = vadd.f32 1.0, %v11726_v47 }
0x21c3   :  { %v11730_v46 = vpop.eup %11729  ;;  %v4833_v48 = vmul.f32 0.5, %v4829_v29  ;;  %v4830_v23 = vadd.f32 1.0, %v11728_v18 }
0x21c4   :  { %v4831_v25 = vmul.f32 0.5, %v4827_v36  ;;  %v4828_v9 = vadd.f32 1.0, %v11730_v46 }
0x21c5   :  { %v4834_v28 = vmul.f32 0.5, %v4830_v23  ;;  %v4837_v40 = vmul.f32 %v4833_v48, %v4797_v1 }
0x21c6   :  { %v4832_v22 = vmul.f32 0.5, %v4828_v9  ;;  %v4835_v27 = vmul.f32 %v4831_v25, %v4789_v60 }
0x21c7   :  { %v4838_v6 = vmul.f32 %v4834_v28, %v4800_v53 }
0x21c8   :  { %v4836_v30 = vmul.f32 %v4832_v22, %v4792_v61 }
0x21c9   :  { %v4840_v54 = vpack.c.bf16 %v4838_v6, %v4837_v40 }
0x21ca   :  { %v4839_v56 = vpack.c.bf16 %v4836_v30, %v4835_v27 }
0x21cc   :  { %10891 = vmatprep.mubr.msk.bf16.mxu1 %vm184_vm0, %v4839_v56 }
0x21cd   :  { %10892 = vmatmul.mubr.msk.bf16.vlgmr.msra.gmra.mrb[132].mxu1 %vm184_vm0, %v4840_v54 }
0x22a0   :  { %v10893_v21 = vpop.f32.mrb[132].mxu1 }
0x22a1   :  { %v4911_v1 = vadd.f32 %v10893_v21, %v4849_v58  ;;  %v4902_v53 = vpop.f32.mrb[133].mxu1 }
0x22a2   :  { %v4903_v60 = vadd.f32 %v4902_v53, %v4849_v58  ;;  %v10894_v61 = vpop.f32.mrb[134].mxu1 }
0x22a3   :  { %v13064_v34 = vadd.f32 %v4911_v1, %v13027_v20  ;;  %v4914_v31 = vadd.f32 %v10894_v61, %v4849_v58  ;;  %v4905_v33 = vpop.f32.mrb[135].mxu1 }
0x22a4   :  { %v4906_v10 = vadd.f32 %v4905_v33, %v4849_v58  ;;  %v13068_v7 = vadd.f32 %v4903_v60, %v13025_v26  ;;  %v13083_v26 = vadd.f32 %v2585_v5, %v12764_v41 }
0x22a5   :  { %v13071_v62 = vadd.f32 %v4914_v31, %v13033_v59  ;;  %v4979_v13 = vsel %vm184_vm0, %v13064_v34, 0.0 }
0x22a6   :  { %4980 = vadd.xlane.f32.xlu0 %v4979_v13  ;;  %v13077_v20 = vadd.f32 %v4906_v10, %v13029_v43  ;;  %v4973_v59 = vsel %vm184_vm0, %v13068_v7, 0.0  ;;  %v4921_v41 = vsel %vm184_vm0, %v13083_v26, 0.0 }
0x22a7   :  { %v4982_v35 = vsel %vm184_vm0, %v13071_v62, 0.0 }
0x22a8   :  { %4983 = vadd.xlane.f32.xlu1 %v4982_v35  ;;  %v4976_v43 = vsel %vm184_vm0, %v13077_v20, 0.0 }
0x22aa   :  { %4974 = vadd.xlane.f32.xlu0 %v4973_v59  ;;  %v11499_v59 = vld [vmem:[#allocation11 + $0x80] sm:$0xff]  }
0x22ab   :  { %10903 = vmatprep.subr.bf16.mxu1 %v11499_v59 }
0x22ac   :  { %4977 = vadd.xlane.f32.xlu1 %v4976_v43  ;;  %10904 = vmatpush3.bf16.msra.mxu1 %v11499_v59  ;;  %v11501_v43 = vld [vmem:[#allocation10 + $0x80] sm:$0xff]  }
0x22ad   :  { %10905 = vmatprep.subr.bf16.mxu1 %v11500_v39  ;;  %10895 = vmatprep.subr.bf16.mxu0 %v11501_v43 }
0x22ae   :  { %4922 = vadd.xlane.f32.xlu0 %v4921_v41  ;;  %10896 = vmatpush3.bf16.msra.mxu0 %v11501_v43  ;;  %v11502_v41 = vld [vmem:[#allocation10 + $0x88] sm:$0xff]  }
0x22af   :  { %10897 = vmatprep.subr.bf16.mxu0 %v11502_v41 }
0x22b0   :  { %4925 = vadd.xlane.f32.xlu1 %v4924_v42  ;;  %10906 = vmatpush3.bf16.msra.mxu1 %v11500_v39  ;;  %v13156_v42 = vld [vmem:[#allocation13 + $0x80] sm:$0xff]  }
0x22b1   :  { %10919 = vmatprep.subr.bf16.mxu1 %v12216_v51 }
0x22b2   :  { %4928 = vadd.xlane.f32.xlu0 %v4927_v49  ;;  %10898 = vmatpush3.bf16.msra.mxu0 %v11502_v41 }
0x22b3   :  { %10911 = vmatprep.subr.bf16.mxu0 %v13156_v42 }
0x22b4   :  { %4931 = vadd.xlane.f32.xlu1 %v4930_v52 }
0x2333   :  { %v4981_v45 = vpop.xlane.xlu0 %4980 }
0x2334   :  { %v4987_v3 = vmul.f32 0.03125, %v4981_v45 }
0x2335   :  { %v4984_v4 = vpop.xlane.xlu1 %4983 }
0x2336   :  { %v13108_v0 = vsub.f32 %v13064_v34, %v4987_v3  ;;  %v4988_v50 = vmul.f32 0.03125, %v4984_v4 }
0x2337   :  { %v4975_v19 = vpop.xlane.xlu0 %4974 }
0x2338   :  { %v13111_v8 = vsub.f32 %v13071_v62, %v4988_v50  ;;  %v4985_v47 = vmul.f32 0.03125, %v4975_v19  ;;  %v4995_v29 = vmul.f32 %v13108_v0, %v13108_v0 }
0x2339   :  { %v4978_v18 = vpop.xlane.xlu1 %4977 }
0x233a   :  { %v13116_v36 = vsub.f32 %v13068_v7, %v4985_v47  ;;  %v4986_v46 = vmul.f32 0.03125, %v4978_v18  ;;  %v5003_v48 = vsel %vm184_vm0, %v4995_v29, 0.0  ;;  %v4996_v23 = vmul.f32 %v13111_v8, %v13111_v8 }
0x233b   :  { %5004 = vadd.xlane.f32.xlu0 %v5003_v48  ;;  %v4923_v25 = vpop.xlane.xlu0 %4922 }
0x233c   :  { %v13122_v9 = vsub.f32 %v13077_v20, %v4986_v46  ;;  %v4933_v28 = vmul.f32 0.03125, %v4923_v25  ;;  %v5006_v22 = vsel %vm184_vm0, %v4996_v23, 0.0  ;;  %v4993_v40 = vmul.f32 %v13116_v36, %v13116_v36 }
0x233d   :  { %5007 = vadd.xlane.f32.xlu1 %v5006_v22  ;;  %v4926_v6 = vpop.xlane.xlu1 %4925  ;;  %v7344_v22 = vld [vmem:[#allocation7 + $0x18] sm:$0xff] }
0x233e   :  { %v13128_v27 = vsub.f32 %v13083_v26, %v4933_v28  ;;  %v4934_v30 = vmul.f32 0.03125, %v4926_v6  ;;  %v4997_v54 = vsel %vm184_vm0, %v4993_v40, 0.0  ;;  %v4994_v56 = vmul.f32 %v13122_v9, %v13122_v9 }
0x233f   :  { %4998 = vadd.xlane.f32.xlu0 %v4997_v54  ;;  %v4929_v58 = vpop.xlane.xlu0 %4928  ;;  %v5026_v54 = vld [vmem:[#allocation7 + $0x10] sm:$0xff] }
0x2340   :  { %v13134_v21 = vsub.f32 %v13089_v15, %v4934_v30  ;;  %v4935_v38 = vmul.f32 0.03125, %v4929_v58  ;;  %v5000_v63 = vsel %vm184_vm0, %v4994_v56, 0.0  ;;  %v4941_v1 = vmul.f32 %v13128_v27, %v13128_v27 }
0x2341   :  { %5001 = vadd.xlane.f32.xlu1 %v5000_v63  ;;  %v4932_v53 = vpop.xlane.xlu1 %4931  ;;  %v5062_v39 = vrot.slane %v5026_v54, %v12527_v32 }
0x2342   :  { %v13140_v60 = vsub.f32 %v13094_v44, %v4935_v38  ;;  %v4936_v61 = vmul.f32 0.03125, %v4932_v53  ;;  %v4945_v31 = vsel %vm184_vm0, %v4941_v1, 0.0  ;;  %v4942_v33 = vmul.f32 %v13134_v21, %v13134_v21 }
0x2343   :  { %4946 = vadd.xlane.f32.xlu0 %v4945_v31  ;;  %v7350_v38 = vrot.slane %v7344_v22, %v12516_v12  ;;  %v5054_v31 = vrot.slane %v5026_v54, %v12519_v16 }
0x2344   :  { %v13146_v10 = vsub.f32 %v13099_v14, %v4936_v61  ;;  %v4948_v5 = vsel %vm184_vm0, %v4942_v33, 0.0  ;;  %v4943_v13 = vmul.f32 %v13140_v60, %v13140_v60 }
0x2345   :  { %4949 = vadd.xlane.f32.xlu1 %v4948_v5 }
0x2346   :  { %v4951_v11 = vsel %vm184_vm0, %v4943_v13, 0.0  ;;  %v4944_v35 = vmul.f32 %v13146_v10, %v13146_v10 }
0x2347   :  { %4952 = vadd.xlane.f32.xlu0 %v4951_v11  ;;  %v7358_v11 = vrot.slane %v7344_v22, %v12522_v24 }
0x2348   :  { %v4954_v37 = vsel %vm184_vm0, %v4944_v35, 0.0 }
0x2349   :  { %4955 = vadd.xlane.f32.xlu1 %v4954_v37 }
0x23c8   :  { %v5005_v49 = vpop.xlane.xlu0 %5004 }
0x23c9   :  { %v5011_v52 = vmul.f32 0.03125, %v5005_v49 }
0x23ca   :  { %v5008_v45 = vpop.xlane.xlu1 %5007 }
0x23cb   :  { %v5015_v3 = vadd.f32 1e-05, %v5011_v52  ;;  %v5012_v4 = vmul.f32 0.03125, %v5008_v45 }
0x23cc   :  { %v4999_v50 = vpop.xlane.xlu0 %4998 }
0x23cd   :  { %11731 = vrsqrt.f32 %v5015_v3  ;;  %v5016_v19 = vadd.f32 1e-05, %v5012_v4  ;;  %v5009_v47 = vmul.f32 0.03125, %v4999_v50 }
0x23ce   :  { %v5002_v29 = vpop.xlane.xlu1 %5001 }
0x23cf   :  { %11733 = vrsqrt.f32 %v5016_v19  ;;  %v5013_v18 = vadd.f32 1e-05, %v5009_v47  ;;  %v5010_v46 = vmul.f32 0.03125, %v5002_v29  ;;  %v5032_v19 = vrot.slane %v5026_v54, %v12516_v12 }
0x23d0   :  { %v4947_v48 = vpop.xlane.xlu0 %4946 }
0x23d1   :  { %11735 = vrsqrt.f32 %v5013_v18  ;;  %v5014_v23 = vadd.f32 1e-05, %v5010_v46  ;;  %v4957_v25 = vmul.f32 0.03125, %v4947_v48  ;;  %v7380_v18 = vrot.slane %v7344_v22, %v12527_v32 }
0x23d2   :  { %v4950_v28 = vpop.xlane.xlu1 %4949  ;;  %v5040_v46 = vrot.slane %v5026_v54, %v12522_v24 }
0x23d3   :  { %11737 = vrsqrt.f32 %v5014_v23  ;;  %v4961_v40 = vadd.f32 1e-05, %v4957_v25  ;;  %v4958_v6 = vmul.f32 0.03125, %v4950_v28 }
0x23d4   :  { %v4953_v30 = vpop.xlane.xlu0 %4952 }
0x23d5   :  { %11739 = vrsqrt.f32 %v4961_v40  ;;  %v4962_v56 = vadd.f32 1e-05, %v4958_v6  ;;  %v4959_v58 = vmul.f32 0.03125, %v4953_v30 }
0x23d6   :  { %v4956_v63 = vpop.xlane.xlu1 %4955 }
0x23d7   :  { %v11732_v1 = vpop.eup %11731  ;;  %11741 = vrsqrt.f32 %v4962_v56  ;;  %v4963_v53 = vadd.f32 1e-05, %v4959_v58  ;;  %v4960_v61 = vmul.f32 0.03125, %v4956_v63 }
0x23d8   :  { %v5023_v33 = vmul.f32 %v11732_v1, %v13108_v0  ;;  %v7372_v0 = vrot.slane %v7344_v22, %v12519_v16 }
0x23d9   :  { %v11734_v5 = vpop.eup %11733  ;;  %11743 = vrsqrt.f32 %v4963_v53  ;;  %v4964_v13 = vadd.f32 1e-05, %v4960_v61 }
0x23da   :  { %v7353_v35 = vmul.f32 %v7350_v38, %v5023_v33  ;;  %v5024_v37 = vmul.f32 %v11734_v5, %v13111_v8  ;;  %v5057_v43 = vmul.f32 %v5054_v31, %v5023_v33 }
0x23db   :  { %v11736_v59 = vpop.eup %11735  ;;  %11745 = vrsqrt.f32 %v4964_v13 }
0x23dc   :  { %v5058_v41 = vmul.f32 %v5054_v31, %v5024_v37  ;;  %v7354_v49 = vmul.f32 %v7350_v38, %v5024_v37  ;;  %v5021_v52 = vmul.f32 %v11736_v59, %v13116_v36  ;;  %v7361_v3 = vadd.f32 %v7358_v11, %v7353_v35 }
0x23dd   :  { %v11738_v45 = vpop.eup %11737  ;;  %v5065_v23 = vadd.f32 %v5062_v39, %v5057_v43 }
0x23de   :  { %v5055_v4 = vmul.f32 %v5054_v31, %v5021_v52  ;;  %v5022_v50 = vmul.f32 %v11738_v45, %v13122_v9  ;;  %v7351_v47 = vmul.f32 %v7350_v38, %v5021_v52  ;;  %v5066_v29 = vadd.f32 %v5062_v39, %v5058_v41 }
0x23df   :  { %v11740_v8 = vpop.eup %11739  ;;  %v7362_v48 = vadd.f32 %v7358_v11, %v7354_v49  ;;  %v7365_v28 = vmul.f32 0.35355338, %v7361_v3 }
0x23e0   :  { %v5056_v25 = vmul.f32 %v5054_v31, %v5022_v50  ;;  %v4969_v36 = vmul.f32 %v11740_v8, %v13128_v27  ;;  %v5063_v40 = vadd.f32 %v5062_v39, %v5055_v4  ;;  %v7352_v6 = vmul.f32 %v7350_v38, %v5022_v50 }
0x23e1   :  { %v11742_v16 = vpop.eup %11741  ;;  %v7359_v30 = vadd.f32 %v7358_v11, %v7351_v47  ;;  %v7366_v9 = vmul.f32 0.35355338, %v7362_v48  ;;  %v13173_v32 = vpack.c.bf16 %v5066_v29, %v5065_v23 }
0x23e2   :  { %v5064_v56 = vadd.f32 %v5062_v39, %v5056_v25  ;;  %v7373_v12 = vmul.f32 %v7372_v0, %v4969_v36  ;;  %v4970_v58 = vmul.f32 %v11742_v16, %v13134_v21  ;;  %v5033_v63 = vmul.f32 %v5032_v19, %v4969_v36 }
0x23e3   :  { %v11744_v1 = vpop.eup %11743  ;;  %v7360_v24 = vadd.f32 %v7358_v11, %v7352_v6  ;;  %v13175_v22 = vpack.c.bf16 %v7366_v9, %v7365_v28  ;;  %v7363_v61 = vmul.f32 0.35355338, %v7359_v30 }
0x23e4   :  { %v13177_v54 = vpack.c.bf16 %v5064_v56, %v5063_v40  ;;  %v7374_v27 = vmul.f32 %v7372_v0, %v4970_v58  ;;  %v4971_v53 = vmul.f32 %v11744_v1, %v13140_v60  ;;  %v7381_v31 = vadd.f32 %v7380_v18, %v7373_v12 }
0x23e5   :  { %v11746_v38 = vpop.eup %11745  ;;  %v5034_v33 = vmul.f32 %v5032_v19, %v4970_v58  ;;  %v5041_v5 = vadd.f32 %v5040_v46, %v5033_v63  ;;  %v7364_v13 = vmul.f32 0.35355338, %v7360_v24 }
0x23e6   :  { %v7382_v35 = vadd.f32 %v7380_v18, %v7374_v27  ;;  %v5035_v21 = vmul.f32 %v5032_v19, %v4971_v53  ;;  %v7375_v37 = vmul.f32 %v7372_v0, %v4971_v53  ;;  %v4972_v59 = vmul.f32 %v11746_v38, %v13146_v10  ;;  %10907 = vmatprep.mubr.msk.bf16.mxu1 %vm184_vm0, %v13177_v54 }
0x23e7   :  { %10908 = vmatmul.mubr.msk.bf16.vlgmr.msra.gmra.mrb[136].mxu1 %vm184_vm0, %v13173_v32  ;;  %v5042_v11 = vadd.f32 %v5040_v46, %v5034_v33  ;;  %v13185_v39 = vpack.c.bf16 %v7364_v13, %v7363_v61  ;;  %v5045_v49 = vmul.f32 0.35355338, %v5041_v5 }
0x23e8   :  { %v13187_v60 = vpack.c.bf16 %v7382_v35, %v7381_v31  ;;  %v5036_v43 = vmul.f32 %v5032_v19, %v4972_v59  ;;  %v7376_v41 = vmul.f32 %v7372_v0, %v4972_v59  ;;  %10921 = vmatprep.mubr.msk.bf16.mxu1 %vm12217_vm1, %v12216_v51  ;;  %v5043_v45 = vadd.f32 %v5040_v46, %v5035_v21  ;;  %v11504_v0 = vld [vmem:[#allocation13 + $0x88] sm:$0xff]  }
0x23e9   :  { %v5046_v52 = vmul.f32 0.35355338, %v5042_v11  ;;  %v7383_v10 = vadd.f32 %v7380_v18, %v7375_v37 }
0x23ea   :  { %v7384_v3 = vadd.f32 %v7380_v18, %v7376_v41  ;;  %v5044_v4 = vadd.f32 %v5040_v46, %v5036_v43  ;;  %v5047_v8 = vmul.f32 0.35355338, %v5043_v45 }
0x23eb   :  { %v13191_v50 = vpack.c.bf16 %v5046_v52, %v5045_v49 }
0x23ec   :  { %v13193_v47 = vpack.c.bf16 %v7384_v3, %v7383_v10  ;;  %v5048_v29 = vmul.f32 0.35355338, %v5044_v4 }
0x23ed   :  { %10899 = vmatprep.mubr.msk.bf16.mxu0 %vm184_vm0, %v13191_v50 }
0x23ee   :  { %v13197_v19 = vpack.c.bf16 %v5048_v29, %v5047_v8 }
0x23f0   :  { %10900 = vmatmul.mubr.msk.bf16.vlgmr.msra.gmra.mrb[112].mxu0 %vm184_vm0, %v13197_v19 }
0x23f1   :  { %10912 = vmatpush3.bf16.msra.mxu0 %v13156_v42  ;;  %10915 = vmatprep.mubr.msk.bf16.mxu0 %vm184_vm0, %v13177_v54 }
0x23f2   :  { %10913 = vmatprep.subr.bf16.mxu0 %v11504_v0 }
0x23f5   :  { %10914 = vmatpush3.bf16.msra.mxu0 %v11504_v0 }
0x23f6   :  { %10925 = vmatprep.subr.bf16.mxu0 %v12216_v51 }
0x23f8   :  { %10916 = vmatmul.mubr.msk.bf16.vlgmr.msra.gmra.mrb[116].mxu0 %vm184_vm0, %v13173_v32 }
0x23f9   :  { %10927 = vmatprep.mubr.msk.bf16.mxu0 %vm12217_vm1, %v12216_v51 }
0x24ba   :  { %v10909_v18 = vpop.f32.mrb[136].mxu1 }
0x24bb   :  { %v5198_v46 = vpop.f32.mrb[137].mxu1 }
0x24bc   :  { %v10910_v48 = vpop.f32.mrb[138].mxu1 }
0x24bd   :  { %v5282_v23 = vpack.c.bf16 %v10910_v48, %v10909_v18  ;;  %v5201_v25 = vpop.f32.mrb[139].mxu1 }
0x24be   :  { %v5281_v36 = vpack.c.bf16 %v5201_v25, %v5198_v46 }
0x24bf   :  { %v5336_v42 = vsel %vm545_vm2, %v5282_v23, 0 }
0x24c0   :  { %v5289_v28 = vsel %vm545_vm2, %v5281_v36, 0  ;;  %10926 = vmatpush3.bf16.xpose.msra.mxu0 %v5336_v42 }
0x24c1   :  { %10920 = vmatpush3.bf16.xpose.msra.mxu1 %v5289_v28  ;;  %10937 = vmatprep.subr.bf16.mxu0 %v12216_v51 }
0x24c2   :  { %10931 = vmatprep.subr.bf16.mxu1 %v12216_v51 }
0x24c3   :  { %v10901_v16 = vpop.f32.mrb[112].mxu0 }
0x24c4   :  { %v5126_v40 = vpop.f32.mrb[113].mxu0 }
0x24c5   :  { %v10902_v6 = vpop.f32.mrb[114].mxu0 }
0x24c6   :  { %v5280_v30 = vpack.c.bf16 %v10902_v6, %v10901_v16  ;;  %v5129_v9 = vpop.f32.mrb[115].mxu0  ;;  %v11506_v6 = vld [vmem:[#allocation10 + $0x90] sm:$0xff]  }
0x24c7   :  { %v5279_v56 = vpack.c.bf16 %v5129_v9, %v5126_v40  ;;  %v11505_v40 = vld [vmem:[#allocation11 + $0x90] sm:$0xff]  }
0x24c8   :  { %10928 = vmatmul.mubr.msk.bf16.vlgmr.msra.gmra.mrb[120].mxu0 %vm545_vm2, %v5280_v30 }
0x24c9   :  { %10922 = vmatmul.mubr.msk.bf16.vlgmr.msra.gmra.mrb[140].mxu1 %vm545_vm2, %v5279_v56  ;;  %10939 = vmatprep.mubr.msk.bf16.mxu0 %vm12217_vm1, %v12216_v51 }
0x24ca   :  { %10933 = vmatprep.mubr.msk.bf16.mxu1 %vm12217_vm1, %v12216_v51 }
0x24cb   :  { %v10917_v12 = vpop.f32.mrb[116].mxu0 }
0x24cc   :  { %v5264_v58 = vpop.f32.mrb[117].mxu0 }
0x24cd   :  { %v10918_v63 = vpop.f32.mrb[118].mxu0 }
0x24ce   :  { %v5284_v1 = vpack.c.bf16 %v10918_v63, %v10917_v12  ;;  %v5267_v24 = vpop.f32.mrb[119].mxu0 }
0x24cf   :  { %v5283_v27 = vpack.c.bf16 %v5267_v24, %v5264_v58 }
0x24d0   :  { %10938 = vmatpush3.bf16.msra.mxu0 %v5284_v1 }
0x24d1   :  { %10932 = vmatpush3.bf16.msra.mxu1 %v5283_v27  ;;  %10951 = vmatprep.subr.bf16.mxu0 %v11505_v40 }
0x24d2   :  { %10943 = vmatprep.subr.bf16.mxu1 %v11506_v6 }
0x259b   :  { %v5372_v53 = vpop.f32.mrb[120].mxu0 }
0x259c   :  { %v5325_v61 = vpop.f32.mrb[140].mxu1  ;;  %v10929_v38 = vpop.f32.mrb[121].mxu0  ;;  %v5385_v31 = vsel %vm640_vm3, %v5372_v53, -inf }
0x259d   :  { %v10923_v33 = vpop.f32.mrb[141].mxu1  ;;  %5386 = vmax.xlane.f32.xlu0 %v5385_v31  ;;  %v5375_v5 = vpop.f32.mrb[122].mxu0  ;;  %v5379_v59 = vsel %vm640_vm3, %v5325_v61, -inf }
0x259e   :  { %v5328_v13 = vpop.f32.mrb[142].mxu1  ;;  %v10930_v35 = vpop.f32.mrb[123].mxu0  ;;  %v5388_v21 = vsel %vm640_vm3, %v5375_v5, -inf }
0x259f   :  { %v10924_v37 = vpop.f32.mrb[143].mxu1  ;;  %5389 = vmax.xlane.f32.xlu1 %v5388_v21  ;;  %v5382_v11 = vsel %vm640_vm3, %v5328_v13, -inf  ;;  %v11509_v35 = vld [vmem:[#allocation13 + $0x90] sm:$0xff]   ;;  %v11510_v21 = vld [vmem:[#allocation13 + $0x98] sm:$0xff]  }
0x25a1   :  { %5380 = vmax.xlane.f32.xlu0 %v5379_v59 }
0x25a3   :  { %5383 = vmax.xlane.f32.xlu1 %v5382_v11 }
0x262a   :  { %v5387_v43 = vpop.xlane.xlu0 %5386 }
0x262b   :  { %v5393_v41 = vsub.f32 %v5372_v53, %v5387_v43 }
0x262c   :  { %v5390_v49 = vpop.xlane.xlu1 %5389 }
0x262d   :  { %v5399_v52 = vmul.f32 1.442695, %v5393_v41  ;;  %v5394_v45 = vsub.f32 %v5375_v5, %v5390_v49 }
0x262e   :  { %v5381_v10 = vpop.xlane.xlu0 %5380 }
0x262f   :  { %11747 = vpow2.f32 %v5399_v52  ;;  %v5401_v3 = vmul.f32 1.442695, %v5394_v45  ;;  %v5391_v4 = vsub.f32 %v5325_v61, %v5381_v10  ;;  %v11507_v61 = vld [vmem:[#allocation11 + $0x98] sm:$0xff]  }
0x2630   :  { %v5384_v8 = vpop.xlane.xlu1 %5383 }
0x2631   :  { %11749 = vpow2.f32 %v5401_v3  ;;  %v5395_v29 = vmul.f32 1.442695, %v5391_v4  ;;  %v5392_v0 = vsub.f32 %v5328_v13, %v5384_v8  ;;  %v11508_v13 = vld [vmem:[#allocation10 + $0x98] sm:$0xff]  }
0x2633   :  { %11751 = vpow2.f32 %v5395_v29  ;;  %v5397_v18 = vmul.f32 1.442695, %v5392_v0 }
0x2635   :  { %11753 = vpow2.f32 %v5397_v18 }
0x2639   :  { %v11748_v46 = vpop.eup %11747 }
0x263a   :  { %v5409_v48 = vsel %vm640_vm3, %v11748_v46, 0.0 }
0x263b   :  { %v11750_v23 = vpop.eup %11749  ;;  %5410 = vadd.xlane.f32.xlu0 %v5409_v48 }
0x263c   :  { %v5412_v25 = vsel %vm640_vm3, %v11750_v23, 0.0 }
0x263d   :  { %v11752_v36 = vpop.eup %11751  ;;  %5413 = vadd.xlane.f32.xlu1 %v5412_v25 }
0x263e   :  { %v5403_v42 = vsel %vm640_vm3, %v11752_v36, 0.0 }
0x263f   :  { %v11754_v28 = vpop.eup %11753  ;;  %5404 = vadd.xlane.f32.xlu0 %v5403_v42 }
0x2640   :  { %v5406_v16 = vsel %vm640_vm3, %v11754_v28, 0.0 }
0x2641   :  { %5407 = vadd.xlane.f32.xlu1 %v5406_v16 }
0x26c8   :  { %v5411_v30 = vpop.xlane.xlu0 %5410 }
0x26c9   :  { %11755 = vrcp.f32 %v5411_v30 }
0x26ca   :  { %v5414_v9 = vpop.xlane.xlu1 %5413 }
0x26cb   :  { %11757 = vrcp.f32 %v5414_v9 }
0x26cc   :  { %v5405_v56 = vpop.xlane.xlu0 %5404 }
0x26cd   :  { %11759 = vrcp.f32 %v5405_v56 }
0x26ce   :  { %v5408_v12 = vpop.xlane.xlu1 %5407 }
0x26cf   :  { %11761 = vrcp.f32 %v5408_v12 }
0x26d3   :  { %v11756_v58 = vpop.eup %11755 }
0x26d4   :  { %v5421_v1 = vmul.f32 %v11756_v58, %v11748_v46 }
0x26d5   :  { %v11758_v63 = vpop.eup %11757 }
0x26d6   :  { %v5422_v24 = vmul.f32 %v11758_v63, %v11750_v23 }
0x26d7   :  { %v11760_v27 = vpop.eup %11759 }
0x26d8   :  { %v5424_v53 = vpack.c.bf16 %v5422_v24, %v5421_v1  ;;  %v5419_v31 = vmul.f32 %v11760_v27, %v11752_v36 }
0x26d9   :  { %v11762_v38 = vpop.eup %11761 }
0x26da   :  { %v5420_v33 = vmul.f32 %v11762_v38, %v11754_v28  ;;  %10940 = vmatmul.mubr.msk.bf16.vlgmr.msra.gmra.mrb[124].mxu0 %vm640_vm3, %v5424_v53 }
0x26db   :  { %10952 = vmatpush3.bf16.msra.mxu0 %v11505_v40  ;;  %10955 = vmatprep.mubr.msk.bf16.mxu0 %vm184_vm0, %v13177_v54 }
0x26dc   :  { %v5423_v5 = vpack.c.bf16 %v5420_v33, %v5419_v31  ;;  %10953 = vmatprep.subr.bf16.mxu0 %v11507_v61 }
0x26de   :  { %10934 = vmatmul.mubr.msk.bf16.vlgmr.msra.gmra.mrb[144].mxu1 %vm640_vm3, %v5423_v5 }
0x26df   :  { %10944 = vmatpush3.bf16.msra.mxu1 %v11506_v6  ;;  %10947 = vmatprep.mubr.msk.bf16.mxu1 %vm184_vm0, %v13191_v50 }
0x26e0   :  { %10954 = vmatpush3.bf16.msra.mxu0 %v11507_v61  ;;  %10945 = vmatprep.subr.bf16.mxu1 %v11508_v13 }
0x26e1   :  { %10967 = vmatprep.subr.bf16.mxu0 %v12216_v51 }
0x26e3   :  { %10956 = vmatmul.mubr.msk.bf16.vlgmr.msra.gmra.mrb[128].mxu0 %vm184_vm0, %v13173_v32  ;;  %10946 = vmatpush3.bf16.msra.mxu1 %v11508_v13 }
0x26e4   :  { %10959 = vmatprep.subr.bf16.mxu1 %v11509_v35  ;;  %10969 = vmatprep.mubr.msk.bf16.mxu0 %vm12217_vm1, %v12216_v51 }
0x26e6   :  { %10948 = vmatmul.mubr.msk.bf16.vlgmr.msra.gmra.mrb[148].mxu1 %vm184_vm0, %v13197_v19 }
0x26e7   :  { %10960 = vmatpush3.bf16.msra.mxu1 %v11509_v35  ;;  %10963 = vmatprep.mubr.msk.bf16.mxu1 %vm184_vm0, %v13177_v54 }
0x26e8   :  { %10961 = vmatprep.subr.bf16.mxu1 %v11510_v21 }
0x26eb   :  { %10962 = vmatpush3.bf16.msra.mxu1 %v11510_v21 }
0x26ec   :  { %10973 = vmatprep.subr.bf16.mxu1 %v12216_v51 }
0x26ee   :  { %10964 = vmatmul.mubr.msk.bf16.vlgmr.msra.gmra.mrb[152].mxu1 %vm184_vm0, %v13173_v32 }
0x26ef   :  { %10975 = vmatprep.mubr.msk.bf16.mxu1 %vm12217_vm1, %v12216_v51 }
0x27ad   :  { %v13247_v37 = vpop.f32.mrb[124].mxu0 }
0x27ae   :  { %v10941_v59 = vpop.f32.mrb[125].mxu0 }
0x27af   :  { %v13249_v11 = vpop.f32.mrb[126].mxu0 }
0x27b0   :  { %v5514_v43 = vpack.c.bf16 %v13249_v11, %v13247_v37  ;;  %v10942_v41 = vpop.f32.mrb[127].mxu0 }
0x27b1   :  { %v13253_v49 = vpop.f32.mrb[144].mxu1 }
0x27b2   :  { %v10935_v52 = vpop.f32.mrb[145].mxu1 }
0x27b3   :  { %v13255_v45 = vpop.f32.mrb[146].mxu1 }
0x27b4   :  { %v5513_v10 = vpack.c.bf16 %v13255_v45, %v13253_v49  ;;  %v10936_v3 = vpop.f32.mrb[147].mxu1 }
0x27b6   :  { %v10957_v4 = vpop.f32.mrb[128].mxu0 }
0x27b7   :  { %v5634_v8 = vpop.f32.mrb[129].mxu0 }
0x27b8   :  { %v10958_v29 = vpop.f32.mrb[130].mxu0 }
0x27b9   :  { %v5718_v0 = vpack.c.bf16 %v10958_v29, %v10957_v4  ;;  %v5637_v18 = vpop.f32.mrb[131].mxu0  ;;  %v10949_v46 = vpop.f32.mrb[148].mxu1 }
0x27ba   :  { %v5717_v48 = vpack.c.bf16 %v5637_v18, %v5634_v8  ;;  %v5568_v23 = vpop.f32.mrb[149].mxu1 }
0x27bb   :  { %v5772_v25 = vsel %vm545_vm2, %v5718_v0, 0  ;;  %v10950_v36 = vpop.f32.mrb[150].mxu1 }
0x27bc   :  { %v5725_v42 = vsel %vm545_vm2, %v5717_v48, 0  ;;  %v5716_v28 = vpack.c.bf16 %v10950_v36, %v10949_v46  ;;  %10974 = vmatpush3.bf16.xpose.msra.mxu1 %v5772_v25  ;;  %v5571_v16 = vpop.f32.mrb[151].mxu1 }
0x27bd   :  { %v5715_v40 = vpack.c.bf16 %v5571_v16, %v5568_v23  ;;  %10968 = vmatpush3.bf16.xpose.msra.mxu0 %v5725_v42  ;;  %10985 = vmatprep.subr.bf16.mxu1 %v12216_v51 }
0x27be   :  { %10979 = vmatprep.subr.bf16.mxu0 %v12216_v51 }
0x27c1   :  { %v10965_v6 = vpop.f32.mrb[152].mxu1 }
0x27c2   :  { %v5700_v30 = vpop.f32.mrb[153].mxu1 }
0x27c3   :  { %10976 = vmatmul.mubr.msk.bf16.vlgmr.msra.gmra.mrb[156].mxu1 %vm545_vm2, %v5716_v28  ;;  %v10966_v9 = vpop.f32.mrb[154].mxu1 }
0x27c4   :  { %v5720_v56 = vpack.c.bf16 %v10966_v9, %v10965_v6  ;;  %10970 = vmatmul.mubr.msk.bf16.vlgmr.msra.gmra.mrb[132].mxu0 %vm545_vm2, %v5715_v40  ;;  %v5703_v12 = vpop.f32.mrb[155].mxu1  ;;  %10987 = vmatprep.mubr.msk.bf16.mxu1 %vm12217_vm1, %v12216_v51 }
0x27c5   :  { %v5719_v58 = vpack.c.bf16 %v5703_v12, %v5700_v30  ;;  %10981 = vmatprep.mubr.msk.bf16.mxu0 %vm12217_vm1, %v12216_v51  ;;  %v11511_v30 = vld [vmem:[#allocation10 + $0xa0] sm:$0xff]  }
0x27c6   :  { %10986 = vmatpush3.bf16.msra.mxu1 %v5720_v56 }
0x27c7   :  { %10980 = vmatpush3.bf16.msra.mxu0 %v5719_v58  ;;  %11003 = vmatprep.subr.bf16.mxu1 %v11511_v30 }
0x2896   :  { %v5808_v63 = vpop.f32.mrb[156].mxu1 }
0x2897   :  { %v5761_v1 = vpop.f32.mrb[132].mxu0  ;;  %v10977_v24 = vpop.f32.mrb[157].mxu1  ;;  %v5821_v13 = vsel %vm640_vm3, %v5808_v63, -inf }
0x2898   :  { %v10971_v27 = vpop.f32.mrb[133].mxu0  ;;  %v5811_v53 = vpop.f32.mrb[158].mxu1  ;;  %v5815_v61 = vsel %vm640_vm3, %v5761_v1, -inf }
0x2899   :  { %5816 = vmax.xlane.f32.xlu0 %v5815_v61  ;;  %v5764_v38 = vpop.f32.mrb[134].mxu0  ;;  %v10978_v31 = vpop.f32.mrb[159].mxu1  ;;  %v5824_v35 = vsel %vm640_vm3, %v5811_v53, -inf }
0x289a   :  { %v10972_v33 = vpop.f32.mrb[135].mxu0  ;;  %v5818_v5 = vsel %vm640_vm3, %v5764_v38, -inf }
0x289b   :  { %5819 = vmax.xlane.f32.xlu1 %v5818_v5 }
0x289d   :  { %5822 = vmax.xlane.f32.xlu0 %v5821_v13  ;;  %v11512_v13 = vld [vmem:[#allocation10 + $0xa8] sm:$0xff]  }
0x289f   :  { %5825 = vmax.xlane.f32.xlu1 %v5824_v35  ;;  %v11513_v35 = vld [vmem:[#allocation11 + $0xa0] sm:$0xff]  }
0x2926   :  { %v5817_v21 = vpop.xlane.xlu0 %5816 }
0x2927   :  { %v5827_v59 = vsub.f32 %v5761_v1, %v5817_v21  ;;  %v11514_v21 = vld [vmem:[#allocation11 + $0xa8] sm:$0xff]  }
0x2928   :  { %v5820_v41 = vpop.xlane.xlu1 %5819 }
0x2929   :  { %v5831_v52 = vmul.f32 1.442695, %v5827_v59  ;;  %v5828_v3 = vsub.f32 %v5764_v38, %v5820_v41  ;;  %v5952_v59 = vld [vmem:[#allocation14 + $0x24] sm:$0xf] }
0x292a   :  { %v5823_v4 = vpop.xlane.xlu0 %5822  ;;  %11415 = vmatprep.subr.msk.bf16.mxu0 %vm1220_vm4, %v5952_v59  ;;  %v5960_v41 = vsel %vm1220_vm4, %v5952_v59, 0 }
0x292b   :  { %11763 = vpow2.f32 %v5831_v52  ;;  %v5833_v8 = vmul.f32 1.442695, %v5828_v3  ;;  %v5829_v29 = vsub.f32 %v5808_v63, %v5823_v4  ;;  %v5516_v52 = vld [vmem:[#allocation14 + $0x20] sm:$0xf] }
0x292c   :  { %v5826_v0 = vpop.xlane.xlu1 %5825 }
0x292d   :  { %11765 = vpow2.f32 %v5833_v8  ;;  %v5835_v18 = vmul.f32 1.442695, %v5829_v29  ;;  %v5830_v46 = vsub.f32 %v5811_v53, %v5826_v0 }
0x292f   :  { %11767 = vpow2.f32 %v5835_v18  ;;  %v5837_v48 = vmul.f32 1.442695, %v5830_v46 }
0x2931   :  { %11769 = vpow2.f32 %v5837_v48 }
0x2935   :  { %v11764_v23 = vpop.eup %11763 }
0x2936   :  { %v5839_v25 = vsel %vm640_vm3, %v11764_v23, 0.0 }
0x2937   :  { %v11766_v36 = vpop.eup %11765  ;;  %5840 = vadd.xlane.f32.xlu0 %v5839_v25 }
0x2938   :  { %v5842_v42 = vsel %vm640_vm3, %v11766_v36, 0.0 }
0x2939   :  { %v11768_v28 = vpop.eup %11767  ;;  %5843 = vadd.xlane.f32.xlu1 %v5842_v42  ;;  %v11515_v42 = vld [vmem:[#allocation13 + $0xa0] sm:$0xff]  }
0x293a   :  { %v5845_v16 = vsel %vm640_vm3, %v11768_v28, 0.0 }
0x293b   :  { %v11770_v40 = vpop.eup %11769  ;;  %5846 = vadd.xlane.f32.xlu0 %v5845_v16 }
0x293c   :  { %v5848_v6 = vsel %vm640_vm3, %v11770_v40, 0.0 }
0x293d   :  { %5849 = vadd.xlane.f32.xlu1 %v5848_v6 }
0x29c4   :  { %v5841_v9 = vpop.xlane.xlu0 %5840 }
0x29c5   :  { %11771 = vrcp.f32 %v5841_v9 }
0x29c6   :  { %v5844_v56 = vpop.xlane.xlu1 %5843 }
0x29c7   :  { %11773 = vrcp.f32 %v5844_v56  ;;  %v11516_v56 = vld [vmem:[#allocation13 + $0xa8] sm:$0xff]  }
0x29c8   :  { %v5847_v12 = vpop.xlane.xlu0 %5846 }
0x29c9   :  { %11775 = vrcp.f32 %v5847_v12 }
0x29ca   :  { %v5850_v58 = vpop.xlane.xlu1 %5849 }
0x29cb   :  { %11777 = vrcp.f32 %v5850_v58 }
0x29cf   :  { %v11772_v63 = vpop.eup %11771 }
0x29d0   :  { %v5855_v24 = vmul.f32 %v11772_v63, %v11764_v23 }
0x29d1   :  { %v11774_v1 = vpop.eup %11773 }
0x29d2   :  { %v5856_v27 = vmul.f32 %v11774_v1, %v11766_v36  ;;  %v6018_v36 = vsel %vm1220_vm4, %v5516_v52, 0 }
0x29d3   :  { %v11776_v53 = vpop.eup %11775 }
0x29d4   :  { %v5859_v61 = vpack.c.bf16 %v5856_v27, %v5855_v24  ;;  %v5857_v31 = vmul.f32 %v11776_v53, %v11768_v28 }
0x29d5   :  { %v11778_v38 = vpop.eup %11777 }
0x29d6   :  { %v5858_v33 = vmul.f32 %v11778_v38, %v11770_v40  ;;  %10982 = vmatmul.mubr.msk.bf16.vlgmr.msra.gmra.mrb[136].mxu0 %vm640_vm3, %v5859_v61 }
0x29d7   :  { %10992 = vmatpush3.bf16.msra.mxu0 %v5960_v41 }
0x29d8   :  { %v5860_v5 = vpack.c.bf16 %v5858_v33, %v5857_v31  ;;  %11416 = vmatprep.subr.msk.bf16.mxu0 %vm1220_vm4, %v5516_v52 }
0x29da   :  { %10988 = vmatmul.mubr.msk.bf16.vlgmr.msra.gmra.mrb[160].mxu1 %vm640_vm3, %v5860_v5 }
0x29db   :  { %11004 = vmatpush3.bf16.msra.mxu1 %v11511_v30  ;;  %11007 = vmatprep.mubr.msk.bf16.mxu1 %vm184_vm0, %v13191_v50 }
0x29dc   :  { %11005 = vmatprep.subr.bf16.mxu1 %v11512_v13 }
0x29df   :  { %11006 = vmatpush3.bf16.msra.mxu1 %v11512_v13 }
0x29e0   :  { %11011 = vmatprep.subr.bf16.mxu1 %v11513_v35 }
0x29e2   :  { %11008 = vmatmul.mubr.msk.bf16.vlgmr.msra.gmra.mrb[164].mxu1 %vm184_vm0, %v13197_v19 }
0x29e3   :  { %11012 = vmatpush3.bf16.msra.mxu1 %v11513_v35  ;;  %11015 = vmatprep.mubr.msk.bf16.mxu1 %vm184_vm0, %v13177_v54 }
0x29e4   :  { %11013 = vmatprep.subr.bf16.mxu1 %v11514_v21 }
0x29e7   :  { %11014 = vmatpush3.bf16.msra.mxu1 %v11514_v21 }
0x29e8   :  { %11027 = vmatprep.subr.bf16.mxu1 %v12216_v51 }
0x29ea   :  { %11016 = vmatmul.mubr.msk.bf16.vlgmr.msra.gmra.mrb[168].mxu1 %vm184_vm0, %v13173_v32 }
0x29eb   :  { %11029 = vmatprep.mubr.msk.bf16.mxu1 %vm12217_vm1, %v12216_v51 }
0x2aa9   :  { %v5898_v3 = vpop.f32.mrb[136].mxu0 }
0x2aaa   :  { %v10983_v4 = vpop.f32.mrb[137].mxu0 }
0x2aab   :  { %v5901_v8 = vpop.f32.mrb[138].mxu0 }
0x2aac   :  { %v5949_v29 = vpack.c.bf16 %v5901_v8, %v5898_v3  ;;  %v10984_v0 = vpop.f32.mrb[139].mxu0 }
0x2aad   :  { %v5942_v18 = vpop.f32.mrb[160].mxu1 }
0x2aae   :  { %v10989_v46 = vpop.f32.mrb[161].mxu1  ;;  %10993 = vmatprep.mubr.msk.bf16.mxu0 %vm545_vm2, %v5949_v29 }
0x2aaf   :  { %v5945_v48 = vpop.f32.mrb[162].mxu1 }
0x2ab0   :  { %v5950_v23 = vpack.c.bf16 %v5945_v48, %v5942_v18  ;;  %v10990_v25 = vpop.f32.mrb[163].mxu1 }
0x2ab2   :  { %10994 = vmatmul.mubr.msk.bf16.vlgmr.msra.gmra.mrb[140].mxu0 %vm545_vm2, %v5950_v23 }
0x2ab3   :  { %10999 = vmatprep.mubr.msk.bf16.mxu0 %vm545_vm2, %v5513_v10  ;;  %10998 = vmatpush3.bf16.msra.mxu0 %v6018_v36 }
0x2ab4   :  { %11019 = vmatprep.subr.bf16.mxu0 %v11515_v42 }
0x2ab5   :  { %v11009_v28 = vpop.f32.mrb[164].mxu1 }
0x2ab6   :  { %v6120_v16 = vpop.f32.mrb[165].mxu1 }
0x2ab7   :  { %v11010_v40 = vpop.f32.mrb[166].mxu1 }
0x2ab8   :  { %v6268_v6 = vpack.c.bf16 %v11010_v40, %v11009_v28  ;;  %v6123_v30 = vpop.f32.mrb[167].mxu1 }
0x2ab9   :  { %v6267_v9 = vpack.c.bf16 %v6123_v30, %v6120_v16 }
0x2abd   :  { %v11017_v12 = vpop.f32.mrb[168].mxu1 }
0x2abe   :  { %11000 = vmatmul.mubr.msk.bf16.vlgmr.msra.gmra.mrb[140].mxu0 %vm545_vm2, %v5514_v43  ;;  %v6186_v58 = vpop.f32.mrb[169].mxu1 }
0x2abf   :  { %11020 = vmatpush3.bf16.msra.mxu0 %v11515_v42  ;;  %v11018_v49 = vpop.f32.mrb[170].mxu1  ;;  %11023 = vmatprep.mubr.msk.bf16.mxu0 %vm184_vm0, %v13177_v54 }
0x2ac0   :  { %v6270_v45 = vpack.c.bf16 %v11018_v49, %v11017_v12  ;;  %v6189_v10 = vpop.f32.mrb[171].mxu1  ;;  %11021 = vmatprep.subr.bf16.mxu0 %v11516_v56 }
0x2ac1   :  { %v6269_v63 = vpack.c.bf16 %v6189_v10, %v6186_v58 }
0x2ac2   :  { %v6324_v37 = vsel %vm545_vm2, %v6270_v45, 0  ;;  %v11517_v45 = vld [vmem:[#allocation10 + $0xb0] sm:$0xff]  }
0x2ac3   :  { %v6277_v1 = vsel %vm545_vm2, %v6269_v63, 0  ;;  %11022 = vmatpush3.bf16.msra.mxu0 %v11516_v56 }
0x2ac4   :  { %11028 = vmatpush3.bf16.xpose.msra.mxu1 %v6277_v1  ;;  %11033 = vmatprep.subr.bf16.mxu0 %v12216_v51 }
0x2ac5   :  { %11039 = vmatprep.subr.bf16.mxu1 %v12216_v51 }
0x2ac6   :  { %11024 = vmatmul.mubr.msk.bf16.vlgmr.msra.gmra.mrb[144].mxu0 %vm184_vm0, %v13173_v32 }
0x2ac7   :  { %11035 = vmatprep.mubr.msk.bf16.mxu0 %vm12217_vm1, %v12216_v51 }
0x2acb   :  { %11030 = vmatmul.mubr.msk.bf16.vlgmr.msra.gmra.mrb[172].mxu1 %vm545_vm2, %v6267_v9 }
0x2acc   :  { %11034 = vmatpush3.bf16.xpose.msra.mxu0 %v6324_v37  ;;  %11041 = vmatprep.mubr.msk.bf16.mxu1 %vm12217_vm1, %v12216_v51 }
0x2acd   :  { %11045 = vmatprep.subr.bf16.mxu0 %v12216_v51 }
0x2ad3   :  { %11036 = vmatmul.mubr.msk.bf16.vlgmr.msra.gmra.mrb[148].mxu0 %vm545_vm2, %v6268_v6 }
0x2ad4   :  { %11047 = vmatprep.mubr.msk.bf16.mxu0 %vm12217_vm1, %v12216_v51 }
0x2b99   :  { %v11025_v11 = vpop.f32.mrb[144].mxu0 }
0x2b9a   :  { %v6252_v43 = vpop.f32.mrb[145].mxu0 }
0x2b9b   :  { %v11026_v24 = vpop.f32.mrb[146].mxu0 }
0x2b9c   :  { %v6272_v27 = vpack.c.bf16 %v11026_v24, %v11025_v11  ;;  %v6255_v53 = vpop.f32.mrb[147].mxu0 }
0x2b9d   :  { %v6271_v61 = vpack.c.bf16 %v6255_v53, %v6252_v43 }
0x2b9e   :  { %v6313_v38 = vpop.f32.mrb[172].mxu1  ;;  %11046 = vmatpush3.bf16.msra.mxu0 %v6272_v27 }
0x2b9f   :  { %v11031_v31 = vpop.f32.mrb[173].mxu1  ;;  %11040 = vmatpush3.bf16.msra.mxu1 %v6271_v61  ;;  %v6367_v33 = vsel %vm640_vm3, %v6313_v38, -inf  ;;  %v11518_v61 = vld [vmem:[#allocation10 + $0xb8] sm:$0xff]  }
0x2ba0   :  { %6368 = vmax.xlane.f32.xlu0 %v6367_v33  ;;  %v6316_v5 = vpop.f32.mrb[174].mxu1  ;;  %11057 = vmatprep.subr.bf16.mxu1 %v11517_v45  ;;  %v11519_v31 = vld [vmem:[#allocation11 + $0xb0] sm:$0xff]  }
0x2ba1   :  { %v11032_v13 = vpop.f32.mrb[175].mxu1  ;;  %v6370_v35 = vsel %vm640_vm3, %v6316_v5, -inf }
0x2ba2   :  { %6371 = vmax.xlane.f32.xlu1 %v6370_v35 }
0x2ba6   :  { %v6360_v21 = vpop.f32.mrb[148].mxu0 }
0x2ba7   :  { %v11037_v59 = vpop.f32.mrb[149].mxu0  ;;  %v6373_v41 = vsel %vm640_vm3, %v6360_v21, -inf }
0x2ba8   :  { %6374 = vmax.xlane.f32.xlu0 %v6373_v41  ;;  %v6363_v52 = vpop.f32.mrb[150].mxu0 }
0x2ba9   :  { %v11038_v3 = vpop.f32.mrb[151].mxu0  ;;  %v6376_v4 = vsel %vm640_vm3, %v6363_v52, -inf }
0x2baa   :  { %6377 = vmax.xlane.f32.xlu1 %v6376_v4 }
0x2c2d   :  { %v6369_v8 = vpop.xlane.xlu0 %6368 }
0x2c2e   :  { %v6379_v29 = vsub.f32 %v6313_v38, %v6369_v8 }
0x2c2f   :  { %v6372_v0 = vpop.xlane.xlu1 %6371 }
0x2c30   :  { %v6383_v18 = vmul.f32 1.442695, %v6379_v29  ;;  %v6380_v46 = vsub.f32 %v6316_v5, %v6372_v0 }
0x2c32   :  { %11779 = vpow2.f32 %v6383_v18  ;;  %v6385_v48 = vmul.f32 1.442695, %v6380_v46 }
0x2c34   :  { %11781 = vpow2.f32 %v6385_v48 }
0x2c35   :  { %v6375_v23 = vpop.xlane.xlu0 %6374 }
0x2c36   :  { %v6381_v25 = vsub.f32 %v6360_v21, %v6375_v23  ;;  %v11520_v21 = vld [vmem:[#allocation11 + $0xb8] sm:$0xff]  }
0x2c37   :  { %v6378_v36 = vpop.xlane.xlu1 %6377 }
0x2c38   :  { %v6387_v42 = vmul.f32 1.442695, %v6381_v25  ;;  %v6382_v28 = vsub.f32 %v6363_v52, %v6378_v36 }
0x2c3a   :  { %11783 = vpow2.f32 %v6387_v42  ;;  %v6389_v16 = vmul.f32 1.442695, %v6382_v28 }
0x2c3c   :  { %v11780_v40 = vpop.eup %11779  ;;  %11785 = vpow2.f32 %v6389_v16  ;;  %v11522_v16 = vld [vmem:[#allocation13 + $0xb8] sm:$0xff]  }
0x2c3d   :  { %v6391_v6 = vsel %vm640_vm3, %v11780_v40, 0.0 }
0x2c3e   :  { %v11782_v30 = vpop.eup %11781  ;;  %6392 = vadd.xlane.f32.xlu0 %v6391_v6 }
0x2c3f   :  { %v6394_v9 = vsel %vm640_vm3, %v11782_v30, 0.0 }
0x2c40   :  { %6395 = vadd.xlane.f32.xlu1 %v6394_v9 }
0x2c44   :  { %v11784_v56 = vpop.eup %11783 }
0x2c45   :  { %v6397_v12 = vsel %vm640_vm3, %v11784_v56, 0.0 }
0x2c46   :  { %v11786_v58 = vpop.eup %11785  ;;  %6398 = vadd.xlane.f32.xlu0 %v6397_v12 }
0x2c47   :  { %v6400_v49 = vsel %vm640_vm3, %v11786_v58, 0.0 }
0x2c48   :  { %6401 = vadd.xlane.f32.xlu1 %v6400_v49 }
0x2ccb   :  { %v6393_v10 = vpop.xlane.xlu0 %6392 }
0x2ccc   :  { %11787 = vrcp.f32 %v6393_v10 }
0x2ccd   :  { %v6396_v63 = vpop.xlane.xlu1 %6395 }
0x2cce   :  { %11789 = vrcp.f32 %v6396_v63 }
0x2cd3   :  { %v6399_v1 = vpop.xlane.xlu0 %6398 }
0x2cd4   :  { %11791 = vrcp.f32 %v6399_v1 }
0x2cd5   :  { %v6402_v37 = vpop.xlane.xlu1 %6401 }
0x2cd6   :  { %v11788_v11 = vpop.eup %11787  ;;  %11793 = vrcp.f32 %v6402_v37 }
0x2cd7   :  { %v6407_v24 = vmul.f32 %v11788_v11, %v11780_v40 }
0x2cd8   :  { %v11790_v43 = vpop.eup %11789 }
0x2cd9   :  { %v6408_v27 = vmul.f32 %v11790_v43, %v11782_v30 }
0x2cdb   :  { %v6411_v53 = vpack.c.bf16 %v6408_v27, %v6407_v24 }
0x2cdd   :  { %11042 = vmatmul.mubr.msk.bf16.vlgmr.msra.gmra.mrb[176].mxu1 %vm640_vm3, %v6411_v53 }
0x2cde   :  { %v11792_v38 = vpop.eup %11791  ;;  %11058 = vmatpush3.bf16.msra.mxu1 %v11517_v45  ;;  %11061 = vmatprep.mubr.msk.bf16.mxu1 %vm184_vm0, %v13191_v50  ;;  %v6504_v50 = vld [vmem:[#allocation14 + $0x28] sm:$0xf] }
0x2cdf   :  { %11059 = vmatprep.subr.bf16.mxu1 %v11518_v61  ;;  %v6409_v5 = vmul.f32 %v11792_v38, %v11784_v56  ;;  %11417 = vmatprep.subr.msk.bf16.mxu0 %vm1220_vm4, %v6504_v50  ;;  %v6512_v59 = vsel %vm1220_vm4, %v6504_v50, 0 }
0x2ce0   :  { %v11794_v33 = vpop.eup %11793 }
0x2ce1   :  { %v6410_v13 = vmul.f32 %v11794_v33, %v11786_v58 }
0x2ce2   :  { %11060 = vmatpush3.bf16.msra.mxu1 %v11518_v61 }
0x2ce3   :  { %v6412_v35 = vpack.c.bf16 %v6410_v13, %v6409_v5  ;;  %11065 = vmatprep.subr.bf16.mxu1 %v11519_v31 }
0x2ce5   :  { %11048 = vmatmul.mubr.msk.bf16.vlgmr.msra.gmra.mrb[152].mxu0 %vm640_vm3, %v6412_v35  ;;  %11062 = vmatmul.mubr.msk.bf16.vlgmr.msra.gmra.mrb[180].mxu1 %vm184_vm0, %v13197_v19  ;;  %v11521_v19 = vld [vmem:[#allocation13 + $0xb0] sm:$0xff]  }
0x2ce6   :  { %11066 = vmatpush3.bf16.msra.mxu1 %v11519_v31  ;;  %11069 = vmatprep.mubr.msk.bf16.mxu1 %vm184_vm0, %v13177_v54 }
0x2ce7   :  { %11067 = vmatprep.subr.bf16.mxu1 %v11520_v21  ;;  %11052 = vmatpush3.bf16.msra.mxu0 %v6512_v59 }
0x2ce8   :  { %11073 = vmatprep.subr.bf16.mxu0 %v11521_v19 }
0x2cea   :  { %11068 = vmatpush3.bf16.msra.mxu1 %v11520_v21 }
0x2ceb   :  { %11081 = vmatprep.subr.bf16.mxu1 %v12216_v51 }
0x2ced   :  { %11070 = vmatmul.mubr.msk.bf16.vlgmr.msra.gmra.mrb[184].mxu1 %vm184_vm0, %v13173_v32 }
0x2cee   :  { %11083 = vmatprep.mubr.msk.bf16.mxu1 %vm12217_vm1, %v12216_v51 }
0x2db0   :  { %v6450_v41 = vpop.f32.mrb[176].mxu1 }
0x2db1   :  { %v11043_v52 = vpop.f32.mrb[177].mxu1 }
0x2db2   :  { %v6453_v3 = vpop.f32.mrb[178].mxu1 }
0x2db3   :  { %v6501_v4 = vpack.c.bf16 %v6453_v3, %v6450_v41  ;;  %v11044_v8 = vpop.f32.mrb[179].mxu1 }
0x2db5   :  { %11053 = vmatprep.mubr.msk.bf16.mxu0 %vm545_vm2, %v6501_v4 }
0x2db8   :  { %v6494_v29 = vpop.f32.mrb[152].mxu0  ;;  %v11063_v0 = vpop.f32.mrb[180].mxu1 }
0x2db9   :  { %v11049_v18 = vpop.f32.mrb[153].mxu0  ;;  %v6618_v46 = vpop.f32.mrb[181].mxu1 }
0x2dba   :  { %v6497_v48 = vpop.f32.mrb[154].mxu0  ;;  %v11064_v23 = vpop.f32.mrb[182].mxu1 }
0x2dbb   :  { %v6502_v25 = vpack.c.bf16 %v6497_v48, %v6494_v29  ;;  %v11050_v36 = vpop.f32.mrb[155].mxu0  ;;  %v6766_v42 = vpack.c.bf16 %v11064_v23, %v11063_v0  ;;  %v6621_v28 = vpop.f32.mrb[183].mxu1 }
0x2dbc   :  { %v6765_v40 = vpack.c.bf16 %v6621_v28, %v6618_v46 }
0x2dbd   :  { %11054 = vmatmul.mubr.msk.bf16.vlgmr.msra.gmra.mrb[140].mxu0 %vm545_vm2, %v6502_v25 }
0x2dbe   :  { %11074 = vmatpush3.bf16.msra.mxu0 %v11521_v19  ;;  %11077 = vmatprep.mubr.msk.bf16.mxu0 %vm184_vm0, %v13177_v54 }
0x2dbf   :  { %11075 = vmatprep.subr.bf16.mxu0 %v11522_v16 }
0x2dc0   :  { %v11071_v6 = vpop.f32.mrb[184].mxu1 }
0x2dc1   :  { %v6684_v30 = vpop.f32.mrb[185].mxu1 }
0x2dc2   :  { %11076 = vmatpush3.bf16.msra.mxu0 %v11522_v16  ;;  %v11072_v9 = vpop.f32.mrb[186].mxu1 }
0x2dc3   :  { %v6768_v56 = vpack.c.bf16 %v11072_v9, %v11071_v6  ;;  %v6687_v12 = vpop.f32.mrb[187].mxu1  ;;  %11087 = vmatprep.subr.bf16.mxu0 %v12216_v51 }
0x2dc4   :  { %v6767_v58 = vpack.c.bf16 %v6687_v12, %v6684_v30 }
0x2dc5   :  { %11078 = vmatmul.mubr.msk.bf16.vlgmr.msra.gmra.mrb[156].mxu0 %vm184_vm0, %v13173_v32  ;;  %v6822_v54 = vsel %vm545_vm2, %v6768_v56, 0 }
0x2dc6   :  { %v6775_v49 = vsel %vm545_vm2, %v6767_v58, 0  ;;  %11089 = vmatprep.mubr.msk.bf16.mxu0 %vm12217_vm1, %v12216_v51 }
0x2dc7   :  { %11082 = vmatpush3.bf16.xpose.msra.mxu1 %v6775_v49 }
0x2dc8   :  { %11093 = vmatprep.subr.bf16.mxu1 %v12216_v51 }
0x2dcb   :  { %11088 = vmatpush3.bf16.xpose.msra.mxu0 %v6822_v54 }
0x2dcc   :  { %11099 = vmatprep.subr.bf16.mxu0 %v12216_v51 }
0x2dce   :  { %11084 = vmatmul.mubr.msk.bf16.vlgmr.msra.gmra.mrb[188].mxu1 %vm545_vm2, %v6765_v40 }
0x2dcf   :  { %11095 = vmatprep.mubr.msk.bf16.mxu1 %vm12217_vm1, %v12216_v51 }
0x2dd2   :  { %11090 = vmatmul.mubr.msk.bf16.vlgmr.msra.gmra.mrb[160].mxu0 %vm545_vm2, %v6766_v42 }
0x2dd3   :  { %11101 = vmatprep.mubr.msk.bf16.mxu0 %vm12217_vm1, %v12216_v51 }
0x2e98   :  { %v11079_v32 = vpop.f32.mrb[156].mxu0 }
0x2e99   :  { %v6750_v45 = vpop.f32.mrb[157].mxu0 }
0x2e9a   :  { %v11080_v10 = vpop.f32.mrb[158].mxu0 }
0x2e9b   :  { %v6770_v63 = vpack.c.bf16 %v11080_v10, %v11079_v32  ;;  %v6753_v1 = vpop.f32.mrb[159].mxu0 }
0x2e9c   :  { %v6769_v37 = vpack.c.bf16 %v6753_v1, %v6750_v45 }
0x2e9d   :  { %11100 = vmatpush3.bf16.msra.mxu0 %v6770_v63 }
0x2e9e   :  { %11094 = vmatpush3.bf16.msra.mxu1 %v6769_v37  ;;  %v7002_v37 = vld [vmem:[#allocation14 + $0x2c] sm:$0xf] }
0x2e9f   :  { %11418 = vmatprep.subr.msk.bf16.mxu0 %vm1220_vm4, %v7002_v37 }
0x2ea1   :  { %v6811_v11 = vpop.f32.mrb[188].mxu1 }
0x2ea2   :  { %v11085_v43 = vpop.f32.mrb[189].mxu1  ;;  %v6865_v24 = vsel %vm640_vm3, %v6811_v11, -inf }
0x2ea3   :  { %6866 = vmax.xlane.f32.xlu0 %v6865_v24  ;;  %v6814_v27 = vpop.f32.mrb[190].mxu1  ;;  %v11523_v43 = vld [vmem:[#allocation10 + $0xc0] sm:$0xff]  }
0x2ea4   :  { %v11086_v53 = vpop.f32.mrb[191].mxu1  ;;  %v6868_v61 = vsel %vm640_vm3, %v6814_v27, -inf }
0x2ea5   :  { %v6858_v38 = vpop.f32.mrb[160].mxu0  ;;  %6869 = vmax.xlane.f32.xlu1 %v6868_v61 }
0x2ea6   :  { %v11091_v31 = vpop.f32.mrb[161].mxu0  ;;  %v6871_v33 = vsel %vm640_vm3, %v6858_v38, -inf }
0x2ea7   :  { %v6861_v5 = vpop.f32.mrb[162].mxu0  ;;  %6872 = vmax.xlane.f32.xlu0 %v6871_v33 }
0x2ea8   :  { %v11092_v13 = vpop.f32.mrb[163].mxu0  ;;  %v6874_v35 = vsel %vm640_vm3, %v6861_v5, -inf }
0x2ea9   :  { %6875 = vmax.xlane.f32.xlu1 %v6874_v35 }
0x2f30   :  { %v6867_v21 = vpop.xlane.xlu0 %6866 }
0x2f31   :  { %v6877_v50 = vsub.f32 %v6811_v11, %v6867_v21  ;;  %v7010_v11 = vsel %vm1220_vm4, %v7002_v37, 0  ;;  %v11524_v21 = vld [vmem:[#allocation10 + $0xc8] sm:$0xff]  }
0x2f32   :  { %v6870_v59 = vpop.xlane.xlu1 %6869 }
0x2f33   :  { %v6881_v19 = vmul.f32 1.442695, %v6877_v50  ;;  %v6878_v41 = vsub.f32 %v6814_v27, %v6870_v59  ;;  %v11525_v50 = vld [vmem:[#allocation13 + $0xc0] sm:$0xff]   ;;  %v11526_v59 = vld [vmem:[#allocation13 + $0xc8] sm:$0xff]  }
0x2f34   :  { %v6873_v52 = vpop.xlane.xlu0 %6872 }
0x2f35   :  { %11795 = vpow2.f32 %v6881_v19  ;;  %v6883_v3 = vmul.f32 1.442695, %v6878_v41  ;;  %v6879_v4 = vsub.f32 %v6858_v38, %v6873_v52  ;;  %v13388_v41 = vld [vmem:[#allocation7 + $0x10] sm:$0xff] }
0x2f36   :  { %v6876_v8 = vpop.xlane.xlu1 %6875  ;;  %v7072_v52 = vrot.slane %v13388_v41, %v12758_v17 }
0x2f37   :  { %11797 = vpow2.f32 %v6883_v3  ;;  %v6885_v29 = vmul.f32 1.442695, %v6879_v4  ;;  %v6880_v0 = vsub.f32 %v6861_v5, %v6876_v8 }
0x2f39   :  { %11799 = vpow2.f32 %v6885_v29  ;;  %v6887_v18 = vmul.f32 1.442695, %v6880_v0 }
0x2f3b   :  { %11801 = vpow2.f32 %v6887_v18 }
0x2f3f   :  { %v11796_v46 = vpop.eup %11795 }
0x2f40   :  { %v6889_v48 = vsel %vm640_vm3, %v11796_v46, 0.0 }
0x2f41   :  { %v11798_v23 = vpop.eup %11797  ;;  %6890 = vadd.xlane.f32.xlu0 %v6889_v48 }
0x2f42   :  { %v6892_v25 = vsel %vm640_vm3, %v11798_v23, 0.0 }
0x2f43   :  { %v11800_v36 = vpop.eup %11799  ;;  %6893 = vadd.xlane.f32.xlu1 %v6892_v25 }
0x2f44   :  { %v6895_v42 = vsel %vm640_vm3, %v11800_v36, 0.0 }
0x2f45   :  { %v11802_v28 = vpop.eup %11801  ;;  %6896 = vadd.xlane.f32.xlu0 %v6895_v42 }
0x2f46   :  { %v6898_v16 = vsel %vm640_vm3, %v11802_v28, 0.0 }
0x2f47   :  { %6899 = vadd.xlane.f32.xlu1 %v6898_v16 }
0x2fce   :  { %v6891_v40 = vpop.xlane.xlu0 %6890 }
0x2fcf   :  { %11803 = vrcp.f32 %v6891_v40 }
0x2fd0   :  { %v6894_v6 = vpop.xlane.xlu1 %6893 }
0x2fd1   :  { %11805 = vrcp.f32 %v6894_v6 }
0x2fd2   :  { %v6897_v30 = vpop.xlane.xlu0 %6896 }
0x2fd3   :  { %11807 = vrcp.f32 %v6897_v30 }
0x2fd4   :  { %v6900_v9 = vpop.xlane.xlu1 %6899 }
0x2fd5   :  { %11809 = vrcp.f32 %v6900_v9 }
0x2fd9   :  { %v11804_v56 = vpop.eup %11803 }
0x2fda   :  { %v6905_v58 = vmul.f32 %v11804_v56, %v11796_v46 }
0x2fdb   :  { %v11806_v12 = vpop.eup %11805 }
0x2fdc   :  { %v6906_v49 = vmul.f32 %v11806_v12, %v11798_v23 }
0x2fdd   :  { %v11808_v54 = vpop.eup %11807 }
0x2fde   :  { %v6909_v32 = vpack.c.bf16 %v6906_v49, %v6905_v58  ;;  %v6907_v10 = vmul.f32 %v11808_v54, %v11800_v36 }
0x2fdf   :  { %v11810_v45 = vpop.eup %11809 }
0x2fe0   :  { %v6908_v63 = vmul.f32 %v11810_v45, %v11802_v28  ;;  %11096 = vmatmul.mubr.msk.bf16.vlgmr.msra.gmra.mrb[192].mxu1 %vm640_vm3, %v6909_v32 }
0x2fe2   :  { %v6910_v1 = vpack.c.bf16 %v6908_v63, %v6907_v10 }
0x2fe4   :  { %11102 = vmatmul.mubr.msk.bf16.vlgmr.msra.gmra.mrb[164].mxu0 %vm640_vm3, %v6910_v1 }
0x2fe5   :  { %11106 = vmatpush3.bf16.msra.mxu0 %v7010_v11 }
0x2fe6   :  { %11127 = vmatprep.subr.bf16.mxu0 %v11523_v43 }
0x30b3   :  { %v6948_v24 = vpop.f32.mrb[192].mxu1 }
0x30b4   :  { %v11097_v27 = vpop.f32.mrb[193].mxu1 }
0x30b5   :  { %v6951_v53 = vpop.f32.mrb[194].mxu1 }
0x30b6   :  { %v6999_v61 = vpack.c.bf16 %v6951_v53, %v6948_v24  ;;  %v11098_v38 = vpop.f32.mrb[195].mxu1 }
0x30b7   :  { %v6992_v31 = vpop.f32.mrb[164].mxu0 }
0x30b8   :  { %v11103_v33 = vpop.f32.mrb[165].mxu0  ;;  %11107 = vmatprep.mubr.msk.bf16.mxu0 %vm545_vm2, %v6999_v61 }
0x30b9   :  { %v6995_v5 = vpop.f32.mrb[166].mxu0 }
0x30ba   :  { %v7000_v13 = vpack.c.bf16 %v6995_v5, %v6992_v31  ;;  %v11104_v35 = vpop.f32.mrb[167].mxu0 }
0x30bc   :  { %11108 = vmatmul.mubr.msk.bf16.vlgmr.msra.gmra.mrb[140].mxu0 %vm545_vm2, %v7000_v13 }
0x30bd   :  { %11128 = vmatpush3.bf16.msra.mxu0 %v11523_v43  ;;  %11131 = vmatprep.mubr.msk.bf16.mxu0 %vm184_vm0, %v13185_v39 }
0x30be   :  { %11129 = vmatprep.subr.bf16.mxu0 %v11524_v21 }
0x30c1   :  { %11130 = vmatpush3.bf16.msra.mxu0 %v11524_v21 }
0x30c2   :  { %11143 = vmatprep.subr.bf16.mxu0 %v11525_v50 }
0x30c4   :  { %11132 = vmatmul.mubr.msk.bf16.vlgmr.msra.gmra.mrb[168].mxu0 %vm184_vm0, %v13175_v22 }
0x30c5   :  { %11144 = vmatpush3.bf16.msra.mxu0 %v11525_v50  ;;  %11147 = vmatprep.mubr.msk.bf16.mxu0 %vm184_vm0, %v13187_v60 }
0x30c6   :  { %11145 = vmatprep.subr.bf16.mxu0 %v11526_v59 }
0x30c9   :  { %11146 = vmatpush3.bf16.msra.mxu0 %v11526_v59  ;;  %v11527_v59 = vld [vmem:[#allocation16 + $0x20] sm:$0xff]  }
0x30ca   :  { %11157 = vmatprep.subr.bf16.mxu0 %v12216_v51  ;;  %11111 = vmatprep.subr.bf16.mxu1 %v11527_v59 }
0x30cb   :  { %11112 = vmatpush3.bf16.msra.mxu1 %v11527_v59 }
0x30cc   :  { %11148 = vmatmul.mubr.msk.bf16.vlgmr.msra.gmra.mrb[172].mxu0 %vm184_vm0, %v13193_v47 }
0x30cd   :  { %11159 = vmatprep.mubr.msk.bf16.mxu0 %vm12217_vm1, %v12216_v51 }
0x318f   :  { %v11109_v19 = vpop.f32.mrb[140].mxu0 }
0x3190   :  { %v7046_v3 = vpop.f32.mrb[141].mxu0  ;;  %v7067_v4 = vadd.f32 %v11109_v19, %v13094_v44  ;;  %v11528_v19 = vld [vmem:[#allocation16 + $0x28] sm:$0xff]  }
0x3191   :  { %v7065_v8 = vadd.f32 %v7046_v3, %v13083_v26  ;;  %v11110_v29 = vpop.f32.mrb[142].mxu0  ;;  %11113 = vmatprep.subr.bf16.mxu1 %v11528_v19 }
0x3192   :  { %v7049_v0 = vpop.f32.mrb[143].mxu0  ;;  %v7068_v46 = vadd.f32 %v11110_v29, %v13099_v14  ;;  %v13398_v23 = vadd.f32 %v7072_v52, %v7067_v4  ;;  %11114 = vmatpush3.bf16.msra.mxu1 %v11528_v19 }
0x3193   :  { %v13394_v18 = vadd.f32 %v7072_v52, %v7065_v8  ;;  %v7066_v48 = vadd.f32 %v7049_v0, %v13089_v15 }
0x3194   :  { %v13404_v42 = vadd.f32 %v7072_v52, %v7068_v46  ;;  %v7083_v15 = vsel %vm184_vm0, %v13398_v23, 0.0 }
0x3195   :  { %v13400_v25 = vadd.f32 %v7072_v52, %v7066_v48  ;;  %v7077_v36 = vsel %vm184_vm0, %v13394_v18, 0.0 }
0x3196   :  { %7078 = vadd.xlane.f32.xlu0 %v7077_v36  ;;  %v7086_v30 = vsel %vm184_vm0, %v13404_v42, 0.0 }
0x3197   :  { %v13406_v44 = vpop.f32.mrb[168].mxu0  ;;  %v7080_v26 = vsel %vm184_vm0, %v13400_v25, 0.0 }
0x3198   :  { %v13410_v28 = vpop.f32.mrb[169].mxu0  ;;  %7081 = vadd.xlane.f32.xlu1 %v7080_v26 }
0x3199   :  { %v13412_v14 = vpop.f32.mrb[170].mxu0 }
0x319a   :  { %v7598_v16 = vpack.c.bf16 %v13412_v14, %v13406_v44  ;;  %7084 = vadd.xlane.f32.xlu0 %v7083_v15  ;;  %v13418_v40 = vpop.f32.mrb[171].mxu0 }
0x319b   :  { %v7597_v6 = vpack.c.bf16 %v13418_v40, %v13410_v28 }
0x319c   :  { %7087 = vadd.xlane.f32.xlu1 %v7086_v30 }
0x319f   :  { %v13424_v9 = vpop.f32.mrb[172].mxu0 }
0x31a0   :  { %v13426_v56 = vpop.f32.mrb[173].mxu0 }
0x31a1   :  { %v13428_v12 = vpop.f32.mrb[174].mxu0 }
0x31a2   :  { %v7602_v58 = vpack.c.bf16 %v13428_v12, %v13424_v9  ;;  %v13432_v49 = vpop.f32.mrb[175].mxu0 }
0x31a3   :  { %v7601_v54 = vpack.c.bf16 %v13432_v49, %v13426_v56 }
0x3223   :  { %v7079_v32 = vpop.xlane.xlu0 %7078 }
0x3224   :  { %v7089_v45 = vmul.f32 0.03125, %v7079_v32  ;;  %v7132_v32 = vrot.slane %v13388_v41, %v12813_v55 }
0x3225   :  { %v7082_v10 = vpop.xlane.xlu1 %7081 }
0x3226   :  { %v7093_v63 = vsub.f32 %v13394_v18, %v7089_v45  ;;  %v7090_v1 = vmul.f32 0.03125, %v7082_v10 }
0x3227   :  { %v7085_v37 = vpop.xlane.xlu0 %7084 }
0x3228   :  { %v7094_v11 = vsub.f32 %v13400_v25, %v7090_v1  ;;  %v7091_v43 = vmul.f32 0.03125, %v7085_v37  ;;  %v7097_v24 = vmul.f32 %v7093_v63, %v7093_v63 }
0x3229   :  { %v7088_v27 = vpop.xlane.xlu1 %7087 }
0x322a   :  { %v7095_v53 = vsub.f32 %v13398_v23, %v7091_v43  ;;  %v7092_v61 = vmul.f32 0.03125, %v7088_v27  ;;  %v7101_v38 = vsel %vm184_vm0, %v7097_v24, 0.0  ;;  %v7098_v31 = vmul.f32 %v7094_v11, %v7094_v11 }
0x322b   :  { %7102 = vadd.xlane.f32.xlu0 %v7101_v38  ;;  %v7140_v24 = vrot.slane %v13388_v41, %v12818_v2 }
0x322c   :  { %v7096_v33 = vsub.f32 %v13404_v42, %v7092_v61  ;;  %v7104_v5 = vsel %vm184_vm0, %v7098_v31, 0.0  ;;  %v7099_v13 = vmul.f32 %v7095_v53, %v7095_v53 }
0x322d   :  { %7105 = vadd.xlane.f32.xlu1 %v7104_v5 }
0x322e   :  { %v7107_v35 = vsel %vm184_vm0, %v7099_v13, 0.0  ;;  %v7100_v21 = vmul.f32 %v7096_v33, %v7096_v33 }
0x322f   :  { %7108 = vadd.xlane.f32.xlu0 %v7107_v35 }
0x3230   :  { %v7110_v50 = vsel %vm184_vm0, %v7100_v21, 0.0 }
0x3231   :  { %7111 = vadd.xlane.f32.xlu1 %v7110_v50 }
0x32b8   :  { %v7103_v52 = vpop.xlane.xlu0 %7102 }
0x32b9   :  { %v7113_v3 = vmul.f32 0.03125, %v7103_v52 }
0x32ba   :  { %v7106_v4 = vpop.xlane.xlu1 %7105 }
0x32bb   :  { %v7117_v8 = vadd.f32 1e-05, %v7113_v3  ;;  %v7114_v29 = vmul.f32 0.03125, %v7106_v4  ;;  %v11530_v3 = vld [vmem:[#allocation17 + $0x28] sm:$0xff]  }
0x32bc   :  { %v7109_v0 = vpop.xlane.xlu0 %7108 }
0x32bd   :  { %11811 = vrsqrt.f32 %v7117_v8  ;;  %v7118_v46 = vadd.f32 1e-05, %v7114_v29  ;;  %v7115_v48 = vmul.f32 0.03125, %v7109_v0 }
0x32be   :  { %v7112_v36 = vpop.xlane.xlu1 %7111 }
0x32bf   :  { %11813 = vrsqrt.f32 %v7118_v46  ;;  %v7119_v26 = vadd.f32 1e-05, %v7115_v48  ;;  %v7116_v15 = vmul.f32 0.03125, %v7112_v36 }
0x32c1   :  { %11815 = vrsqrt.f32 %v7119_v26  ;;  %v7120_v30 = vadd.f32 1e-05, %v7116_v15 }
0x32c3   :  { %11817 = vrsqrt.f32 %v7120_v30 }
0x32c7   :  { %v11812_v45 = vpop.eup %11811 }
0x32c8   :  { %v7125_v10 = vmul.f32 %v11812_v45, %v7093_v63 }
0x32c9   :  { %v11814_v1 = vpop.eup %11813 }
0x32ca   :  { %v7126_v37 = vmul.f32 %v11814_v1, %v7094_v11  ;;  %v7133_v43 = vmul.f32 %v7132_v32, %v7125_v10  ;;  %v11529_v11 = vld [vmem:[#allocation17 + $0x20] sm:$0xff]  }
0x32cb   :  { %v11816_v27 = vpop.eup %11815  ;;  %11119 = vmatprep.subr.bf16.mxu1 %v11529_v11 }
0x32cc   :  { %v7127_v61 = vmul.f32 %v11816_v27, %v7095_v53  ;;  %v7134_v38 = vmul.f32 %v7132_v32, %v7126_v37  ;;  %v7141_v35 = vadd.f32 %v7140_v24, %v7133_v43  ;;  %v11531_v53 = vld [vmem:[#allocation11 + $0xc0] sm:$0xff]  }
0x32cd   :  { %v11818_v31 = vpop.eup %11817 }
0x32ce   :  { %v7135_v5 = vmul.f32 %v7132_v32, %v7127_v61  ;;  %v7128_v13 = vmul.f32 %v11818_v31, %v7096_v33  ;;  %v7142_v21 = vadd.f32 %v7140_v24, %v7134_v38  ;;  %v9941_v33 = vld [vmem:[#allocation8 + $0x2] ss:$0 sm:$0xff] }
0x32d0   :  { %v7136_v50 = vmul.f32 %v7132_v32, %v7128_v13  ;;  %v7145_v59 = vpack.c.bf16 %v7142_v21, %v7141_v35  ;;  %v7143_v19 = vadd.f32 %v7140_v24, %v7135_v5 }
0x32d2   :  { %11115 = vmatprep.mubr.msk.bf16.mxu1 %vm184_vm0, %v7145_v59  ;;  %v7144_v63 = vadd.f32 %v7140_v24, %v7136_v50 }
0x32d4   :  { %v7146_v52 = vpack.c.bf16 %v7144_v63, %v7143_v19 }
0x32d6   :  { %11116 = vmatmul.mubr.msk.bf16.vlgmr.msra.gmra.mrb[196].mxu1 %vm184_vm0, %v7146_v52 }
0x32d7   :  { %11120 = vmatpush3.bf16.msra.mxu1 %v11529_v11 }
0x32d8   :  { %11121 = vmatprep.subr.bf16.mxu1 %v11530_v3 }
0x32db   :  { %11122 = vmatpush3.bf16.msra.mxu1 %v11530_v3 }
0x32dc   :  { %11135 = vmatprep.subr.bf16.mxu1 %v11531_v53 }
0x33a9   :  { %v11117_v4 = vpop.f32.mrb[196].mxu1 }
0x33aa   :  { %v7219_v8 = vadd.f32 %v11117_v4, %v9941_v33  ;;  %v7210_v29 = vpop.f32.mrb[197].mxu1 }
0x33ab   :  { %v7211_v0 = vadd.f32 %v9941_v33, %v7210_v29  ;;  %v11118_v46 = vpop.f32.mrb[198].mxu1 }
0x33ac   :  { %v7227_v48 = vmul.f32 %v7219_v8, %v7219_v8  ;;  %v7222_v36 = vadd.f32 %v11118_v46, %v9941_v33  ;;  %v7213_v26 = vpop.f32.mrb[199].mxu1 }
0x33ad   :  { %v7225_v15 = vmul.f32 %v7211_v0, %v7211_v0  ;;  %v7214_v30 = vadd.f32 %v9941_v33, %v7213_v26 }
0x33ae   :  { %v7231_v32 = vmul.f32 %v7227_v48, %v7219_v8  ;;  %v7228_v45 = vmul.f32 %v7222_v36, %v7222_v36 }
0x33af   :  { %v7229_v10 = vmul.f32 %v7225_v15, %v7211_v0  ;;  %v7226_v1 = vmul.f32 %v7214_v30, %v7214_v30 }
0x33b0   :  { %v7235_v37 = vmul.f32 0.044715, %v7231_v32  ;;  %v7232_v43 = vmul.f32 %v7228_v45, %v7222_v36 }
0x33b1   :  { %v7233_v24 = vmul.f32 0.044715, %v7229_v10  ;;  %v7230_v27 = vmul.f32 %v7226_v1, %v7214_v30 }
0x33b2   :  { %v7239_v61 = vadd.f32 %v7235_v37, %v7219_v8  ;;  %v7236_v38 = vmul.f32 0.044715, %v7232_v43 }
0x33b3   :  { %v7237_v31 = vadd.f32 %v7233_v24, %v7211_v0  ;;  %v7234_v5 = vmul.f32 0.044715, %v7230_v27  ;;  %v11532_v27 = vld [vmem:[#allocation11 + $0xc8] sm:$0xff]  }
0x33b4   :  { %v7243_v13 = vmul.f32 0.7978846, %v7239_v61  ;;  %v7240_v35 = vadd.f32 %v7236_v38, %v7222_v36 }
0x33b5   :  { %v7241_v21 = vmul.f32 0.7978846, %v7237_v31  ;;  %v7238_v50 = vadd.f32 %v7234_v5, %v7214_v30 }
0x33b6   :  { %11819 = vtanh.f32 %v7243_v13  ;;  %v7244_v59 = vmul.f32 0.7978846, %v7240_v35 }
0x33b7   :  { %11821 = vtanh.f32 %v7241_v21  ;;  %v7242_v19 = vmul.f32 0.7978846, %v7238_v50 }
0x33b8   :  { %11823 = vtanh.f32 %v7244_v59 }
0x33b9   :  { %11825 = vtanh.f32 %v7242_v19 }
0x33c0   :  { %v11820_v63 = vpop.eup %11819 }
0x33c1   :  { %v11822_v52 = vpop.eup %11821  ;;  %v7251_v11 = vadd.f32 1.0, %v11820_v63 }
0x33c2   :  { %v11824_v3 = vpop.eup %11823  ;;  %v7249_v33 = vadd.f32 1.0, %v11822_v52 }
0x33c3   :  { %v11826_v4 = vpop.eup %11825  ;;  %v7255_v29 = vmul.f32 0.5, %v7251_v11  ;;  %v7252_v46 = vadd.f32 1.0, %v11824_v3 }
0x33c4   :  { %v7253_v48 = vmul.f32 0.5, %v7249_v33  ;;  %v7250_v26 = vadd.f32 1.0, %v11826_v4 }
0x33c5   :  { %v7256_v15 = vmul.f32 0.5, %v7252_v46  ;;  %v7259_v45 = vmul.f32 %v7255_v29, %v7219_v8  ;;  %v7271_v8 = vrot.slane %v13388_v41, %v13058_v57 }
0x33c6   :  { %v7254_v32 = vmul.f32 0.5, %v7250_v26  ;;  %v7257_v1 = vmul.f32 %v7253_v48, %v7211_v0 }
0x33c7   :  { %v7260_v10 = vmul.f32 %v7256_v15, %v7222_v36 }
0x33c8   :  { %v7258_v37 = vmul.f32 %v7254_v32, %v7214_v30 }
0x33c9   :  { %v7262_v43 = vpack.c.bf16 %v7260_v10, %v7259_v45 }
0x33ca   :  { %v7261_v24 = vpack.c.bf16 %v7258_v37, %v7257_v1 }
0x33cc   :  { %11123 = vmatprep.mubr.msk.bf16.mxu1 %vm184_vm0, %v7261_v24 }
0x33cd   :  { %11124 = vmatmul.mubr.msk.bf16.vlgmr.msra.gmra.mrb[200].mxu1 %vm184_vm0, %v7262_v43 }
0x33ce   :  { %11136 = vmatpush3.bf16.msra.mxu1 %v11531_v53  ;;  %11139 = vmatprep.mubr.msk.bf16.mxu1 %vm184_vm0, %v13187_v60 }
0x33cf   :  { %11137 = vmatprep.subr.bf16.mxu1 %v11532_v27 }
0x33d2   :  { %11138 = vmatpush3.bf16.msra.mxu1 %v11532_v27 }
0x33d3   :  { %11151 = vmatprep.subr.bf16.mxu1 %v12216_v51 }
0x33d5   :  { %11140 = vmatmul.mubr.msk.bf16.vlgmr.msra.gmra.mrb[204].mxu1 %vm184_vm0, %v13193_v47 }
0x33d6   :  { %11153 = vmatprep.mubr.msk.bf16.mxu1 %vm12217_vm1, %v12216_v51 }
0x34a0   :  { %v11125_v0 = vpop.f32.mrb[200].mxu1 }
0x34a1   :  { %v7333_v36 = vadd.f32 %v11125_v0, %v7271_v8  ;;  %v7324_v30 = vpop.f32.mrb[201].mxu1 }
0x34a2   :  { %v7325_v53 = vadd.f32 %v7324_v30, %v7271_v8  ;;  %v11126_v61 = vpop.f32.mrb[202].mxu1  ;;  %v11534_v30 = vld [vmem:[#allocation10 + $0xd0] sm:$0xff]  }
0x34a3   :  { %v7341_v38 = vadd.f32 %v7333_v36, %v13398_v23  ;;  %v7336_v31 = vadd.f32 %v11126_v61, %v7271_v8  ;;  %v7327_v5 = vpop.f32.mrb[203].mxu1  ;;  %v11533_v36 = vld [vmem:[#allocation11 + $0xd0] sm:$0xff]  }
0x34a4   :  { %v7339_v13 = vadd.f32 %v7325_v53, %v13394_v18  ;;  %v7328_v35 = vadd.f32 %v7327_v5, %v7271_v8 }
0x34a5   :  { %9667 = vst.msk [vmem:[#allocation20 + $0x10] sm:$0xff] %vm184_vm0, %v7341_v38  ;;  %v7342_v21 = vadd.f32 %v7336_v31, %v13404_v42 }
0x34a6   :  { %9665 = vst.msk [vmem:[#allocation20] sm:$0xff] %vm184_vm0, %v7339_v13  ;;  %v7340_v41 = vadd.f32 %v7328_v35, %v13400_v25 }
0x34a7   :  { %9668 = vst.msk [vmem:[#allocation20 + $0x18] sm:$0xff] %vm184_vm0, %v7342_v21 }
0x34a8   :  { %9666 = vst.msk [vmem:[#allocation20 + $0x8] sm:$0xff] %vm184_vm0, %v7340_v41  ;;  %v11141_v50 = vpop.f32.mrb[204].mxu1 }
0x34a9   :  { %v7516_v59 = vpop.f32.mrb[205].mxu1 }
0x34aa   :  { %v11142_v23 = vpop.f32.mrb[206].mxu1 }
0x34ab   :  { %v7600_v19 = vpack.c.bf16 %v11142_v23, %v11141_v50  ;;  %v7519_v63 = vpop.f32.mrb[207].mxu1 }
0x34ac   :  { %v7599_v52 = vpack.c.bf16 %v7519_v63, %v7516_v59  ;;  %v11535_v59 = vld [vmem:[#allocation11 + $0xd8] sm:$0xff]  }
0x34ad   :  { %v7654_v18 = vsel %vm545_vm2, %v7600_v19, 0 }
0x34ae   :  { %v7607_v11 = vsel %vm545_vm2, %v7599_v52, 0  ;;  %11158 = vmatpush3.bf16.xpose.msra.mxu0 %v7654_v18  ;;  %v11536_v18 = vld [vmem:[#allocation10 + $0xd8] sm:$0xff]  }
0x34af   :  { %11152 = vmatpush3.bf16.xpose.msra.mxu1 %v7607_v11  ;;  %11169 = vmatprep.subr.bf16.mxu0 %v12216_v51  ;;  %v11537_v11 = vld [vmem:[#allocation13 + $0xd0] sm:$0xff]  }
0x34b0   :  { %11163 = vmatprep.subr.bf16.mxu1 %v12216_v51 }
0x34b5   :  { %11160 = vmatmul.mubr.msk.bf16.vlgmr.msra.gmra.mrb[176].mxu0 %vm545_vm2, %v7598_v16 }
0x34b6   :  { %11154 = vmatmul.mubr.msk.bf16.vlgmr.msra.gmra.mrb[208].mxu1 %vm545_vm2, %v7597_v6  ;;  %11170 = vmatpush3.bf16.msra.mxu0 %v7602_v58 }
0x34b7   :  { %11164 = vmatpush3.bf16.msra.mxu1 %v7601_v54  ;;  %11171 = vmatprep.mubr.msk.bf16.mxu0 %vm12217_vm1, %v12216_v51 }
0x34b8   :  { %11165 = vmatprep.mubr.msk.bf16.mxu1 %vm12217_vm1, %v12216_v51  ;;  %11183 = vmatprep.subr.bf16.mxu0 %v11533_v36 }
0x34b9   :  { %11175 = vmatprep.subr.bf16.mxu1 %v11534_v30 }
0x3588   :  { %v7690_v25 = vpop.f32.mrb[176].mxu0 }
0x3589   :  { %v7643_v42 = vpop.f32.mrb[208].mxu1  ;;  %v11161_v44 = vpop.f32.mrb[177].mxu0  ;;  %v7703_v28 = vsel %vm640_vm3, %v7690_v25, -inf }
0x358a   :  { %7704 = vmax.xlane.f32.xlu0 %v7703_v28  ;;  %v11155_v14 = vpop.f32.mrb[209].mxu1  ;;  %v7693_v16 = vpop.f32.mrb[178].mxu0  ;;  %v7697_v12 = vsel %vm640_vm3, %v7643_v42, -inf }
0x358b   :  { %v7646_v40 = vpop.f32.mrb[210].mxu1  ;;  %v11162_v6 = vpop.f32.mrb[179].mxu0  ;;  %v7706_v9 = vsel %vm640_vm3, %v7693_v16, -inf }
0x358c   :  { %7707 = vmax.xlane.f32.xlu1 %v7706_v9  ;;  %v11156_v56 = vpop.f32.mrb[211].mxu1  ;;  %v7700_v58 = vsel %vm640_vm3, %v7646_v40, -inf }
0x358e   :  { %7698 = vmax.xlane.f32.xlu0 %v7697_v12 }
0x3590   :  { %7701 = vmax.xlane.f32.xlu1 %v7700_v58 }
0x3617   :  { %v7705_v49 = vpop.xlane.xlu0 %7704 }
0x3618   :  { %v7711_v54 = vsub.f32 %v7690_v25, %v7705_v49  ;;  %v11538_v25 = vld [vmem:[#allocation13 + $0xd8] sm:$0xff]  }
0x3619   :  { %v7708_v3 = vpop.xlane.xlu1 %7707 }
0x361a   :  { %v7717_v33 = vmul.f32 1.442695, %v7711_v54  ;;  %v7712_v4 = vsub.f32 %v7693_v16, %v7708_v3 }
0x361b   :  { %v7699_v29 = vpop.xlane.xlu0 %7698 }
0x361c   :  { %11827 = vpow2.f32 %v7717_v33  ;;  %v7719_v46 = vmul.f32 1.442695, %v7712_v4  ;;  %v7709_v48 = vsub.f32 %v7643_v42, %v7699_v29 }
0x361d   :  { %v7702_v26 = vpop.xlane.xlu1 %7701 }
0x361e   :  { %11829 = vpow2.f32 %v7719_v46  ;;  %v7713_v15 = vmul.f32 1.442695, %v7709_v48  ;;  %v7710_v32 = vsub.f32 %v7646_v40, %v7702_v26 }
0x3620   :  { %11831 = vpow2.f32 %v7713_v15  ;;  %v7715_v45 = vmul.f32 1.442695, %v7710_v32 }
0x3622   :  { %11833 = vpow2.f32 %v7715_v45 }
0x3626   :  { %v11828_v10 = vpop.eup %11827 }
0x3627   :  { %v7727_v1 = vsel %vm640_vm3, %v11828_v10, 0.0 }
0x3628   :  { %v11830_v37 = vpop.eup %11829  ;;  %7728 = vadd.xlane.f32.xlu0 %v7727_v1 }
0x3629   :  { %v7730_v43 = vsel %vm640_vm3, %v11830_v37, 0.0 }
0x362a   :  { %v11832_v24 = vpop.eup %11831  ;;  %7731 = vadd.xlane.f32.xlu1 %v7730_v43 }
0x362b   :  { %v7721_v27 = vsel %vm640_vm3, %v11832_v24, 0.0 }
0x362c   :  { %v11834_v8 = vpop.eup %11833  ;;  %7722 = vadd.xlane.f32.xlu0 %v7721_v27 }
0x362d   :  { %v7724_v0 = vsel %vm640_vm3, %v11834_v8, 0.0 }
0x362e   :  { %7725 = vadd.xlane.f32.xlu1 %v7724_v0 }
0x36b5   :  { %v7729_v53 = vpop.xlane.xlu0 %7728 }
0x36b6   :  { %11835 = vrcp.f32 %v7729_v53 }
0x36b7   :  { %v7732_v61 = vpop.xlane.xlu1 %7731 }
0x36b8   :  { %11837 = vrcp.f32 %v7732_v61 }
0x36b9   :  { %v7723_v38 = vpop.xlane.xlu0 %7722 }
0x36ba   :  { %11839 = vrcp.f32 %v7723_v38 }
0x36bb   :  { %v7726_v31 = vpop.xlane.xlu1 %7725 }
0x36bc   :  { %11841 = vrcp.f32 %v7726_v31 }
0x36c0   :  { %v11836_v5 = vpop.eup %11835 }
0x36c1   :  { %v7739_v35 = vmul.f32 %v11836_v5, %v11828_v10 }
0x36c2   :  { %v11838_v13 = vpop.eup %11837 }
0x36c3   :  { %v7740_v21 = vmul.f32 %v11838_v13, %v11830_v37 }
0x36c4   :  { %v11840_v41 = vpop.eup %11839 }
0x36c5   :  { %v7742_v50 = vpack.c.bf16 %v7740_v21, %v7739_v35  ;;  %v7737_v19 = vmul.f32 %v11840_v41, %v11832_v24 }
0x36c6   :  { %v11842_v23 = vpop.eup %11841 }
0x36c7   :  { %v7738_v63 = vmul.f32 %v11842_v23, %v11834_v8  ;;  %11172 = vmatmul.mubr.msk.bf16.vlgmr.msra.gmra.mrb[180].mxu0 %vm640_vm3, %v7742_v50 }
0x36c8   :  { %11184 = vmatpush3.bf16.msra.mxu0 %v11533_v36  ;;  %11187 = vmatprep.mubr.msk.bf16.mxu0 %vm184_vm0, %v13187_v60 }
0x36c9   :  { %v7741_v52 = vpack.c.bf16 %v7738_v63, %v7737_v19  ;;  %11185 = vmatprep.subr.bf16.mxu0 %v11535_v59 }
0x36cb   :  { %11166 = vmatmul.mubr.msk.bf16.vlgmr.msra.gmra.mrb[212].mxu1 %vm640_vm3, %v7741_v52 }
0x36cc   :  { %11176 = vmatpush3.bf16.msra.mxu1 %v11534_v30  ;;  %11179 = vmatprep.mubr.msk.bf16.mxu1 %vm184_vm0, %v13185_v39 }
0x36cd   :  { %11186 = vmatpush3.bf16.msra.mxu0 %v11535_v59  ;;  %11177 = vmatprep.subr.bf16.mxu1 %v11536_v18 }
0x36ce   :  { %11199 = vmatprep.subr.bf16.mxu0 %v12216_v51 }
0x36d0   :  { %11188 = vmatmul.mubr.msk.bf16.vlgmr.msra.gmra.mrb[184].mxu0 %vm184_vm0, %v13193_v47  ;;  %11178 = vmatpush3.bf16.msra.mxu1 %v11536_v18 }
0x36d1   :  { %11191 = vmatprep.subr.bf16.mxu1 %v11537_v11  ;;  %11201 = vmatprep.mubr.msk.bf16.mxu0 %vm12217_vm1, %v12216_v51 }
0x36d3   :  { %11180 = vmatmul.mubr.msk.bf16.vlgmr.msra.gmra.mrb[216].mxu1 %vm184_vm0, %v13175_v22 }
0x36d4   :  { %11192 = vmatpush3.bf16.msra.mxu1 %v11537_v11  ;;  %11195 = vmatprep.mubr.msk.bf16.mxu1 %vm184_vm0, %v13187_v60 }
0x36d5   :  { %11193 = vmatprep.subr.bf16.mxu1 %v11538_v25 }
0x36d8   :  { %11194 = vmatpush3.bf16.msra.mxu1 %v11538_v25 }
0x36d9   :  { %11205 = vmatprep.subr.bf16.mxu1 %v12216_v51 }
0x36db   :  { %11196 = vmatmul.mubr.msk.bf16.vlgmr.msra.gmra.mrb[220].mxu1 %vm184_vm0, %v13193_v47 }
0x36dc   :  { %11207 = vmatprep.mubr.msk.bf16.mxu1 %vm12217_vm1, %v12216_v51 }
0x379a   :  { %v13519_v42 = vpop.f32.mrb[180].mxu0 }
0x379b   :  { %v11173_v44 = vpop.f32.mrb[181].mxu0 }
0x379c   :  { %v13521_v28 = vpop.f32.mrb[182].mxu0 }
0x379d   :  { %v7832_v14 = vpack.c.bf16 %v13521_v28, %v13519_v42  ;;  %v11174_v16 = vpop.f32.mrb[183].mxu0 }
0x379e   :  { %v13525_v40 = vpop.f32.mrb[212].mxu1 }
0x379f   :  { %v11167_v6 = vpop.f32.mrb[213].mxu1 }
0x37a0   :  { %v13527_v9 = vpop.f32.mrb[214].mxu1 }
0x37a1   :  { %v7831_v56 = vpack.c.bf16 %v13527_v9, %v13525_v40  ;;  %v11168_v12 = vpop.f32.mrb[215].mxu1 }
0x37a3   :  { %v11189_v58 = vpop.f32.mrb[184].mxu0 }
0x37a4   :  { %v7952_v49 = vpop.f32.mrb[185].mxu0 }
0x37a5   :  { %v11190_v54 = vpop.f32.mrb[186].mxu0 }
0x37a6   :  { %v8036_v3 = vpack.c.bf16 %v11190_v54, %v11189_v58  ;;  %v7955_v33 = vpop.f32.mrb[187].mxu0  ;;  %v11181_v4 = vpop.f32.mrb[216].mxu1 }
0x37a7   :  { %v8035_v29 = vpack.c.bf16 %v7955_v33, %v7952_v49  ;;  %v7886_v46 = vpop.f32.mrb[217].mxu1 }
0x37a8   :  { %v8090_v48 = vsel %vm545_vm2, %v8036_v3, 0  ;;  %v11182_v26 = vpop.f32.mrb[218].mxu1 }
0x37a9   :  { %v8043_v15 = vsel %vm545_vm2, %v8035_v29, 0  ;;  %v8034_v32 = vpack.c.bf16 %v11182_v26, %v11181_v4  ;;  %11206 = vmatpush3.bf16.xpose.msra.mxu1 %v8090_v48  ;;  %v7889_v45 = vpop.f32.mrb[219].mxu1 }
0x37aa   :  { %v8033_v10 = vpack.c.bf16 %v7889_v45, %v7886_v46  ;;  %11200 = vmatpush3.bf16.xpose.msra.mxu0 %v8043_v15  ;;  %11217 = vmatprep.subr.bf16.mxu1 %v12216_v51  ;;  %v11539_v46 = vld [vmem:[#allocation10 + $0xe0] sm:$0xff]  }
0x37ab   :  { %11211 = vmatprep.subr.bf16.mxu0 %v12216_v51 }
0x37ae   :  { %v11197_v1 = vpop.f32.mrb[220].mxu1 }
0x37af   :  { %v8018_v37 = vpop.f32.mrb[221].mxu1 }
0x37b0   :  { %11208 = vmatmul.mubr.msk.bf16.vlgmr.msra.gmra.mrb[224].mxu1 %vm545_vm2, %v8034_v32  ;;  %v11198_v43 = vpop.f32.mrb[222].mxu1 }
0x37b1   :  { %v8038_v24 = vpack.c.bf16 %v11198_v43, %v11197_v1  ;;  %11202 = vmatmul.mubr.msk.bf16.vlgmr.msra.gmra.mrb[188].mxu0 %vm545_vm2, %v8033_v10  ;;  %v8021_v27 = vpop.f32.mrb[223].mxu1  ;;  %11219 = vmatprep.mubr.msk.bf16.mxu1 %vm12217_vm1, %v12216_v51 }
0x37b2   :  { %v8037_v8 = vpack.c.bf16 %v8021_v27, %v8018_v37  ;;  %11213 = vmatprep.mubr.msk.bf16.mxu0 %vm12217_vm1, %v12216_v51 }
0x37b3   :  { %11218 = vmatpush3.bf16.msra.mxu1 %v8038_v24 }
0x37b4   :  { %11212 = vmatpush3.bf16.msra.mxu0 %v8037_v8  ;;  %11235 = vmatprep.subr.bf16.mxu1 %v11539_v46 }
0x3883   :  { %v8126_v0 = vpop.f32.mrb[224].mxu1 }
0x3884   :  { %v8079_v36 = vpop.f32.mrb[188].mxu0  ;;  %v11209_v30 = vpop.f32.mrb[225].mxu1  ;;  %v8139_v21 = vsel %vm640_vm3, %v8126_v0, -inf }
0x3885   :  { %v11203_v53 = vpop.f32.mrb[189].mxu0  ;;  %v8129_v61 = vpop.f32.mrb[226].mxu1  ;;  %v8133_v38 = vsel %vm640_vm3, %v8079_v36, -inf  ;;  %v11540_v30 = vld [vmem:[#allocation10 + $0xe8] sm:$0xff]  }
0x3886   :  { %8134 = vmax.xlane.f32.xlu0 %v8133_v38  ;;  %v8082_v31 = vpop.f32.mrb[190].mxu0  ;;  %v11210_v5 = vpop.f32.mrb[227].mxu1  ;;  %v8142_v41 = vsel %vm640_vm3, %v8129_v61, -inf  ;;  %v11541_v53 = vld [vmem:[#allocation11 + $0xe0] sm:$0xff]   ;;  %v8270_v38 = vld [vmem:[#allocation14 + $0x34] sm:$0xf] }
0x3887   :  { %v11204_v13 = vpop.f32.mrb[191].mxu0  ;;  %v8136_v35 = vsel %vm640_vm3, %v8082_v31, -inf  ;;  %11419 = vmatprep.subr.msk.bf16.mxu0 %vm1220_vm4, %v8270_v38  ;;  %v7834_v5 = vld [vmem:[#allocation14 + $0x30] sm:$0xf] }
0x3888   :  { %8137 = vmax.xlane.f32.xlu1 %v8136_v35 }
0x388a   :  { %8140 = vmax.xlane.f32.xlu0 %v8139_v21 }
0x388c   :  { %8143 = vmax.xlane.f32.xlu1 %v8142_v41 }
0x3913   :  { %v8135_v50 = vpop.xlane.xlu0 %8134 }
0x3914   :  { %v8145_v59 = vsub.f32 %v8079_v36, %v8135_v50 }
0x3915   :  { %v8138_v23 = vpop.xlane.xlu1 %8137 }
0x3916   :  { %v8149_v19 = vmul.f32 1.442695, %v8145_v59  ;;  %v8146_v63 = vsub.f32 %v8082_v31, %v8138_v23  ;;  %v8278_v31 = vsel %vm1220_vm4, %v8270_v38, 0 }
0x3917   :  { %v8141_v52 = vpop.xlane.xlu0 %8140 }
0x3918   :  { %11843 = vpow2.f32 %v8149_v19  ;;  %v8151_v18 = vmul.f32 1.442695, %v8146_v63  ;;  %v8147_v11 = vsub.f32 %v8126_v0, %v8141_v52 }
0x3919   :  { %v8144_v25 = vpop.xlane.xlu1 %8143 }
0x391a   :  { %11845 = vpow2.f32 %v8151_v18  ;;  %v8153_v44 = vmul.f32 1.442695, %v8147_v11  ;;  %v8148_v16 = vsub.f32 %v8129_v61, %v8144_v25  ;;  %v11542_v61 = vld [vmem:[#allocation11 + $0xe8] sm:$0xff]   ;;  %v8336_v18 = vsel %vm1220_vm4, %v7834_v5, 0  ;;  %v11543_v11 = vld [vmem:[#allocation13 + $0xe0] sm:$0xff]  }
0x391c   :  { %11847 = vpow2.f32 %v8153_v44  ;;  %v8155_v6 = vmul.f32 1.442695, %v8148_v16 }
0x391e   :  { %11849 = vpow2.f32 %v8155_v6 }
0x3922   :  { %v11844_v12 = vpop.eup %11843 }
0x3923   :  { %v8157_v58 = vsel %vm640_vm3, %v11844_v12, 0.0 }
0x3924   :  { %v11846_v49 = vpop.eup %11845  ;;  %8158 = vadd.xlane.f32.xlu0 %v8157_v58 }
0x3925   :  { %v8160_v54 = vsel %vm640_vm3, %v11846_v49, 0.0 }
0x3926   :  { %v11848_v3 = vpop.eup %11847  ;;  %8161 = vadd.xlane.f32.xlu1 %v8160_v54 }
0x3927   :  { %v8163_v33 = vsel %vm640_vm3, %v11848_v3, 0.0 }
0x3928   :  { %v11850_v4 = vpop.eup %11849  ;;  %8164 = vadd.xlane.f32.xlu0 %v8163_v33 }
0x3929   :  { %v8166_v29 = vsel %vm640_vm3, %v11850_v4, 0.0 }
0x392a   :  { %8167 = vadd.xlane.f32.xlu1 %v8166_v29 }
0x39b1   :  { %v8159_v48 = vpop.xlane.xlu0 %8158 }
0x39b2   :  { %11851 = vrcp.f32 %v8159_v48 }
0x39b3   :  { %v8162_v26 = vpop.xlane.xlu1 %8161 }
0x39b4   :  { %11853 = vrcp.f32 %v8162_v26 }
0x39b5   :  { %v8165_v15 = vpop.xlane.xlu0 %8164 }
0x39b6   :  { %11855 = vrcp.f32 %v8165_v15 }
0x39b7   :  { %v8168_v32 = vpop.xlane.xlu1 %8167 }
0x39b8   :  { %11857 = vrcp.f32 %v8168_v32 }
0x39bc   :  { %v11852_v45 = vpop.eup %11851 }
0x39bd   :  { %v8173_v1 = vmul.f32 %v11852_v45, %v11844_v12 }
0x39be   :  { %v11854_v10 = vpop.eup %11853 }
0x39bf   :  { %v8174_v37 = vmul.f32 %v11854_v10, %v11846_v49  ;;  %v11544_v49 = vld [vmem:[#allocation13 + $0xe8] sm:$0xff]  }
0x39c0   :  { %v11856_v43 = vpop.eup %11855 }
0x39c1   :  { %v8177_v24 = vpack.c.bf16 %v8174_v37, %v8173_v1  ;;  %v8175_v8 = vmul.f32 %v11856_v43, %v11848_v3 }
0x39c2   :  { %v11858_v27 = vpop.eup %11857 }
0x39c3   :  { %v8176_v0 = vmul.f32 %v11858_v27, %v11850_v4  ;;  %11214 = vmatmul.mubr.msk.bf16.vlgmr.msra.gmra.mrb[192].mxu0 %vm640_vm3, %v8177_v24 }
0x39c4   :  { %11224 = vmatpush3.bf16.msra.mxu0 %v8278_v31 }
0x39c5   :  { %v8178_v36 = vpack.c.bf16 %v8176_v0, %v8175_v8  ;;  %11420 = vmatprep.subr.msk.bf16.mxu0 %vm1220_vm4, %v7834_v5 }
0x39c7   :  { %11220 = vmatmul.mubr.msk.bf16.vlgmr.msra.gmra.mrb[228].mxu1 %vm640_vm3, %v8178_v36 }
0x39c8   :  { %11236 = vmatpush3.bf16.msra.mxu1 %v11539_v46  ;;  %11239 = vmatprep.mubr.msk.bf16.mxu1 %vm184_vm0, %v13185_v39 }
0x39c9   :  { %11237 = vmatprep.subr.bf16.mxu1 %v11540_v30 }
0x39cc   :  { %11238 = vmatpush3.bf16.msra.mxu1 %v11540_v30 }
0x39cd   :  { %11243 = vmatprep.subr.bf16.mxu1 %v11541_v53 }
0x39cf   :  { %11240 = vmatmul.mubr.msk.bf16.vlgmr.msra.gmra.mrb[232].mxu1 %vm184_vm0, %v13175_v22 }
0x39d0   :  { %11244 = vmatpush3.bf16.msra.mxu1 %v11541_v53  ;;  %11247 = vmatprep.mubr.msk.bf16.mxu1 %vm184_vm0, %v13187_v60 }
0x39d1   :  { %11245 = vmatprep.subr.bf16.mxu1 %v11542_v61 }
0x39d4   :  { %11246 = vmatpush3.bf16.msra.mxu1 %v11542_v61 }
0x39d5   :  { %11259 = vmatprep.subr.bf16.mxu1 %v12216_v51 }
0x39d7   :  { %11248 = vmatmul.mubr.msk.bf16.vlgmr.msra.gmra.mrb[236].mxu1 %vm184_vm0, %v13193_v47 }
0x39d8   :  { %11261 = vmatprep.mubr.msk.bf16.mxu1 %vm12217_vm1, %v12216_v51 }
0x3a96   :  { %v8216_v13 = vpop.f32.mrb[192].mxu0 }
0x3a97   :  { %v11215_v35 = vpop.f32.mrb[193].mxu0 }
0x3a98   :  { %v8219_v21 = vpop.f32.mrb[194].mxu0 }
0x3a99   :  { %v8267_v41 = vpack.c.bf16 %v8219_v21, %v8216_v13  ;;  %v11216_v50 = vpop.f32.mrb[195].mxu0 }
0x3a9a   :  { %v8260_v59 = vpop.f32.mrb[228].mxu1 }
0x3a9b   :  { %v11221_v23 = vpop.f32.mrb[229].mxu1  ;;  %11225 = vmatprep.mubr.msk.bf16.mxu0 %vm545_vm2, %v8267_v41 }
0x3a9c   :  { %v8263_v19 = vpop.f32.mrb[230].mxu1 }
0x3a9d   :  { %v8268_v63 = vpack.c.bf16 %v8263_v19, %v8260_v59  ;;  %v11222_v52 = vpop.f32.mrb[231].mxu1 }
0x3a9f   :  { %11226 = vmatmul.mubr.msk.bf16.vlgmr.msra.gmra.mrb[196].mxu0 %vm545_vm2, %v8268_v63 }
0x3aa0   :  { %11231 = vmatprep.mubr.msk.bf16.mxu0 %vm545_vm2, %v7831_v56  ;;  %11230 = vmatpush3.bf16.msra.mxu0 %v8336_v18 }
0x3aa1   :  { %11251 = vmatprep.subr.bf16.mxu0 %v11543_v11 }
0x3aa2   :  { %v11241_v25 = vpop.f32.mrb[232].mxu1 }
0x3aa3   :  { %v8438_v44 = vpop.f32.mrb[233].mxu1 }
0x3aa4   :  { %v11242_v16 = vpop.f32.mrb[234].mxu1 }
0x3aa5   :  { %v8586_v6 = vpack.c.bf16 %v11242_v16, %v11241_v25  ;;  %v8441_v12 = vpop.f32.mrb[235].mxu1  ;;  %v11545_v16 = vld [vmem:[#allocation10 + $0xf0] sm:$0xff]  }
0x3aa6   :  { %v8585_v58 = vpack.c.bf16 %v8441_v12, %v8438_v44 }
0x3aaa   :  { %v11249_v54 = vpop.f32.mrb[236].mxu1 }
0x3aab   :  { %11232 = vmatmul.mubr.msk.bf16.vlgmr.msra.gmra.mrb[196].mxu0 %vm545_vm2, %v7832_v14  ;;  %v8504_v3 = vpop.f32.mrb[237].mxu1 }
0x3aac   :  { %11252 = vmatpush3.bf16.msra.mxu0 %v11543_v11  ;;  %v11250_v40 = vpop.f32.mrb[238].mxu1  ;;  %11255 = vmatprep.mubr.msk.bf16.mxu0 %vm184_vm0, %v13187_v60 }
0x3aad   :  { %v8588_v9 = vpack.c.bf16 %v11250_v40, %v11249_v54  ;;  %v8507_v56 = vpop.f32.mrb[239].mxu1  ;;  %11253 = vmatprep.subr.bf16.mxu0 %v11544_v49 }
0x3aae   :  { %v8587_v33 = vpack.c.bf16 %v8507_v56, %v8504_v3 }
0x3aaf   :  { %v8642_v42 = vsel %vm545_vm2, %v8588_v9, 0 }
0x3ab0   :  { %v8595_v4 = vsel %vm545_vm2, %v8587_v33, 0  ;;  %11254 = vmatpush3.bf16.msra.mxu0 %v11544_v49  ;;  %v11546_v33 = vld [vmem:[#allocation10 + $0xf8] sm:$0xff]  }
0x3ab1   :  { %11260 = vmatpush3.bf16.xpose.msra.mxu1 %v8595_v4  ;;  %11265 = vmatprep.subr.bf16.mxu0 %v12216_v51 }
0x3ab2   :  { %11271 = vmatprep.subr.bf16.mxu1 %v12216_v51 }
0x3ab3   :  { %11256 = vmatmul.mubr.msk.bf16.vlgmr.msra.gmra.mrb[200].mxu0 %vm184_vm0, %v13193_v47 }
0x3ab4   :  { %11267 = vmatprep.mubr.msk.bf16.mxu0 %vm12217_vm1, %v12216_v51 }
0x3ab8   :  { %11262 = vmatmul.mubr.msk.bf16.vlgmr.msra.gmra.mrb[240].mxu1 %vm545_vm2, %v8585_v58 }
0x3ab9   :  { %11266 = vmatpush3.bf16.xpose.msra.mxu0 %v8642_v42  ;;  %11273 = vmatprep.mubr.msk.bf16.mxu1 %vm12217_vm1, %v12216_v51  ;;  %v11547_v42 = vld [vmem:[#allocation11 + $0xf0] sm:$0xff]  }
0x3aba   :  { %11277 = vmatprep.subr.bf16.mxu0 %v12216_v51 }
0x3ac0   :  { %11268 = vmatmul.mubr.msk.bf16.vlgmr.msra.gmra.mrb[204].mxu0 %vm545_vm2, %v8586_v6 }
0x3ac1   :  { %11279 = vmatprep.mubr.msk.bf16.mxu0 %vm12217_vm1, %v12216_v51 }
0x3b86   :  { %v11257_v28 = vpop.f32.mrb[200].mxu0 }
0x3b87   :  { %v8570_v14 = vpop.f32.mrb[201].mxu0 }
0x3b88   :  { %v11258_v29 = vpop.f32.mrb[202].mxu0 }
0x3b89   :  { %v8590_v46 = vpack.c.bf16 %v11258_v29, %v11257_v28  ;;  %v8573_v48 = vpop.f32.mrb[203].mxu0 }
0x3b8a   :  { %v8589_v26 = vpack.c.bf16 %v8573_v48, %v8570_v14  ;;  %v11548_v48 = vld [vmem:[#allocation11 + $0xf8] sm:$0xff]  }
0x3b8b   :  { %v8631_v15 = vpop.f32.mrb[240].mxu1  ;;  %11278 = vmatpush3.bf16.msra.mxu0 %v8590_v46 }
0x3b8c   :  { %v11263_v32 = vpop.f32.mrb[241].mxu1  ;;  %11272 = vmatpush3.bf16.msra.mxu1 %v8589_v26  ;;  %v8685_v45 = vsel %vm640_vm3, %v8631_v15, -inf }
0x3b8d   :  { %8686 = vmax.xlane.f32.xlu0 %v8685_v45  ;;  %v8634_v10 = vpop.f32.mrb[242].mxu1  ;;  %11289 = vmatprep.subr.bf16.mxu1 %v11545_v16 }
0x3b8e   :  { %v11264_v1 = vpop.f32.mrb[243].mxu1  ;;  %v8688_v37 = vsel %vm640_vm3, %v8634_v10, -inf }
0x3b8f   :  { %8689 = vmax.xlane.f32.xlu1 %v8688_v37 }
0x3b93   :  { %v8678_v43 = vpop.f32.mrb[204].mxu0 }
0x3b94   :  { %v11269_v24 = vpop.f32.mrb[205].mxu0  ;;  %v8691_v27 = vsel %vm640_vm3, %v8678_v43, -inf }
0x3b95   :  { %8692 = vmax.xlane.f32.xlu0 %v8691_v27  ;;  %v8681_v8 = vpop.f32.mrb[206].mxu0 }
0x3b96   :  { %v11270_v0 = vpop.f32.mrb[207].mxu0  ;;  %v8694_v36 = vsel %vm640_vm3, %v8681_v8, -inf }
0x3b97   :  { %8695 = vmax.xlane.f32.xlu1 %v8694_v36 }
0x3c1a   :  { %v8687_v30 = vpop.xlane.xlu0 %8686 }
0x3c1b   :  { %v8697_v53 = vsub.f32 %v8631_v15, %v8687_v30 }
0x3c1c   :  { %v8690_v61 = vpop.xlane.xlu1 %8689 }
0x3c1d   :  { %v8701_v38 = vmul.f32 1.442695, %v8697_v53  ;;  %v8698_v31 = vsub.f32 %v8634_v10, %v8690_v61 }
0x3c1f   :  { %11859 = vpow2.f32 %v8701_v38  ;;  %v8703_v5 = vmul.f32 1.442695, %v8698_v31  ;;  %v11550_v38 = vld [vmem:[#allocation13 + $0xf8] sm:$0xff]  }
0x3c21   :  { %11861 = vpow2.f32 %v8703_v5 }
0x3c22   :  { %v8693_v13 = vpop.xlane.xlu0 %8692 }
0x3c23   :  { %v8699_v35 = vsub.f32 %v8678_v43, %v8693_v13 }
0x3c24   :  { %v8696_v21 = vpop.xlane.xlu1 %8695 }
0x3c25   :  { %v8705_v41 = vmul.f32 1.442695, %v8699_v35  ;;  %v8700_v50 = vsub.f32 %v8681_v8, %v8696_v21 }
0x3c27   :  { %11863 = vpow2.f32 %v8705_v41  ;;  %v8707_v59 = vmul.f32 1.442695, %v8700_v50 }
0x3c29   :  { %v11860_v23 = vpop.eup %11859  ;;  %11865 = vpow2.f32 %v8707_v59 }
0x3c2a   :  { %v8709_v19 = vsel %vm640_vm3, %v11860_v23, 0.0 }
0x3c2b   :  { %v11862_v63 = vpop.eup %11861  ;;  %8710 = vadd.xlane.f32.xlu0 %v8709_v19 }
0x3c2c   :  { %v8712_v52 = vsel %vm640_vm3, %v11862_v63, 0.0 }
0x3c2d   :  { %8713 = vadd.xlane.f32.xlu1 %v8712_v52 }
0x3c31   :  { %v11864_v18 = vpop.eup %11863 }
0x3c32   :  { %v8715_v11 = vsel %vm640_vm3, %v11864_v18, 0.0 }
0x3c33   :  { %v11866_v25 = vpop.eup %11865  ;;  %8716 = vadd.xlane.f32.xlu0 %v8715_v11 }
0x3c34   :  { %v8718_v44 = vsel %vm640_vm3, %v11866_v25, 0.0 }
0x3c35   :  { %8719 = vadd.xlane.f32.xlu1 %v8718_v44 }
0x3cb8   :  { %v8711_v6 = vpop.xlane.xlu0 %8710 }
0x3cb9   :  { %11867 = vrcp.f32 %v8711_v6 }
0x3cba   :  { %v8714_v12 = vpop.xlane.xlu1 %8713 }
0x3cbb   :  { %11869 = vrcp.f32 %v8714_v12 }
0x3cc0   :  { %v8717_v58 = vpop.xlane.xlu0 %8716 }
0x3cc1   :  { %11871 = vrcp.f32 %v8717_v58 }
0x3cc2   :  { %v8720_v49 = vpop.xlane.xlu1 %8719 }
0x3cc3   :  { %v11868_v54 = vpop.eup %11867  ;;  %11873 = vrcp.f32 %v8720_v49 }
0x3cc4   :  { %v8725_v40 = vmul.f32 %v11868_v54, %v11860_v23 }
0x3cc5   :  { %v11870_v3 = vpop.eup %11869 }
0x3cc6   :  { %v8726_v9 = vmul.f32 %v11870_v3, %v11862_v63 }
0x3cc8   :  { %v8729_v56 = vpack.c.bf16 %v8726_v9, %v8725_v40 }
0x3cca   :  { %11274 = vmatmul.mubr.msk.bf16.vlgmr.msra.gmra.mrb[244].mxu1 %vm640_vm3, %v8729_v56 }
0x3ccb   :  { %v11872_v4 = vpop.eup %11871  ;;  %11290 = vmatpush3.bf16.msra.mxu1 %v11545_v16  ;;  %11293 = vmatprep.mubr.msk.bf16.mxu1 %vm184_vm0, %v13185_v39  ;;  %v8822_v39 = vld [vmem:[#allocation14 + $0x38] sm:$0xf] }
0x3ccc   :  { %11291 = vmatprep.subr.bf16.mxu1 %v11546_v33  ;;  %v8727_v14 = vmul.f32 %v11872_v4, %v11864_v18  ;;  %11421 = vmatprep.subr.msk.bf16.mxu0 %vm1220_vm4, %v8822_v39  ;;  %v8830_v26 = vsel %vm1220_vm4, %v8822_v39, 0 }
0x3ccd   :  { %v11874_v28 = vpop.eup %11873 }
0x3cce   :  { %v8728_v29 = vmul.f32 %v11874_v28, %v11866_v25 }
0x3ccf   :  { %11292 = vmatpush3.bf16.msra.mxu1 %v11546_v33 }
0x3cd0   :  { %v8730_v46 = vpack.c.bf16 %v8728_v29, %v8727_v14  ;;  %11297 = vmatprep.subr.bf16.mxu1 %v11547_v42 }
0x3cd2   :  { %11280 = vmatmul.mubr.msk.bf16.vlgmr.msra.gmra.mrb[208].mxu0 %vm640_vm3, %v8730_v46  ;;  %11294 = vmatmul.mubr.msk.bf16.vlgmr.msra.gmra.mrb[248].mxu1 %vm184_vm0, %v13175_v22  ;;  %v11549_v22 = vld [vmem:[#allocation13 + $0xf0] sm:$0xff]  }
0x3cd3   :  { %11298 = vmatpush3.bf16.msra.mxu1 %v11547_v42  ;;  %11301 = vmatprep.mubr.msk.bf16.mxu1 %vm184_vm0, %v13187_v60 }
0x3cd4   :  { %11299 = vmatprep.subr.bf16.mxu1 %v11548_v48  ;;  %11284 = vmatpush3.bf16.msra.mxu0 %v8830_v26 }
0x3cd5   :  { %11305 = vmatprep.subr.bf16.mxu0 %v11549_v22 }
0x3cd7   :  { %11300 = vmatpush3.bf16.msra.mxu1 %v11548_v48 }
0x3cd8   :  { %11313 = vmatprep.subr.bf16.mxu1 %v12216_v51 }
0x3cda   :  { %11302 = vmatmul.mubr.msk.bf16.vlgmr.msra.gmra.mrb[252].mxu1 %vm184_vm0, %v13193_v47 }
0x3cdb   :  { %11315 = vmatprep.mubr.msk.bf16.mxu1 %vm12217_vm1, %v12216_v51 }
0x3d9d   :  { %v8768_v15 = vpop.f32.mrb[244].mxu1 }
0x3d9e   :  { %v11275_v32 = vpop.f32.mrb[245].mxu1 }
0x3d9f   :  { %v8771_v45 = vpop.f32.mrb[246].mxu1 }
0x3da0   :  { %v8819_v10 = vpack.c.bf16 %v8771_v45, %v8768_v15  ;;  %v11276_v1 = vpop.f32.mrb[247].mxu1 }
0x3da2   :  { %11285 = vmatprep.mubr.msk.bf16.mxu0 %vm545_vm2, %v8819_v10 }
0x3da5   :  { %v8812_v37 = vpop.f32.mrb[208].mxu0  ;;  %v11295_v43 = vpop.f32.mrb[248].mxu1 }
0x3da6   :  { %v11281_v24 = vpop.f32.mrb[209].mxu0  ;;  %v8936_v27 = vpop.f32.mrb[249].mxu1 }
0x3da7   :  { %v8815_v8 = vpop.f32.mrb[210].mxu0  ;;  %v11296_v0 = vpop.f32.mrb[250].mxu1 }
0x3da8   :  { %v8820_v36 = vpack.c.bf16 %v8815_v8, %v8812_v37  ;;  %v11282_v30 = vpop.f32.mrb[211].mxu0  ;;  %v9084_v53 = vpack.c.bf16 %v11296_v0, %v11295_v43  ;;  %v8939_v61 = vpop.f32.mrb[251].mxu1 }
0x3da9   :  { %v9083_v31 = vpack.c.bf16 %v8939_v61, %v8936_v27 }
0x3daa   :  { %11286 = vmatmul.mubr.msk.bf16.vlgmr.msra.gmra.mrb[196].mxu0 %vm545_vm2, %v8820_v36 }
0x3dab   :  { %11306 = vmatpush3.bf16.msra.mxu0 %v11549_v22  ;;  %11309 = vmatprep.mubr.msk.bf16.mxu0 %vm184_vm0, %v13187_v60 }
0x3dac   :  { %11307 = vmatprep.subr.bf16.mxu0 %v11550_v38 }
0x3dad   :  { %v11303_v5 = vpop.f32.mrb[252].mxu1 }
0x3dae   :  { %v9002_v13 = vpop.f32.mrb[253].mxu1 }
0x3daf   :  { %11308 = vmatpush3.bf16.msra.mxu0 %v11550_v38  ;;  %v11304_v35 = vpop.f32.mrb[254].mxu1 }
0x3db0   :  { %v9086_v21 = vpack.c.bf16 %v11304_v35, %v11303_v5  ;;  %v9005_v41 = vpop.f32.mrb[255].mxu1  ;;  %11319 = vmatprep.subr.bf16.mxu0 %v12216_v51 }
0x3db1   :  { %v9085_v50 = vpack.c.bf16 %v9005_v41, %v9002_v13  ;;  %v9320_v41 = vld [vmem:[#allocation14 + $0x3c] sm:$0xf] }
0x3db2   :  { %11310 = vmatmul.mubr.msk.bf16.vlgmr.msra.gmra.mrb[212].mxu0 %vm184_vm0, %v13193_v47  ;;  %v9140_v60 = vsel %vm545_vm2, %v9086_v21, 0 }
0x3db3   :  { %v9093_v59 = vsel %vm545_vm2, %v9085_v50, 0  ;;  %11321 = vmatprep.mubr.msk.bf16.mxu0 %vm12217_vm1, %v12216_v51  ;;  %v9328_v50 = vsel %vm1220_vm4, %v9320_v41, 0 }
0x3db4   :  { %11314 = vmatpush3.bf16.xpose.msra.mxu1 %v9093_v59 }
0x3db5   :  { %11325 = vmatprep.subr.bf16.mxu1 %v12216_v51 }
0x3db8   :  { %11320 = vmatpush3.bf16.xpose.msra.mxu0 %v9140_v60 }
0x3db9   :  { %11331 = vmatprep.subr.bf16.mxu0 %v12216_v51 }
0x3dbb   :  { %11316 = vmatmul.mubr.msk.bf16.vlgmr.msra.gmra.mrb[0].mxu1 %vm545_vm2, %v9083_v31 }
0x3dbc   :  { %11327 = vmatprep.mubr.msk.bf16.mxu1 %vm12217_vm1, %v12216_v51 }
0x3dbf   :  { %11322 = vmatmul.mubr.msk.bf16.vlgmr.msra.gmra.mrb[216].mxu0 %vm545_vm2, %v9084_v53 }
0x3dc0   :  { %11333 = vmatprep.mubr.msk.bf16.mxu0 %vm12217_vm1, %v12216_v51 }
0x3e85   :  { %v11311_v47 = vpop.f32.mrb[212].mxu0 }
0x3e86   :  { %v9068_v23 = vpop.f32.mrb[213].mxu0 }
0x3e87   :  { %v11312_v19 = vpop.f32.mrb[214].mxu0 }
0x3e88   :  { %v9088_v63 = vpack.c.bf16 %v11312_v19, %v11311_v47  ;;  %v9071_v52 = vpop.f32.mrb[215].mxu0 }
0x3e89   :  { %v9087_v18 = vpack.c.bf16 %v9071_v52, %v9068_v23 }
0x3e8a   :  { %11332 = vmatpush3.bf16.msra.mxu0 %v9088_v63 }
0x3e8b   :  { %11326 = vmatpush3.bf16.msra.mxu1 %v9087_v18  ;;  %11422 = vmatprep.subr.msk.bf16.mxu0 %vm1220_vm4, %v9320_v41 }
0x3e8e   :  { %v9129_v11 = vpop.f32.mrb[0].mxu1 }
0x3e8f   :  { %v11317_v25 = vpop.f32.mrb[1].mxu1  ;;  %v9183_v44 = vsel %vm640_vm3, %v9129_v11, -inf }
0x3e90   :  { %9184 = vmax.xlane.f32.xlu0 %v9183_v44  ;;  %v9132_v16 = vpop.f32.mrb[2].mxu1 }
0x3e91   :  { %v11318_v6 = vpop.f32.mrb[3].mxu1  ;;  %v9186_v12 = vsel %vm640_vm3, %v9132_v16, -inf }
0x3e92   :  { %v9176_v58 = vpop.f32.mrb[216].mxu0  ;;  %9187 = vmax.xlane.f32.xlu1 %v9186_v12 }
0x3e93   :  { %v11323_v51 = vpop.f32.mrb[217].mxu0  ;;  %v9189_v49 = vsel %vm640_vm3, %v9176_v58, -inf }
0x3e94   :  { %v9179_v54 = vpop.f32.mrb[218].mxu0  ;;  %9190 = vmax.xlane.f32.xlu0 %v9189_v49 }
0x3e95   :  { %v11324_v3 = vpop.f32.mrb[219].mxu0  ;;  %v9192_v40 = vsel %vm640_vm3, %v9179_v54, -inf }
0x3e96   :  { %9193 = vmax.xlane.f32.xlu1 %v9192_v40 }
0x3f1d   :  { %v9185_v9 = vpop.xlane.xlu0 %9184 }
0x3f1e   :  { %v9195_v56 = vsub.f32 %v9129_v11, %v9185_v9 }
0x3f1f   :  { %v9188_v33 = vpop.xlane.xlu1 %9187 }
0x3f20   :  { %v9199_v4 = vmul.f32 1.442695, %v9195_v56  ;;  %v9196_v42 = vsub.f32 %v9132_v16, %v9188_v33  ;;  %v13649_v16 = vld [vmem:[#allocation7 + $0x18] sm:$0xff] }
0x3f21   :  { %v9191_v28 = vpop.xlane.xlu0 %9190  ;;  %v9390_v6 = vrot.slane %v13649_v16, %v12758_v17 }
0x3f22   :  { %11875 = vpow2.f32 %v9199_v4  ;;  %v9201_v14 = vmul.f32 1.442695, %v9196_v42  ;;  %v9197_v29 = vsub.f32 %v9176_v58, %v9191_v28 }
0x3f23   :  { %v9194_v46 = vpop.xlane.xlu1 %9193 }
0x3f24   :  { %11877 = vpow2.f32 %v9201_v14  ;;  %v9203_v48 = vmul.f32 1.442695, %v9197_v29  ;;  %v9198_v39 = vsub.f32 %v9179_v54, %v9194_v46 }
0x3f26   :  { %11879 = vpow2.f32 %v9203_v48  ;;  %v9205_v26 = vmul.f32 1.442695, %v9198_v39 }
0x3f28   :  { %11881 = vpow2.f32 %v9205_v26 }
0x3f2c   :  { %v11876_v22 = vpop.eup %11875 }
0x3f2d   :  { %v9207_v15 = vsel %vm640_vm3, %v11876_v22, 0.0 }
0x3f2e   :  { %v11878_v32 = vpop.eup %11877  ;;  %9208 = vadd.xlane.f32.xlu0 %v9207_v15 }
0x3f2f   :  { %v9210_v45 = vsel %vm640_vm3, %v11878_v32, 0.0 }
0x3f30   :  { %v11880_v10 = vpop.eup %11879  ;;  %9211 = vadd.xlane.f32.xlu1 %v9210_v45 }
0x3f31   :  { %v9213_v1 = vsel %vm640_vm3, %v11880_v10, 0.0 }
0x3f32   :  { %v11882_v37 = vpop.eup %11881  ;;  %9214 = vadd.xlane.f32.xlu0 %v9213_v1 }
0x3f33   :  { %v9216_v43 = vsel %vm640_vm3, %v11882_v37, 0.0 }
0x3f34   :  { %9217 = vadd.xlane.f32.xlu1 %v9216_v43 }
0x3fbb   :  { %v9209_v24 = vpop.xlane.xlu0 %9208 }
0x3fbc   :  { %11883 = vrcp.f32 %v9209_v24 }
0x3fbd   :  { %v9212_v27 = vpop.xlane.xlu1 %9211 }
0x3fbe   :  { %11885 = vrcp.f32 %v9212_v27 }
0x3fbf   :  { %v9215_v8 = vpop.xlane.xlu0 %9214 }
0x3fc0   :  { %11887 = vrcp.f32 %v9215_v8 }
0x3fc1   :  { %v9218_v0 = vpop.xlane.xlu1 %9217 }
0x3fc2   :  { %11889 = vrcp.f32 %v9218_v0  ;;  %v11551_v0 = vld [vmem:[#allocation16 + $0x30] sm:$0xff]  }
0x3fc3   :  { %11343 = vmatprep.subr.bf16.mxu1 %v11551_v0 }
0x3fc6   :  { %v11884_v36 = vpop.eup %11883 }
0x3fc7   :  { %v9223_v53 = vmul.f32 %v11884_v36, %v11876_v22  ;;  %v11552_v36 = vld [vmem:[#allocation16 + $0x38] sm:$0xff]  }
0x3fc8   :  { %v11886_v30 = vpop.eup %11885 }
0x3fc9   :  { %v9224_v61 = vmul.f32 %v11886_v30, %v11878_v32 }
0x3fca   :  { %v11888_v38 = vpop.eup %11887 }
0x3fcb   :  { %v9227_v31 = vpack.c.bf16 %v9224_v61, %v9223_v53  ;;  %v9225_v13 = vmul.f32 %v11888_v38, %v11880_v10 }
0x3fcc   :  { %v11890_v5 = vpop.eup %11889 }
0x3fcd   :  { %v9226_v35 = vmul.f32 %v11890_v5, %v11882_v37  ;;  %11328 = vmatmul.mubr.msk.bf16.vlgmr.msra.gmra.mrb[4].mxu1 %vm640_vm3, %v9227_v31 }
0x3fce   :  { %11344 = vmatpush3.bf16.msra.mxu1 %v11551_v0 }
0x3fcf   :  { %v9228_v21 = vpack.c.bf16 %v9226_v35, %v9225_v13  ;;  %11345 = vmatprep.subr.bf16.mxu1 %v11552_v36 }
0x3fd1   :  { %11334 = vmatmul.mubr.msk.bf16.vlgmr.msra.gmra.mrb[220].mxu0 %vm640_vm3, %v9228_v21 }
0x3fd2   :  { %11338 = vmatpush3.bf16.msra.mxu0 %v9328_v50  ;;  %11346 = vmatpush3.bf16.msra.mxu1 %v11552_v36 }
0x40a0   :  { %v9266_v59 = vpop.f32.mrb[4].mxu1 }
0x40a1   :  { %v11329_v60 = vpop.f32.mrb[5].mxu1 }
0x40a2   :  { %v9269_v47 = vpop.f32.mrb[6].mxu1  ;;  %v9450_v60 = vrot.slane %v13649_v16, %v12813_v55 }
0x40a3   :  { %v9317_v23 = vpack.c.bf16 %v9269_v47, %v9266_v59  ;;  %v11330_v19 = vpop.f32.mrb[7].mxu1 }
0x40a4   :  { %v9310_v63 = vpop.f32.mrb[220].mxu0 }
0x40a5   :  { %v11335_v52 = vpop.f32.mrb[221].mxu0  ;;  %11339 = vmatprep.mubr.msk.bf16.mxu0 %vm545_vm2, %v9317_v23 }
0x40a6   :  { %v9313_v18 = vpop.f32.mrb[222].mxu0  ;;  %v9458_v52 = vrot.slane %v13649_v16, %v12818_v2  ;;  %v11554_v2 = vld [vmem:[#allocation17 + $0x38] sm:$0xff]  }
0x40a7   :  { %v9318_v11 = vpack.c.bf16 %v9313_v18, %v9310_v63  ;;  %v11336_v25 = vpop.f32.mrb[223].mxu0 }
0x40a9   :  { %11340 = vmatmul.mubr.msk.bf16.vlgmr.msra.gmra.mrb[196].mxu0 %vm545_vm2, %v9318_v11 }
0x417c   :  { %v11341_v44 = vpop.f32.mrb[196].mxu0 }
0x417d   :  { %v9364_v12 = vpop.f32.mrb[197].mxu0  ;;  %v9385_v58 = vadd.f32 %v11341_v44, %v13064_v34 }
0x417e   :  { %v9383_v51 = vadd.f32 %v9364_v12, %v13068_v7  ;;  %v11342_v49 = vpop.f32.mrb[198].mxu0 }
0x417f   :  { %v9367_v54 = vpop.f32.mrb[199].mxu0  ;;  %v9386_v40 = vadd.f32 %v11342_v49, %v13071_v62  ;;  %v13659_v56 = vadd.f32 %v9390_v6, %v9385_v58 }
0x4180   :  { %v13655_v3 = vadd.f32 %v9390_v6, %v9383_v51  ;;  %v9384_v9 = vadd.f32 %v9367_v54, %v13077_v20 }
0x4181   :  { %v13665_v4 = vadd.f32 %v9390_v6, %v9386_v40  ;;  %v9401_v7 = vsel %vm184_vm0, %v13659_v56, 0.0 }
0x4182   :  { %v13661_v33 = vadd.f32 %v9390_v6, %v9384_v9  ;;  %v9395_v17 = vsel %vm184_vm0, %v13655_v3, 0.0 }
0x4183   :  { %9396 = vadd.xlane.f32.xlu0 %v9395_v17  ;;  %v9404_v62 = vsel %vm184_vm0, %v13665_v4, 0.0 }
0x4184   :  { %v9398_v34 = vsel %vm184_vm0, %v13661_v33, 0.0 }
0x4185   :  { %9399 = vadd.xlane.f32.xlu1 %v9398_v34  ;;  %v11553_v34 = vld [vmem:[#allocation17 + $0x30] sm:$0xff]  }
0x4186   :  { %11351 = vmatprep.subr.bf16.mxu1 %v11553_v34 }
0x4187   :  { %9402 = vadd.xlane.f32.xlu0 %v9401_v7  ;;  %v10022_v7 = vld [vmem:[#allocation8 + $0x3] ss:$0 sm:$0xff] }
0x4189   :  { %9405 = vadd.xlane.f32.xlu1 %v9404_v62 }
0x4210   :  { %v9397_v20 = vpop.xlane.xlu0 %9396 }
0x4211   :  { %v9407_v42 = vmul.f32 0.03125, %v9397_v20 }
0x4212   :  { %v9400_v28 = vpop.xlane.xlu1 %9399 }
0x4213   :  { %v9411_v14 = vsub.f32 %v13655_v3, %v9407_v42  ;;  %v9408_v29 = vmul.f32 0.03125, %v9400_v28 }
0x4214   :  { %v9403_v46 = vpop.xlane.xlu0 %9402 }
0x4215   :  { %v9412_v48 = vsub.f32 %v13661_v33, %v9408_v29  ;;  %v9409_v39 = vmul.f32 0.03125, %v9403_v46  ;;  %v9415_v26 = vmul.f32 %v9411_v14, %v9411_v14 }
0x4216   :  { %v9406_v22 = vpop.xlane.xlu1 %9405 }
0x4217   :  { %v9413_v15 = vsub.f32 %v13659_v56, %v9409_v39  ;;  %v9410_v32 = vmul.f32 0.03125, %v9406_v22  ;;  %v9419_v45 = vsel %vm184_vm0, %v9415_v26, 0.0  ;;  %v9416_v10 = vmul.f32 %v9412_v48, %v9412_v48 }
0x4218   :  { %9420 = vadd.xlane.f32.xlu0 %v9419_v45 }
0x4219   :  { %v9414_v1 = vsub.f32 %v13665_v4, %v9410_v32  ;;  %v9422_v37 = vsel %vm184_vm0, %v9416_v10, 0.0  ;;  %v9417_v43 = vmul.f32 %v9413_v15, %v9413_v15 }
0x421a   :  { %9423 = vadd.xlane.f32.xlu1 %v9422_v37 }
0x421b   :  { %v9425_v24 = vsel %vm184_vm0, %v9417_v43, 0.0  ;;  %v9418_v27 = vmul.f32 %v9414_v1, %v9414_v1 }
0x421c   :  { %9426 = vadd.xlane.f32.xlu0 %v9425_v24 }
0x421d   :  { %v9428_v8 = vsel %vm184_vm0, %v9418_v27, 0.0 }
0x421e   :  { %9429 = vadd.xlane.f32.xlu1 %v9428_v8 }
0x42a5   :  { %v9421_v30 = vpop.xlane.xlu0 %9420 }
0x42a6   :  { %v9431_v53 = vmul.f32 0.03125, %v9421_v30 }
0x42a7   :  { %v9424_v61 = vpop.xlane.xlu1 %9423 }
0x42a8   :  { %v9435_v38 = vadd.f32 1e-05, %v9431_v53  ;;  %v9432_v31 = vmul.f32 0.03125, %v9424_v61 }
0x42a9   :  { %v9427_v5 = vpop.xlane.xlu0 %9426 }
0x42aa   :  { %11891 = vrsqrt.f32 %v9435_v38  ;;  %v9436_v13 = vadd.f32 1e-05, %v9432_v31  ;;  %v9433_v35 = vmul.f32 0.03125, %v9427_v5 }
0x42ab   :  { %v9430_v21 = vpop.xlane.xlu1 %9429 }
0x42ac   :  { %11893 = vrsqrt.f32 %v9436_v13  ;;  %v9437_v41 = vadd.f32 1e-05, %v9433_v35  ;;  %v9434_v50 = vmul.f32 0.03125, %v9430_v21 }
0x42ae   :  { %11895 = vrsqrt.f32 %v9437_v41  ;;  %v9438_v59 = vadd.f32 1e-05, %v9434_v50 }
0x42b0   :  { %11897 = vrsqrt.f32 %v9438_v59 }
0x42b4   :  { %v11892_v47 = vpop.eup %11891 }
0x42b5   :  { %v9443_v23 = vmul.f32 %v11892_v47, %v9411_v14 }
0x42b6   :  { %v11894_v19 = vpop.eup %11893 }
0x42b7   :  { %v9444_v63 = vmul.f32 %v11894_v19, %v9412_v48  ;;  %v9451_v18 = vmul.f32 %v9450_v60, %v9443_v23 }
0x42b8   :  { %v11896_v11 = vpop.eup %11895 }
0x42b9   :  { %v9445_v25 = vmul.f32 %v11896_v11, %v9413_v15  ;;  %v9452_v44 = vmul.f32 %v9450_v60, %v9444_v63  ;;  %v9459_v51 = vadd.f32 %v9458_v52, %v9451_v18 }
0x42ba   :  { %v11898_v6 = vpop.eup %11897 }
0x42bb   :  { %v9453_v12 = vmul.f32 %v9450_v60, %v9445_v25  ;;  %v9446_v58 = vmul.f32 %v11898_v6, %v9414_v1  ;;  %v9460_v49 = vadd.f32 %v9458_v52, %v9452_v44 }
0x42bd   :  { %v9454_v54 = vmul.f32 %v9450_v60, %v9446_v58  ;;  %v9463_v40 = vpack.c.bf16 %v9460_v49, %v9459_v51  ;;  %v9461_v9 = vadd.f32 %v9458_v52, %v9453_v12 }
0x42bf   :  { %v9462_v55 = vadd.f32 %v9458_v52, %v9454_v54  ;;  %11347 = vmatprep.mubr.msk.bf16.mxu1 %vm184_vm0, %v9463_v40 }
0x42c1   :  { %v9464_v17 = vpack.c.bf16 %v9462_v55, %v9461_v9 }
0x42c3   :  { %11348 = vmatmul.mubr.msk.bf16.vlgmr.msra.gmra.mrb[8].mxu1 %vm184_vm0, %v9464_v17 }
0x42c4   :  { %11352 = vmatpush3.bf16.msra.mxu1 %v11553_v34 }
0x42c5   :  { %11353 = vmatprep.subr.bf16.mxu1 %v11554_v2 }
0x42c8   :  { %11354 = vmatpush3.bf16.msra.mxu1 %v11554_v2 }
0x4396   :  { %v11349_v62 = vpop.f32.mrb[8].mxu1 }
0x4397   :  { %v9537_v20 = vadd.f32 %v11349_v62, %v10022_v7  ;;  %v9528_v42 = vpop.f32.mrb[9].mxu1 }
0x4398   :  { %v9529_v28 = vadd.f32 %v10022_v7, %v9528_v42  ;;  %v11350_v14 = vpop.f32.mrb[10].mxu1 }
0x4399   :  { %v9545_v29 = vmul.f32 %v9537_v20, %v9537_v20  ;;  %v9540_v46 = vadd.f32 %v11350_v14, %v10022_v7  ;;  %v9531_v48 = vpop.f32.mrb[11].mxu1 }
0x439a   :  { %v9543_v39 = vmul.f32 %v9529_v28, %v9529_v28  ;;  %v9532_v26 = vadd.f32 %v10022_v7, %v9531_v48 }
0x439b   :  { %v9549_v22 = vmul.f32 %v9545_v29, %v9537_v20  ;;  %v9546_v15 = vmul.f32 %v9540_v46, %v9540_v46 }
0x439c   :  { %v9547_v32 = vmul.f32 %v9543_v39, %v9529_v28  ;;  %v9544_v45 = vmul.f32 %v9532_v26, %v9532_v26 }
0x439d   :  { %v9553_v10 = vmul.f32 0.044715, %v9549_v22  ;;  %v9550_v1 = vmul.f32 %v9546_v15, %v9540_v46 }
0x439e   :  { %v9551_v37 = vmul.f32 0.044715, %v9547_v32  ;;  %v9548_v43 = vmul.f32 %v9544_v45, %v9532_v26 }
0x439f   :  { %v9557_v24 = vadd.f32 %v9553_v10, %v9537_v20  ;;  %v9554_v27 = vmul.f32 0.044715, %v9550_v1 }
0x43a0   :  { %v9555_v8 = vadd.f32 %v9551_v37, %v9529_v28  ;;  %v9552_v0 = vmul.f32 0.044715, %v9548_v43 }
0x43a1   :  { %v9561_v36 = vmul.f32 0.7978846, %v9557_v24  ;;  %v9558_v30 = vadd.f32 %v9554_v27, %v9540_v46 }
0x43a2   :  { %v9559_v53 = vmul.f32 0.7978846, %v9555_v8  ;;  %v9556_v61 = vadd.f32 %v9552_v0, %v9532_v26 }
0x43a3   :  { %11899 = vtanh.f32 %v9561_v36  ;;  %v9562_v38 = vmul.f32 0.7978846, %v9558_v30 }
0x43a4   :  { %11901 = vtanh.f32 %v9559_v53  ;;  %v9560_v31 = vmul.f32 0.7978846, %v9556_v61 }
0x43a5   :  { %11903 = vtanh.f32 %v9562_v38 }
0x43a6   :  { %11905 = vtanh.f32 %v9560_v31 }
0x43ad   :  { %v11900_v5 = vpop.eup %11899 }
0x43ae   :  { %v11902_v13 = vpop.eup %11901  ;;  %v9569_v35 = vadd.f32 1.0, %v11900_v5 }
0x43af   :  { %v11904_v21 = vpop.eup %11903  ;;  %v9567_v41 = vadd.f32 1.0, %v11902_v13 }
0x43b0   :  { %v11906_v50 = vpop.eup %11905  ;;  %v9573_v59 = vmul.f32 0.5, %v9569_v35  ;;  %v9570_v60 = vadd.f32 1.0, %v11904_v21 }
0x43b1   :  { %v9571_v47 = vmul.f32 0.5, %v9567_v41  ;;  %v9568_v23 = vadd.f32 1.0, %v11906_v50 }
0x43b2   :  { %v9574_v19 = vmul.f32 0.5, %v9570_v60  ;;  %v9577_v52 = vmul.f32 %v9573_v59, %v9537_v20 }
0x43b3   :  { %v9572_v63 = vmul.f32 0.5, %v9568_v23  ;;  %v9575_v11 = vmul.f32 %v9571_v47, %v9529_v28 }
0x43b4   :  { %v9578_v18 = vmul.f32 %v9574_v19, %v9540_v46 }
0x43b5   :  { %v9576_v25 = vmul.f32 %v9572_v63, %v9532_v26 }
0x43b6   :  { %v9580_v44 = vpack.c.bf16 %v9578_v18, %v9577_v52 }
0x43b7   :  { %v9579_v6 = vpack.c.bf16 %v9576_v25, %v9575_v11 }
0x43b9   :  { %11355 = vmatprep.mubr.msk.bf16.mxu1 %vm184_vm0, %v9579_v6 }
0x43ba   :  { %11356 = vmatmul.mubr.msk.bf16.vlgmr.msra.gmra.mrb[12].mxu1 %vm184_vm0, %v9580_v44 }
0x43bb   :  { %12151 = shalt.err (!%p12148_p0)
}
0x43bc   :  { %s12152_s26 = scalar_lea.hbm %s13740_s11, 512 }
0x43bd   :  { %p12153_p1 = scmp.ne.s32.totalorder %s13740_s11, %s12152_s26  ;;  %p12156_p2 = scmp.lt.u32.totalorder %s12152_s26, %s13740_s11 }
0x43bf   :  { %p12158_p3 = pnand %p12156_p2, %p12153_p1 }
0x43c1   :  { %12161 = shalt.err (!%p12158_p3)
}
0x43c2   :  { %9692 = dma.vmem_to_hbm [thread:$0]  %s9687_s20, 512, %s13740_s11, [#allocation21], %s12202_s29, %s12202_s29, %s12203_s30   ;;  %v9589_v12 = vrot.slane %v13649_v16, %v13058_v57 }
0x43c3   :  { %s12219_s21 = smov [#allocation19]  }
0x43c4   :  { %s9674_s15 = sshll.u32 %s12219_s21, 4  ;;  %s9675_s15 = int_to_ptr.vmem [resolvable:$true] %s9674_s15 }
0x43c5   :  { %s12162_s11 = scalar_lea.vmem %s9675_s15, 512  ;;  %p12167_p5 = scmp.lt.s32.totalorder %s9675_s15, %s9675_s15 }
0x43c6   :  { %p12163_p4 = scmp.ne.s32.totalorder %s9675_s15, %s12162_s11  ;;  %p12168_p6 = scmp.lt.s32.totalorder %s12162_s11, %s12162_s11 }
0x43c8   :  { %p12169_p7 = por %p12168_p6, %p12167_p5 }
0x43ca   :  { %p12170_p8 = pnand %p12169_p7, %p12163_p4 }
0x448d   :  { %v11357_v58 = vpop.f32.mrb[12].mxu1 }
0x448e   :  { %v9651_v51 = vadd.f32 %v11357_v58, %v9589_v12  ;;  %v9642_v49 = vpop.f32.mrb[13].mxu1 }
0x448f   :  { %v9643_v54 = vadd.f32 %v9642_v49, %v9589_v12  ;;  %v11358_v40 = vpop.f32.mrb[14].mxu1 }
0x4490   :  { %v9659_v9 = vadd.f32 %v9651_v51, %v13659_v56  ;;  %v9654_v55 = vadd.f32 %v11358_v40, %v9589_v12  ;;  %v9645_v17 = vpop.f32.mrb[15].mxu1 }
0x4491   :  { %v9657_v34 = vadd.f32 %v9643_v54, %v13655_v3  ;;  %v9646_v2 = vadd.f32 %v9645_v17, %v9589_v12 }
0x4492   :  { %9663 = vst.msk [vmem:[#allocation19 + $0x10] sm:$0xff] %vm184_vm0, %v9659_v9  ;;  %v9660_v7 = vadd.f32 %v9654_v55, %v13665_v4 }
0x4493   :  { %9661 = vst.msk [vmem:[#allocation19] sm:$0xff] %vm184_vm0, %v9657_v34  ;;  %v9658_v57 = vadd.f32 %v9646_v2, %v13661_v33 }
0x4494   :  { %9664 = vst.msk [vmem:[#allocation19 + $0x18] sm:$0xff] %vm184_vm0, %v9660_v7 }
0x4495   :  { %9662 = vst.msk [vmem:[#allocation19 + $0x8] sm:$0xff] %vm184_vm0, %v9658_v57 }
0x4496   :  { %12173 = shalt.err (!%p12170_p8)
}
0x4497   :  { %s12174_s5 = scalar_lea.hbm %s13739_s10, 512 }
0x4498   :  { %p12175_p9 = scmp.ne.s32.totalorder %s13739_s10, %s12174_s5  ;;  %p12178_p10 = scmp.lt.u32.totalorder %s12174_s5, %s13739_s10 }
0x449a   :  { %p12180_p11 = pnand %p12178_p10, %p12175_p9 }
0x449c   :  { %12183 = shalt.err (!%p12180_p11)
}
0x449d   :  { %9680 = dma.vmem_to_hbm [thread:$0]  %s9675_s15, 512, %s13739_s10, [#allocation4], %s12202_s29, %s12202_s29, %s12203_s30  }
0x449e   :  { %12196 = dma.done.wait [#allocation4], 512  }
0x449f   :  { %12197 = vsyncadd [#allocation4], 4294966784 }
0x44a0   :  { %12198 = dma.done.wait [#allocation21], 512  }
0x44a1   :  { %12199 = vsyncadd [#allocation21], 4294966784 }
0x44a2   :  { %9699 = vsyncpa [#allocation3], 1 }
0x44a3   :  { %9700 = vsyncpa [#allocation6], 1 }
0x44a4   :  { %9701 = vsyncpa [#allocation9], 1 }
0x44a5   :  { %9702 = vsyncpa [#allocation12], 1 }
0x44a6   :  { %9703 = vsyncpa [#allocation15], 1 }
0x44a7   :  { %9704 = vsyncpa [#allocation18], 1 }
0x44a8   :  { %9705 = vsyncpa [#allocation4], 1 }
0x44a9   :  { %9706 = vsyncpa [#allocation21], 1 }

</bundles_post_ra>
